<compile_context>
chip_gen: v6e
topology: v6e:2x2x1
jax: 0.10.0
libtpu: 0.0.40
codegen_flags: <defaults>
</compile_context>

<pallas_src>
import functools
import math

import jax
import jax.numpy as jnp
from jax.experimental import pallas as pl
from jax.experimental.pallas import tpu as pltpu


# Order in which the stacked parameter arrays are passed to the fused kernel.
PARAM_KEYS = (
    # self-attention (Q/K fused into one (D, 2D) projection)
    "s_wqk", "s_bqk", "s_wv", "s_bv", "s_wo", "s_bo", "s_g", "s_b",
    # cross-attention (Q/K fused; shared for both directions)
    "c_wqk", "c_bqk", "c_wv", "c_bv", "c_wo", "c_bo", "c_g", "c_b",
    # feed-forward
    "f_w1", "f_b1", "f_w2", "f_b2", "f_g", "f_b",
)

# A @ B^T without materializing the transpose (contracting dims ((1,),(1,))).
_NT_DIMS = (((1,), (1,)), ((), ()))


def _layer_norm(x, gamma, beta, eps=1e-5):
    mean = jnp.mean(x, axis=-1, keepdims=True)
    var = jnp.mean(jnp.square(x - mean), axis=-1, keepdims=True)
    return (x - mean) * jax.lax.rsqrt(var + eps) * gamma + beta


# ----------------------------- fused Pallas kernel ---------------------------

def cross_encoder_kernel(src_ref, spos_ref, tgt_ref, tpos_ref, *refs,
                         num_layers, nhead):
    """Runs the full layer stack for ONE batch element; both streams stay VMEM-resident."""
    (s_wqk, s_bqk, s_wv, s_bv, s_wo, s_bo, s_g, s_b,
     c_wqk, c_bqk, c_wv, c_bv, c_wo, c_bo, c_g, c_b,
     f_w1, f_b1, f_w2, f_b2, f_g, f_b,
     src_out_ref, tgt_out_ref) = refs

    f32 = jnp.float32
    src = src_ref[...]               # (S_src, D) running residual stream
    tgt = tgt_ref[...]               # (S_tgt, D) running residual stream
    spos = spos_ref[...]             # (S_src, D) positional encoding (constant)
    tpos = tpos_ref[...]             # (S_tgt, D) positional encoding (constant)

    d_model = src.shape[-1]
    hd = d_model // nhead
    scale = 1.0 / math.sqrt(hd)

    def mha_ln(q, k, v, wo_t, bo, residual, g, b):
        """Multi-head attention + out-proj + residual + post-LayerNorm."""
        attn = jnp.zeros_like(residual)
        for h in range(nhead):                       # static unroll, nhead small
            sl = slice(h * hd, (h + 1) * hd)
            s = jax.lax.dot_general(q[:, sl] * scale, k[:, sl], _NT_DIMS,
                                    preferred_element_type=f32)       # (Sq, Sk)
            s = s - jnp.max(s, axis=-1, keepdims=True)
            p = jnp.exp(s)
            p = p * pl.reciprocal(jnp.sum(p, axis=-1, keepdims=True), approx=True)
            oh = jnp.dot(p, v[:, sl], preferred_element_type=f32)     # (Sq, hd)
            # Per-head row-slice of Wo^T: sum_h oh @ Wo^T[h] == concat(heads) @ Wo^T,
            # so no concatenate / lane re-pack is needed.
            attn = attn + jnp.dot(oh, wo_t[sl, :], preferred_element_type=f32)
        return _layer_norm(residual + attn + bo, g, b)

    def ffn_ln(x, w1, b1, w2, b2, g, b):
        h1 = jnp.maximum(jnp.dot(x, w1, preferred_element_type=f32) + b1, 0.0)
        y = jnp.dot(h1, w2, preferred_element_type=f32) + b2
        return _layer_norm(x + y, g, b)

    for i in range(num_layers):                      # static unroll over layers
        # ---- self-attention (shared weights, applied to each stream) --------
        pqk = jnp.dot(src + spos, s_wqk[i], preferred_element_type=f32) + s_bqk[i]
        pv = jnp.dot(src, s_wv[i], preferred_element_type=f32) + s_bv[i]
        src = mha_ln(pqk[:, :d_model], pqk[:, d_model:], pv,
                     s_wo[i], s_bo[i], src, s_g[i], s_b[i])

        pqk = jnp.dot(tgt + tpos, s_wqk[i], preferred_element_type=f32) + s_bqk[i]
        pv = jnp.dot(tgt, s_wv[i], preferred_element_type=f32) + s_bv[i]
        tgt = mha_ln(pqk[:, :d_model], pqk[:, d_model:], pv,
                     s_wo[i], s_bo[i], tgt, s_g[i], s_b[i])

        # ---- cross-attention (shared weights, both directions from the post-
        # ---- self-attention streams; each stream projected exactly once) ----
        sqk = jnp.dot(src + spos, c_wqk[i], preferred_element_type=f32) + c_bqk[i]
        tqk = jnp.dot(tgt + tpos, c_wqk[i], preferred_element_type=f32) + c_bqk[i]
        sv = jnp.dot(src, c_wv[i], preferred_element_type=f32) + c_bv[i]
        tv = jnp.dot(tgt, c_wv[i], preferred_element_type=f32) + c_bv[i]
        src_q, src_k = sqk[:, :d_model], sqk[:, d_model:]
        tgt_q, tgt_k = tqk[:, :d_model], tqk[:, d_model:]
        new_src = mha_ln(src_q, tgt_k, tv, c_wo[i], c_bo[i], src, c_g[i], c_b[i])
        new_tgt = mha_ln(tgt_q, src_k, sv, c_wo[i], c_bo[i], tgt, c_g[i], c_b[i])
        src, tgt = new_src, new_tgt

        # ---- feed-forward (shared weights) -----------------------------------
        src = ffn_ln(src, f_w1[i], f_b1[i], f_w2[i], f_b2[i], f_g[i], f_b[i])
        tgt = ffn_ln(tgt, f_w1[i], f_b1[i], f_w2[i], f_b2[i], f_g[i], f_b[i])

    src_out_ref[...] = src
    tgt_out_ref[...] = tgt


# ------------------------------ JAX wrapper ----------------------------------

def transformer_cross_encoder_forward(packed, src, tgt, src_pos, tgt_pos,
                                      num_layers, nhead):
    """src/src_pos: (S_src, B, D), tgt/tgt_pos: (S_tgt, B, D) (PyTorch seq-first
    layout).  Returns (src, tgt) with the same layouts."""
    # One-time layout fix to batch-major; everything per-layer happens in-kernel.
    src_b = jnp.transpose(src, (1, 0, 2))     # (B, S_src, D)
    tgt_b = jnp.transpose(tgt, (1, 0, 2))     # (B, S_tgt, D)
    spos_b = jnp.transpose(src_pos, (1, 0, 2))
    tpos_b = jnp.transpose(tgt_pos, (1, 0, 2))

    B, S_src, D = src_b.shape
    S_tgt = tgt_b.shape[1]

    def batch_spec(rows, cols):
        # leading batch dim squeezed out -> kernel sees rank-2 (rows, cols) refs
        return pl.BlockSpec((None, rows, cols), lambda b: (b, 0, 0))

    def whole_spec(arr):
        # same block for every grid step -> weights stay VMEM-resident
        nd = arr.ndim
        return pl.BlockSpec(arr.shape, lambda b: (0,) * nd)

    param_list = [packed[k] for k in PARAM_KEYS]
    in_specs = ([batch_spec(S_src, D), batch_spec(S_src, D),
                 batch_spec(S_tgt, D), batch_spec(S_tgt, D)]
                + [whole_spec(a) for a in param_list])

    src_out, tgt_out = pl.pallas_call(
        functools.partial(cross_encoder_kernel, num_layers=num_layers, nhead=nhead),
        out_shape=(jax.ShapeDtypeStruct((B, S_src, D), jnp.float32),
                   jax.ShapeDtypeStruct((B, S_tgt, D), jnp.float32)),
        grid=(B,),
        in_specs=in_specs,
        out_specs=(batch_spec(S_src, D), batch_spec(S_tgt, D)),
        compiler_params=pltpu.CompilerParams(dimension_semantics=("parallel",)),
    )(src_b, spos_b, tgt_b, tpos_b, *param_list)

    return (jnp.transpose(src_out, (1, 0, 2)),    # (S_src, B, D)
            jnp.transpose(tgt_out, (1, 0, 2)))    # (S_tgt, B, D)


# --------------------------- parameter construction --------------------------

def _xavier_uniform(key, shape):
    fan_out, fan_in = shape
    bound = math.sqrt(6.0 / (fan_in + fan_out))
    return jax.random.uniform(key, shape, jnp.float32, -bound, bound)


def make_attn_params(key, d_model):
    # PyTorch Linear layout: W is (out, in), y = x @ W^T + b.
    ks = jax.random.split(key, 4)
    return {
        "wq": _xavier_uniform(ks[0], (d_model, d_model)),
        "wk": _xavier_uniform(ks[1], (d_model, d_model)),
        "wv": _xavier_uniform(ks[2], (d_model, d_model)),
        "bq": jnp.zeros((1, d_model), jnp.float32),
        "bk": jnp.zeros((1, d_model), jnp.float32),
        "bv": jnp.zeros((1, d_model), jnp.float32),
        "wo": _xavier_uniform(ks[3], (d_model, d_model)),
        "bo": jnp.zeros((1, d_model), jnp.float32),
        "ln_g": jnp.ones((1, d_model), jnp.float32),
        "ln_b": jnp.zeros((1, d_model), jnp.float32),
    }


def make_ffn_params(key, d_model, dim_ff):
    ks = jax.random.split(key, 2)
    return {
        "w1": _xavier_uniform(ks[0], (dim_ff, d_model)),
        "b1": jnp.zeros((1, dim_ff), jnp.float32),
        "w2": _xavier_uniform(ks[1], (d_model, dim_ff)),
        "b2": jnp.zeros((1, d_model), jnp.float32),
        "ln_g": jnp.ones((1, d_model), jnp.float32),
        "ln_b": jnp.zeros((1, d_model), jnp.float32),
    }


def make_params(key, num_layers, d_model, dim_ff):
    keys = jax.random.split(key, 3 * num_layers)
    return {
        "self": [make_attn_params(keys[i], d_model) for i in range(num_layers)],
        "cross": [make_attn_params(keys[num_layers + i], d_model) for i in range(num_layers)],
        "ffn": [make_ffn_params(keys[2 * num_layers + i], d_model, dim_ff)
                for i in range(num_layers)],
    }


def pack_params(params):
    """Stack per-layer PyTorch-layout params and pre-transpose weights so the
    kernel computes y = x @ W_t + b with no in-kernel weight transposes; the
    Q and K projections are fused into a single (D, 2D) weight."""
    def stack(group, key, transpose=False):
        a = jnp.stack([lp[key] for lp in group])
        return jnp.swapaxes(a, -1, -2) if transpose else a

    slf, cross, ffn = params["self"], params["cross"], params["ffn"]
    return {
        # self-attention
        "s_wqk": jnp.concatenate([stack(slf, "wq", True), stack(slf, "wk", True)], axis=-1),
        "s_bqk": jnp.concatenate([stack(slf, "bq"), stack(slf, "bk")], axis=-1),
        "s_wv": stack(slf, "wv", True), "s_bv": stack(slf, "bv"),
        "s_wo": stack(slf, "wo", True), "s_bo": stack(slf, "bo"),
        "s_g": stack(slf, "ln_g"), "s_b": stack(slf, "ln_b"),
        # cross-attention
        "c_wqk": jnp.concatenate([stack(cross, "wq", True), stack(cross, "wk", True)], axis=-1),
        "c_bqk": jnp.concatenate([stack(cross, "bq"), stack(cross, "bk")], axis=-1),
        "c_wv": stack(cross, "wv", True), "c_bv": stack(cross, "bv"),
        "c_wo": stack(cross, "wo", True), "c_bo": stack(cross, "bo"),
        "c_g": stack(cross, "ln_g"), "c_b": stack(cross, "ln_b"),
        # feed-forward
        "f_w1": stack(ffn, "w1", True), "f_b1": stack(ffn, "b1"),
        "f_w2": stack(ffn, "w2", True), "f_b2": stack(ffn, "b2"),
        "f_g": stack(ffn, "ln_g"), "f_b": stack(ffn, "ln_b"),
    }


# ----------------------------------- main -------------------------------------

if __name__ == "__main__":
    num_layers = 2
    d_model = 32
    nhead = 4
    dim_ff = 64
    B = 2
    S_src = 16
    S_tgt = 8

    root = jax.random.PRNGKey(0)
    k_params, k_src, k_tgt, k_spos, k_tpos = jax.random.split(root, 5)

    params = make_params(k_params, num_layers, d_model, dim_ff)
    packed = pack_params(params)   # packed once, outside the per-call path

    # PyTorch seq-first layout: (S, B, D)
    src = jax.random.normal(k_src, (S_src, B, d_model), jnp.float32)
    tgt = jax.random.normal(k_tgt, (S_tgt, B, d_model), jnp.float32)
    src_pos = jax.random.normal(k_spos, (S_src, B, d_model), jnp.float32)
    tgt_pos = jax.random.normal(k_tpos, (S_tgt, B, d_model), jnp.float32)

    fwd = jax.jit(functools.partial(transformer_cross_encoder_forward,
                                    num_layers=num_layers, nhead=nhead))
    src_out, tgt_out = fwd(packed, src, tgt, src_pos, tgt_pos)
    src_out, tgt_out = jax.block_until_ready((src_out, tgt_out))

    assert src_out.shape == (S_src, B, d_model), src_out.shape
    assert tgt_out.shape == (S_tgt, B, d_model), tgt_out.shape
    assert bool(jnp.all(jnp.isfinite(src_out))) and bool(jnp.all(jnp.isfinite(tgt_out)))
    print("KERNEL_OK")
</pallas_src>

<mosaic_0001>
module attributes {stable_mosaic.version = 11 : i64} {
  func.func @cross_encoder_kernel(%arg0: i32, %arg1: memref<1x16x32xf32, #tpu.memory_space<vmem>>, %arg2: memref<1x16x32xf32, #tpu.memory_space<vmem>>, %arg3: memref<1x8x32xf32, #tpu.memory_space<vmem>>, %arg4: memref<1x8x32xf32, #tpu.memory_space<vmem>>, %arg5: memref<2x32x64xf32, #tpu.memory_space<vmem>>, %arg6: memref<2x1x64xf32, #tpu.memory_space<vmem>>, %arg7: memref<2x32x32xf32, #tpu.memory_space<vmem>>, %arg8: memref<2x1x32xf32, #tpu.memory_space<vmem>>, %arg9: memref<2x32x32xf32, #tpu.memory_space<vmem>>, %arg10: memref<2x1x32xf32, #tpu.memory_space<vmem>>, %arg11: memref<2x1x32xf32, #tpu.memory_space<vmem>>, %arg12: memref<2x1x32xf32, #tpu.memory_space<vmem>>, %arg13: memref<2x32x64xf32, #tpu.memory_space<vmem>>, %arg14: memref<2x1x64xf32, #tpu.memory_space<vmem>>, %arg15: memref<2x32x32xf32, #tpu.memory_space<vmem>>, %arg16: memref<2x1x32xf32, #tpu.memory_space<vmem>>, %arg17: memref<2x32x32xf32, #tpu.memory_space<vmem>>, %arg18: memref<2x1x32xf32, #tpu.memory_space<vmem>>, %arg19: memref<2x1x32xf32, #tpu.memory_space<vmem>>, %arg20: memref<2x1x32xf32, #tpu.memory_space<vmem>>, %arg21: memref<2x32x64xf32, #tpu.memory_space<vmem>>, %arg22: memref<2x1x64xf32, #tpu.memory_space<vmem>>, %arg23: memref<2x64x32xf32, #tpu.memory_space<vmem>>, %arg24: memref<2x1x32xf32, #tpu.memory_space<vmem>>, %arg25: memref<2x1x32xf32, #tpu.memory_space<vmem>>, %arg26: memref<2x1x32xf32, #tpu.memory_space<vmem>>, %arg27: memref<1x16x32xf32, #tpu.memory_space<vmem>>, %arg28: memref<1x8x32xf32, #tpu.memory_space<vmem>>) attributes {dimension_semantics = [#tpu.dimension_semantics<parallel>], iteration_bounds = array<i64: 2>, scalar_prefetch = 0 : i64, scratch_operands = 0 : i64, tpu.core_type = #tpu.core_type<tc>, window_params = [{transform_indices = @transform_0, window_bounds = array<i64: 1, 16, 32>}, {transform_indices = @transform_1, window_bounds = array<i64: 1, 16, 32>}, {transform_indices = @transform_2, window_bounds = array<i64: 1, 8, 32>}, {transform_indices = @transform_3, window_bounds = array<i64: 1, 8, 32>}, {pipeline_mode = #tpu.pipeline_mode<synchronous>, transform_indices = @transform_4, window_bounds = array<i64: 2, 32, 64>}, {pipeline_mode = #tpu.pipeline_mode<synchronous>, transform_indices = @transform_5, window_bounds = array<i64: 2, 1, 64>}, {pipeline_mode = #tpu.pipeline_mode<synchronous>, transform_indices = @transform_6, window_bounds = array<i64: 2, 32, 32>}, {pipeline_mode = #tpu.pipeline_mode<synchronous>, transform_indices = @transform_7, window_bounds = array<i64: 2, 1, 32>}, {pipeline_mode = #tpu.pipeline_mode<synchronous>, transform_indices = @transform_8, window_bounds = array<i64: 2, 32, 32>}, {pipeline_mode = #tpu.pipeline_mode<synchronous>, transform_indices = @transform_9, window_bounds = array<i64: 2, 1, 32>}, {pipeline_mode = #tpu.pipeline_mode<synchronous>, transform_indices = @transform_10, window_bounds = array<i64: 2, 1, 32>}, {pipeline_mode = #tpu.pipeline_mode<synchronous>, transform_indices = @transform_11, window_bounds = array<i64: 2, 1, 32>}, {pipeline_mode = #tpu.pipeline_mode<synchronous>, transform_indices = @transform_12, window_bounds = array<i64: 2, 32, 64>}, {pipeline_mode = #tpu.pipeline_mode<synchronous>, transform_indices = @transform_13, window_bounds = array<i64: 2, 1, 64>}, {pipeline_mode = #tpu.pipeline_mode<synchronous>, transform_indices = @transform_14, window_bounds = array<i64: 2, 32, 32>}, {pipeline_mode = #tpu.pipeline_mode<synchronous>, transform_indices = @transform_15, window_bounds = array<i64: 2, 1, 32>}, {pipeline_mode = #tpu.pipeline_mode<synchronous>, transform_indices = @transform_16, window_bounds = array<i64: 2, 32, 32>}, {pipeline_mode = #tpu.pipeline_mode<synchronous>, transform_indices = @transform_17, window_bounds = array<i64: 2, 1, 32>}, {pipeline_mode = #tpu.pipeline_mode<synchronous>, transform_indices = @transform_18, window_bounds = array<i64: 2, 1, 32>}, {pipeline_mode = #tpu.pipeline_mode<synchronous>, transform_indices = @transform_19, window_bounds = array<i64: 2, 1, 32>}, {pipeline_mode = #tpu.pipeline_mode<synchronous>, transform_indices = @transform_20, window_bounds = array<i64: 2, 32, 64>}, {pipeline_mode = #tpu.pipeline_mode<synchronous>, transform_indices = @transform_21, window_bounds = array<i64: 2, 1, 64>}, {pipeline_mode = #tpu.pipeline_mode<synchronous>, transform_indices = @transform_22, window_bounds = array<i64: 2, 64, 32>}, {pipeline_mode = #tpu.pipeline_mode<synchronous>, transform_indices = @transform_23, window_bounds = array<i64: 2, 1, 32>}, {pipeline_mode = #tpu.pipeline_mode<synchronous>, transform_indices = @transform_24, window_bounds = array<i64: 2, 1, 32>}, {pipeline_mode = #tpu.pipeline_mode<synchronous>, transform_indices = @transform_25, window_bounds = array<i64: 2, 1, 32>}, {transform_indices = @transform_26, window_bounds = array<i64: 1, 16, 32>}, {transform_indices = @transform_27, window_bounds = array<i64: 1, 8, 32>}]} {
    %c0 = arith.constant 0 : index
    %c0_0 = arith.constant 0 : index
    %c0_1 = arith.constant 0 : index
    %0 = vector.load %arg1[%c0, %c0_0, %c0_1] : memref<1x16x32xf32, #tpu.memory_space<vmem>>, vector<1x16x32xf32>
    %1 = vector.shape_cast %0 : vector<1x16x32xf32> to vector<16x32xf32>
    %c0_2 = arith.constant 0 : index
    %c0_3 = arith.constant 0 : index
    %c0_4 = arith.constant 0 : index
    %2 = vector.load %arg3[%c0_2, %c0_3, %c0_4] : memref<1x8x32xf32, #tpu.memory_space<vmem>>, vector<1x8x32xf32>
    %3 = vector.shape_cast %2 : vector<1x8x32xf32> to vector<8x32xf32>
    %c0_5 = arith.constant 0 : index
    %c0_6 = arith.constant 0 : index
    %c0_7 = arith.constant 0 : index
    %4 = vector.load %arg2[%c0_5, %c0_6, %c0_7] : memref<1x16x32xf32, #tpu.memory_space<vmem>>, vector<1x16x32xf32>
    %5 = vector.shape_cast %4 : vector<1x16x32xf32> to vector<16x32xf32>
    %c0_8 = arith.constant 0 : index
    %c0_9 = arith.constant 0 : index
    %c0_10 = arith.constant 0 : index
    %6 = vector.load %arg4[%c0_8, %c0_9, %c0_10] : memref<1x8x32xf32, #tpu.memory_space<vmem>>, vector<1x8x32xf32>
    %7 = vector.shape_cast %6 : vector<1x8x32xf32> to vector<8x32xf32>
    %8 = arith.addf %1, %5 : vector<16x32xf32>
    %c0_11 = arith.constant 0 : index
    %c0_12 = arith.constant 0 : index
    %c0_13 = arith.constant 0 : index
    %9 = vector.load %arg5[%c0_11, %c0_12, %c0_13] : memref<2x32x64xf32, #tpu.memory_space<vmem>>, vector<1x32x64xf32>
    %10 = vector.shape_cast %9 : vector<1x32x64xf32> to vector<32x64xf32>
    %cst = arith.constant dense<0.000000e+00> : vector<16x64xf32>
    %11 = tpu.matmul %8, %10, %cst {dimension_numbers = #tpu.dot_dimension_numbers<[1], [0], [0], [1], [0, 0, 1, 1], [], []>} : vector<16x32xf32>, vector<32x64xf32>, vector<16x64xf32> -> vector<16x64xf32>
    %c0_14 = arith.constant 0 : index
    %c0_15 = arith.constant 0 : index
    %c0_16 = arith.constant 0 : index
    %12 = vector.load %arg6[%c0_14, %c0_15, %c0_16] : memref<2x1x64xf32, #tpu.memory_space<vmem>>, vector<1x1x64xf32>
    %13 = vector.shape_cast %12 : vector<1x1x64xf32> to vector<1x64xf32>
    %14 = vector.broadcast %13 : vector<1x64xf32> to vector<16x64xf32>
    %15 = arith.addf %11, %14 : vector<16x64xf32>
    %c0_17 = arith.constant 0 : index
    %c0_18 = arith.constant 0 : index
    %c0_19 = arith.constant 0 : index
    %16 = vector.load %arg7[%c0_17, %c0_18, %c0_19] : memref<2x32x32xf32, #tpu.memory_space<vmem>>, vector<1x32x32xf32>
    %17 = vector.shape_cast %16 : vector<1x32x32xf32> to vector<32x32xf32>
    %cst_20 = arith.constant dense<0.000000e+00> : vector<16x32xf32>
    %18 = tpu.matmul %1, %17, %cst_20 {dimension_numbers = #tpu.dot_dimension_numbers<[1], [0], [0], [1], [0, 0, 1, 1], [], []>} : vector<16x32xf32>, vector<32x32xf32>, vector<16x32xf32> -> vector<16x32xf32>
    %c0_21 = arith.constant 0 : index
    %c0_22 = arith.constant 0 : index
    %c0_23 = arith.constant 0 : index
    %19 = vector.load %arg8[%c0_21, %c0_22, %c0_23] : memref<2x1x32xf32, #tpu.memory_space<vmem>>, vector<1x1x32xf32>
    %20 = vector.shape_cast %19 : vector<1x1x32xf32> to vector<1x32xf32>
    %21 = vector.broadcast %20 : vector<1x32xf32> to vector<16x32xf32>
    %22 = arith.addf %18, %21 : vector<16x32xf32>
    %23 = vector.extract_strided_slice %15 {offsets = [0, 0], sizes = [16, 32], strides = [1, 1]} : vector<16x64xf32> to vector<16x32xf32>
    %24 = vector.extract_strided_slice %15 {offsets = [0, 32], sizes = [16, 32], strides = [1, 1]} : vector<16x64xf32> to vector<16x32xf32>
    %c0_24 = arith.constant 0 : index
    %c0_25 = arith.constant 0 : index
    %c0_26 = arith.constant 0 : index
    %25 = vector.load %arg9[%c0_24, %c0_25, %c0_26] : memref<2x32x32xf32, #tpu.memory_space<vmem>>, vector<1x32x32xf32>
    %26 = vector.shape_cast %25 : vector<1x32x32xf32> to vector<32x32xf32>
    %c0_27 = arith.constant 0 : index
    %c0_28 = arith.constant 0 : index
    %c0_29 = arith.constant 0 : index
    %27 = vector.load %arg10[%c0_27, %c0_28, %c0_29] : memref<2x1x32xf32, #tpu.memory_space<vmem>>, vector<1x1x32xf32>
    %28 = vector.shape_cast %27 : vector<1x1x32xf32> to vector<1x32xf32>
    %c0_30 = arith.constant 0 : index
    %c0_31 = arith.constant 0 : index
    %c0_32 = arith.constant 0 : index
    %29 = vector.load %arg11[%c0_30, %c0_31, %c0_32] : memref<2x1x32xf32, #tpu.memory_space<vmem>>, vector<1x1x32xf32>
    %30 = vector.shape_cast %29 : vector<1x1x32xf32> to vector<1x32xf32>
    %c0_33 = arith.constant 0 : index
    %c0_34 = arith.constant 0 : index
    %c0_35 = arith.constant 0 : index
    %31 = vector.load %arg12[%c0_33, %c0_34, %c0_35] : memref<2x1x32xf32, #tpu.memory_space<vmem>>, vector<1x1x32xf32>
    %32 = vector.shape_cast %31 : vector<1x1x32xf32> to vector<1x32xf32>
    %cst_36 = arith.constant 0.000000e+00 : f32
    %33 = vector.broadcast %cst_36 : f32 to vector<16x32xf32>
    %34 = vector.extract_strided_slice %23 {offsets = [0, 0], sizes = [16, 8], strides = [1, 1]} : vector<16x32xf32> to vector<16x8xf32>
    %cst_37 = arith.constant 0.353553385 : f32
    %35 = vector.broadcast %cst_37 : f32 to vector<16x8xf32>
    %36 = arith.mulf %34, %35 : vector<16x8xf32>
    %37 = vector.extract_strided_slice %24 {offsets = [0, 0], sizes = [16, 8], strides = [1, 1]} : vector<16x32xf32> to vector<16x8xf32>
    %cst_38 = arith.constant dense<0.000000e+00> : vector<16x16xf32>
    %38 = tpu.matmul %36, %37, %cst_38 {dimension_numbers = #tpu.dot_dimension_numbers<[1], [1], [0], [0], [0, 0, 1, 0], [], []>} : vector<16x8xf32>, vector<16x8xf32>, vector<16x16xf32> -> vector<16x16xf32>
    %cst_39 = arith.constant dense<0xFF800000> : vector<16xf32>
    %39 = vector.multi_reduction <maximumf>, %38, %cst_39 [1] : vector<16x16xf32> to vector<16xf32>
    %40 = vector.shape_cast %39 : vector<16xf32> to vector<16x1xf32>
    %41 = vector.broadcast %40 : vector<16x1xf32> to vector<16x16xf32>
    %42 = arith.subf %38, %41 : vector<16x16xf32>
    %43 = math.exp %42 : vector<16x16xf32>
    %cst_40 = arith.constant dense<0.000000e+00> : vector<16xf32>
    %44 = vector.multi_reduction <add>, %43, %cst_40 [1] : vector<16x16xf32> to vector<16xf32>
    %45 = vector.shape_cast %44 : vector<16xf32> to vector<16x1xf32>
    %46 = tpu.reciprocal %45 {approx = true} : vector<16x1xf32> -> vector<16x1xf32>
    %47 = vector.broadcast %46 : vector<16x1xf32> to vector<16x16xf32>
    %48 = arith.mulf %43, %47 : vector<16x16xf32>
    %49 = vector.extract_strided_slice %22 {offsets = [0, 0], sizes = [16, 8], strides = [1, 1]} : vector<16x32xf32> to vector<16x8xf32>
    %cst_41 = arith.constant dense<0.000000e+00> : vector<16x8xf32>
    %50 = tpu.matmul %48, %49, %cst_41 {dimension_numbers = #tpu.dot_dimension_numbers<[1], [0], [0], [1], [0, 0, 1, 1], [], []>} : vector<16x16xf32>, vector<16x8xf32>, vector<16x8xf32> -> vector<16x8xf32>
    %51 = vector.extract_strided_slice %26 {offsets = [0, 0], sizes = [8, 32], strides = [1, 1]} : vector<32x32xf32> to vector<8x32xf32>
    %cst_42 = arith.constant dense<0.000000e+00> : vector<16x32xf32>
    %52 = tpu.matmul %50, %51, %cst_42 {dimension_numbers = #tpu.dot_dimension_numbers<[1], [0], [0], [1], [0, 0, 1, 1], [], []>} : vector<16x8xf32>, vector<8x32xf32>, vector<16x32xf32> -> vector<16x32xf32>
    %53 = arith.addf %33, %52 : vector<16x32xf32>
    %54 = vector.extract_strided_slice %23 {offsets = [0, 8], sizes = [16, 8], strides = [1, 1]} : vector<16x32xf32> to vector<16x8xf32>
    %cst_43 = arith.constant 0.353553385 : f32
    %55 = vector.broadcast %cst_43 : f32 to vector<16x8xf32>
    %56 = arith.mulf %54, %55 : vector<16x8xf32>
    %57 = vector.extract_strided_slice %24 {offsets = [0, 8], sizes = [16, 8], strides = [1, 1]} : vector<16x32xf32> to vector<16x8xf32>
    %cst_44 = arith.constant dense<0.000000e+00> : vector<16x16xf32>
    %58 = tpu.matmul %56, %57, %cst_44 {dimension_numbers = #tpu.dot_dimension_numbers<[1], [1], [0], [0], [0, 0, 1, 0], [], []>} : vector<16x8xf32>, vector<16x8xf32>, vector<16x16xf32> -> vector<16x16xf32>
    %cst_45 = arith.constant dense<0xFF800000> : vector<16xf32>
    %59 = vector.multi_reduction <maximumf>, %58, %cst_45 [1] : vector<16x16xf32> to vector<16xf32>
    %60 = vector.shape_cast %59 : vector<16xf32> to vector<16x1xf32>
    %61 = vector.broadcast %60 : vector<16x1xf32> to vector<16x16xf32>
    %62 = arith.subf %58, %61 : vector<16x16xf32>
    %63 = math.exp %62 : vector<16x16xf32>
    %cst_46 = arith.constant dense<0.000000e+00> : vector<16xf32>
    %64 = vector.multi_reduction <add>, %63, %cst_46 [1] : vector<16x16xf32> to vector<16xf32>
    %65 = vector.shape_cast %64 : vector<16xf32> to vector<16x1xf32>
    %66 = tpu.reciprocal %65 {approx = true} : vector<16x1xf32> -> vector<16x1xf32>
    %67 = vector.broadcast %66 : vector<16x1xf32> to vector<16x16xf32>
    %68 = arith.mulf %63, %67 : vector<16x16xf32>
    %69 = vector.extract_strided_slice %22 {offsets = [0, 8], sizes = [16, 8], strides = [1, 1]} : vector<16x32xf32> to vector<16x8xf32>
    %cst_47 = arith.constant dense<0.000000e+00> : vector<16x8xf32>
    %70 = tpu.matmul %68, %69, %cst_47 {dimension_numbers = #tpu.dot_dimension_numbers<[1], [0], [0], [1], [0, 0, 1, 1], [], []>} : vector<16x16xf32>, vector<16x8xf32>, vector<16x8xf32> -> vector<16x8xf32>
    %71 = vector.extract_strided_slice %26 {offsets = [8, 0], sizes = [8, 32], strides = [1, 1]} : vector<32x32xf32> to vector<8x32xf32>
    %cst_48 = arith.constant dense<0.000000e+00> : vector<16x32xf32>
    %72 = tpu.matmul %70, %71, %cst_48 {dimension_numbers = #tpu.dot_dimension_numbers<[1], [0], [0], [1], [0, 0, 1, 1], [], []>} : vector<16x8xf32>, vector<8x32xf32>, vector<16x32xf32> -> vector<16x32xf32>
    %73 = arith.addf %53, %72 : vector<16x32xf32>
    %74 = vector.extract_strided_slice %23 {offsets = [0, 16], sizes = [16, 8], strides = [1, 1]} : vector<16x32xf32> to vector<16x8xf32>
    %cst_49 = arith.constant 0.353553385 : f32
    %75 = vector.broadcast %cst_49 : f32 to vector<16x8xf32>
    %76 = arith.mulf %74, %75 : vector<16x8xf32>
    %77 = vector.extract_strided_slice %24 {offsets = [0, 16], sizes = [16, 8], strides = [1, 1]} : vector<16x32xf32> to vector<16x8xf32>
    %cst_50 = arith.constant dense<0.000000e+00> : vector<16x16xf32>
    %78 = tpu.matmul %76, %77, %cst_50 {dimension_numbers = #tpu.dot_dimension_numbers<[1], [1], [0], [0], [0, 0, 1, 0], [], []>} : vector<16x8xf32>, vector<16x8xf32>, vector<16x16xf32> -> vector<16x16xf32>
    %cst_51 = arith.constant dense<0xFF800000> : vector<16xf32>
    %79 = vector.multi_reduction <maximumf>, %78, %cst_51 [1] : vector<16x16xf32> to vector<16xf32>
    %80 = vector.shape_cast %79 : vector<16xf32> to vector<16x1xf32>
    %81 = vector.broadcast %80 : vector<16x1xf32> to vector<16x16xf32>
    %82 = arith.subf %78, %81 : vector<16x16xf32>
    %83 = math.exp %82 : vector<16x16xf32>
    %cst_52 = arith.constant dense<0.000000e+00> : vector<16xf32>
    %84 = vector.multi_reduction <add>, %83, %cst_52 [1] : vector<16x16xf32> to vector<16xf32>
    %85 = vector.shape_cast %84 : vector<16xf32> to vector<16x1xf32>
    %86 = tpu.reciprocal %85 {approx = true} : vector<16x1xf32> -> vector<16x1xf32>
    %87 = vector.broadcast %86 : vector<16x1xf32> to vector<16x16xf32>
    %88 = arith.mulf %83, %87 : vector<16x16xf32>
    %89 = vector.extract_strided_slice %22 {offsets = [0, 16], sizes = [16, 8], strides = [1, 1]} : vector<16x32xf32> to vector<16x8xf32>
    %cst_53 = arith.constant dense<0.000000e+00> : vector<16x8xf32>
    %90 = tpu.matmul %88, %89, %cst_53 {dimension_numbers = #tpu.dot_dimension_numbers<[1], [0], [0], [1], [0, 0, 1, 1], [], []>} : vector<16x16xf32>, vector<16x8xf32>, vector<16x8xf32> -> vector<16x8xf32>
    %91 = vector.extract_strided_slice %26 {offsets = [16, 0], sizes = [8, 32], strides = [1, 1]} : vector<32x32xf32> to vector<8x32xf32>
    %cst_54 = arith.constant dense<0.000000e+00> : vector<16x32xf32>
    %92 = tpu.matmul %90, %91, %cst_54 {dimension_numbers = #tpu.dot_dimension_numbers<[1], [0], [0], [1], [0, 0, 1, 1], [], []>} : vector<16x8xf32>, vector<8x32xf32>, vector<16x32xf32> -> vector<16x32xf32>
    %93 = arith.addf %73, %92 : vector<16x32xf32>
    %94 = vector.extract_strided_slice %23 {offsets = [0, 24], sizes = [16, 8], strides = [1, 1]} : vector<16x32xf32> to vector<16x8xf32>
    %cst_55 = arith.constant 0.353553385 : f32
    %95 = vector.broadcast %cst_55 : f32 to vector<16x8xf32>
    %96 = arith.mulf %94, %95 : vector<16x8xf32>
    %97 = vector.extract_strided_slice %24 {offsets = [0, 24], sizes = [16, 8], strides = [1, 1]} : vector<16x32xf32> to vector<16x8xf32>
    %cst_56 = arith.constant dense<0.000000e+00> : vector<16x16xf32>
    %98 = tpu.matmul %96, %97, %cst_56 {dimension_numbers = #tpu.dot_dimension_numbers<[1], [1], [0], [0], [0, 0, 1, 0], [], []>} : vector<16x8xf32>, vector<16x8xf32>, vector<16x16xf32> -> vector<16x16xf32>
    %cst_57 = arith.constant dense<0xFF800000> : vector<16xf32>
    %99 = vector.multi_reduction <maximumf>, %98, %cst_57 [1] : vector<16x16xf32> to vector<16xf32>
    %100 = vector.shape_cast %99 : vector<16xf32> to vector<16x1xf32>
    %101 = vector.broadcast %100 : vector<16x1xf32> to vector<16x16xf32>
    %102 = arith.subf %98, %101 : vector<16x16xf32>
    %103 = math.exp %102 : vector<16x16xf32>
    %cst_58 = arith.constant dense<0.000000e+00> : vector<16xf32>
    %104 = vector.multi_reduction <add>, %103, %cst_58 [1] : vector<16x16xf32> to vector<16xf32>
    %105 = vector.shape_cast %104 : vector<16xf32> to vector<16x1xf32>
    %106 = tpu.reciprocal %105 {approx = true} : vector<16x1xf32> -> vector<16x1xf32>
    %107 = vector.broadcast %106 : vector<16x1xf32> to vector<16x16xf32>
    %108 = arith.mulf %103, %107 : vector<16x16xf32>
    %109 = vector.extract_strided_slice %22 {offsets = [0, 24], sizes = [16, 8], strides = [1, 1]} : vector<16x32xf32> to vector<16x8xf32>
    %cst_59 = arith.constant dense<0.000000e+00> : vector<16x8xf32>
    %110 = tpu.matmul %108, %109, %cst_59 {dimension_numbers = #tpu.dot_dimension_numbers<[1], [0], [0], [1], [0, 0, 1, 1], [], []>} : vector<16x16xf32>, vector<16x8xf32>, vector<16x8xf32> -> vector<16x8xf32>
    %111 = vector.extract_strided_slice %26 {offsets = [24, 0], sizes = [8, 32], strides = [1, 1]} : vector<32x32xf32> to vector<8x32xf32>
    %cst_60 = arith.constant dense<0.000000e+00> : vector<16x32xf32>
    %112 = tpu.matmul %110, %111, %cst_60 {dimension_numbers = #tpu.dot_dimension_numbers<[1], [0], [0], [1], [0, 0, 1, 1], [], []>} : vector<16x8xf32>, vector<8x32xf32>, vector<16x32xf32> -> vector<16x32xf32>
    %113 = arith.addf %93, %112 : vector<16x32xf32>
    %114 = arith.addf %1, %113 : vector<16x32xf32>
    %115 = vector.broadcast %28 : vector<1x32xf32> to vector<16x32xf32>
    %116 = arith.addf %114, %115 : vector<16x32xf32>
    %cst_61 = arith.constant dense<0.000000e+00> : vector<16xf32>
    %117 = vector.multi_reduction <add>, %116, %cst_61 [1] : vector<16x32xf32> to vector<16xf32>
    %118 = vector.shape_cast %117 : vector<16xf32> to vector<16x1xf32>
    %cst_62 = arith.constant 3.200000e+01 : f32
    %119 = vector.broadcast %cst_62 : f32 to vector<16x1xf32>
    %120 = arith.divf %118, %119 : vector<16x1xf32>
    %121 = vector.broadcast %120 : vector<16x1xf32> to vector<16x32xf32>
    %122 = arith.subf %116, %121 : vector<16x32xf32>
    %123 = arith.mulf %122, %122 : vector<16x32xf32>
    %cst_63 = arith.constant dense<0.000000e+00> : vector<16xf32>
    %124 = vector.multi_reduction <add>, %123, %cst_63 [1] : vector<16x32xf32> to vector<16xf32>
    %125 = vector.shape_cast %124 : vector<16xf32> to vector<16x1xf32>
    %cst_64 = arith.constant 3.200000e+01 : f32
    %126 = vector.broadcast %cst_64 : f32 to vector<16x1xf32>
    %127 = arith.divf %125, %126 : vector<16x1xf32>
    %128 = vector.broadcast %120 : vector<16x1xf32> to vector<16x32xf32>
    %129 = arith.subf %116, %128 : vector<16x32xf32>
    %cst_65 = arith.constant 9.99999974E-6 : f32
    %130 = vector.broadcast %cst_65 : f32 to vector<16x1xf32>
    %131 = arith.addf %127, %130 : vector<16x1xf32>
    %132 = math.rsqrt %131 : vector<16x1xf32>
    %133 = vector.broadcast %132 : vector<16x1xf32> to vector<16x32xf32>
    %134 = arith.mulf %129, %133 : vector<16x32xf32>
    %135 = vector.broadcast %30 : vector<1x32xf32> to vector<16x32xf32>
    %136 = arith.mulf %134, %135 : vector<16x32xf32>
    %137 = vector.broadcast %32 : vector<1x32xf32> to vector<16x32xf32>
    %138 = arith.addf %136, %137 : vector<16x32xf32>
    %139 = arith.addf %3, %7 : vector<8x32xf32>
    %c0_66 = arith.constant 0 : index
    %c0_67 = arith.constant 0 : index
    %c0_68 = arith.constant 0 : index
    %140 = vector.load %arg5[%c0_66, %c0_67, %c0_68] : memref<2x32x64xf32, #tpu.memory_space<vmem>>, vector<1x32x64xf32>
    %141 = vector.shape_cast %140 : vector<1x32x64xf32> to vector<32x64xf32>
    %cst_69 = arith.constant dense<0.000000e+00> : vector<8x64xf32>
    %142 = tpu.matmul %139, %141, %cst_69 {dimension_numbers = #tpu.dot_dimension_numbers<[1], [0], [0], [1], [0, 0, 1, 1], [], []>} : vector<8x32xf32>, vector<32x64xf32>, vector<8x64xf32> -> vector<8x64xf32>
    %c0_70 = arith.constant 0 : index
    %c0_71 = arith.constant 0 : index
    %c0_72 = arith.constant 0 : index
    %143 = vector.load %arg6[%c0_70, %c0_71, %c0_72] : memref<2x1x64xf32, #tpu.memory_space<vmem>>, vector<1x1x64xf32>
    %144 = vector.shape_cast %143 : vector<1x1x64xf32> to vector<1x64xf32>
    %145 = vector.broadcast %144 : vector<1x64xf32> to vector<8x64xf32>
    %146 = arith.addf %142, %145 : vector<8x64xf32>
    %c0_73 = arith.constant 0 : index
    %c0_74 = arith.constant 0 : index
    %c0_75 = arith.constant 0 : index
    %147 = vector.load %arg7[%c0_73, %c0_74, %c0_75] : memref<2x32x32xf32, #tpu.memory_space<vmem>>, vector<1x32x32xf32>
    %148 = vector.shape_cast %147 : vector<1x32x32xf32> to vector<32x32xf32>
    %cst_76 = arith.constant dense<0.000000e+00> : vector<8x32xf32>
    %149 = tpu.matmul %3, %148, %cst_76 {dimension_numbers = #tpu.dot_dimension_numbers<[1], [0], [0], [1], [0, 0, 1, 1], [], []>} : vector<8x32xf32>, vector<32x32xf32>, vector<8x32xf32> -> vector<8x32xf32>
    %c0_77 = arith.constant 0 : index
    %c0_78 = arith.constant 0 : index
    %c0_79 = arith.constant 0 : index
    %150 = vector.load %arg8[%c0_77, %c0_78, %c0_79] : memref<2x1x32xf32, #tpu.memory_space<vmem>>, vector<1x1x32xf32>
    %151 = vector.shape_cast %150 : vector<1x1x32xf32> to vector<1x32xf32>
    %152 = vector.broadcast %151 : vector<1x32xf32> to vector<8x32xf32>
    %153 = arith.addf %149, %152 : vector<8x32xf32>
    %154 = vector.extract_strided_slice %146 {offsets = [0, 0], sizes = [8, 32], strides = [1, 1]} : vector<8x64xf32> to vector<8x32xf32>
    %155 = vector.extract_strided_slice %146 {offsets = [0, 32], sizes = [8, 32], strides = [1, 1]} : vector<8x64xf32> to vector<8x32xf32>
    %c0_80 = arith.constant 0 : index
    %c0_81 = arith.constant 0 : index
    %c0_82 = arith.constant 0 : index
    %156 = vector.load %arg9[%c0_80, %c0_81, %c0_82] : memref<2x32x32xf32, #tpu.memory_space<vmem>>, vector<1x32x32xf32>
    %157 = vector.shape_cast %156 : vector<1x32x32xf32> to vector<32x32xf32>
    %c0_83 = arith.constant 0 : index
    %c0_84 = arith.constant 0 : index
    %c0_85 = arith.constant 0 : index
    %158 = vector.load %arg10[%c0_83, %c0_84, %c0_85] : memref<2x1x32xf32, #tpu.memory_space<vmem>>, vector<1x1x32xf32>
    %159 = vector.shape_cast %158 : vector<1x1x32xf32> to vector<1x32xf32>
    %c0_86 = arith.constant 0 : index
    %c0_87 = arith.constant 0 : index
    %c0_88 = arith.constant 0 : index
    %160 = vector.load %arg11[%c0_86, %c0_87, %c0_88] : memref<2x1x32xf32, #tpu.memory_space<vmem>>, vector<1x1x32xf32>
    %161 = vector.shape_cast %160 : vector<1x1x32xf32> to vector<1x32xf32>
    %c0_89 = arith.constant 0 : index
    %c0_90 = arith.constant 0 : index
    %c0_91 = arith.constant 0 : index
    %162 = vector.load %arg12[%c0_89, %c0_90, %c0_91] : memref<2x1x32xf32, #tpu.memory_space<vmem>>, vector<1x1x32xf32>
    %163 = vector.shape_cast %162 : vector<1x1x32xf32> to vector<1x32xf32>
    %cst_92 = arith.constant 0.000000e+00 : f32
    %164 = vector.broadcast %cst_92 : f32 to vector<8x32xf32>
    %165 = vector.extract_strided_slice %154 {offsets = [0, 0], sizes = [8, 8], strides = [1, 1]} : vector<8x32xf32> to vector<8x8xf32>
    %cst_93 = arith.constant 0.353553385 : f32
    %166 = vector.broadcast %cst_93 : f32 to vector<8x8xf32>
    %167 = arith.mulf %165, %166 : vector<8x8xf32>
    %168 = vector.extract_strided_slice %155 {offsets = [0, 0], sizes = [8, 8], strides = [1, 1]} : vector<8x32xf32> to vector<8x8xf32>
    %cst_94 = arith.constant dense<0.000000e+00> : vector<8x8xf32>
    %169 = tpu.matmul %167, %168, %cst_94 {dimension_numbers = #tpu.dot_dimension_numbers<[1], [1], [0], [0], [0, 0, 1, 0], [], []>} : vector<8x8xf32>, vector<8x8xf32>, vector<8x8xf32> -> vector<8x8xf32>
    %cst_95 = arith.constant dense<0xFF800000> : vector<8xf32>
    %170 = vector.multi_reduction <maximumf>, %169, %cst_95 [1] : vector<8x8xf32> to vector<8xf32>
    %171 = vector.shape_cast %170 : vector<8xf32> to vector<8x1xf32>
    %172 = vector.broadcast %171 : vector<8x1xf32> to vector<8x8xf32>
    %173 = arith.subf %169, %172 : vector<8x8xf32>
    %174 = math.exp %173 : vector<8x8xf32>
    %cst_96 = arith.constant dense<0.000000e+00> : vector<8xf32>
    %175 = vector.multi_reduction <add>, %174, %cst_96 [1] : vector<8x8xf32> to vector<8xf32>
    %176 = vector.shape_cast %175 : vector<8xf32> to vector<8x1xf32>
    %177 = tpu.reciprocal %176 {approx = true} : vector<8x1xf32> -> vector<8x1xf32>
    %178 = vector.broadcast %177 : vector<8x1xf32> to vector<8x8xf32>
    %179 = arith.mulf %174, %178 : vector<8x8xf32>
    %180 = vector.extract_strided_slice %153 {offsets = [0, 0], sizes = [8, 8], strides = [1, 1]} : vector<8x32xf32> to vector<8x8xf32>
    %cst_97 = arith.constant dense<0.000000e+00> : vector<8x8xf32>
    %181 = tpu.matmul %179, %180, %cst_97 {dimension_numbers = #tpu.dot_dimension_numbers<[1], [0], [0], [1], [0, 0, 1, 1], [], []>} : vector<8x8xf32>, vector<8x8xf32>, vector<8x8xf32> -> vector<8x8xf32>
    %182 = vector.extract_strided_slice %157 {offsets = [0, 0], sizes = [8, 32], strides = [1, 1]} : vector<32x32xf32> to vector<8x32xf32>
    %cst_98 = arith.constant dense<0.000000e+00> : vector<8x32xf32>
    %183 = tpu.matmul %181, %182, %cst_98 {dimension_numbers = #tpu.dot_dimension_numbers<[1], [0], [0], [1], [0, 0, 1, 1], [], []>} : vector<8x8xf32>, vector<8x32xf32>, vector<8x32xf32> -> vector<8x32xf32>
    %184 = arith.addf %164, %183 : vector<8x32xf32>
    %185 = vector.extract_strided_slice %154 {offsets = [0, 8], sizes = [8, 8], strides = [1, 1]} : vector<8x32xf32> to vector<8x8xf32>
    %cst_99 = arith.constant 0.353553385 : f32
    %186 = vector.broadcast %cst_99 : f32 to vector<8x8xf32>
    %187 = arith.mulf %185, %186 : vector<8x8xf32>
    %188 = vector.extract_strided_slice %155 {offsets = [0, 8], sizes = [8, 8], strides = [1, 1]} : vector<8x32xf32> to vector<8x8xf32>
    %cst_100 = arith.constant dense<0.000000e+00> : vector<8x8xf32>
    %189 = tpu.matmul %187, %188, %cst_100 {dimension_numbers = #tpu.dot_dimension_numbers<[1], [1], [0], [0], [0, 0, 1, 0], [], []>} : vector<8x8xf32>, vector<8x8xf32>, vector<8x8xf32> -> vector<8x8xf32>
    %cst_101 = arith.constant dense<0xFF800000> : vector<8xf32>
    %190 = vector.multi_reduction <maximumf>, %189, %cst_101 [1] : vector<8x8xf32> to vector<8xf32>
    %191 = vector.shape_cast %190 : vector<8xf32> to vector<8x1xf32>
    %192 = vector.broadcast %191 : vector<8x1xf32> to vector<8x8xf32>
    %193 = arith.subf %189, %192 : vector<8x8xf32>
    %194 = math.exp %193 : vector<8x8xf32>
    %cst_102 = arith.constant dense<0.000000e+00> : vector<8xf32>
    %195 = vector.multi_reduction <add>, %194, %cst_102 [1] : vector<8x8xf32> to vector<8xf32>
    %196 = vector.shape_cast %195 : vector<8xf32> to vector<8x1xf32>
    %197 = tpu.reciprocal %196 {approx = true} : vector<8x1xf32> -> vector<8x1xf32>
    %198 = vector.broadcast %197 : vector<8x1xf32> to vector<8x8xf32>
    %199 = arith.mulf %194, %198 : vector<8x8xf32>
    %200 = vector.extract_strided_slice %153 {offsets = [0, 8], sizes = [8, 8], strides = [1, 1]} : vector<8x32xf32> to vector<8x8xf32>
    %cst_103 = arith.constant dense<0.000000e+00> : vector<8x8xf32>
    %201 = tpu.matmul %199, %200, %cst_103 {dimension_numbers = #tpu.dot_dimension_numbers<[1], [0], [0], [1], [0, 0, 1, 1], [], []>} : vector<8x8xf32>, vector<8x8xf32>, vector<8x8xf32> -> vector<8x8xf32>
    %202 = vector.extract_strided_slice %157 {offsets = [8, 0], sizes = [8, 32], strides = [1, 1]} : vector<32x32xf32> to vector<8x32xf32>
    %cst_104 = arith.constant dense<0.000000e+00> : vector<8x32xf32>
    %203 = tpu.matmul %201, %202, %cst_104 {dimension_numbers = #tpu.dot_dimension_numbers<[1], [0], [0], [1], [0, 0, 1, 1], [], []>} : vector<8x8xf32>, vector<8x32xf32>, vector<8x32xf32> -> vector<8x32xf32>
    %204 = arith.addf %184, %203 : vector<8x32xf32>
    %205 = vector.extract_strided_slice %154 {offsets = [0, 16], sizes = [8, 8], strides = [1, 1]} : vector<8x32xf32> to vector<8x8xf32>
    %cst_105 = arith.constant 0.353553385 : f32
    %206 = vector.broadcast %cst_105 : f32 to vector<8x8xf32>
    %207 = arith.mulf %205, %206 : vector<8x8xf32>
    %208 = vector.extract_strided_slice %155 {offsets = [0, 16], sizes = [8, 8], strides = [1, 1]} : vector<8x32xf32> to vector<8x8xf32>
    %cst_106 = arith.constant dense<0.000000e+00> : vector<8x8xf32>
    %209 = tpu.matmul %207, %208, %cst_106 {dimension_numbers = #tpu.dot_dimension_numbers<[1], [1], [0], [0], [0, 0, 1, 0], [], []>} : vector<8x8xf32>, vector<8x8xf32>, vector<8x8xf32> -> vector<8x8xf32>
    %cst_107 = arith.constant dense<0xFF800000> : vector<8xf32>
    %210 = vector.multi_reduction <maximumf>, %209, %cst_107 [1] : vector<8x8xf32> to vector<8xf32>
    %211 = vector.shape_cast %210 : vector<8xf32> to vector<8x1xf32>
    %212 = vector.broadcast %211 : vector<8x1xf32> to vector<8x8xf32>
    %213 = arith.subf %209, %212 : vector<8x8xf32>
    %214 = math.exp %213 : vector<8x8xf32>
    %cst_108 = arith.constant dense<0.000000e+00> : vector<8xf32>
    %215 = vector.multi_reduction <add>, %214, %cst_108 [1] : vector<8x8xf32> to vector<8xf32>
    %216 = vector.shape_cast %215 : vector<8xf32> to vector<8x1xf32>
    %217 = tpu.reciprocal %216 {approx = true} : vector<8x1xf32> -> vector<8x1xf32>
    %218 = vector.broadcast %217 : vector<8x1xf32> to vector<8x8xf32>
    %219 = arith.mulf %214, %218 : vector<8x8xf32>
    %220 = vector.extract_strided_slice %153 {offsets = [0, 16], sizes = [8, 8], strides = [1, 1]} : vector<8x32xf32> to vector<8x8xf32>
    %cst_109 = arith.constant dense<0.000000e+00> : vector<8x8xf32>
    %221 = tpu.matmul %219, %220, %cst_109 {dimension_numbers = #tpu.dot_dimension_numbers<[1], [0], [0], [1], [0, 0, 1, 1], [], []>} : vector<8x8xf32>, vector<8x8xf32>, vector<8x8xf32> -> vector<8x8xf32>
    %222 = vector.extract_strided_slice %157 {offsets = [16, 0], sizes = [8, 32], strides = [1, 1]} : vector<32x32xf32> to vector<8x32xf32>
    %cst_110 = arith.constant dense<0.000000e+00> : vector<8x32xf32>
    %223 = tpu.matmul %221, %222, %cst_110 {dimension_numbers = #tpu.dot_dimension_numbers<[1], [0], [0], [1], [0, 0, 1, 1], [], []>} : vector<8x8xf32>, vector<8x32xf32>, vector<8x32xf32> -> vector<8x32xf32>
    %224 = arith.addf %204, %223 : vector<8x32xf32>
    %225 = vector.extract_strided_slice %154 {offsets = [0, 24], sizes = [8, 8], strides = [1, 1]} : vector<8x32xf32> to vector<8x8xf32>
    %cst_111 = arith.constant 0.353553385 : f32
    %226 = vector.broadcast %cst_111 : f32 to vector<8x8xf32>
    %227 = arith.mulf %225, %226 : vector<8x8xf32>
    %228 = vector.extract_strided_slice %155 {offsets = [0, 24], sizes = [8, 8], strides = [1, 1]} : vector<8x32xf32> to vector<8x8xf32>
    %cst_112 = arith.constant dense<0.000000e+00> : vector<8x8xf32>
    %229 = tpu.matmul %227, %228, %cst_112 {dimension_numbers = #tpu.dot_dimension_numbers<[1], [1], [0], [0], [0, 0, 1, 0], [], []>} : vector<8x8xf32>, vector<8x8xf32>, vector<8x8xf32> -> vector<8x8xf32>
    %cst_113 = arith.constant dense<0xFF800000> : vector<8xf32>
    %230 = vector.multi_reduction <maximumf>, %229, %cst_113 [1] : vector<8x8xf32> to vector<8xf32>
    %231 = vector.shape_cast %230 : vector<8xf32> to vector<8x1xf32>
    %232 = vector.broadcast %231 : vector<8x1xf32> to vector<8x8xf32>
    %233 = arith.subf %229, %232 : vector<8x8xf32>
    %234 = math.exp %233 : vector<8x8xf32>
    %cst_114 = arith.constant dense<0.000000e+00> : vector<8xf32>
    %235 = vector.multi_reduction <add>, %234, %cst_114 [1] : vector<8x8xf32> to vector<8xf32>
    %236 = vector.shape_cast %235 : vector<8xf32> to vector<8x1xf32>
    %237 = tpu.reciprocal %236 {approx = true} : vector<8x1xf32> -> vector<8x1xf32>
    %238 = vector.broadcast %237 : vector<8x1xf32> to vector<8x8xf32>
    %239 = arith.mulf %234, %238 : vector<8x8xf32>
    %240 = vector.extract_strided_slice %153 {offsets = [0, 24], sizes = [8, 8], strides = [1, 1]} : vector<8x32xf32> to vector<8x8xf32>
    %cst_115 = arith.constant dense<0.000000e+00> : vector<8x8xf32>
    %241 = tpu.matmul %239, %240, %cst_115 {dimension_numbers = #tpu.dot_dimension_numbers<[1], [0], [0], [1], [0, 0, 1, 1], [], []>} : vector<8x8xf32>, vector<8x8xf32>, vector<8x8xf32> -> vector<8x8xf32>
    %242 = vector.extract_strided_slice %157 {offsets = [24, 0], sizes = [8, 32], strides = [1, 1]} : vector<32x32xf32> to vector<8x32xf32>
    %cst_116 = arith.constant dense<0.000000e+00> : vector<8x32xf32>
    %243 = tpu.matmul %241, %242, %cst_116 {dimension_numbers = #tpu.dot_dimension_numbers<[1], [0], [0], [1], [0, 0, 1, 1], [], []>} : vector<8x8xf32>, vector<8x32xf32>, vector<8x32xf32> -> vector<8x32xf32>
    %244 = arith.addf %224, %243 : vector<8x32xf32>
    %245 = arith.addf %3, %244 : vector<8x32xf32>
    %246 = vector.broadcast %159 : vector<1x32xf32> to vector<8x32xf32>
    %247 = arith.addf %245, %246 : vector<8x32xf32>
    %cst_117 = arith.constant dense<0.000000e+00> : vector<8xf32>
    %248 = vector.multi_reduction <add>, %247, %cst_117 [1] : vector<8x32xf32> to vector<8xf32>
    %249 = vector.shape_cast %248 : vector<8xf32> to vector<8x1xf32>
    %cst_118 = arith.constant 3.200000e+01 : f32
    %250 = vector.broadcast %cst_118 : f32 to vector<8x1xf32>
    %251 = arith.divf %249, %250 : vector<8x1xf32>
    %252 = vector.broadcast %251 : vector<8x1xf32> to vector<8x32xf32>
    %253 = arith.subf %247, %252 : vector<8x32xf32>
    %254 = arith.mulf %253, %253 : vector<8x32xf32>
    %cst_119 = arith.constant dense<0.000000e+00> : vector<8xf32>
    %255 = vector.multi_reduction <add>, %254, %cst_119 [1] : vector<8x32xf32> to vector<8xf32>
    %256 = vector.shape_cast %255 : vector<8xf32> to vector<8x1xf32>
    %cst_120 = arith.constant 3.200000e+01 : f32
    %257 = vector.broadcast %cst_120 : f32 to vector<8x1xf32>
    %258 = arith.divf %256, %257 : vector<8x1xf32>
    %259 = vector.broadcast %251 : vector<8x1xf32> to vector<8x32xf32>
    %260 = arith.subf %247, %259 : vector<8x32xf32>
    %cst_121 = arith.constant 9.99999974E-6 : f32
    %261 = vector.broadcast %cst_121 : f32 to vector<8x1xf32>
    %262 = arith.addf %258, %261 : vector<8x1xf32>
    %263 = math.rsqrt %262 : vector<8x1xf32>
    %264 = vector.broadcast %263 : vector<8x1xf32> to vector<8x32xf32>
    %265 = arith.mulf %260, %264 : vector<8x32xf32>
    %266 = vector.broadcast %161 : vector<1x32xf32> to vector<8x32xf32>
    %267 = arith.mulf %265, %266 : vector<8x32xf32>
    %268 = vector.broadcast %163 : vector<1x32xf32> to vector<8x32xf32>
    %269 = arith.addf %267, %268 : vector<8x32xf32>
    %270 = arith.addf %138, %5 : vector<16x32xf32>
    %c0_122 = arith.constant 0 : index
    %c0_123 = arith.constant 0 : index
    %c0_124 = arith.constant 0 : index
    %271 = vector.load %arg13[%c0_122, %c0_123, %c0_124] : memref<2x32x64xf32, #tpu.memory_space<vmem>>, vector<1x32x64xf32>
    %272 = vector.shape_cast %271 : vector<1x32x64xf32> to vector<32x64xf32>
    %cst_125 = arith.constant dense<0.000000e+00> : vector<16x64xf32>
    %273 = tpu.matmul %270, %272, %cst_125 {dimension_numbers = #tpu.dot_dimension_numbers<[1], [0], [0], [1], [0, 0, 1, 1], [], []>} : vector<16x32xf32>, vector<32x64xf32>, vector<16x64xf32> -> vector<16x64xf32>
    %c0_126 = arith.constant 0 : index
    %c0_127 = arith.constant 0 : index
    %c0_128 = arith.constant 0 : index
    %274 = vector.load %arg14[%c0_126, %c0_127, %c0_128] : memref<2x1x64xf32, #tpu.memory_space<vmem>>, vector<1x1x64xf32>
    %275 = vector.shape_cast %274 : vector<1x1x64xf32> to vector<1x64xf32>
    %276 = vector.broadcast %275 : vector<1x64xf32> to vector<16x64xf32>
    %277 = arith.addf %273, %276 : vector<16x64xf32>
    %278 = arith.addf %269, %7 : vector<8x32xf32>
    %c0_129 = arith.constant 0 : index
    %c0_130 = arith.constant 0 : index
    %c0_131 = arith.constant 0 : index
    %279 = vector.load %arg13[%c0_129, %c0_130, %c0_131] : memref<2x32x64xf32, #tpu.memory_space<vmem>>, vector<1x32x64xf32>
    %280 = vector.shape_cast %279 : vector<1x32x64xf32> to vector<32x64xf32>
    %cst_132 = arith.constant dense<0.000000e+00> : vector<8x64xf32>
    %281 = tpu.matmul %278, %280, %cst_132 {dimension_numbers = #tpu.dot_dimension_numbers<[1], [0], [0], [1], [0, 0, 1, 1], [], []>} : vector<8x32xf32>, vector<32x64xf32>, vector<8x64xf32> -> vector<8x64xf32>
    %c0_133 = arith.constant 0 : index
    %c0_134 = arith.constant 0 : index
    %c0_135 = arith.constant 0 : index
    %282 = vector.load %arg14[%c0_133, %c0_134, %c0_135] : memref<2x1x64xf32, #tpu.memory_space<vmem>>, vector<1x1x64xf32>
    %283 = vector.shape_cast %282 : vector<1x1x64xf32> to vector<1x64xf32>
    %284 = vector.broadcast %283 : vector<1x64xf32> to vector<8x64xf32>
    %285 = arith.addf %281, %284 : vector<8x64xf32>
    %c0_136 = arith.constant 0 : index
    %c0_137 = arith.constant 0 : index
    %c0_138 = arith.constant 0 : index
    %286 = vector.load %arg15[%c0_136, %c0_137, %c0_138] : memref<2x32x32xf32, #tpu.memory_space<vmem>>, vector<1x32x32xf32>
    %287 = vector.shape_cast %286 : vector<1x32x32xf32> to vector<32x32xf32>
    %cst_139 = arith.constant dense<0.000000e+00> : vector<16x32xf32>
    %288 = tpu.matmul %138, %287, %cst_139 {dimension_numbers = #tpu.dot_dimension_numbers<[1], [0], [0], [1], [0, 0, 1, 1], [], []>} : vector<16x32xf32>, vector<32x32xf32>, vector<16x32xf32> -> vector<16x32xf32>
    %c0_140 = arith.constant 0 : index
    %c0_141 = arith.constant 0 : index
    %c0_142 = arith.constant 0 : index
    %289 = vector.load %arg16[%c0_140, %c0_141, %c0_142] : memref<2x1x32xf32, #tpu.memory_space<vmem>>, vector<1x1x32xf32>
    %290 = vector.shape_cast %289 : vector<1x1x32xf32> to vector<1x32xf32>
    %291 = vector.broadcast %290 : vector<1x32xf32> to vector<16x32xf32>
    %292 = arith.addf %288, %291 : vector<16x32xf32>
    %c0_143 = arith.constant 0 : index
    %c0_144 = arith.constant 0 : index
    %c0_145 = arith.constant 0 : index
    %293 = vector.load %arg15[%c0_143, %c0_144, %c0_145] : memref<2x32x32xf32, #tpu.memory_space<vmem>>, vector<1x32x32xf32>
    %294 = vector.shape_cast %293 : vector<1x32x32xf32> to vector<32x32xf32>
    %cst_146 = arith.constant dense<0.000000e+00> : vector<8x32xf32>
    %295 = tpu.matmul %269, %294, %cst_146 {dimension_numbers = #tpu.dot_dimension_numbers<[1], [0], [0], [1], [0, 0, 1, 1], [], []>} : vector<8x32xf32>, vector<32x32xf32>, vector<8x32xf32> -> vector<8x32xf32>
    %c0_147 = arith.constant 0 : index
    %c0_148 = arith.constant 0 : index
    %c0_149 = arith.constant 0 : index
    %296 = vector.load %arg16[%c0_147, %c0_148, %c0_149] : memref<2x1x32xf32, #tpu.memory_space<vmem>>, vector<1x1x32xf32>
    %297 = vector.shape_cast %296 : vector<1x1x32xf32> to vector<1x32xf32>
    %298 = vector.broadcast %297 : vector<1x32xf32> to vector<8x32xf32>
    %299 = arith.addf %295, %298 : vector<8x32xf32>
    %300 = vector.extract_strided_slice %277 {offsets = [0, 0], sizes = [16, 32], strides = [1, 1]} : vector<16x64xf32> to vector<16x32xf32>
    %301 = vector.extract_strided_slice %277 {offsets = [0, 32], sizes = [16, 32], strides = [1, 1]} : vector<16x64xf32> to vector<16x32xf32>
    %302 = vector.extract_strided_slice %285 {offsets = [0, 0], sizes = [8, 32], strides = [1, 1]} : vector<8x64xf32> to vector<8x32xf32>
    %303 = vector.extract_strided_slice %285 {offsets = [0, 32], sizes = [8, 32], strides = [1, 1]} : vector<8x64xf32> to vector<8x32xf32>
    %c0_150 = arith.constant 0 : index
    %c0_151 = arith.constant 0 : index
    %c0_152 = arith.constant 0 : index
    %304 = vector.load %arg17[%c0_150, %c0_151, %c0_152] : memref<2x32x32xf32, #tpu.memory_space<vmem>>, vector<1x32x32xf32>
    %305 = vector.shape_cast %304 : vector<1x32x32xf32> to vector<32x32xf32>
    %c0_153 = arith.constant 0 : index
    %c0_154 = arith.constant 0 : index
    %c0_155 = arith.constant 0 : index
    %306 = vector.load %arg18[%c0_153, %c0_154, %c0_155] : memref<2x1x32xf32, #tpu.memory_space<vmem>>, vector<1x1x32xf32>
    %307 = vector.shape_cast %306 : vector<1x1x32xf32> to vector<1x32xf32>
    %c0_156 = arith.constant 0 : index
    %c0_157 = arith.constant 0 : index
    %c0_158 = arith.constant 0 : index
    %308 = vector.load %arg19[%c0_156, %c0_157, %c0_158] : memref<2x1x32xf32, #tpu.memory_space<vmem>>, vector<1x1x32xf32>
    %309 = vector.shape_cast %308 : vector<1x1x32xf32> to vector<1x32xf32>
    %c0_159 = arith.constant 0 : index
    %c0_160 = arith.constant 0 : index
    %c0_161 = arith.constant 0 : index
    %310 = vector.load %arg20[%c0_159, %c0_160, %c0_161] : memref<2x1x32xf32, #tpu.memory_space<vmem>>, vector<1x1x32xf32>
    %311 = vector.shape_cast %310 : vector<1x1x32xf32> to vector<1x32xf32>
    %cst_162 = arith.constant 0.000000e+00 : f32
    %312 = vector.broadcast %cst_162 : f32 to vector<16x32xf32>
    %313 = vector.extract_strided_slice %300 {offsets = [0, 0], sizes = [16, 8], strides = [1, 1]} : vector<16x32xf32> to vector<16x8xf32>
    %cst_163 = arith.constant 0.353553385 : f32
    %314 = vector.broadcast %cst_163 : f32 to vector<16x8xf32>
    %315 = arith.mulf %313, %314 : vector<16x8xf32>
    %316 = vector.extract_strided_slice %303 {offsets = [0, 0], sizes = [8, 8], strides = [1, 1]} : vector<8x32xf32> to vector<8x8xf32>
    %cst_164 = arith.constant dense<0.000000e+00> : vector<16x8xf32>
    %317 = tpu.matmul %315, %316, %cst_164 {dimension_numbers = #tpu.dot_dimension_numbers<[1], [1], [0], [0], [0, 0, 1, 0], [], []>} : vector<16x8xf32>, vector<8x8xf32>, vector<16x8xf32> -> vector<16x8xf32>
    %cst_165 = arith.constant dense<0xFF800000> : vector<16xf32>
    %318 = vector.multi_reduction <maximumf>, %317, %cst_165 [1] : vector<16x8xf32> to vector<16xf32>
    %319 = vector.shape_cast %318 : vector<16xf32> to vector<16x1xf32>
    %320 = vector.broadcast %319 : vector<16x1xf32> to vector<16x8xf32>
    %321 = arith.subf %317, %320 : vector<16x8xf32>
    %322 = math.exp %321 : vector<16x8xf32>
    %cst_166 = arith.constant dense<0.000000e+00> : vector<16xf32>
    %323 = vector.multi_reduction <add>, %322, %cst_166 [1] : vector<16x8xf32> to vector<16xf32>
    %324 = vector.shape_cast %323 : vector<16xf32> to vector<16x1xf32>
    %325 = tpu.reciprocal %324 {approx = true} : vector<16x1xf32> -> vector<16x1xf32>
    %326 = vector.broadcast %325 : vector<16x1xf32> to vector<16x8xf32>
    %327 = arith.mulf %322, %326 : vector<16x8xf32>
    %328 = vector.extract_strided_slice %299 {offsets = [0, 0], sizes = [8, 8], strides = [1, 1]} : vector<8x32xf32> to vector<8x8xf32>
    %cst_167 = arith.constant dense<0.000000e+00> : vector<16x8xf32>
    %329 = tpu.matmul %327, %328, %cst_167 {dimension_numbers = #tpu.dot_dimension_numbers<[1], [0], [0], [1], [0, 0, 1, 1], [], []>} : vector<16x8xf32>, vector<8x8xf32>, vector<16x8xf32> -> vector<16x8xf32>
    %330 = vector.extract_strided_slice %305 {offsets = [0, 0], sizes = [8, 32], strides = [1, 1]} : vector<32x32xf32> to vector<8x32xf32>
    %cst_168 = arith.constant dense<0.000000e+00> : vector<16x32xf32>
    %331 = tpu.matmul %329, %330, %cst_168 {dimension_numbers = #tpu.dot_dimension_numbers<[1], [0], [0], [1], [0, 0, 1, 1], [], []>} : vector<16x8xf32>, vector<8x32xf32>, vector<16x32xf32> -> vector<16x32xf32>
    %332 = arith.addf %312, %331 : vector<16x32xf32>
    %333 = vector.extract_strided_slice %300 {offsets = [0, 8], sizes = [16, 8], strides = [1, 1]} : vector<16x32xf32> to vector<16x8xf32>
    %cst_169 = arith.constant 0.353553385 : f32
    %334 = vector.broadcast %cst_169 : f32 to vector<16x8xf32>
    %335 = arith.mulf %333, %334 : vector<16x8xf32>
    %336 = vector.extract_strided_slice %303 {offsets = [0, 8], sizes = [8, 8], strides = [1, 1]} : vector<8x32xf32> to vector<8x8xf32>
    %cst_170 = arith.constant dense<0.000000e+00> : vector<16x8xf32>
    %337 = tpu.matmul %335, %336, %cst_170 {dimension_numbers = #tpu.dot_dimension_numbers<[1], [1], [0], [0], [0, 0, 1, 0], [], []>} : vector<16x8xf32>, vector<8x8xf32>, vector<16x8xf32> -> vector<16x8xf32>
    %cst_171 = arith.constant dense<0xFF800000> : vector<16xf32>
    %338 = vector.multi_reduction <maximumf>, %337, %cst_171 [1] : vector<16x8xf32> to vector<16xf32>
    %339 = vector.shape_cast %338 : vector<16xf32> to vector<16x1xf32>
    %340 = vector.broadcast %339 : vector<16x1xf32> to vector<16x8xf32>
    %341 = arith.subf %337, %340 : vector<16x8xf32>
    %342 = math.exp %341 : vector<16x8xf32>
    %cst_172 = arith.constant dense<0.000000e+00> : vector<16xf32>
    %343 = vector.multi_reduction <add>, %342, %cst_172 [1] : vector<16x8xf32> to vector<16xf32>
    %344 = vector.shape_cast %343 : vector<16xf32> to vector<16x1xf32>
    %345 = tpu.reciprocal %344 {approx = true} : vector<16x1xf32> -> vector<16x1xf32>
    %346 = vector.broadcast %345 : vector<16x1xf32> to vector<16x8xf32>
    %347 = arith.mulf %342, %346 : vector<16x8xf32>
    %348 = vector.extract_strided_slice %299 {offsets = [0, 8], sizes = [8, 8], strides = [1, 1]} : vector<8x32xf32> to vector<8x8xf32>
    %cst_173 = arith.constant dense<0.000000e+00> : vector<16x8xf32>
    %349 = tpu.matmul %347, %348, %cst_173 {dimension_numbers = #tpu.dot_dimension_numbers<[1], [0], [0], [1], [0, 0, 1, 1], [], []>} : vector<16x8xf32>, vector<8x8xf32>, vector<16x8xf32> -> vector<16x8xf32>
    %350 = vector.extract_strided_slice %305 {offsets = [8, 0], sizes = [8, 32], strides = [1, 1]} : vector<32x32xf32> to vector<8x32xf32>
    %cst_174 = arith.constant dense<0.000000e+00> : vector<16x32xf32>
    %351 = tpu.matmul %349, %350, %cst_174 {dimension_numbers = #tpu.dot_dimension_numbers<[1], [0], [0], [1], [0, 0, 1, 1], [], []>} : vector<16x8xf32>, vector<8x32xf32>, vector<16x32xf32> -> vector<16x32xf32>
    %352 = arith.addf %332, %351 : vector<16x32xf32>
    %353 = vector.extract_strided_slice %300 {offsets = [0, 16], sizes = [16, 8], strides = [1, 1]} : vector<16x32xf32> to vector<16x8xf32>
    %cst_175 = arith.constant 0.353553385 : f32
    %354 = vector.broadcast %cst_175 : f32 to vector<16x8xf32>
    %355 = arith.mulf %353, %354 : vector<16x8xf32>
    %356 = vector.extract_strided_slice %303 {offsets = [0, 16], sizes = [8, 8], strides = [1, 1]} : vector<8x32xf32> to vector<8x8xf32>
    %cst_176 = arith.constant dense<0.000000e+00> : vector<16x8xf32>
    %357 = tpu.matmul %355, %356, %cst_176 {dimension_numbers = #tpu.dot_dimension_numbers<[1], [1], [0], [0], [0, 0, 1, 0], [], []>} : vector<16x8xf32>, vector<8x8xf32>, vector<16x8xf32> -> vector<16x8xf32>
    %cst_177 = arith.constant dense<0xFF800000> : vector<16xf32>
    %358 = vector.multi_reduction <maximumf>, %357, %cst_177 [1] : vector<16x8xf32> to vector<16xf32>
    %359 = vector.shape_cast %358 : vector<16xf32> to vector<16x1xf32>
    %360 = vector.broadcast %359 : vector<16x1xf32> to vector<16x8xf32>
    %361 = arith.subf %357, %360 : vector<16x8xf32>
    %362 = math.exp %361 : vector<16x8xf32>
    %cst_178 = arith.constant dense<0.000000e+00> : vector<16xf32>
    %363 = vector.multi_reduction <add>, %362, %cst_178 [1] : vector<16x8xf32> to vector<16xf32>
    %364 = vector.shape_cast %363 : vector<16xf32> to vector<16x1xf32>
    %365 = tpu.reciprocal %364 {approx = true} : vector<16x1xf32> -> vector<16x1xf32>
    %366 = vector.broadcast %365 : vector<16x1xf32> to vector<16x8xf32>
    %367 = arith.mulf %362, %366 : vector<16x8xf32>
    %368 = vector.extract_strided_slice %299 {offsets = [0, 16], sizes = [8, 8], strides = [1, 1]} : vector<8x32xf32> to vector<8x8xf32>
    %cst_179 = arith.constant dense<0.000000e+00> : vector<16x8xf32>
    %369 = tpu.matmul %367, %368, %cst_179 {dimension_numbers = #tpu.dot_dimension_numbers<[1], [0], [0], [1], [0, 0, 1, 1], [], []>} : vector<16x8xf32>, vector<8x8xf32>, vector<16x8xf32> -> vector<16x8xf32>
    %370 = vector.extract_strided_slice %305 {offsets = [16, 0], sizes = [8, 32], strides = [1, 1]} : vector<32x32xf32> to vector<8x32xf32>
    %cst_180 = arith.constant dense<0.000000e+00> : vector<16x32xf32>
    %371 = tpu.matmul %369, %370, %cst_180 {dimension_numbers = #tpu.dot_dimension_numbers<[1], [0], [0], [1], [0, 0, 1, 1], [], []>} : vector<16x8xf32>, vector<8x32xf32>, vector<16x32xf32> -> vector<16x32xf32>
    %372 = arith.addf %352, %371 : vector<16x32xf32>
    %373 = vector.extract_strided_slice %300 {offsets = [0, 24], sizes = [16, 8], strides = [1, 1]} : vector<16x32xf32> to vector<16x8xf32>
    %cst_181 = arith.constant 0.353553385 : f32
    %374 = vector.broadcast %cst_181 : f32 to vector<16x8xf32>
    %375 = arith.mulf %373, %374 : vector<16x8xf32>
    %376 = vector.extract_strided_slice %303 {offsets = [0, 24], sizes = [8, 8], strides = [1, 1]} : vector<8x32xf32> to vector<8x8xf32>
    %cst_182 = arith.constant dense<0.000000e+00> : vector<16x8xf32>
    %377 = tpu.matmul %375, %376, %cst_182 {dimension_numbers = #tpu.dot_dimension_numbers<[1], [1], [0], [0], [0, 0, 1, 0], [], []>} : vector<16x8xf32>, vector<8x8xf32>, vector<16x8xf32> -> vector<16x8xf32>
    %cst_183 = arith.constant dense<0xFF800000> : vector<16xf32>
    %378 = vector.multi_reduction <maximumf>, %377, %cst_183 [1] : vector<16x8xf32> to vector<16xf32>
    %379 = vector.shape_cast %378 : vector<16xf32> to vector<16x1xf32>
    %380 = vector.broadcast %379 : vector<16x1xf32> to vector<16x8xf32>
    %381 = arith.subf %377, %380 : vector<16x8xf32>
    %382 = math.exp %381 : vector<16x8xf32>
    %cst_184 = arith.constant dense<0.000000e+00> : vector<16xf32>
    %383 = vector.multi_reduction <add>, %382, %cst_184 [1] : vector<16x8xf32> to vector<16xf32>
    %384 = vector.shape_cast %383 : vector<16xf32> to vector<16x1xf32>
    %385 = tpu.reciprocal %384 {approx = true} : vector<16x1xf32> -> vector<16x1xf32>
    %386 = vector.broadcast %385 : vector<16x1xf32> to vector<16x8xf32>
    %387 = arith.mulf %382, %386 : vector<16x8xf32>
    %388 = vector.extract_strided_slice %299 {offsets = [0, 24], sizes = [8, 8], strides = [1, 1]} : vector<8x32xf32> to vector<8x8xf32>
    %cst_185 = arith.constant dense<0.000000e+00> : vector<16x8xf32>
    %389 = tpu.matmul %387, %388, %cst_185 {dimension_numbers = #tpu.dot_dimension_numbers<[1], [0], [0], [1], [0, 0, 1, 1], [], []>} : vector<16x8xf32>, vector<8x8xf32>, vector<16x8xf32> -> vector<16x8xf32>
    %390 = vector.extract_strided_slice %305 {offsets = [24, 0], sizes = [8, 32], strides = [1, 1]} : vector<32x32xf32> to vector<8x32xf32>
    %cst_186 = arith.constant dense<0.000000e+00> : vector<16x32xf32>
    %391 = tpu.matmul %389, %390, %cst_186 {dimension_numbers = #tpu.dot_dimension_numbers<[1], [0], [0], [1], [0, 0, 1, 1], [], []>} : vector<16x8xf32>, vector<8x32xf32>, vector<16x32xf32> -> vector<16x32xf32>
    %392 = arith.addf %372, %391 : vector<16x32xf32>
    %393 = arith.addf %138, %392 : vector<16x32xf32>
    %394 = vector.broadcast %307 : vector<1x32xf32> to vector<16x32xf32>
    %395 = arith.addf %393, %394 : vector<16x32xf32>
    %cst_187 = arith.constant dense<0.000000e+00> : vector<16xf32>
    %396 = vector.multi_reduction <add>, %395, %cst_187 [1] : vector<16x32xf32> to vector<16xf32>
    %397 = vector.shape_cast %396 : vector<16xf32> to vector<16x1xf32>
    %cst_188 = arith.constant 3.200000e+01 : f32
    %398 = vector.broadcast %cst_188 : f32 to vector<16x1xf32>
    %399 = arith.divf %397, %398 : vector<16x1xf32>
    %400 = vector.broadcast %399 : vector<16x1xf32> to vector<16x32xf32>
    %401 = arith.subf %395, %400 : vector<16x32xf32>
    %402 = arith.mulf %401, %401 : vector<16x32xf32>
    %cst_189 = arith.constant dense<0.000000e+00> : vector<16xf32>
    %403 = vector.multi_reduction <add>, %402, %cst_189 [1] : vector<16x32xf32> to vector<16xf32>
    %404 = vector.shape_cast %403 : vector<16xf32> to vector<16x1xf32>
    %cst_190 = arith.constant 3.200000e+01 : f32
    %405 = vector.broadcast %cst_190 : f32 to vector<16x1xf32>
    %406 = arith.divf %404, %405 : vector<16x1xf32>
    %407 = vector.broadcast %399 : vector<16x1xf32> to vector<16x32xf32>
    %408 = arith.subf %395, %407 : vector<16x32xf32>
    %cst_191 = arith.constant 9.99999974E-6 : f32
    %409 = vector.broadcast %cst_191 : f32 to vector<16x1xf32>
    %410 = arith.addf %406, %409 : vector<16x1xf32>
    %411 = math.rsqrt %410 : vector<16x1xf32>
    %412 = vector.broadcast %411 : vector<16x1xf32> to vector<16x32xf32>
    %413 = arith.mulf %408, %412 : vector<16x32xf32>
    %414 = vector.broadcast %309 : vector<1x32xf32> to vector<16x32xf32>
    %415 = arith.mulf %413, %414 : vector<16x32xf32>
    %416 = vector.broadcast %311 : vector<1x32xf32> to vector<16x32xf32>
    %417 = arith.addf %415, %416 : vector<16x32xf32>
    %c0_192 = arith.constant 0 : index
    %c0_193 = arith.constant 0 : index
    %c0_194 = arith.constant 0 : index
    %418 = vector.load %arg17[%c0_192, %c0_193, %c0_194] : memref<2x32x32xf32, #tpu.memory_space<vmem>>, vector<1x32x32xf32>
    %419 = vector.shape_cast %418 : vector<1x32x32xf32> to vector<32x32xf32>
    %c0_195 = arith.constant 0 : index
    %c0_196 = arith.constant 0 : index
    %c0_197 = arith.constant 0 : index
    %420 = vector.load %arg18[%c0_195, %c0_196, %c0_197] : memref<2x1x32xf32, #tpu.memory_space<vmem>>, vector<1x1x32xf32>
    %421 = vector.shape_cast %420 : vector<1x1x32xf32> to vector<1x32xf32>
    %c0_198 = arith.constant 0 : index
    %c0_199 = arith.constant 0 : index
    %c0_200 = arith.constant 0 : index
    %422 = vector.load %arg19[%c0_198, %c0_199, %c0_200] : memref<2x1x32xf32, #tpu.memory_space<vmem>>, vector<1x1x32xf32>
    %423 = vector.shape_cast %422 : vector<1x1x32xf32> to vector<1x32xf32>
    %c0_201 = arith.constant 0 : index
    %c0_202 = arith.constant 0 : index
    %c0_203 = arith.constant 0 : index
    %424 = vector.load %arg20[%c0_201, %c0_202, %c0_203] : memref<2x1x32xf32, #tpu.memory_space<vmem>>, vector<1x1x32xf32>
    %425 = vector.shape_cast %424 : vector<1x1x32xf32> to vector<1x32xf32>
    %cst_204 = arith.constant 0.000000e+00 : f32
    %426 = vector.broadcast %cst_204 : f32 to vector<8x32xf32>
    %427 = vector.extract_strided_slice %302 {offsets = [0, 0], sizes = [8, 8], strides = [1, 1]} : vector<8x32xf32> to vector<8x8xf32>
    %cst_205 = arith.constant 0.353553385 : f32
    %428 = vector.broadcast %cst_205 : f32 to vector<8x8xf32>
    %429 = arith.mulf %427, %428 : vector<8x8xf32>
    %430 = vector.extract_strided_slice %301 {offsets = [0, 0], sizes = [16, 8], strides = [1, 1]} : vector<16x32xf32> to vector<16x8xf32>
    %cst_206 = arith.constant dense<0.000000e+00> : vector<8x16xf32>
    %431 = tpu.matmul %429, %430, %cst_206 {dimension_numbers = #tpu.dot_dimension_numbers<[1], [1], [0], [0], [0, 0, 1, 0], [], []>} : vector<8x8xf32>, vector<16x8xf32>, vector<8x16xf32> -> vector<8x16xf32>
    %cst_207 = arith.constant dense<0xFF800000> : vector<8xf32>
    %432 = vector.multi_reduction <maximumf>, %431, %cst_207 [1] : vector<8x16xf32> to vector<8xf32>
    %433 = vector.shape_cast %432 : vector<8xf32> to vector<8x1xf32>
    %434 = vector.broadcast %433 : vector<8x1xf32> to vector<8x16xf32>
    %435 = arith.subf %431, %434 : vector<8x16xf32>
    %436 = math.exp %435 : vector<8x16xf32>
    %cst_208 = arith.constant dense<0.000000e+00> : vector<8xf32>
    %437 = vector.multi_reduction <add>, %436, %cst_208 [1] : vector<8x16xf32> to vector<8xf32>
    %438 = vector.shape_cast %437 : vector<8xf32> to vector<8x1xf32>
    %439 = tpu.reciprocal %438 {approx = true} : vector<8x1xf32> -> vector<8x1xf32>
    %440 = vector.broadcast %439 : vector<8x1xf32> to vector<8x16xf32>
    %441 = arith.mulf %436, %440 : vector<8x16xf32>
    %442 = vector.extract_strided_slice %292 {offsets = [0, 0], sizes = [16, 8], strides = [1, 1]} : vector<16x32xf32> to vector<16x8xf32>
    %cst_209 = arith.constant dense<0.000000e+00> : vector<8x8xf32>
    %443 = tpu.matmul %441, %442, %cst_209 {dimension_numbers = #tpu.dot_dimension_numbers<[1], [0], [0], [1], [0, 0, 1, 1], [], []>} : vector<8x16xf32>, vector<16x8xf32>, vector<8x8xf32> -> vector<8x8xf32>
    %444 = vector.extract_strided_slice %419 {offsets = [0, 0], sizes = [8, 32], strides = [1, 1]} : vector<32x32xf32> to vector<8x32xf32>
    %cst_210 = arith.constant dense<0.000000e+00> : vector<8x32xf32>
    %445 = tpu.matmul %443, %444, %cst_210 {dimension_numbers = #tpu.dot_dimension_numbers<[1], [0], [0], [1], [0, 0, 1, 1], [], []>} : vector<8x8xf32>, vector<8x32xf32>, vector<8x32xf32> -> vector<8x32xf32>
    %446 = arith.addf %426, %445 : vector<8x32xf32>
    %447 = vector.extract_strided_slice %302 {offsets = [0, 8], sizes = [8, 8], strides = [1, 1]} : vector<8x32xf32> to vector<8x8xf32>
    %cst_211 = arith.constant 0.353553385 : f32
    %448 = vector.broadcast %cst_211 : f32 to vector<8x8xf32>
    %449 = arith.mulf %447, %448 : vector<8x8xf32>
    %450 = vector.extract_strided_slice %301 {offsets = [0, 8], sizes = [16, 8], strides = [1, 1]} : vector<16x32xf32> to vector<16x8xf32>
    %cst_212 = arith.constant dense<0.000000e+00> : vector<8x16xf32>
    %451 = tpu.matmul %449, %450, %cst_212 {dimension_numbers = #tpu.dot_dimension_numbers<[1], [1], [0], [0], [0, 0, 1, 0], [], []>} : vector<8x8xf32>, vector<16x8xf32>, vector<8x16xf32> -> vector<8x16xf32>
    %cst_213 = arith.constant dense<0xFF800000> : vector<8xf32>
    %452 = vector.multi_reduction <maximumf>, %451, %cst_213 [1] : vector<8x16xf32> to vector<8xf32>
    %453 = vector.shape_cast %452 : vector<8xf32> to vector<8x1xf32>
    %454 = vector.broadcast %453 : vector<8x1xf32> to vector<8x16xf32>
    %455 = arith.subf %451, %454 : vector<8x16xf32>
    %456 = math.exp %455 : vector<8x16xf32>
    %cst_214 = arith.constant dense<0.000000e+00> : vector<8xf32>
    %457 = vector.multi_reduction <add>, %456, %cst_214 [1] : vector<8x16xf32> to vector<8xf32>
    %458 = vector.shape_cast %457 : vector<8xf32> to vector<8x1xf32>
    %459 = tpu.reciprocal %458 {approx = true} : vector<8x1xf32> -> vector<8x1xf32>
    %460 = vector.broadcast %459 : vector<8x1xf32> to vector<8x16xf32>
    %461 = arith.mulf %456, %460 : vector<8x16xf32>
    %462 = vector.extract_strided_slice %292 {offsets = [0, 8], sizes = [16, 8], strides = [1, 1]} : vector<16x32xf32> to vector<16x8xf32>
    %cst_215 = arith.constant dense<0.000000e+00> : vector<8x8xf32>
    %463 = tpu.matmul %461, %462, %cst_215 {dimension_numbers = #tpu.dot_dimension_numbers<[1], [0], [0], [1], [0, 0, 1, 1], [], []>} : vector<8x16xf32>, vector<16x8xf32>, vector<8x8xf32> -> vector<8x8xf32>
    %464 = vector.extract_strided_slice %419 {offsets = [8, 0], sizes = [8, 32], strides = [1, 1]} : vector<32x32xf32> to vector<8x32xf32>
    %cst_216 = arith.constant dense<0.000000e+00> : vector<8x32xf32>
    %465 = tpu.matmul %463, %464, %cst_216 {dimension_numbers = #tpu.dot_dimension_numbers<[1], [0], [0], [1], [0, 0, 1, 1], [], []>} : vector<8x8xf32>, vector<8x32xf32>, vector<8x32xf32> -> vector<8x32xf32>
    %466 = arith.addf %446, %465 : vector<8x32xf32>
    %467 = vector.extract_strided_slice %302 {offsets = [0, 16], sizes = [8, 8], strides = [1, 1]} : vector<8x32xf32> to vector<8x8xf32>
    %cst_217 = arith.constant 0.353553385 : f32
    %468 = vector.broadcast %cst_217 : f32 to vector<8x8xf32>
    %469 = arith.mulf %467, %468 : vector<8x8xf32>
    %470 = vector.extract_strided_slice %301 {offsets = [0, 16], sizes = [16, 8], strides = [1, 1]} : vector<16x32xf32> to vector<16x8xf32>
    %cst_218 = arith.constant dense<0.000000e+00> : vector<8x16xf32>
    %471 = tpu.matmul %469, %470, %cst_218 {dimension_numbers = #tpu.dot_dimension_numbers<[1], [1], [0], [0], [0, 0, 1, 0], [], []>} : vector<8x8xf32>, vector<16x8xf32>, vector<8x16xf32> -> vector<8x16xf32>
    %cst_219 = arith.constant dense<0xFF800000> : vector<8xf32>
    %472 = vector.multi_reduction <maximumf>, %471, %cst_219 [1] : vector<8x16xf32> to vector<8xf32>
    %473 = vector.shape_cast %472 : vector<8xf32> to vector<8x1xf32>
    %474 = vector.broadcast %473 : vector<8x1xf32> to vector<8x16xf32>
    %475 = arith.subf %471, %474 : vector<8x16xf32>
    %476 = math.exp %475 : vector<8x16xf32>
    %cst_220 = arith.constant dense<0.000000e+00> : vector<8xf32>
    %477 = vector.multi_reduction <add>, %476, %cst_220 [1] : vector<8x16xf32> to vector<8xf32>
    %478 = vector.shape_cast %477 : vector<8xf32> to vector<8x1xf32>
    %479 = tpu.reciprocal %478 {approx = true} : vector<8x1xf32> -> vector<8x1xf32>
    %480 = vector.broadcast %479 : vector<8x1xf32> to vector<8x16xf32>
    %481 = arith.mulf %476, %480 : vector<8x16xf32>
    %482 = vector.extract_strided_slice %292 {offsets = [0, 16], sizes = [16, 8], strides = [1, 1]} : vector<16x32xf32> to vector<16x8xf32>
    %cst_221 = arith.constant dense<0.000000e+00> : vector<8x8xf32>
    %483 = tpu.matmul %481, %482, %cst_221 {dimension_numbers = #tpu.dot_dimension_numbers<[1], [0], [0], [1], [0, 0, 1, 1], [], []>} : vector<8x16xf32>, vector<16x8xf32>, vector<8x8xf32> -> vector<8x8xf32>
    %484 = vector.extract_strided_slice %419 {offsets = [16, 0], sizes = [8, 32], strides = [1, 1]} : vector<32x32xf32> to vector<8x32xf32>
    %cst_222 = arith.constant dense<0.000000e+00> : vector<8x32xf32>
    %485 = tpu.matmul %483, %484, %cst_222 {dimension_numbers = #tpu.dot_dimension_numbers<[1], [0], [0], [1], [0, 0, 1, 1], [], []>} : vector<8x8xf32>, vector<8x32xf32>, vector<8x32xf32> -> vector<8x32xf32>
    %486 = arith.addf %466, %485 : vector<8x32xf32>
    %487 = vector.extract_strided_slice %302 {offsets = [0, 24], sizes = [8, 8], strides = [1, 1]} : vector<8x32xf32> to vector<8x8xf32>
    %cst_223 = arith.constant 0.353553385 : f32
    %488 = vector.broadcast %cst_223 : f32 to vector<8x8xf32>
    %489 = arith.mulf %487, %488 : vector<8x8xf32>
    %490 = vector.extract_strided_slice %301 {offsets = [0, 24], sizes = [16, 8], strides = [1, 1]} : vector<16x32xf32> to vector<16x8xf32>
    %cst_224 = arith.constant dense<0.000000e+00> : vector<8x16xf32>
    %491 = tpu.matmul %489, %490, %cst_224 {dimension_numbers = #tpu.dot_dimension_numbers<[1], [1], [0], [0], [0, 0, 1, 0], [], []>} : vector<8x8xf32>, vector<16x8xf32>, vector<8x16xf32> -> vector<8x16xf32>
    %cst_225 = arith.constant dense<0xFF800000> : vector<8xf32>
    %492 = vector.multi_reduction <maximumf>, %491, %cst_225 [1] : vector<8x16xf32> to vector<8xf32>
    %493 = vector.shape_cast %492 : vector<8xf32> to vector<8x1xf32>
    %494 = vector.broadcast %493 : vector<8x1xf32> to vector<8x16xf32>
    %495 = arith.subf %491, %494 : vector<8x16xf32>
    %496 = math.exp %495 : vector<8x16xf32>
    %cst_226 = arith.constant dense<0.000000e+00> : vector<8xf32>
    %497 = vector.multi_reduction <add>, %496, %cst_226 [1] : vector<8x16xf32> to vector<8xf32>
    %498 = vector.shape_cast %497 : vector<8xf32> to vector<8x1xf32>
    %499 = tpu.reciprocal %498 {approx = true} : vector<8x1xf32> -> vector<8x1xf32>
    %500 = vector.broadcast %499 : vector<8x1xf32> to vector<8x16xf32>
    %501 = arith.mulf %496, %500 : vector<8x16xf32>
    %502 = vector.extract_strided_slice %292 {offsets = [0, 24], sizes = [16, 8], strides = [1, 1]} : vector<16x32xf32> to vector<16x8xf32>
    %cst_227 = arith.constant dense<0.000000e+00> : vector<8x8xf32>
    %503 = tpu.matmul %501, %502, %cst_227 {dimension_numbers = #tpu.dot_dimension_numbers<[1], [0], [0], [1], [0, 0, 1, 1], [], []>} : vector<8x16xf32>, vector<16x8xf32>, vector<8x8xf32> -> vector<8x8xf32>
    %504 = vector.extract_strided_slice %419 {offsets = [24, 0], sizes = [8, 32], strides = [1, 1]} : vector<32x32xf32> to vector<8x32xf32>
    %cst_228 = arith.constant dense<0.000000e+00> : vector<8x32xf32>
    %505 = tpu.matmul %503, %504, %cst_228 {dimension_numbers = #tpu.dot_dimension_numbers<[1], [0], [0], [1], [0, 0, 1, 1], [], []>} : vector<8x8xf32>, vector<8x32xf32>, vector<8x32xf32> -> vector<8x32xf32>
    %506 = arith.addf %486, %505 : vector<8x32xf32>
    %507 = arith.addf %269, %506 : vector<8x32xf32>
    %508 = vector.broadcast %421 : vector<1x32xf32> to vector<8x32xf32>
    %509 = arith.addf %507, %508 : vector<8x32xf32>
    %cst_229 = arith.constant dense<0.000000e+00> : vector<8xf32>
    %510 = vector.multi_reduction <add>, %509, %cst_229 [1] : vector<8x32xf32> to vector<8xf32>
    %511 = vector.shape_cast %510 : vector<8xf32> to vector<8x1xf32>
    %cst_230 = arith.constant 3.200000e+01 : f32
    %512 = vector.broadcast %cst_230 : f32 to vector<8x1xf32>
    %513 = arith.divf %511, %512 : vector<8x1xf32>
    %514 = vector.broadcast %513 : vector<8x1xf32> to vector<8x32xf32>
    %515 = arith.subf %509, %514 : vector<8x32xf32>
    %516 = arith.mulf %515, %515 : vector<8x32xf32>
    %cst_231 = arith.constant dense<0.000000e+00> : vector<8xf32>
    %517 = vector.multi_reduction <add>, %516, %cst_231 [1] : vector<8x32xf32> to vector<8xf32>
    %518 = vector.shape_cast %517 : vector<8xf32> to vector<8x1xf32>
    %cst_232 = arith.constant 3.200000e+01 : f32
    %519 = vector.broadcast %cst_232 : f32 to vector<8x1xf32>
    %520 = arith.divf %518, %519 : vector<8x1xf32>
    %521 = vector.broadcast %513 : vector<8x1xf32> to vector<8x32xf32>
    %522 = arith.subf %509, %521 : vector<8x32xf32>
    %cst_233 = arith.constant 9.99999974E-6 : f32
    %523 = vector.broadcast %cst_233 : f32 to vector<8x1xf32>
    %524 = arith.addf %520, %523 : vector<8x1xf32>
    %525 = math.rsqrt %524 : vector<8x1xf32>
    %526 = vector.broadcast %525 : vector<8x1xf32> to vector<8x32xf32>
    %527 = arith.mulf %522, %526 : vector<8x32xf32>
    %528 = vector.broadcast %423 : vector<1x32xf32> to vector<8x32xf32>
    %529 = arith.mulf %527, %528 : vector<8x32xf32>
    %530 = vector.broadcast %425 : vector<1x32xf32> to vector<8x32xf32>
    %531 = arith.addf %529, %530 : vector<8x32xf32>
    %c0_234 = arith.constant 0 : index
    %c0_235 = arith.constant 0 : index
    %c0_236 = arith.constant 0 : index
    %532 = vector.load %arg21[%c0_234, %c0_235, %c0_236] : memref<2x32x64xf32, #tpu.memory_space<vmem>>, vector<1x32x64xf32>
    %533 = vector.shape_cast %532 : vector<1x32x64xf32> to vector<32x64xf32>
    %c0_237 = arith.constant 0 : index
    %c0_238 = arith.constant 0 : index
    %c0_239 = arith.constant 0 : index
    %534 = vector.load %arg22[%c0_237, %c0_238, %c0_239] : memref<2x1x64xf32, #tpu.memory_space<vmem>>, vector<1x1x64xf32>
    %535 = vector.shape_cast %534 : vector<1x1x64xf32> to vector<1x64xf32>
    %c0_240 = arith.constant 0 : index
    %c0_241 = arith.constant 0 : index
    %c0_242 = arith.constant 0 : index
    %536 = vector.load %arg23[%c0_240, %c0_241, %c0_242] : memref<2x64x32xf32, #tpu.memory_space<vmem>>, vector<1x64x32xf32>
    %537 = vector.shape_cast %536 : vector<1x64x32xf32> to vector<64x32xf32>
    %c0_243 = arith.constant 0 : index
    %c0_244 = arith.constant 0 : index
    %c0_245 = arith.constant 0 : index
    %538 = vector.load %arg24[%c0_243, %c0_244, %c0_245] : memref<2x1x32xf32, #tpu.memory_space<vmem>>, vector<1x1x32xf32>
    %539 = vector.shape_cast %538 : vector<1x1x32xf32> to vector<1x32xf32>
    %c0_246 = arith.constant 0 : index
    %c0_247 = arith.constant 0 : index
    %c0_248 = arith.constant 0 : index
    %540 = vector.load %arg25[%c0_246, %c0_247, %c0_248] : memref<2x1x32xf32, #tpu.memory_space<vmem>>, vector<1x1x32xf32>
    %541 = vector.shape_cast %540 : vector<1x1x32xf32> to vector<1x32xf32>
    %c0_249 = arith.constant 0 : index
    %c0_250 = arith.constant 0 : index
    %c0_251 = arith.constant 0 : index
    %542 = vector.load %arg26[%c0_249, %c0_250, %c0_251] : memref<2x1x32xf32, #tpu.memory_space<vmem>>, vector<1x1x32xf32>
    %543 = vector.shape_cast %542 : vector<1x1x32xf32> to vector<1x32xf32>
    %cst_252 = arith.constant dense<0.000000e+00> : vector<16x64xf32>
    %544 = tpu.matmul %417, %533, %cst_252 {dimension_numbers = #tpu.dot_dimension_numbers<[1], [0], [0], [1], [0, 0, 1, 1], [], []>} : vector<16x32xf32>, vector<32x64xf32>, vector<16x64xf32> -> vector<16x64xf32>
    %545 = vector.broadcast %535 : vector<1x64xf32> to vector<16x64xf32>
    %546 = arith.addf %544, %545 : vector<16x64xf32>
    %cst_253 = arith.constant 0.000000e+00 : f32
    %547 = vector.broadcast %cst_253 : f32 to vector<16x64xf32>
    %548 = arith.maximumf %546, %547 : vector<16x64xf32>
    %cst_254 = arith.constant dense<0.000000e+00> : vector<16x32xf32>
    %549 = tpu.matmul %548, %537, %cst_254 {dimension_numbers = #tpu.dot_dimension_numbers<[1], [0], [0], [1], [0, 0, 1, 1], [], []>} : vector<16x64xf32>, vector<64x32xf32>, vector<16x32xf32> -> vector<16x32xf32>
    %550 = vector.broadcast %539 : vector<1x32xf32> to vector<16x32xf32>
    %551 = arith.addf %549, %550 : vector<16x32xf32>
    %552 = arith.addf %417, %551 : vector<16x32xf32>
    %cst_255 = arith.constant dense<0.000000e+00> : vector<16xf32>
    %553 = vector.multi_reduction <add>, %552, %cst_255 [1] : vector<16x32xf32> to vector<16xf32>
    %554 = vector.shape_cast %553 : vector<16xf32> to vector<16x1xf32>
    %cst_256 = arith.constant 3.200000e+01 : f32
    %555 = vector.broadcast %cst_256 : f32 to vector<16x1xf32>
    %556 = arith.divf %554, %555 : vector<16x1xf32>
    %557 = vector.broadcast %556 : vector<16x1xf32> to vector<16x32xf32>
    %558 = arith.subf %552, %557 : vector<16x32xf32>
    %559 = arith.mulf %558, %558 : vector<16x32xf32>
    %cst_257 = arith.constant dense<0.000000e+00> : vector<16xf32>
    %560 = vector.multi_reduction <add>, %559, %cst_257 [1] : vector<16x32xf32> to vector<16xf32>
    %561 = vector.shape_cast %560 : vector<16xf32> to vector<16x1xf32>
    %cst_258 = arith.constant 3.200000e+01 : f32
    %562 = vector.broadcast %cst_258 : f32 to vector<16x1xf32>
    %563 = arith.divf %561, %562 : vector<16x1xf32>
    %564 = vector.broadcast %556 : vector<16x1xf32> to vector<16x32xf32>
    %565 = arith.subf %552, %564 : vector<16x32xf32>
    %cst_259 = arith.constant 9.99999974E-6 : f32
    %566 = vector.broadcast %cst_259 : f32 to vector<16x1xf32>
    %567 = arith.addf %563, %566 : vector<16x1xf32>
    %568 = math.rsqrt %567 : vector<16x1xf32>
    %569 = vector.broadcast %568 : vector<16x1xf32> to vector<16x32xf32>
    %570 = arith.mulf %565, %569 : vector<16x32xf32>
    %571 = vector.broadcast %541 : vector<1x32xf32> to vector<16x32xf32>
    %572 = arith.mulf %570, %571 : vector<16x32xf32>
    %573 = vector.broadcast %543 : vector<1x32xf32> to vector<16x32xf32>
    %574 = arith.addf %572, %573 : vector<16x32xf32>
    %c0_260 = arith.constant 0 : index
    %c0_261 = arith.constant 0 : index
    %c0_262 = arith.constant 0 : index
    %575 = vector.load %arg21[%c0_260, %c0_261, %c0_262] : memref<2x32x64xf32, #tpu.memory_space<vmem>>, vector<1x32x64xf32>
    %576 = vector.shape_cast %575 : vector<1x32x64xf32> to vector<32x64xf32>
    %c0_263 = arith.constant 0 : index
    %c0_264 = arith.constant 0 : index
    %c0_265 = arith.constant 0 : index
    %577 = vector.load %arg22[%c0_263, %c0_264, %c0_265] : memref<2x1x64xf32, #tpu.memory_space<vmem>>, vector<1x1x64xf32>
    %578 = vector.shape_cast %577 : vector<1x1x64xf32> to vector<1x64xf32>
    %c0_266 = arith.constant 0 : index
    %c0_267 = arith.constant 0 : index
    %c0_268 = arith.constant 0 : index
    %579 = vector.load %arg23[%c0_266, %c0_267, %c0_268] : memref<2x64x32xf32, #tpu.memory_space<vmem>>, vector<1x64x32xf32>
    %580 = vector.shape_cast %579 : vector<1x64x32xf32> to vector<64x32xf32>
    %c0_269 = arith.constant 0 : index
    %c0_270 = arith.constant 0 : index
    %c0_271 = arith.constant 0 : index
    %581 = vector.load %arg24[%c0_269, %c0_270, %c0_271] : memref<2x1x32xf32, #tpu.memory_space<vmem>>, vector<1x1x32xf32>
    %582 = vector.shape_cast %581 : vector<1x1x32xf32> to vector<1x32xf32>
    %c0_272 = arith.constant 0 : index
    %c0_273 = arith.constant 0 : index
    %c0_274 = arith.constant 0 : index
    %583 = vector.load %arg25[%c0_272, %c0_273, %c0_274] : memref<2x1x32xf32, #tpu.memory_space<vmem>>, vector<1x1x32xf32>
    %584 = vector.shape_cast %583 : vector<1x1x32xf32> to vector<1x32xf32>
    %c0_275 = arith.constant 0 : index
    %c0_276 = arith.constant 0 : index
    %c0_277 = arith.constant 0 : index
    %585 = vector.load %arg26[%c0_275, %c0_276, %c0_277] : memref<2x1x32xf32, #tpu.memory_space<vmem>>, vector<1x1x32xf32>
    %586 = vector.shape_cast %585 : vector<1x1x32xf32> to vector<1x32xf32>
    %cst_278 = arith.constant dense<0.000000e+00> : vector<8x64xf32>
    %587 = tpu.matmul %531, %576, %cst_278 {dimension_numbers = #tpu.dot_dimension_numbers<[1], [0], [0], [1], [0, 0, 1, 1], [], []>} : vector<8x32xf32>, vector<32x64xf32>, vector<8x64xf32> -> vector<8x64xf32>
    %588 = vector.broadcast %578 : vector<1x64xf32> to vector<8x64xf32>
    %589 = arith.addf %587, %588 : vector<8x64xf32>
    %cst_279 = arith.constant 0.000000e+00 : f32
    %590 = vector.broadcast %cst_279 : f32 to vector<8x64xf32>
    %591 = arith.maximumf %589, %590 : vector<8x64xf32>
    %cst_280 = arith.constant dense<0.000000e+00> : vector<8x32xf32>
    %592 = tpu.matmul %591, %580, %cst_280 {dimension_numbers = #tpu.dot_dimension_numbers<[1], [0], [0], [1], [0, 0, 1, 1], [], []>} : vector<8x64xf32>, vector<64x32xf32>, vector<8x32xf32> -> vector<8x32xf32>
    %593 = vector.broadcast %582 : vector<1x32xf32> to vector<8x32xf32>
    %594 = arith.addf %592, %593 : vector<8x32xf32>
    %595 = arith.addf %531, %594 : vector<8x32xf32>
    %cst_281 = arith.constant dense<0.000000e+00> : vector<8xf32>
    %596 = vector.multi_reduction <add>, %595, %cst_281 [1] : vector<8x32xf32> to vector<8xf32>
    %597 = vector.shape_cast %596 : vector<8xf32> to vector<8x1xf32>
    %cst_282 = arith.constant 3.200000e+01 : f32
    %598 = vector.broadcast %cst_282 : f32 to vector<8x1xf32>
    %599 = arith.divf %597, %598 : vector<8x1xf32>
    %600 = vector.broadcast %599 : vector<8x1xf32> to vector<8x32xf32>
    %601 = arith.subf %595, %600 : vector<8x32xf32>
    %602 = arith.mulf %601, %601 : vector<8x32xf32>
    %cst_283 = arith.constant dense<0.000000e+00> : vector<8xf32>
    %603 = vector.multi_reduction <add>, %602, %cst_283 [1] : vector<8x32xf32> to vector<8xf32>
    %604 = vector.shape_cast %603 : vector<8xf32> to vector<8x1xf32>
    %cst_284 = arith.constant 3.200000e+01 : f32
    %605 = vector.broadcast %cst_284 : f32 to vector<8x1xf32>
    %606 = arith.divf %604, %605 : vector<8x1xf32>
    %607 = vector.broadcast %599 : vector<8x1xf32> to vector<8x32xf32>
    %608 = arith.subf %595, %607 : vector<8x32xf32>
    %cst_285 = arith.constant 9.99999974E-6 : f32
    %609 = vector.broadcast %cst_285 : f32 to vector<8x1xf32>
    %610 = arith.addf %606, %609 : vector<8x1xf32>
    %611 = math.rsqrt %610 : vector<8x1xf32>
    %612 = vector.broadcast %611 : vector<8x1xf32> to vector<8x32xf32>
    %613 = arith.mulf %608, %612 : vector<8x32xf32>
    %614 = vector.broadcast %584 : vector<1x32xf32> to vector<8x32xf32>
    %615 = arith.mulf %613, %614 : vector<8x32xf32>
    %616 = vector.broadcast %586 : vector<1x32xf32> to vector<8x32xf32>
    %617 = arith.addf %615, %616 : vector<8x32xf32>
    %618 = arith.addf %574, %5 : vector<16x32xf32>
    %c1 = arith.constant 1 : index
    %c0_286 = arith.constant 0 : index
    %c0_287 = arith.constant 0 : index
    %619 = vector.load %arg5[%c1, %c0_286, %c0_287] : memref<2x32x64xf32, #tpu.memory_space<vmem>>, vector<1x32x64xf32>
    %620 = vector.shape_cast %619 : vector<1x32x64xf32> to vector<32x64xf32>
    %cst_288 = arith.constant dense<0.000000e+00> : vector<16x64xf32>
    %621 = tpu.matmul %618, %620, %cst_288 {dimension_numbers = #tpu.dot_dimension_numbers<[1], [0], [0], [1], [0, 0, 1, 1], [], []>} : vector<16x32xf32>, vector<32x64xf32>, vector<16x64xf32> -> vector<16x64xf32>
    %c1_289 = arith.constant 1 : index
    %c0_290 = arith.constant 0 : index
    %c0_291 = arith.constant 0 : index
    %622 = vector.load %arg6[%c1_289, %c0_290, %c0_291] : memref<2x1x64xf32, #tpu.memory_space<vmem>>, vector<1x1x64xf32>
    %623 = vector.shape_cast %622 : vector<1x1x64xf32> to vector<1x64xf32>
    %624 = vector.broadcast %623 : vector<1x64xf32> to vector<16x64xf32>
    %625 = arith.addf %621, %624 : vector<16x64xf32>
    %c1_292 = arith.constant 1 : index
    %c0_293 = arith.constant 0 : index
    %c0_294 = arith.constant 0 : index
    %626 = vector.load %arg7[%c1_292, %c0_293, %c0_294] : memref<2x32x32xf32, #tpu.memory_space<vmem>>, vector<1x32x32xf32>
    %627 = vector.shape_cast %626 : vector<1x32x32xf32> to vector<32x32xf32>
    %cst_295 = arith.constant dense<0.000000e+00> : vector<16x32xf32>
    %628 = tpu.matmul %574, %627, %cst_295 {dimension_numbers = #tpu.dot_dimension_numbers<[1], [0], [0], [1], [0, 0, 1, 1], [], []>} : vector<16x32xf32>, vector<32x32xf32>, vector<16x32xf32> -> vector<16x32xf32>
    %c1_296 = arith.constant 1 : index
    %c0_297 = arith.constant 0 : index
    %c0_298 = arith.constant 0 : index
    %629 = vector.load %arg8[%c1_296, %c0_297, %c0_298] : memref<2x1x32xf32, #tpu.memory_space<vmem>>, vector<1x1x32xf32>
    %630 = vector.shape_cast %629 : vector<1x1x32xf32> to vector<1x32xf32>
    %631 = vector.broadcast %630 : vector<1x32xf32> to vector<16x32xf32>
    %632 = arith.addf %628, %631 : vector<16x32xf32>
    %633 = vector.extract_strided_slice %625 {offsets = [0, 0], sizes = [16, 32], strides = [1, 1]} : vector<16x64xf32> to vector<16x32xf32>
    %634 = vector.extract_strided_slice %625 {offsets = [0, 32], sizes = [16, 32], strides = [1, 1]} : vector<16x64xf32> to vector<16x32xf32>
    %c1_299 = arith.constant 1 : index
    %c0_300 = arith.constant 0 : index
    %c0_301 = arith.constant 0 : index
    %635 = vector.load %arg9[%c1_299, %c0_300, %c0_301] : memref<2x32x32xf32, #tpu.memory_space<vmem>>, vector<1x32x32xf32>
    %636 = vector.shape_cast %635 : vector<1x32x32xf32> to vector<32x32xf32>
    %c1_302 = arith.constant 1 : index
    %c0_303 = arith.constant 0 : index
    %c0_304 = arith.constant 0 : index
    %637 = vector.load %arg10[%c1_302, %c0_303, %c0_304] : memref<2x1x32xf32, #tpu.memory_space<vmem>>, vector<1x1x32xf32>
    %638 = vector.shape_cast %637 : vector<1x1x32xf32> to vector<1x32xf32>
    %c1_305 = arith.constant 1 : index
    %c0_306 = arith.constant 0 : index
    %c0_307 = arith.constant 0 : index
    %639 = vector.load %arg11[%c1_305, %c0_306, %c0_307] : memref<2x1x32xf32, #tpu.memory_space<vmem>>, vector<1x1x32xf32>
    %640 = vector.shape_cast %639 : vector<1x1x32xf32> to vector<1x32xf32>
    %c1_308 = arith.constant 1 : index
    %c0_309 = arith.constant 0 : index
    %c0_310 = arith.constant 0 : index
    %641 = vector.load %arg12[%c1_308, %c0_309, %c0_310] : memref<2x1x32xf32, #tpu.memory_space<vmem>>, vector<1x1x32xf32>
    %642 = vector.shape_cast %641 : vector<1x1x32xf32> to vector<1x32xf32>
    %cst_311 = arith.constant 0.000000e+00 : f32
    %643 = vector.broadcast %cst_311 : f32 to vector<16x32xf32>
    %644 = vector.extract_strided_slice %633 {offsets = [0, 0], sizes = [16, 8], strides = [1, 1]} : vector<16x32xf32> to vector<16x8xf32>
    %cst_312 = arith.constant 0.353553385 : f32
    %645 = vector.broadcast %cst_312 : f32 to vector<16x8xf32>
    %646 = arith.mulf %644, %645 : vector<16x8xf32>
    %647 = vector.extract_strided_slice %634 {offsets = [0, 0], sizes = [16, 8], strides = [1, 1]} : vector<16x32xf32> to vector<16x8xf32>
    %cst_313 = arith.constant dense<0.000000e+00> : vector<16x16xf32>
    %648 = tpu.matmul %646, %647, %cst_313 {dimension_numbers = #tpu.dot_dimension_numbers<[1], [1], [0], [0], [0, 0, 1, 0], [], []>} : vector<16x8xf32>, vector<16x8xf32>, vector<16x16xf32> -> vector<16x16xf32>
    %cst_314 = arith.constant dense<0xFF800000> : vector<16xf32>
    %649 = vector.multi_reduction <maximumf>, %648, %cst_314 [1] : vector<16x16xf32> to vector<16xf32>
    %650 = vector.shape_cast %649 : vector<16xf32> to vector<16x1xf32>
    %651 = vector.broadcast %650 : vector<16x1xf32> to vector<16x16xf32>
    %652 = arith.subf %648, %651 : vector<16x16xf32>
    %653 = math.exp %652 : vector<16x16xf32>
    %cst_315 = arith.constant dense<0.000000e+00> : vector<16xf32>
    %654 = vector.multi_reduction <add>, %653, %cst_315 [1] : vector<16x16xf32> to vector<16xf32>
    %655 = vector.shape_cast %654 : vector<16xf32> to vector<16x1xf32>
    %656 = tpu.reciprocal %655 {approx = true} : vector<16x1xf32> -> vector<16x1xf32>
    %657 = vector.broadcast %656 : vector<16x1xf32> to vector<16x16xf32>
    %658 = arith.mulf %653, %657 : vector<16x16xf32>
    %659 = vector.extract_strided_slice %632 {offsets = [0, 0], sizes = [16, 8], strides = [1, 1]} : vector<16x32xf32> to vector<16x8xf32>
    %cst_316 = arith.constant dense<0.000000e+00> : vector<16x8xf32>
    %660 = tpu.matmul %658, %659, %cst_316 {dimension_numbers = #tpu.dot_dimension_numbers<[1], [0], [0], [1], [0, 0, 1, 1], [], []>} : vector<16x16xf32>, vector<16x8xf32>, vector<16x8xf32> -> vector<16x8xf32>
    %661 = vector.extract_strided_slice %636 {offsets = [0, 0], sizes = [8, 32], strides = [1, 1]} : vector<32x32xf32> to vector<8x32xf32>
    %cst_317 = arith.constant dense<0.000000e+00> : vector<16x32xf32>
    %662 = tpu.matmul %660, %661, %cst_317 {dimension_numbers = #tpu.dot_dimension_numbers<[1], [0], [0], [1], [0, 0, 1, 1], [], []>} : vector<16x8xf32>, vector<8x32xf32>, vector<16x32xf32> -> vector<16x32xf32>
    %663 = arith.addf %643, %662 : vector<16x32xf32>
    %664 = vector.extract_strided_slice %633 {offsets = [0, 8], sizes = [16, 8], strides = [1, 1]} : vector<16x32xf32> to vector<16x8xf32>
    %cst_318 = arith.constant 0.353553385 : f32
    %665 = vector.broadcast %cst_318 : f32 to vector<16x8xf32>
    %666 = arith.mulf %664, %665 : vector<16x8xf32>
    %667 = vector.extract_strided_slice %634 {offsets = [0, 8], sizes = [16, 8], strides = [1, 1]} : vector<16x32xf32> to vector<16x8xf32>
    %cst_319 = arith.constant dense<0.000000e+00> : vector<16x16xf32>
    %668 = tpu.matmul %666, %667, %cst_319 {dimension_numbers = #tpu.dot_dimension_numbers<[1], [1], [0], [0], [0, 0, 1, 0], [], []>} : vector<16x8xf32>, vector<16x8xf32>, vector<16x16xf32> -> vector<16x16xf32>
    %cst_320 = arith.constant dense<0xFF800000> : vector<16xf32>
    %669 = vector.multi_reduction <maximumf>, %668, %cst_320 [1] : vector<16x16xf32> to vector<16xf32>
    %670 = vector.shape_cast %669 : vector<16xf32> to vector<16x1xf32>
    %671 = vector.broadcast %670 : vector<16x1xf32> to vector<16x16xf32>
    %672 = arith.subf %668, %671 : vector<16x16xf32>
    %673 = math.exp %672 : vector<16x16xf32>
    %cst_321 = arith.constant dense<0.000000e+00> : vector<16xf32>
    %674 = vector.multi_reduction <add>, %673, %cst_321 [1] : vector<16x16xf32> to vector<16xf32>
    %675 = vector.shape_cast %674 : vector<16xf32> to vector<16x1xf32>
    %676 = tpu.reciprocal %675 {approx = true} : vector<16x1xf32> -> vector<16x1xf32>
    %677 = vector.broadcast %676 : vector<16x1xf32> to vector<16x16xf32>
    %678 = arith.mulf %673, %677 : vector<16x16xf32>
    %679 = vector.extract_strided_slice %632 {offsets = [0, 8], sizes = [16, 8], strides = [1, 1]} : vector<16x32xf32> to vector<16x8xf32>
    %cst_322 = arith.constant dense<0.000000e+00> : vector<16x8xf32>
    %680 = tpu.matmul %678, %679, %cst_322 {dimension_numbers = #tpu.dot_dimension_numbers<[1], [0], [0], [1], [0, 0, 1, 1], [], []>} : vector<16x16xf32>, vector<16x8xf32>, vector<16x8xf32> -> vector<16x8xf32>
    %681 = vector.extract_strided_slice %636 {offsets = [8, 0], sizes = [8, 32], strides = [1, 1]} : vector<32x32xf32> to vector<8x32xf32>
    %cst_323 = arith.constant dense<0.000000e+00> : vector<16x32xf32>
    %682 = tpu.matmul %680, %681, %cst_323 {dimension_numbers = #tpu.dot_dimension_numbers<[1], [0], [0], [1], [0, 0, 1, 1], [], []>} : vector<16x8xf32>, vector<8x32xf32>, vector<16x32xf32> -> vector<16x32xf32>
    %683 = arith.addf %663, %682 : vector<16x32xf32>
    %684 = vector.extract_strided_slice %633 {offsets = [0, 16], sizes = [16, 8], strides = [1, 1]} : vector<16x32xf32> to vector<16x8xf32>
    %cst_324 = arith.constant 0.353553385 : f32
    %685 = vector.broadcast %cst_324 : f32 to vector<16x8xf32>
    %686 = arith.mulf %684, %685 : vector<16x8xf32>
    %687 = vector.extract_strided_slice %634 {offsets = [0, 16], sizes = [16, 8], strides = [1, 1]} : vector<16x32xf32> to vector<16x8xf32>
    %cst_325 = arith.constant dense<0.000000e+00> : vector<16x16xf32>
    %688 = tpu.matmul %686, %687, %cst_325 {dimension_numbers = #tpu.dot_dimension_numbers<[1], [1], [0], [0], [0, 0, 1, 0], [], []>} : vector<16x8xf32>, vector<16x8xf32>, vector<16x16xf32> -> vector<16x16xf32>
    %cst_326 = arith.constant dense<0xFF800000> : vector<16xf32>
    %689 = vector.multi_reduction <maximumf>, %688, %cst_326 [1] : vector<16x16xf32> to vector<16xf32>
    %690 = vector.shape_cast %689 : vector<16xf32> to vector<16x1xf32>
    %691 = vector.broadcast %690 : vector<16x1xf32> to vector<16x16xf32>
    %692 = arith.subf %688, %691 : vector<16x16xf32>
    %693 = math.exp %692 : vector<16x16xf32>
    %cst_327 = arith.constant dense<0.000000e+00> : vector<16xf32>
    %694 = vector.multi_reduction <add>, %693, %cst_327 [1] : vector<16x16xf32> to vector<16xf32>
    %695 = vector.shape_cast %694 : vector<16xf32> to vector<16x1xf32>
    %696 = tpu.reciprocal %695 {approx = true} : vector<16x1xf32> -> vector<16x1xf32>
    %697 = vector.broadcast %696 : vector<16x1xf32> to vector<16x16xf32>
    %698 = arith.mulf %693, %697 : vector<16x16xf32>
    %699 = vector.extract_strided_slice %632 {offsets = [0, 16], sizes = [16, 8], strides = [1, 1]} : vector<16x32xf32> to vector<16x8xf32>
    %cst_328 = arith.constant dense<0.000000e+00> : vector<16x8xf32>
    %700 = tpu.matmul %698, %699, %cst_328 {dimension_numbers = #tpu.dot_dimension_numbers<[1], [0], [0], [1], [0, 0, 1, 1], [], []>} : vector<16x16xf32>, vector<16x8xf32>, vector<16x8xf32> -> vector<16x8xf32>
    %701 = vector.extract_strided_slice %636 {offsets = [16, 0], sizes = [8, 32], strides = [1, 1]} : vector<32x32xf32> to vector<8x32xf32>
    %cst_329 = arith.constant dense<0.000000e+00> : vector<16x32xf32>
    %702 = tpu.matmul %700, %701, %cst_329 {dimension_numbers = #tpu.dot_dimension_numbers<[1], [0], [0], [1], [0, 0, 1, 1], [], []>} : vector<16x8xf32>, vector<8x32xf32>, vector<16x32xf32> -> vector<16x32xf32>
    %703 = arith.addf %683, %702 : vector<16x32xf32>
    %704 = vector.extract_strided_slice %633 {offsets = [0, 24], sizes = [16, 8], strides = [1, 1]} : vector<16x32xf32> to vector<16x8xf32>
    %cst_330 = arith.constant 0.353553385 : f32
    %705 = vector.broadcast %cst_330 : f32 to vector<16x8xf32>
    %706 = arith.mulf %704, %705 : vector<16x8xf32>
    %707 = vector.extract_strided_slice %634 {offsets = [0, 24], sizes = [16, 8], strides = [1, 1]} : vector<16x32xf32> to vector<16x8xf32>
    %cst_331 = arith.constant dense<0.000000e+00> : vector<16x16xf32>
    %708 = tpu.matmul %706, %707, %cst_331 {dimension_numbers = #tpu.dot_dimension_numbers<[1], [1], [0], [0], [0, 0, 1, 0], [], []>} : vector<16x8xf32>, vector<16x8xf32>, vector<16x16xf32> -> vector<16x16xf32>
    %cst_332 = arith.constant dense<0xFF800000> : vector<16xf32>
    %709 = vector.multi_reduction <maximumf>, %708, %cst_332 [1] : vector<16x16xf32> to vector<16xf32>
    %710 = vector.shape_cast %709 : vector<16xf32> to vector<16x1xf32>
    %711 = vector.broadcast %710 : vector<16x1xf32> to vector<16x16xf32>
    %712 = arith.subf %708, %711 : vector<16x16xf32>
    %713 = math.exp %712 : vector<16x16xf32>
    %cst_333 = arith.constant dense<0.000000e+00> : vector<16xf32>
    %714 = vector.multi_reduction <add>, %713, %cst_333 [1] : vector<16x16xf32> to vector<16xf32>
    %715 = vector.shape_cast %714 : vector<16xf32> to vector<16x1xf32>
    %716 = tpu.reciprocal %715 {approx = true} : vector<16x1xf32> -> vector<16x1xf32>
    %717 = vector.broadcast %716 : vector<16x1xf32> to vector<16x16xf32>
    %718 = arith.mulf %713, %717 : vector<16x16xf32>
    %719 = vector.extract_strided_slice %632 {offsets = [0, 24], sizes = [16, 8], strides = [1, 1]} : vector<16x32xf32> to vector<16x8xf32>
    %cst_334 = arith.constant dense<0.000000e+00> : vector<16x8xf32>
    %720 = tpu.matmul %718, %719, %cst_334 {dimension_numbers = #tpu.dot_dimension_numbers<[1], [0], [0], [1], [0, 0, 1, 1], [], []>} : vector<16x16xf32>, vector<16x8xf32>, vector<16x8xf32> -> vector<16x8xf32>
    %721 = vector.extract_strided_slice %636 {offsets = [24, 0], sizes = [8, 32], strides = [1, 1]} : vector<32x32xf32> to vector<8x32xf32>
    %cst_335 = arith.constant dense<0.000000e+00> : vector<16x32xf32>
    %722 = tpu.matmul %720, %721, %cst_335 {dimension_numbers = #tpu.dot_dimension_numbers<[1], [0], [0], [1], [0, 0, 1, 1], [], []>} : vector<16x8xf32>, vector<8x32xf32>, vector<16x32xf32> -> vector<16x32xf32>
    %723 = arith.addf %703, %722 : vector<16x32xf32>
    %724 = arith.addf %574, %723 : vector<16x32xf32>
    %725 = vector.broadcast %638 : vector<1x32xf32> to vector<16x32xf32>
    %726 = arith.addf %724, %725 : vector<16x32xf32>
    %cst_336 = arith.constant dense<0.000000e+00> : vector<16xf32>
    %727 = vector.multi_reduction <add>, %726, %cst_336 [1] : vector<16x32xf32> to vector<16xf32>
    %728 = vector.shape_cast %727 : vector<16xf32> to vector<16x1xf32>
    %cst_337 = arith.constant 3.200000e+01 : f32
    %729 = vector.broadcast %cst_337 : f32 to vector<16x1xf32>
    %730 = arith.divf %728, %729 : vector<16x1xf32>
    %731 = vector.broadcast %730 : vector<16x1xf32> to vector<16x32xf32>
    %732 = arith.subf %726, %731 : vector<16x32xf32>
    %733 = arith.mulf %732, %732 : vector<16x32xf32>
    %cst_338 = arith.constant dense<0.000000e+00> : vector<16xf32>
    %734 = vector.multi_reduction <add>, %733, %cst_338 [1] : vector<16x32xf32> to vector<16xf32>
    %735 = vector.shape_cast %734 : vector<16xf32> to vector<16x1xf32>
    %cst_339 = arith.constant 3.200000e+01 : f32
    %736 = vector.broadcast %cst_339 : f32 to vector<16x1xf32>
    %737 = arith.divf %735, %736 : vector<16x1xf32>
    %738 = vector.broadcast %730 : vector<16x1xf32> to vector<16x32xf32>
    %739 = arith.subf %726, %738 : vector<16x32xf32>
    %cst_340 = arith.constant 9.99999974E-6 : f32
    %740 = vector.broadcast %cst_340 : f32 to vector<16x1xf32>
    %741 = arith.addf %737, %740 : vector<16x1xf32>
    %742 = math.rsqrt %741 : vector<16x1xf32>
    %743 = vector.broadcast %742 : vector<16x1xf32> to vector<16x32xf32>
    %744 = arith.mulf %739, %743 : vector<16x32xf32>
    %745 = vector.broadcast %640 : vector<1x32xf32> to vector<16x32xf32>
    %746 = arith.mulf %744, %745 : vector<16x32xf32>
    %747 = vector.broadcast %642 : vector<1x32xf32> to vector<16x32xf32>
    %748 = arith.addf %746, %747 : vector<16x32xf32>
    %749 = arith.addf %617, %7 : vector<8x32xf32>
    %c1_341 = arith.constant 1 : index
    %c0_342 = arith.constant 0 : index
    %c0_343 = arith.constant 0 : index
    %750 = vector.load %arg5[%c1_341, %c0_342, %c0_343] : memref<2x32x64xf32, #tpu.memory_space<vmem>>, vector<1x32x64xf32>
    %751 = vector.shape_cast %750 : vector<1x32x64xf32> to vector<32x64xf32>
    %cst_344 = arith.constant dense<0.000000e+00> : vector<8x64xf32>
    %752 = tpu.matmul %749, %751, %cst_344 {dimension_numbers = #tpu.dot_dimension_numbers<[1], [0], [0], [1], [0, 0, 1, 1], [], []>} : vector<8x32xf32>, vector<32x64xf32>, vector<8x64xf32> -> vector<8x64xf32>
    %c1_345 = arith.constant 1 : index
    %c0_346 = arith.constant 0 : index
    %c0_347 = arith.constant 0 : index
    %753 = vector.load %arg6[%c1_345, %c0_346, %c0_347] : memref<2x1x64xf32, #tpu.memory_space<vmem>>, vector<1x1x64xf32>
    %754 = vector.shape_cast %753 : vector<1x1x64xf32> to vector<1x64xf32>
    %755 = vector.broadcast %754 : vector<1x64xf32> to vector<8x64xf32>
    %756 = arith.addf %752, %755 : vector<8x64xf32>
    %c1_348 = arith.constant 1 : index
    %c0_349 = arith.constant 0 : index
    %c0_350 = arith.constant 0 : index
    %757 = vector.load %arg7[%c1_348, %c0_349, %c0_350] : memref<2x32x32xf32, #tpu.memory_space<vmem>>, vector<1x32x32xf32>
    %758 = vector.shape_cast %757 : vector<1x32x32xf32> to vector<32x32xf32>
    %cst_351 = arith.constant dense<0.000000e+00> : vector<8x32xf32>
    %759 = tpu.matmul %617, %758, %cst_351 {dimension_numbers = #tpu.dot_dimension_numbers<[1], [0], [0], [1], [0, 0, 1, 1], [], []>} : vector<8x32xf32>, vector<32x32xf32>, vector<8x32xf32> -> vector<8x32xf32>
    %c1_352 = arith.constant 1 : index
    %c0_353 = arith.constant 0 : index
    %c0_354 = arith.constant 0 : index
    %760 = vector.load %arg8[%c1_352, %c0_353, %c0_354] : memref<2x1x32xf32, #tpu.memory_space<vmem>>, vector<1x1x32xf32>
    %761 = vector.shape_cast %760 : vector<1x1x32xf32> to vector<1x32xf32>
    %762 = vector.broadcast %761 : vector<1x32xf32> to vector<8x32xf32>
    %763 = arith.addf %759, %762 : vector<8x32xf32>
    %764 = vector.extract_strided_slice %756 {offsets = [0, 0], sizes = [8, 32], strides = [1, 1]} : vector<8x64xf32> to vector<8x32xf32>
    %765 = vector.extract_strided_slice %756 {offsets = [0, 32], sizes = [8, 32], strides = [1, 1]} : vector<8x64xf32> to vector<8x32xf32>
    %c1_355 = arith.constant 1 : index
    %c0_356 = arith.constant 0 : index
    %c0_357 = arith.constant 0 : index
    %766 = vector.load %arg9[%c1_355, %c0_356, %c0_357] : memref<2x32x32xf32, #tpu.memory_space<vmem>>, vector<1x32x32xf32>
    %767 = vector.shape_cast %766 : vector<1x32x32xf32> to vector<32x32xf32>
    %c1_358 = arith.constant 1 : index
    %c0_359 = arith.constant 0 : index
    %c0_360 = arith.constant 0 : index
    %768 = vector.load %arg10[%c1_358, %c0_359, %c0_360] : memref<2x1x32xf32, #tpu.memory_space<vmem>>, vector<1x1x32xf32>
    %769 = vector.shape_cast %768 : vector<1x1x32xf32> to vector<1x32xf32>
    %c1_361 = arith.constant 1 : index
    %c0_362 = arith.constant 0 : index
    %c0_363 = arith.constant 0 : index
    %770 = vector.load %arg11[%c1_361, %c0_362, %c0_363] : memref<2x1x32xf32, #tpu.memory_space<vmem>>, vector<1x1x32xf32>
    %771 = vector.shape_cast %770 : vector<1x1x32xf32> to vector<1x32xf32>
    %c1_364 = arith.constant 1 : index
    %c0_365 = arith.constant 0 : index
    %c0_366 = arith.constant 0 : index
    %772 = vector.load %arg12[%c1_364, %c0_365, %c0_366] : memref<2x1x32xf32, #tpu.memory_space<vmem>>, vector<1x1x32xf32>
    %773 = vector.shape_cast %772 : vector<1x1x32xf32> to vector<1x32xf32>
    %cst_367 = arith.constant 0.000000e+00 : f32
    %774 = vector.broadcast %cst_367 : f32 to vector<8x32xf32>
    %775 = vector.extract_strided_slice %764 {offsets = [0, 0], sizes = [8, 8], strides = [1, 1]} : vector<8x32xf32> to vector<8x8xf32>
    %cst_368 = arith.constant 0.353553385 : f32
    %776 = vector.broadcast %cst_368 : f32 to vector<8x8xf32>
    %777 = arith.mulf %775, %776 : vector<8x8xf32>
    %778 = vector.extract_strided_slice %765 {offsets = [0, 0], sizes = [8, 8], strides = [1, 1]} : vector<8x32xf32> to vector<8x8xf32>
    %cst_369 = arith.constant dense<0.000000e+00> : vector<8x8xf32>
    %779 = tpu.matmul %777, %778, %cst_369 {dimension_numbers = #tpu.dot_dimension_numbers<[1], [1], [0], [0], [0, 0, 1, 0], [], []>} : vector<8x8xf32>, vector<8x8xf32>, vector<8x8xf32> -> vector<8x8xf32>
    %cst_370 = arith.constant dense<0xFF800000> : vector<8xf32>
    %780 = vector.multi_reduction <maximumf>, %779, %cst_370 [1] : vector<8x8xf32> to vector<8xf32>
    %781 = vector.shape_cast %780 : vector<8xf32> to vector<8x1xf32>
    %782 = vector.broadcast %781 : vector<8x1xf32> to vector<8x8xf32>
    %783 = arith.subf %779, %782 : vector<8x8xf32>
    %784 = math.exp %783 : vector<8x8xf32>
    %cst_371 = arith.constant dense<0.000000e+00> : vector<8xf32>
    %785 = vector.multi_reduction <add>, %784, %cst_371 [1] : vector<8x8xf32> to vector<8xf32>
    %786 = vector.shape_cast %785 : vector<8xf32> to vector<8x1xf32>
    %787 = tpu.reciprocal %786 {approx = true} : vector<8x1xf32> -> vector<8x1xf32>
    %788 = vector.broadcast %787 : vector<8x1xf32> to vector<8x8xf32>
    %789 = arith.mulf %784, %788 : vector<8x8xf32>
    %790 = vector.extract_strided_slice %763 {offsets = [0, 0], sizes = [8, 8], strides = [1, 1]} : vector<8x32xf32> to vector<8x8xf32>
    %cst_372 = arith.constant dense<0.000000e+00> : vector<8x8xf32>
    %791 = tpu.matmul %789, %790, %cst_372 {dimension_numbers = #tpu.dot_dimension_numbers<[1], [0], [0], [1], [0, 0, 1, 1], [], []>} : vector<8x8xf32>, vector<8x8xf32>, vector<8x8xf32> -> vector<8x8xf32>
    %792 = vector.extract_strided_slice %767 {offsets = [0, 0], sizes = [8, 32], strides = [1, 1]} : vector<32x32xf32> to vector<8x32xf32>
    %cst_373 = arith.constant dense<0.000000e+00> : vector<8x32xf32>
    %793 = tpu.matmul %791, %792, %cst_373 {dimension_numbers = #tpu.dot_dimension_numbers<[1], [0], [0], [1], [0, 0, 1, 1], [], []>} : vector<8x8xf32>, vector<8x32xf32>, vector<8x32xf32> -> vector<8x32xf32>
    %794 = arith.addf %774, %793 : vector<8x32xf32>
    %795 = vector.extract_strided_slice %764 {offsets = [0, 8], sizes = [8, 8], strides = [1, 1]} : vector<8x32xf32> to vector<8x8xf32>
    %cst_374 = arith.constant 0.353553385 : f32
    %796 = vector.broadcast %cst_374 : f32 to vector<8x8xf32>
    %797 = arith.mulf %795, %796 : vector<8x8xf32>
    %798 = vector.extract_strided_slice %765 {offsets = [0, 8], sizes = [8, 8], strides = [1, 1]} : vector<8x32xf32> to vector<8x8xf32>
    %cst_375 = arith.constant dense<0.000000e+00> : vector<8x8xf32>
    %799 = tpu.matmul %797, %798, %cst_375 {dimension_numbers = #tpu.dot_dimension_numbers<[1], [1], [0], [0], [0, 0, 1, 0], [], []>} : vector<8x8xf32>, vector<8x8xf32>, vector<8x8xf32> -> vector<8x8xf32>
    %cst_376 = arith.constant dense<0xFF800000> : vector<8xf32>
    %800 = vector.multi_reduction <maximumf>, %799, %cst_376 [1] : vector<8x8xf32> to vector<8xf32>
    %801 = vector.shape_cast %800 : vector<8xf32> to vector<8x1xf32>
    %802 = vector.broadcast %801 : vector<8x1xf32> to vector<8x8xf32>
    %803 = arith.subf %799, %802 : vector<8x8xf32>
    %804 = math.exp %803 : vector<8x8xf32>
    %cst_377 = arith.constant dense<0.000000e+00> : vector<8xf32>
    %805 = vector.multi_reduction <add>, %804, %cst_377 [1] : vector<8x8xf32> to vector<8xf32>
    %806 = vector.shape_cast %805 : vector<8xf32> to vector<8x1xf32>
    %807 = tpu.reciprocal %806 {approx = true} : vector<8x1xf32> -> vector<8x1xf32>
    %808 = vector.broadcast %807 : vector<8x1xf32> to vector<8x8xf32>
    %809 = arith.mulf %804, %808 : vector<8x8xf32>
    %810 = vector.extract_strided_slice %763 {offsets = [0, 8], sizes = [8, 8], strides = [1, 1]} : vector<8x32xf32> to vector<8x8xf32>
    %cst_378 = arith.constant dense<0.000000e+00> : vector<8x8xf32>
    %811 = tpu.matmul %809, %810, %cst_378 {dimension_numbers = #tpu.dot_dimension_numbers<[1], [0], [0], [1], [0, 0, 1, 1], [], []>} : vector<8x8xf32>, vector<8x8xf32>, vector<8x8xf32> -> vector<8x8xf32>
    %812 = vector.extract_strided_slice %767 {offsets = [8, 0], sizes = [8, 32], strides = [1, 1]} : vector<32x32xf32> to vector<8x32xf32>
    %cst_379 = arith.constant dense<0.000000e+00> : vector<8x32xf32>
    %813 = tpu.matmul %811, %812, %cst_379 {dimension_numbers = #tpu.dot_dimension_numbers<[1], [0], [0], [1], [0, 0, 1, 1], [], []>} : vector<8x8xf32>, vector<8x32xf32>, vector<8x32xf32> -> vector<8x32xf32>
    %814 = arith.addf %794, %813 : vector<8x32xf32>
    %815 = vector.extract_strided_slice %764 {offsets = [0, 16], sizes = [8, 8], strides = [1, 1]} : vector<8x32xf32> to vector<8x8xf32>
    %cst_380 = arith.constant 0.353553385 : f32
    %816 = vector.broadcast %cst_380 : f32 to vector<8x8xf32>
    %817 = arith.mulf %815, %816 : vector<8x8xf32>
    %818 = vector.extract_strided_slice %765 {offsets = [0, 16], sizes = [8, 8], strides = [1, 1]} : vector<8x32xf32> to vector<8x8xf32>
    %cst_381 = arith.constant dense<0.000000e+00> : vector<8x8xf32>
    %819 = tpu.matmul %817, %818, %cst_381 {dimension_numbers = #tpu.dot_dimension_numbers<[1], [1], [0], [0], [0, 0, 1, 0], [], []>} : vector<8x8xf32>, vector<8x8xf32>, vector<8x8xf32> -> vector<8x8xf32>
    %cst_382 = arith.constant dense<0xFF800000> : vector<8xf32>
    %820 = vector.multi_reduction <maximumf>, %819, %cst_382 [1] : vector<8x8xf32> to vector<8xf32>
    %821 = vector.shape_cast %820 : vector<8xf32> to vector<8x1xf32>
    %822 = vector.broadcast %821 : vector<8x1xf32> to vector<8x8xf32>
    %823 = arith.subf %819, %822 : vector<8x8xf32>
    %824 = math.exp %823 : vector<8x8xf32>
    %cst_383 = arith.constant dense<0.000000e+00> : vector<8xf32>
    %825 = vector.multi_reduction <add>, %824, %cst_383 [1] : vector<8x8xf32> to vector<8xf32>
    %826 = vector.shape_cast %825 : vector<8xf32> to vector<8x1xf32>
    %827 = tpu.reciprocal %826 {approx = true} : vector<8x1xf32> -> vector<8x1xf32>
    %828 = vector.broadcast %827 : vector<8x1xf32> to vector<8x8xf32>
    %829 = arith.mulf %824, %828 : vector<8x8xf32>
    %830 = vector.extract_strided_slice %763 {offsets = [0, 16], sizes = [8, 8], strides = [1, 1]} : vector<8x32xf32> to vector<8x8xf32>
    %cst_384 = arith.constant dense<0.000000e+00> : vector<8x8xf32>
    %831 = tpu.matmul %829, %830, %cst_384 {dimension_numbers = #tpu.dot_dimension_numbers<[1], [0], [0], [1], [0, 0, 1, 1], [], []>} : vector<8x8xf32>, vector<8x8xf32>, vector<8x8xf32> -> vector<8x8xf32>
    %832 = vector.extract_strided_slice %767 {offsets = [16, 0], sizes = [8, 32], strides = [1, 1]} : vector<32x32xf32> to vector<8x32xf32>
    %cst_385 = arith.constant dense<0.000000e+00> : vector<8x32xf32>
    %833 = tpu.matmul %831, %832, %cst_385 {dimension_numbers = #tpu.dot_dimension_numbers<[1], [0], [0], [1], [0, 0, 1, 1], [], []>} : vector<8x8xf32>, vector<8x32xf32>, vector<8x32xf32> -> vector<8x32xf32>
    %834 = arith.addf %814, %833 : vector<8x32xf32>
    %835 = vector.extract_strided_slice %764 {offsets = [0, 24], sizes = [8, 8], strides = [1, 1]} : vector<8x32xf32> to vector<8x8xf32>
    %cst_386 = arith.constant 0.353553385 : f32
    %836 = vector.broadcast %cst_386 : f32 to vector<8x8xf32>
    %837 = arith.mulf %835, %836 : vector<8x8xf32>
    %838 = vector.extract_strided_slice %765 {offsets = [0, 24], sizes = [8, 8], strides = [1, 1]} : vector<8x32xf32> to vector<8x8xf32>
    %cst_387 = arith.constant dense<0.000000e+00> : vector<8x8xf32>
    %839 = tpu.matmul %837, %838, %cst_387 {dimension_numbers = #tpu.dot_dimension_numbers<[1], [1], [0], [0], [0, 0, 1, 0], [], []>} : vector<8x8xf32>, vector<8x8xf32>, vector<8x8xf32> -> vector<8x8xf32>
    %cst_388 = arith.constant dense<0xFF800000> : vector<8xf32>
    %840 = vector.multi_reduction <maximumf>, %839, %cst_388 [1] : vector<8x8xf32> to vector<8xf32>
    %841 = vector.shape_cast %840 : vector<8xf32> to vector<8x1xf32>
    %842 = vector.broadcast %841 : vector<8x1xf32> to vector<8x8xf32>
    %843 = arith.subf %839, %842 : vector<8x8xf32>
    %844 = math.exp %843 : vector<8x8xf32>
    %cst_389 = arith.constant dense<0.000000e+00> : vector<8xf32>
    %845 = vector.multi_reduction <add>, %844, %cst_389 [1] : vector<8x8xf32> to vector<8xf32>
    %846 = vector.shape_cast %845 : vector<8xf32> to vector<8x1xf32>
    %847 = tpu.reciprocal %846 {approx = true} : vector<8x1xf32> -> vector<8x1xf32>
    %848 = vector.broadcast %847 : vector<8x1xf32> to vector<8x8xf32>
    %849 = arith.mulf %844, %848 : vector<8x8xf32>
    %850 = vector.extract_strided_slice %763 {offsets = [0, 24], sizes = [8, 8], strides = [1, 1]} : vector<8x32xf32> to vector<8x8xf32>
    %cst_390 = arith.constant dense<0.000000e+00> : vector<8x8xf32>
    %851 = tpu.matmul %849, %850, %cst_390 {dimension_numbers = #tpu.dot_dimension_numbers<[1], [0], [0], [1], [0, 0, 1, 1], [], []>} : vector<8x8xf32>, vector<8x8xf32>, vector<8x8xf32> -> vector<8x8xf32>
    %852 = vector.extract_strided_slice %767 {offsets = [24, 0], sizes = [8, 32], strides = [1, 1]} : vector<32x32xf32> to vector<8x32xf32>
    %cst_391 = arith.constant dense<0.000000e+00> : vector<8x32xf32>
    %853 = tpu.matmul %851, %852, %cst_391 {dimension_numbers = #tpu.dot_dimension_numbers<[1], [0], [0], [1], [0, 0, 1, 1], [], []>} : vector<8x8xf32>, vector<8x32xf32>, vector<8x32xf32> -> vector<8x32xf32>
    %854 = arith.addf %834, %853 : vector<8x32xf32>
    %855 = arith.addf %617, %854 : vector<8x32xf32>
    %856 = vector.broadcast %769 : vector<1x32xf32> to vector<8x32xf32>
    %857 = arith.addf %855, %856 : vector<8x32xf32>
    %cst_392 = arith.constant dense<0.000000e+00> : vector<8xf32>
    %858 = vector.multi_reduction <add>, %857, %cst_392 [1] : vector<8x32xf32> to vector<8xf32>
    %859 = vector.shape_cast %858 : vector<8xf32> to vector<8x1xf32>
    %cst_393 = arith.constant 3.200000e+01 : f32
    %860 = vector.broadcast %cst_393 : f32 to vector<8x1xf32>
    %861 = arith.divf %859, %860 : vector<8x1xf32>
    %862 = vector.broadcast %861 : vector<8x1xf32> to vector<8x32xf32>
    %863 = arith.subf %857, %862 : vector<8x32xf32>
    %864 = arith.mulf %863, %863 : vector<8x32xf32>
    %cst_394 = arith.constant dense<0.000000e+00> : vector<8xf32>
    %865 = vector.multi_reduction <add>, %864, %cst_394 [1] : vector<8x32xf32> to vector<8xf32>
    %866 = vector.shape_cast %865 : vector<8xf32> to vector<8x1xf32>
    %cst_395 = arith.constant 3.200000e+01 : f32
    %867 = vector.broadcast %cst_395 : f32 to vector<8x1xf32>
    %868 = arith.divf %866, %867 : vector<8x1xf32>
    %869 = vector.broadcast %861 : vector<8x1xf32> to vector<8x32xf32>
    %870 = arith.subf %857, %869 : vector<8x32xf32>
    %cst_396 = arith.constant 9.99999974E-6 : f32
    %871 = vector.broadcast %cst_396 : f32 to vector<8x1xf32>
    %872 = arith.addf %868, %871 : vector<8x1xf32>
    %873 = math.rsqrt %872 : vector<8x1xf32>
    %874 = vector.broadcast %873 : vector<8x1xf32> to vector<8x32xf32>
    %875 = arith.mulf %870, %874 : vector<8x32xf32>
    %876 = vector.broadcast %771 : vector<1x32xf32> to vector<8x32xf32>
    %877 = arith.mulf %875, %876 : vector<8x32xf32>
    %878 = vector.broadcast %773 : vector<1x32xf32> to vector<8x32xf32>
    %879 = arith.addf %877, %878 : vector<8x32xf32>
    %880 = arith.addf %748, %5 : vector<16x32xf32>
    %c1_397 = arith.constant 1 : index
    %c0_398 = arith.constant 0 : index
    %c0_399 = arith.constant 0 : index
    %881 = vector.load %arg13[%c1_397, %c0_398, %c0_399] : memref<2x32x64xf32, #tpu.memory_space<vmem>>, vector<1x32x64xf32>
    %882 = vector.shape_cast %881 : vector<1x32x64xf32> to vector<32x64xf32>
    %cst_400 = arith.constant dense<0.000000e+00> : vector<16x64xf32>
    %883 = tpu.matmul %880, %882, %cst_400 {dimension_numbers = #tpu.dot_dimension_numbers<[1], [0], [0], [1], [0, 0, 1, 1], [], []>} : vector<16x32xf32>, vector<32x64xf32>, vector<16x64xf32> -> vector<16x64xf32>
    %c1_401 = arith.constant 1 : index
    %c0_402 = arith.constant 0 : index
    %c0_403 = arith.constant 0 : index
    %884 = vector.load %arg14[%c1_401, %c0_402, %c0_403] : memref<2x1x64xf32, #tpu.memory_space<vmem>>, vector<1x1x64xf32>
    %885 = vector.shape_cast %884 : vector<1x1x64xf32> to vector<1x64xf32>
    %886 = vector.broadcast %885 : vector<1x64xf32> to vector<16x64xf32>
    %887 = arith.addf %883, %886 : vector<16x64xf32>
    %888 = arith.addf %879, %7 : vector<8x32xf32>
    %c1_404 = arith.constant 1 : index
    %c0_405 = arith.constant 0 : index
    %c0_406 = arith.constant 0 : index
    %889 = vector.load %arg13[%c1_404, %c0_405, %c0_406] : memref<2x32x64xf32, #tpu.memory_space<vmem>>, vector<1x32x64xf32>
    %890 = vector.shape_cast %889 : vector<1x32x64xf32> to vector<32x64xf32>
    %cst_407 = arith.constant dense<0.000000e+00> : vector<8x64xf32>
    %891 = tpu.matmul %888, %890, %cst_407 {dimension_numbers = #tpu.dot_dimension_numbers<[1], [0], [0], [1], [0, 0, 1, 1], [], []>} : vector<8x32xf32>, vector<32x64xf32>, vector<8x64xf32> -> vector<8x64xf32>
    %c1_408 = arith.constant 1 : index
    %c0_409 = arith.constant 0 : index
    %c0_410 = arith.constant 0 : index
    %892 = vector.load %arg14[%c1_408, %c0_409, %c0_410] : memref<2x1x64xf32, #tpu.memory_space<vmem>>, vector<1x1x64xf32>
    %893 = vector.shape_cast %892 : vector<1x1x64xf32> to vector<1x64xf32>
    %894 = vector.broadcast %893 : vector<1x64xf32> to vector<8x64xf32>
    %895 = arith.addf %891, %894 : vector<8x64xf32>
    %c1_411 = arith.constant 1 : index
    %c0_412 = arith.constant 0 : index
    %c0_413 = arith.constant 0 : index
    %896 = vector.load %arg15[%c1_411, %c0_412, %c0_413] : memref<2x32x32xf32, #tpu.memory_space<vmem>>, vector<1x32x32xf32>
    %897 = vector.shape_cast %896 : vector<1x32x32xf32> to vector<32x32xf32>
    %cst_414 = arith.constant dense<0.000000e+00> : vector<16x32xf32>
    %898 = tpu.matmul %748, %897, %cst_414 {dimension_numbers = #tpu.dot_dimension_numbers<[1], [0], [0], [1], [0, 0, 1, 1], [], []>} : vector<16x32xf32>, vector<32x32xf32>, vector<16x32xf32> -> vector<16x32xf32>
    %c1_415 = arith.constant 1 : index
    %c0_416 = arith.constant 0 : index
    %c0_417 = arith.constant 0 : index
    %899 = vector.load %arg16[%c1_415, %c0_416, %c0_417] : memref<2x1x32xf32, #tpu.memory_space<vmem>>, vector<1x1x32xf32>
    %900 = vector.shape_cast %899 : vector<1x1x32xf32> to vector<1x32xf32>
    %901 = vector.broadcast %900 : vector<1x32xf32> to vector<16x32xf32>
    %902 = arith.addf %898, %901 : vector<16x32xf32>
    %c1_418 = arith.constant 1 : index
    %c0_419 = arith.constant 0 : index
    %c0_420 = arith.constant 0 : index
    %903 = vector.load %arg15[%c1_418, %c0_419, %c0_420] : memref<2x32x32xf32, #tpu.memory_space<vmem>>, vector<1x32x32xf32>
    %904 = vector.shape_cast %903 : vector<1x32x32xf32> to vector<32x32xf32>
    %cst_421 = arith.constant dense<0.000000e+00> : vector<8x32xf32>
    %905 = tpu.matmul %879, %904, %cst_421 {dimension_numbers = #tpu.dot_dimension_numbers<[1], [0], [0], [1], [0, 0, 1, 1], [], []>} : vector<8x32xf32>, vector<32x32xf32>, vector<8x32xf32> -> vector<8x32xf32>
    %c1_422 = arith.constant 1 : index
    %c0_423 = arith.constant 0 : index
    %c0_424 = arith.constant 0 : index
    %906 = vector.load %arg16[%c1_422, %c0_423, %c0_424] : memref<2x1x32xf32, #tpu.memory_space<vmem>>, vector<1x1x32xf32>
    %907 = vector.shape_cast %906 : vector<1x1x32xf32> to vector<1x32xf32>
    %908 = vector.broadcast %907 : vector<1x32xf32> to vector<8x32xf32>
    %909 = arith.addf %905, %908 : vector<8x32xf32>
    %910 = vector.extract_strided_slice %887 {offsets = [0, 0], sizes = [16, 32], strides = [1, 1]} : vector<16x64xf32> to vector<16x32xf32>
    %911 = vector.extract_strided_slice %887 {offsets = [0, 32], sizes = [16, 32], strides = [1, 1]} : vector<16x64xf32> to vector<16x32xf32>
    %912 = vector.extract_strided_slice %895 {offsets = [0, 0], sizes = [8, 32], strides = [1, 1]} : vector<8x64xf32> to vector<8x32xf32>
    %913 = vector.extract_strided_slice %895 {offsets = [0, 32], sizes = [8, 32], strides = [1, 1]} : vector<8x64xf32> to vector<8x32xf32>
    %c1_425 = arith.constant 1 : index
    %c0_426 = arith.constant 0 : index
    %c0_427 = arith.constant 0 : index
    %914 = vector.load %arg17[%c1_425, %c0_426, %c0_427] : memref<2x32x32xf32, #tpu.memory_space<vmem>>, vector<1x32x32xf32>
    %915 = vector.shape_cast %914 : vector<1x32x32xf32> to vector<32x32xf32>
    %c1_428 = arith.constant 1 : index
    %c0_429 = arith.constant 0 : index
    %c0_430 = arith.constant 0 : index
    %916 = vector.load %arg18[%c1_428, %c0_429, %c0_430] : memref<2x1x32xf32, #tpu.memory_space<vmem>>, vector<1x1x32xf32>
    %917 = vector.shape_cast %916 : vector<1x1x32xf32> to vector<1x32xf32>
    %c1_431 = arith.constant 1 : index
    %c0_432 = arith.constant 0 : index
    %c0_433 = arith.constant 0 : index
    %918 = vector.load %arg19[%c1_431, %c0_432, %c0_433] : memref<2x1x32xf32, #tpu.memory_space<vmem>>, vector<1x1x32xf32>
    %919 = vector.shape_cast %918 : vector<1x1x32xf32> to vector<1x32xf32>
    %c1_434 = arith.constant 1 : index
    %c0_435 = arith.constant 0 : index
    %c0_436 = arith.constant 0 : index
    %920 = vector.load %arg20[%c1_434, %c0_435, %c0_436] : memref<2x1x32xf32, #tpu.memory_space<vmem>>, vector<1x1x32xf32>
    %921 = vector.shape_cast %920 : vector<1x1x32xf32> to vector<1x32xf32>
    %cst_437 = arith.constant 0.000000e+00 : f32
    %922 = vector.broadcast %cst_437 : f32 to vector<16x32xf32>
    %923 = vector.extract_strided_slice %910 {offsets = [0, 0], sizes = [16, 8], strides = [1, 1]} : vector<16x32xf32> to vector<16x8xf32>
    %cst_438 = arith.constant 0.353553385 : f32
    %924 = vector.broadcast %cst_438 : f32 to vector<16x8xf32>
    %925 = arith.mulf %923, %924 : vector<16x8xf32>
    %926 = vector.extract_strided_slice %913 {offsets = [0, 0], sizes = [8, 8], strides = [1, 1]} : vector<8x32xf32> to vector<8x8xf32>
    %cst_439 = arith.constant dense<0.000000e+00> : vector<16x8xf32>
    %927 = tpu.matmul %925, %926, %cst_439 {dimension_numbers = #tpu.dot_dimension_numbers<[1], [1], [0], [0], [0, 0, 1, 0], [], []>} : vector<16x8xf32>, vector<8x8xf32>, vector<16x8xf32> -> vector<16x8xf32>
    %cst_440 = arith.constant dense<0xFF800000> : vector<16xf32>
    %928 = vector.multi_reduction <maximumf>, %927, %cst_440 [1] : vector<16x8xf32> to vector<16xf32>
    %929 = vector.shape_cast %928 : vector<16xf32> to vector<16x1xf32>
    %930 = vector.broadcast %929 : vector<16x1xf32> to vector<16x8xf32>
    %931 = arith.subf %927, %930 : vector<16x8xf32>
    %932 = math.exp %931 : vector<16x8xf32>
    %cst_441 = arith.constant dense<0.000000e+00> : vector<16xf32>
    %933 = vector.multi_reduction <add>, %932, %cst_441 [1] : vector<16x8xf32> to vector<16xf32>
    %934 = vector.shape_cast %933 : vector<16xf32> to vector<16x1xf32>
    %935 = tpu.reciprocal %934 {approx = true} : vector<16x1xf32> -> vector<16x1xf32>
    %936 = vector.broadcast %935 : vector<16x1xf32> to vector<16x8xf32>
    %937 = arith.mulf %932, %936 : vector<16x8xf32>
    %938 = vector.extract_strided_slice %909 {offsets = [0, 0], sizes = [8, 8], strides = [1, 1]} : vector<8x32xf32> to vector<8x8xf32>
    %cst_442 = arith.constant dense<0.000000e+00> : vector<16x8xf32>
    %939 = tpu.matmul %937, %938, %cst_442 {dimension_numbers = #tpu.dot_dimension_numbers<[1], [0], [0], [1], [0, 0, 1, 1], [], []>} : vector<16x8xf32>, vector<8x8xf32>, vector<16x8xf32> -> vector<16x8xf32>
    %940 = vector.extract_strided_slice %915 {offsets = [0, 0], sizes = [8, 32], strides = [1, 1]} : vector<32x32xf32> to vector<8x32xf32>
    %cst_443 = arith.constant dense<0.000000e+00> : vector<16x32xf32>
    %941 = tpu.matmul %939, %940, %cst_443 {dimension_numbers = #tpu.dot_dimension_numbers<[1], [0], [0], [1], [0, 0, 1, 1], [], []>} : vector<16x8xf32>, vector<8x32xf32>, vector<16x32xf32> -> vector<16x32xf32>
    %942 = arith.addf %922, %941 : vector<16x32xf32>
    %943 = vector.extract_strided_slice %910 {offsets = [0, 8], sizes = [16, 8], strides = [1, 1]} : vector<16x32xf32> to vector<16x8xf32>
    %cst_444 = arith.constant 0.353553385 : f32
    %944 = vector.broadcast %cst_444 : f32 to vector<16x8xf32>
    %945 = arith.mulf %943, %944 : vector<16x8xf32>
    %946 = vector.extract_strided_slice %913 {offsets = [0, 8], sizes = [8, 8], strides = [1, 1]} : vector<8x32xf32> to vector<8x8xf32>
    %cst_445 = arith.constant dense<0.000000e+00> : vector<16x8xf32>
    %947 = tpu.matmul %945, %946, %cst_445 {dimension_numbers = #tpu.dot_dimension_numbers<[1], [1], [0], [0], [0, 0, 1, 0], [], []>} : vector<16x8xf32>, vector<8x8xf32>, vector<16x8xf32> -> vector<16x8xf32>
    %cst_446 = arith.constant dense<0xFF800000> : vector<16xf32>
    %948 = vector.multi_reduction <maximumf>, %947, %cst_446 [1] : vector<16x8xf32> to vector<16xf32>
    %949 = vector.shape_cast %948 : vector<16xf32> to vector<16x1xf32>
    %950 = vector.broadcast %949 : vector<16x1xf32> to vector<16x8xf32>
    %951 = arith.subf %947, %950 : vector<16x8xf32>
    %952 = math.exp %951 : vector<16x8xf32>
    %cst_447 = arith.constant dense<0.000000e+00> : vector<16xf32>
    %953 = vector.multi_reduction <add>, %952, %cst_447 [1] : vector<16x8xf32> to vector<16xf32>
    %954 = vector.shape_cast %953 : vector<16xf32> to vector<16x1xf32>
    %955 = tpu.reciprocal %954 {approx = true} : vector<16x1xf32> -> vector<16x1xf32>
    %956 = vector.broadcast %955 : vector<16x1xf32> to vector<16x8xf32>
    %957 = arith.mulf %952, %956 : vector<16x8xf32>
    %958 = vector.extract_strided_slice %909 {offsets = [0, 8], sizes = [8, 8], strides = [1, 1]} : vector<8x32xf32> to vector<8x8xf32>
    %cst_448 = arith.constant dense<0.000000e+00> : vector<16x8xf32>
    %959 = tpu.matmul %957, %958, %cst_448 {dimension_numbers = #tpu.dot_dimension_numbers<[1], [0], [0], [1], [0, 0, 1, 1], [], []>} : vector<16x8xf32>, vector<8x8xf32>, vector<16x8xf32> -> vector<16x8xf32>
    %960 = vector.extract_strided_slice %915 {offsets = [8, 0], sizes = [8, 32], strides = [1, 1]} : vector<32x32xf32> to vector<8x32xf32>
    %cst_449 = arith.constant dense<0.000000e+00> : vector<16x32xf32>
    %961 = tpu.matmul %959, %960, %cst_449 {dimension_numbers = #tpu.dot_dimension_numbers<[1], [0], [0], [1], [0, 0, 1, 1], [], []>} : vector<16x8xf32>, vector<8x32xf32>, vector<16x32xf32> -> vector<16x32xf32>
    %962 = arith.addf %942, %961 : vector<16x32xf32>
    %963 = vector.extract_strided_slice %910 {offsets = [0, 16], sizes = [16, 8], strides = [1, 1]} : vector<16x32xf32> to vector<16x8xf32>
    %cst_450 = arith.constant 0.353553385 : f32
    %964 = vector.broadcast %cst_450 : f32 to vector<16x8xf32>
    %965 = arith.mulf %963, %964 : vector<16x8xf32>
    %966 = vector.extract_strided_slice %913 {offsets = [0, 16], sizes = [8, 8], strides = [1, 1]} : vector<8x32xf32> to vector<8x8xf32>
    %cst_451 = arith.constant dense<0.000000e+00> : vector<16x8xf32>
    %967 = tpu.matmul %965, %966, %cst_451 {dimension_numbers = #tpu.dot_dimension_numbers<[1], [1], [0], [0], [0, 0, 1, 0], [], []>} : vector<16x8xf32>, vector<8x8xf32>, vector<16x8xf32> -> vector<16x8xf32>
    %cst_452 = arith.constant dense<0xFF800000> : vector<16xf32>
    %968 = vector.multi_reduction <maximumf>, %967, %cst_452 [1] : vector<16x8xf32> to vector<16xf32>
    %969 = vector.shape_cast %968 : vector<16xf32> to vector<16x1xf32>
    %970 = vector.broadcast %969 : vector<16x1xf32> to vector<16x8xf32>
    %971 = arith.subf %967, %970 : vector<16x8xf32>
    %972 = math.exp %971 : vector<16x8xf32>
    %cst_453 = arith.constant dense<0.000000e+00> : vector<16xf32>
    %973 = vector.multi_reduction <add>, %972, %cst_453 [1] : vector<16x8xf32> to vector<16xf32>
    %974 = vector.shape_cast %973 : vector<16xf32> to vector<16x1xf32>
    %975 = tpu.reciprocal %974 {approx = true} : vector<16x1xf32> -> vector<16x1xf32>
    %976 = vector.broadcast %975 : vector<16x1xf32> to vector<16x8xf32>
    %977 = arith.mulf %972, %976 : vector<16x8xf32>
    %978 = vector.extract_strided_slice %909 {offsets = [0, 16], sizes = [8, 8], strides = [1, 1]} : vector<8x32xf32> to vector<8x8xf32>
    %cst_454 = arith.constant dense<0.000000e+00> : vector<16x8xf32>
    %979 = tpu.matmul %977, %978, %cst_454 {dimension_numbers = #tpu.dot_dimension_numbers<[1], [0], [0], [1], [0, 0, 1, 1], [], []>} : vector<16x8xf32>, vector<8x8xf32>, vector<16x8xf32> -> vector<16x8xf32>
    %980 = vector.extract_strided_slice %915 {offsets = [16, 0], sizes = [8, 32], strides = [1, 1]} : vector<32x32xf32> to vector<8x32xf32>
    %cst_455 = arith.constant dense<0.000000e+00> : vector<16x32xf32>
    %981 = tpu.matmul %979, %980, %cst_455 {dimension_numbers = #tpu.dot_dimension_numbers<[1], [0], [0], [1], [0, 0, 1, 1], [], []>} : vector<16x8xf32>, vector<8x32xf32>, vector<16x32xf32> -> vector<16x32xf32>
    %982 = arith.addf %962, %981 : vector<16x32xf32>
    %983 = vector.extract_strided_slice %910 {offsets = [0, 24], sizes = [16, 8], strides = [1, 1]} : vector<16x32xf32> to vector<16x8xf32>
    %cst_456 = arith.constant 0.353553385 : f32
    %984 = vector.broadcast %cst_456 : f32 to vector<16x8xf32>
    %985 = arith.mulf %983, %984 : vector<16x8xf32>
    %986 = vector.extract_strided_slice %913 {offsets = [0, 24], sizes = [8, 8], strides = [1, 1]} : vector<8x32xf32> to vector<8x8xf32>
    %cst_457 = arith.constant dense<0.000000e+00> : vector<16x8xf32>
    %987 = tpu.matmul %985, %986, %cst_457 {dimension_numbers = #tpu.dot_dimension_numbers<[1], [1], [0], [0], [0, 0, 1, 0], [], []>} : vector<16x8xf32>, vector<8x8xf32>, vector<16x8xf32> -> vector<16x8xf32>
    %cst_458 = arith.constant dense<0xFF800000> : vector<16xf32>
    %988 = vector.multi_reduction <maximumf>, %987, %cst_458 [1] : vector<16x8xf32> to vector<16xf32>
    %989 = vector.shape_cast %988 : vector<16xf32> to vector<16x1xf32>
    %990 = vector.broadcast %989 : vector<16x1xf32> to vector<16x8xf32>
    %991 = arith.subf %987, %990 : vector<16x8xf32>
    %992 = math.exp %991 : vector<16x8xf32>
    %cst_459 = arith.constant dense<0.000000e+00> : vector<16xf32>
    %993 = vector.multi_reduction <add>, %992, %cst_459 [1] : vector<16x8xf32> to vector<16xf32>
    %994 = vector.shape_cast %993 : vector<16xf32> to vector<16x1xf32>
    %995 = tpu.reciprocal %994 {approx = true} : vector<16x1xf32> -> vector<16x1xf32>
    %996 = vector.broadcast %995 : vector<16x1xf32> to vector<16x8xf32>
    %997 = arith.mulf %992, %996 : vector<16x8xf32>
    %998 = vector.extract_strided_slice %909 {offsets = [0, 24], sizes = [8, 8], strides = [1, 1]} : vector<8x32xf32> to vector<8x8xf32>
    %cst_460 = arith.constant dense<0.000000e+00> : vector<16x8xf32>
    %999 = tpu.matmul %997, %998, %cst_460 {dimension_numbers = #tpu.dot_dimension_numbers<[1], [0], [0], [1], [0, 0, 1, 1], [], []>} : vector<16x8xf32>, vector<8x8xf32>, vector<16x8xf32> -> vector<16x8xf32>
    %1000 = vector.extract_strided_slice %915 {offsets = [24, 0], sizes = [8, 32], strides = [1, 1]} : vector<32x32xf32> to vector<8x32xf32>
    %cst_461 = arith.constant dense<0.000000e+00> : vector<16x32xf32>
    %1001 = tpu.matmul %999, %1000, %cst_461 {dimension_numbers = #tpu.dot_dimension_numbers<[1], [0], [0], [1], [0, 0, 1, 1], [], []>} : vector<16x8xf32>, vector<8x32xf32>, vector<16x32xf32> -> vector<16x32xf32>
    %1002 = arith.addf %982, %1001 : vector<16x32xf32>
    %1003 = arith.addf %748, %1002 : vector<16x32xf32>
    %1004 = vector.broadcast %917 : vector<1x32xf32> to vector<16x32xf32>
    %1005 = arith.addf %1003, %1004 : vector<16x32xf32>
    %cst_462 = arith.constant dense<0.000000e+00> : vector<16xf32>
    %1006 = vector.multi_reduction <add>, %1005, %cst_462 [1] : vector<16x32xf32> to vector<16xf32>
    %1007 = vector.shape_cast %1006 : vector<16xf32> to vector<16x1xf32>
    %cst_463 = arith.constant 3.200000e+01 : f32
    %1008 = vector.broadcast %cst_463 : f32 to vector<16x1xf32>
    %1009 = arith.divf %1007, %1008 : vector<16x1xf32>
    %1010 = vector.broadcast %1009 : vector<16x1xf32> to vector<16x32xf32>
    %1011 = arith.subf %1005, %1010 : vector<16x32xf32>
    %1012 = arith.mulf %1011, %1011 : vector<16x32xf32>
    %cst_464 = arith.constant dense<0.000000e+00> : vector<16xf32>
    %1013 = vector.multi_reduction <add>, %1012, %cst_464 [1] : vector<16x32xf32> to vector<16xf32>
    %1014 = vector.shape_cast %1013 : vector<16xf32> to vector<16x1xf32>
    %cst_465 = arith.constant 3.200000e+01 : f32
    %1015 = vector.broadcast %cst_465 : f32 to vector<16x1xf32>
    %1016 = arith.divf %1014, %1015 : vector<16x1xf32>
    %1017 = vector.broadcast %1009 : vector<16x1xf32> to vector<16x32xf32>
    %1018 = arith.subf %1005, %1017 : vector<16x32xf32>
    %cst_466 = arith.constant 9.99999974E-6 : f32
    %1019 = vector.broadcast %cst_466 : f32 to vector<16x1xf32>
    %1020 = arith.addf %1016, %1019 : vector<16x1xf32>
    %1021 = math.rsqrt %1020 : vector<16x1xf32>
    %1022 = vector.broadcast %1021 : vector<16x1xf32> to vector<16x32xf32>
    %1023 = arith.mulf %1018, %1022 : vector<16x32xf32>
    %1024 = vector.broadcast %919 : vector<1x32xf32> to vector<16x32xf32>
    %1025 = arith.mulf %1023, %1024 : vector<16x32xf32>
    %1026 = vector.broadcast %921 : vector<1x32xf32> to vector<16x32xf32>
    %1027 = arith.addf %1025, %1026 : vector<16x32xf32>
    %c1_467 = arith.constant 1 : index
    %c0_468 = arith.constant 0 : index
    %c0_469 = arith.constant 0 : index
    %1028 = vector.load %arg17[%c1_467, %c0_468, %c0_469] : memref<2x32x32xf32, #tpu.memory_space<vmem>>, vector<1x32x32xf32>
    %1029 = vector.shape_cast %1028 : vector<1x32x32xf32> to vector<32x32xf32>
    %c1_470 = arith.constant 1 : index
    %c0_471 = arith.constant 0 : index
    %c0_472 = arith.constant 0 : index
    %1030 = vector.load %arg18[%c1_470, %c0_471, %c0_472] : memref<2x1x32xf32, #tpu.memory_space<vmem>>, vector<1x1x32xf32>
    %1031 = vector.shape_cast %1030 : vector<1x1x32xf32> to vector<1x32xf32>
    %c1_473 = arith.constant 1 : index
    %c0_474 = arith.constant 0 : index
    %c0_475 = arith.constant 0 : index
    %1032 = vector.load %arg19[%c1_473, %c0_474, %c0_475] : memref<2x1x32xf32, #tpu.memory_space<vmem>>, vector<1x1x32xf32>
    %1033 = vector.shape_cast %1032 : vector<1x1x32xf32> to vector<1x32xf32>
    %c1_476 = arith.constant 1 : index
    %c0_477 = arith.constant 0 : index
    %c0_478 = arith.constant 0 : index
    %1034 = vector.load %arg20[%c1_476, %c0_477, %c0_478] : memref<2x1x32xf32, #tpu.memory_space<vmem>>, vector<1x1x32xf32>
    %1035 = vector.shape_cast %1034 : vector<1x1x32xf32> to vector<1x32xf32>
    %cst_479 = arith.constant 0.000000e+00 : f32
    %1036 = vector.broadcast %cst_479 : f32 to vector<8x32xf32>
    %1037 = vector.extract_strided_slice %912 {offsets = [0, 0], sizes = [8, 8], strides = [1, 1]} : vector<8x32xf32> to vector<8x8xf32>
    %cst_480 = arith.constant 0.353553385 : f32
    %1038 = vector.broadcast %cst_480 : f32 to vector<8x8xf32>
    %1039 = arith.mulf %1037, %1038 : vector<8x8xf32>
    %1040 = vector.extract_strided_slice %911 {offsets = [0, 0], sizes = [16, 8], strides = [1, 1]} : vector<16x32xf32> to vector<16x8xf32>
    %cst_481 = arith.constant dense<0.000000e+00> : vector<8x16xf32>
    %1041 = tpu.matmul %1039, %1040, %cst_481 {dimension_numbers = #tpu.dot_dimension_numbers<[1], [1], [0], [0], [0, 0, 1, 0], [], []>} : vector<8x8xf32>, vector<16x8xf32>, vector<8x16xf32> -> vector<8x16xf32>
    %cst_482 = arith.constant dense<0xFF800000> : vector<8xf32>
    %1042 = vector.multi_reduction <maximumf>, %1041, %cst_482 [1] : vector<8x16xf32> to vector<8xf32>
    %1043 = vector.shape_cast %1042 : vector<8xf32> to vector<8x1xf32>
    %1044 = vector.broadcast %1043 : vector<8x1xf32> to vector<8x16xf32>
    %1045 = arith.subf %1041, %1044 : vector<8x16xf32>
    %1046 = math.exp %1045 : vector<8x16xf32>
    %cst_483 = arith.constant dense<0.000000e+00> : vector<8xf32>
    %1047 = vector.multi_reduction <add>, %1046, %cst_483 [1] : vector<8x16xf32> to vector<8xf32>
    %1048 = vector.shape_cast %1047 : vector<8xf32> to vector<8x1xf32>
    %1049 = tpu.reciprocal %1048 {approx = true} : vector<8x1xf32> -> vector<8x1xf32>
    %1050 = vector.broadcast %1049 : vector<8x1xf32> to vector<8x16xf32>
    %1051 = arith.mulf %1046, %1050 : vector<8x16xf32>
    %1052 = vector.extract_strided_slice %902 {offsets = [0, 0], sizes = [16, 8], strides = [1, 1]} : vector<16x32xf32> to vector<16x8xf32>
    %cst_484 = arith.constant dense<0.000000e+00> : vector<8x8xf32>
    %1053 = tpu.matmul %1051, %1052, %cst_484 {dimension_numbers = #tpu.dot_dimension_numbers<[1], [0], [0], [1], [0, 0, 1, 1], [], []>} : vector<8x16xf32>, vector<16x8xf32>, vector<8x8xf32> -> vector<8x8xf32>
    %1054 = vector.extract_strided_slice %1029 {offsets = [0, 0], sizes = [8, 32], strides = [1, 1]} : vector<32x32xf32> to vector<8x32xf32>
    %cst_485 = arith.constant dense<0.000000e+00> : vector<8x32xf32>
    %1055 = tpu.matmul %1053, %1054, %cst_485 {dimension_numbers = #tpu.dot_dimension_numbers<[1], [0], [0], [1], [0, 0, 1, 1], [], []>} : vector<8x8xf32>, vector<8x32xf32>, vector<8x32xf32> -> vector<8x32xf32>
    %1056 = arith.addf %1036, %1055 : vector<8x32xf32>
    %1057 = vector.extract_strided_slice %912 {offsets = [0, 8], sizes = [8, 8], strides = [1, 1]} : vector<8x32xf32> to vector<8x8xf32>
    %cst_486 = arith.constant 0.353553385 : f32
    %1058 = vector.broadcast %cst_486 : f32 to vector<8x8xf32>
    %1059 = arith.mulf %1057, %1058 : vector<8x8xf32>
    %1060 = vector.extract_strided_slice %911 {offsets = [0, 8], sizes = [16, 8], strides = [1, 1]} : vector<16x32xf32> to vector<16x8xf32>
    %cst_487 = arith.constant dense<0.000000e+00> : vector<8x16xf32>
    %1061 = tpu.matmul %1059, %1060, %cst_487 {dimension_numbers = #tpu.dot_dimension_numbers<[1], [1], [0], [0], [0, 0, 1, 0], [], []>} : vector<8x8xf32>, vector<16x8xf32>, vector<8x16xf32> -> vector<8x16xf32>
    %cst_488 = arith.constant dense<0xFF800000> : vector<8xf32>
    %1062 = vector.multi_reduction <maximumf>, %1061, %cst_488 [1] : vector<8x16xf32> to vector<8xf32>
    %1063 = vector.shape_cast %1062 : vector<8xf32> to vector<8x1xf32>
    %1064 = vector.broadcast %1063 : vector<8x1xf32> to vector<8x16xf32>
    %1065 = arith.subf %1061, %1064 : vector<8x16xf32>
    %1066 = math.exp %1065 : vector<8x16xf32>
    %cst_489 = arith.constant dense<0.000000e+00> : vector<8xf32>
    %1067 = vector.multi_reduction <add>, %1066, %cst_489 [1] : vector<8x16xf32> to vector<8xf32>
    %1068 = vector.shape_cast %1067 : vector<8xf32> to vector<8x1xf32>
    %1069 = tpu.reciprocal %1068 {approx = true} : vector<8x1xf32> -> vector<8x1xf32>
    %1070 = vector.broadcast %1069 : vector<8x1xf32> to vector<8x16xf32>
    %1071 = arith.mulf %1066, %1070 : vector<8x16xf32>
    %1072 = vector.extract_strided_slice %902 {offsets = [0, 8], sizes = [16, 8], strides = [1, 1]} : vector<16x32xf32> to vector<16x8xf32>
    %cst_490 = arith.constant dense<0.000000e+00> : vector<8x8xf32>
    %1073 = tpu.matmul %1071, %1072, %cst_490 {dimension_numbers = #tpu.dot_dimension_numbers<[1], [0], [0], [1], [0, 0, 1, 1], [], []>} : vector<8x16xf32>, vector<16x8xf32>, vector<8x8xf32> -> vector<8x8xf32>
    %1074 = vector.extract_strided_slice %1029 {offsets = [8, 0], sizes = [8, 32], strides = [1, 1]} : vector<32x32xf32> to vector<8x32xf32>
    %cst_491 = arith.constant dense<0.000000e+00> : vector<8x32xf32>
    %1075 = tpu.matmul %1073, %1074, %cst_491 {dimension_numbers = #tpu.dot_dimension_numbers<[1], [0], [0], [1], [0, 0, 1, 1], [], []>} : vector<8x8xf32>, vector<8x32xf32>, vector<8x32xf32> -> vector<8x32xf32>
    %1076 = arith.addf %1056, %1075 : vector<8x32xf32>
    %1077 = vector.extract_strided_slice %912 {offsets = [0, 16], sizes = [8, 8], strides = [1, 1]} : vector<8x32xf32> to vector<8x8xf32>
    %cst_492 = arith.constant 0.353553385 : f32
    %1078 = vector.broadcast %cst_492 : f32 to vector<8x8xf32>
    %1079 = arith.mulf %1077, %1078 : vector<8x8xf32>
    %1080 = vector.extract_strided_slice %911 {offsets = [0, 16], sizes = [16, 8], strides = [1, 1]} : vector<16x32xf32> to vector<16x8xf32>
    %cst_493 = arith.constant dense<0.000000e+00> : vector<8x16xf32>
    %1081 = tpu.matmul %1079, %1080, %cst_493 {dimension_numbers = #tpu.dot_dimension_numbers<[1], [1], [0], [0], [0, 0, 1, 0], [], []>} : vector<8x8xf32>, vector<16x8xf32>, vector<8x16xf32> -> vector<8x16xf32>
    %cst_494 = arith.constant dense<0xFF800000> : vector<8xf32>
    %1082 = vector.multi_reduction <maximumf>, %1081, %cst_494 [1] : vector<8x16xf32> to vector<8xf32>
    %1083 = vector.shape_cast %1082 : vector<8xf32> to vector<8x1xf32>
    %1084 = vector.broadcast %1083 : vector<8x1xf32> to vector<8x16xf32>
    %1085 = arith.subf %1081, %1084 : vector<8x16xf32>
    %1086 = math.exp %1085 : vector<8x16xf32>
    %cst_495 = arith.constant dense<0.000000e+00> : vector<8xf32>
    %1087 = vector.multi_reduction <add>, %1086, %cst_495 [1] : vector<8x16xf32> to vector<8xf32>
    %1088 = vector.shape_cast %1087 : vector<8xf32> to vector<8x1xf32>
    %1089 = tpu.reciprocal %1088 {approx = true} : vector<8x1xf32> -> vector<8x1xf32>
    %1090 = vector.broadcast %1089 : vector<8x1xf32> to vector<8x16xf32>
    %1091 = arith.mulf %1086, %1090 : vector<8x16xf32>
    %1092 = vector.extract_strided_slice %902 {offsets = [0, 16], sizes = [16, 8], strides = [1, 1]} : vector<16x32xf32> to vector<16x8xf32>
    %cst_496 = arith.constant dense<0.000000e+00> : vector<8x8xf32>
    %1093 = tpu.matmul %1091, %1092, %cst_496 {dimension_numbers = #tpu.dot_dimension_numbers<[1], [0], [0], [1], [0, 0, 1, 1], [], []>} : vector<8x16xf32>, vector<16x8xf32>, vector<8x8xf32> -> vector<8x8xf32>
    %1094 = vector.extract_strided_slice %1029 {offsets = [16, 0], sizes = [8, 32], strides = [1, 1]} : vector<32x32xf32> to vector<8x32xf32>
    %cst_497 = arith.constant dense<0.000000e+00> : vector<8x32xf32>
    %1095 = tpu.matmul %1093, %1094, %cst_497 {dimension_numbers = #tpu.dot_dimension_numbers<[1], [0], [0], [1], [0, 0, 1, 1], [], []>} : vector<8x8xf32>, vector<8x32xf32>, vector<8x32xf32> -> vector<8x32xf32>
    %1096 = arith.addf %1076, %1095 : vector<8x32xf32>
    %1097 = vector.extract_strided_slice %912 {offsets = [0, 24], sizes = [8, 8], strides = [1, 1]} : vector<8x32xf32> to vector<8x8xf32>
    %cst_498 = arith.constant 0.353553385 : f32
    %1098 = vector.broadcast %cst_498 : f32 to vector<8x8xf32>
    %1099 = arith.mulf %1097, %1098 : vector<8x8xf32>
    %1100 = vector.extract_strided_slice %911 {offsets = [0, 24], sizes = [16, 8], strides = [1, 1]} : vector<16x32xf32> to vector<16x8xf32>
    %cst_499 = arith.constant dense<0.000000e+00> : vector<8x16xf32>
    %1101 = tpu.matmul %1099, %1100, %cst_499 {dimension_numbers = #tpu.dot_dimension_numbers<[1], [1], [0], [0], [0, 0, 1, 0], [], []>} : vector<8x8xf32>, vector<16x8xf32>, vector<8x16xf32> -> vector<8x16xf32>
    %cst_500 = arith.constant dense<0xFF800000> : vector<8xf32>
    %1102 = vector.multi_reduction <maximumf>, %1101, %cst_500 [1] : vector<8x16xf32> to vector<8xf32>
    %1103 = vector.shape_cast %1102 : vector<8xf32> to vector<8x1xf32>
    %1104 = vector.broadcast %1103 : vector<8x1xf32> to vector<8x16xf32>
    %1105 = arith.subf %1101, %1104 : vector<8x16xf32>
    %1106 = math.exp %1105 : vector<8x16xf32>
    %cst_501 = arith.constant dense<0.000000e+00> : vector<8xf32>
    %1107 = vector.multi_reduction <add>, %1106, %cst_501 [1] : vector<8x16xf32> to vector<8xf32>
    %1108 = vector.shape_cast %1107 : vector<8xf32> to vector<8x1xf32>
    %1109 = tpu.reciprocal %1108 {approx = true} : vector<8x1xf32> -> vector<8x1xf32>
    %1110 = vector.broadcast %1109 : vector<8x1xf32> to vector<8x16xf32>
    %1111 = arith.mulf %1106, %1110 : vector<8x16xf32>
    %1112 = vector.extract_strided_slice %902 {offsets = [0, 24], sizes = [16, 8], strides = [1, 1]} : vector<16x32xf32> to vector<16x8xf32>
    %cst_502 = arith.constant dense<0.000000e+00> : vector<8x8xf32>
    %1113 = tpu.matmul %1111, %1112, %cst_502 {dimension_numbers = #tpu.dot_dimension_numbers<[1], [0], [0], [1], [0, 0, 1, 1], [], []>} : vector<8x16xf32>, vector<16x8xf32>, vector<8x8xf32> -> vector<8x8xf32>
    %1114 = vector.extract_strided_slice %1029 {offsets = [24, 0], sizes = [8, 32], strides = [1, 1]} : vector<32x32xf32> to vector<8x32xf32>
    %cst_503 = arith.constant dense<0.000000e+00> : vector<8x32xf32>
    %1115 = tpu.matmul %1113, %1114, %cst_503 {dimension_numbers = #tpu.dot_dimension_numbers<[1], [0], [0], [1], [0, 0, 1, 1], [], []>} : vector<8x8xf32>, vector<8x32xf32>, vector<8x32xf32> -> vector<8x32xf32>
    %1116 = arith.addf %1096, %1115 : vector<8x32xf32>
    %1117 = arith.addf %879, %1116 : vector<8x32xf32>
    %1118 = vector.broadcast %1031 : vector<1x32xf32> to vector<8x32xf32>
    %1119 = arith.addf %1117, %1118 : vector<8x32xf32>
    %cst_504 = arith.constant dense<0.000000e+00> : vector<8xf32>
    %1120 = vector.multi_reduction <add>, %1119, %cst_504 [1] : vector<8x32xf32> to vector<8xf32>
    %1121 = vector.shape_cast %1120 : vector<8xf32> to vector<8x1xf32>
    %cst_505 = arith.constant 3.200000e+01 : f32
    %1122 = vector.broadcast %cst_505 : f32 to vector<8x1xf32>
    %1123 = arith.divf %1121, %1122 : vector<8x1xf32>
    %1124 = vector.broadcast %1123 : vector<8x1xf32> to vector<8x32xf32>
    %1125 = arith.subf %1119, %1124 : vector<8x32xf32>
    %1126 = arith.mulf %1125, %1125 : vector<8x32xf32>
    %cst_506 = arith.constant dense<0.000000e+00> : vector<8xf32>
    %1127 = vector.multi_reduction <add>, %1126, %cst_506 [1] : vector<8x32xf32> to vector<8xf32>
    %1128 = vector.shape_cast %1127 : vector<8xf32> to vector<8x1xf32>
    %cst_507 = arith.constant 3.200000e+01 : f32
    %1129 = vector.broadcast %cst_507 : f32 to vector<8x1xf32>
    %1130 = arith.divf %1128, %1129 : vector<8x1xf32>
    %1131 = vector.broadcast %1123 : vector<8x1xf32> to vector<8x32xf32>
    %1132 = arith.subf %1119, %1131 : vector<8x32xf32>
    %cst_508 = arith.constant 9.99999974E-6 : f32
    %1133 = vector.broadcast %cst_508 : f32 to vector<8x1xf32>
    %1134 = arith.addf %1130, %1133 : vector<8x1xf32>
    %1135 = math.rsqrt %1134 : vector<8x1xf32>
    %1136 = vector.broadcast %1135 : vector<8x1xf32> to vector<8x32xf32>
    %1137 = arith.mulf %1132, %1136 : vector<8x32xf32>
    %1138 = vector.broadcast %1033 : vector<1x32xf32> to vector<8x32xf32>
    %1139 = arith.mulf %1137, %1138 : vector<8x32xf32>
    %1140 = vector.broadcast %1035 : vector<1x32xf32> to vector<8x32xf32>
    %1141 = arith.addf %1139, %1140 : vector<8x32xf32>
    %c1_509 = arith.constant 1 : index
    %c0_510 = arith.constant 0 : index
    %c0_511 = arith.constant 0 : index
    %1142 = vector.load %arg21[%c1_509, %c0_510, %c0_511] : memref<2x32x64xf32, #tpu.memory_space<vmem>>, vector<1x32x64xf32>
    %1143 = vector.shape_cast %1142 : vector<1x32x64xf32> to vector<32x64xf32>
    %c1_512 = arith.constant 1 : index
    %c0_513 = arith.constant 0 : index
    %c0_514 = arith.constant 0 : index
    %1144 = vector.load %arg22[%c1_512, %c0_513, %c0_514] : memref<2x1x64xf32, #tpu.memory_space<vmem>>, vector<1x1x64xf32>
    %1145 = vector.shape_cast %1144 : vector<1x1x64xf32> to vector<1x64xf32>
    %c1_515 = arith.constant 1 : index
    %c0_516 = arith.constant 0 : index
    %c0_517 = arith.constant 0 : index
    %1146 = vector.load %arg23[%c1_515, %c0_516, %c0_517] : memref<2x64x32xf32, #tpu.memory_space<vmem>>, vector<1x64x32xf32>
    %1147 = vector.shape_cast %1146 : vector<1x64x32xf32> to vector<64x32xf32>
    %c1_518 = arith.constant 1 : index
    %c0_519 = arith.constant 0 : index
    %c0_520 = arith.constant 0 : index
    %1148 = vector.load %arg24[%c1_518, %c0_519, %c0_520] : memref<2x1x32xf32, #tpu.memory_space<vmem>>, vector<1x1x32xf32>
    %1149 = vector.shape_cast %1148 : vector<1x1x32xf32> to vector<1x32xf32>
    %c1_521 = arith.constant 1 : index
    %c0_522 = arith.constant 0 : index
    %c0_523 = arith.constant 0 : index
    %1150 = vector.load %arg25[%c1_521, %c0_522, %c0_523] : memref<2x1x32xf32, #tpu.memory_space<vmem>>, vector<1x1x32xf32>
    %1151 = vector.shape_cast %1150 : vector<1x1x32xf32> to vector<1x32xf32>
    %c1_524 = arith.constant 1 : index
    %c0_525 = arith.constant 0 : index
    %c0_526 = arith.constant 0 : index
    %1152 = vector.load %arg26[%c1_524, %c0_525, %c0_526] : memref<2x1x32xf32, #tpu.memory_space<vmem>>, vector<1x1x32xf32>
    %1153 = vector.shape_cast %1152 : vector<1x1x32xf32> to vector<1x32xf32>
    %cst_527 = arith.constant dense<0.000000e+00> : vector<16x64xf32>
    %1154 = tpu.matmul %1027, %1143, %cst_527 {dimension_numbers = #tpu.dot_dimension_numbers<[1], [0], [0], [1], [0, 0, 1, 1], [], []>} : vector<16x32xf32>, vector<32x64xf32>, vector<16x64xf32> -> vector<16x64xf32>
    %1155 = vector.broadcast %1145 : vector<1x64xf32> to vector<16x64xf32>
    %1156 = arith.addf %1154, %1155 : vector<16x64xf32>
    %cst_528 = arith.constant 0.000000e+00 : f32
    %1157 = vector.broadcast %cst_528 : f32 to vector<16x64xf32>
    %1158 = arith.maximumf %1156, %1157 : vector<16x64xf32>
    %cst_529 = arith.constant dense<0.000000e+00> : vector<16x32xf32>
    %1159 = tpu.matmul %1158, %1147, %cst_529 {dimension_numbers = #tpu.dot_dimension_numbers<[1], [0], [0], [1], [0, 0, 1, 1], [], []>} : vector<16x64xf32>, vector<64x32xf32>, vector<16x32xf32> -> vector<16x32xf32>
    %1160 = vector.broadcast %1149 : vector<1x32xf32> to vector<16x32xf32>
    %1161 = arith.addf %1159, %1160 : vector<16x32xf32>
    %1162 = arith.addf %1027, %1161 : vector<16x32xf32>
    %cst_530 = arith.constant dense<0.000000e+00> : vector<16xf32>
    %1163 = vector.multi_reduction <add>, %1162, %cst_530 [1] : vector<16x32xf32> to vector<16xf32>
    %1164 = vector.shape_cast %1163 : vector<16xf32> to vector<16x1xf32>
    %cst_531 = arith.constant 3.200000e+01 : f32
    %1165 = vector.broadcast %cst_531 : f32 to vector<16x1xf32>
    %1166 = arith.divf %1164, %1165 : vector<16x1xf32>
    %1167 = vector.broadcast %1166 : vector<16x1xf32> to vector<16x32xf32>
    %1168 = arith.subf %1162, %1167 : vector<16x32xf32>
    %1169 = arith.mulf %1168, %1168 : vector<16x32xf32>
    %cst_532 = arith.constant dense<0.000000e+00> : vector<16xf32>
    %1170 = vector.multi_reduction <add>, %1169, %cst_532 [1] : vector<16x32xf32> to vector<16xf32>
    %1171 = vector.shape_cast %1170 : vector<16xf32> to vector<16x1xf32>
    %cst_533 = arith.constant 3.200000e+01 : f32
    %1172 = vector.broadcast %cst_533 : f32 to vector<16x1xf32>
    %1173 = arith.divf %1171, %1172 : vector<16x1xf32>
    %1174 = vector.broadcast %1166 : vector<16x1xf32> to vector<16x32xf32>
    %1175 = arith.subf %1162, %1174 : vector<16x32xf32>
    %cst_534 = arith.constant 9.99999974E-6 : f32
    %1176 = vector.broadcast %cst_534 : f32 to vector<16x1xf32>
    %1177 = arith.addf %1173, %1176 : vector<16x1xf32>
    %1178 = math.rsqrt %1177 : vector<16x1xf32>
    %1179 = vector.broadcast %1178 : vector<16x1xf32> to vector<16x32xf32>
    %1180 = arith.mulf %1175, %1179 : vector<16x32xf32>
    %1181 = vector.broadcast %1151 : vector<1x32xf32> to vector<16x32xf32>
    %1182 = arith.mulf %1180, %1181 : vector<16x32xf32>
    %1183 = vector.broadcast %1153 : vector<1x32xf32> to vector<16x32xf32>
    %1184 = arith.addf %1182, %1183 : vector<16x32xf32>
    %c1_535 = arith.constant 1 : index
    %c0_536 = arith.constant 0 : index
    %c0_537 = arith.constant 0 : index
    %1185 = vector.load %arg21[%c1_535, %c0_536, %c0_537] : memref<2x32x64xf32, #tpu.memory_space<vmem>>, vector<1x32x64xf32>
    %1186 = vector.shape_cast %1185 : vector<1x32x64xf32> to vector<32x64xf32>
    %c1_538 = arith.constant 1 : index
    %c0_539 = arith.constant 0 : index
    %c0_540 = arith.constant 0 : index
    %1187 = vector.load %arg22[%c1_538, %c0_539, %c0_540] : memref<2x1x64xf32, #tpu.memory_space<vmem>>, vector<1x1x64xf32>
    %1188 = vector.shape_cast %1187 : vector<1x1x64xf32> to vector<1x64xf32>
    %c1_541 = arith.constant 1 : index
    %c0_542 = arith.constant 0 : index
    %c0_543 = arith.constant 0 : index
    %1189 = vector.load %arg23[%c1_541, %c0_542, %c0_543] : memref<2x64x32xf32, #tpu.memory_space<vmem>>, vector<1x64x32xf32>
    %1190 = vector.shape_cast %1189 : vector<1x64x32xf32> to vector<64x32xf32>
    %c1_544 = arith.constant 1 : index
    %c0_545 = arith.constant 0 : index
    %c0_546 = arith.constant 0 : index
    %1191 = vector.load %arg24[%c1_544, %c0_545, %c0_546] : memref<2x1x32xf32, #tpu.memory_space<vmem>>, vector<1x1x32xf32>
    %1192 = vector.shape_cast %1191 : vector<1x1x32xf32> to vector<1x32xf32>
    %c1_547 = arith.constant 1 : index
    %c0_548 = arith.constant 0 : index
    %c0_549 = arith.constant 0 : index
    %1193 = vector.load %arg25[%c1_547, %c0_548, %c0_549] : memref<2x1x32xf32, #tpu.memory_space<vmem>>, vector<1x1x32xf32>
    %1194 = vector.shape_cast %1193 : vector<1x1x32xf32> to vector<1x32xf32>
    %c1_550 = arith.constant 1 : index
    %c0_551 = arith.constant 0 : index
    %c0_552 = arith.constant 0 : index
    %1195 = vector.load %arg26[%c1_550, %c0_551, %c0_552] : memref<2x1x32xf32, #tpu.memory_space<vmem>>, vector<1x1x32xf32>
    %1196 = vector.shape_cast %1195 : vector<1x1x32xf32> to vector<1x32xf32>
    %cst_553 = arith.constant dense<0.000000e+00> : vector<8x64xf32>
    %1197 = tpu.matmul %1141, %1186, %cst_553 {dimension_numbers = #tpu.dot_dimension_numbers<[1], [0], [0], [1], [0, 0, 1, 1], [], []>} : vector<8x32xf32>, vector<32x64xf32>, vector<8x64xf32> -> vector<8x64xf32>
    %1198 = vector.broadcast %1188 : vector<1x64xf32> to vector<8x64xf32>
    %1199 = arith.addf %1197, %1198 : vector<8x64xf32>
    %cst_554 = arith.constant 0.000000e+00 : f32
    %1200 = vector.broadcast %cst_554 : f32 to vector<8x64xf32>
    %1201 = arith.maximumf %1199, %1200 : vector<8x64xf32>
    %cst_555 = arith.constant dense<0.000000e+00> : vector<8x32xf32>
    %1202 = tpu.matmul %1201, %1190, %cst_555 {dimension_numbers = #tpu.dot_dimension_numbers<[1], [0], [0], [1], [0, 0, 1, 1], [], []>} : vector<8x64xf32>, vector<64x32xf32>, vector<8x32xf32> -> vector<8x32xf32>
    %1203 = vector.broadcast %1192 : vector<1x32xf32> to vector<8x32xf32>
    %1204 = arith.addf %1202, %1203 : vector<8x32xf32>
    %1205 = arith.addf %1141, %1204 : vector<8x32xf32>
    %cst_556 = arith.constant dense<0.000000e+00> : vector<8xf32>
    %1206 = vector.multi_reduction <add>, %1205, %cst_556 [1] : vector<8x32xf32> to vector<8xf32>
    %1207 = vector.shape_cast %1206 : vector<8xf32> to vector<8x1xf32>
    %cst_557 = arith.constant 3.200000e+01 : f32
    %1208 = vector.broadcast %cst_557 : f32 to vector<8x1xf32>
    %1209 = arith.divf %1207, %1208 : vector<8x1xf32>
    %1210 = vector.broadcast %1209 : vector<8x1xf32> to vector<8x32xf32>
    %1211 = arith.subf %1205, %1210 : vector<8x32xf32>
    %1212 = arith.mulf %1211, %1211 : vector<8x32xf32>
    %cst_558 = arith.constant dense<0.000000e+00> : vector<8xf32>
    %1213 = vector.multi_reduction <add>, %1212, %cst_558 [1] : vector<8x32xf32> to vector<8xf32>
    %1214 = vector.shape_cast %1213 : vector<8xf32> to vector<8x1xf32>
    %cst_559 = arith.constant 3.200000e+01 : f32
    %1215 = vector.broadcast %cst_559 : f32 to vector<8x1xf32>
    %1216 = arith.divf %1214, %1215 : vector<8x1xf32>
    %1217 = vector.broadcast %1209 : vector<8x1xf32> to vector<8x32xf32>
    %1218 = arith.subf %1205, %1217 : vector<8x32xf32>
    %cst_560 = arith.constant 9.99999974E-6 : f32
    %1219 = vector.broadcast %cst_560 : f32 to vector<8x1xf32>
    %1220 = arith.addf %1216, %1219 : vector<8x1xf32>
    %1221 = math.rsqrt %1220 : vector<8x1xf32>
    %1222 = vector.broadcast %1221 : vector<8x1xf32> to vector<8x32xf32>
    %1223 = arith.mulf %1218, %1222 : vector<8x32xf32>
    %1224 = vector.broadcast %1194 : vector<1x32xf32> to vector<8x32xf32>
    %1225 = arith.mulf %1223, %1224 : vector<8x32xf32>
    %1226 = vector.broadcast %1196 : vector<1x32xf32> to vector<8x32xf32>
    %1227 = arith.addf %1225, %1226 : vector<8x32xf32>
    %c0_561 = arith.constant 0 : index
    %c0_562 = arith.constant 0 : index
    %c0_563 = arith.constant 0 : index
    %1228 = vector.load %arg27[%c0_561, %c0_562, %c0_563] : memref<1x16x32xf32, #tpu.memory_space<vmem>>, vector<1x16x32xf32>
    %1229 = vector.shape_cast %1228 : vector<1x16x32xf32> to vector<16x32xf32>
    %1230 = vector.shape_cast %1184 : vector<16x32xf32> to vector<1x16x32xf32>
    tpu.vector_store %arg27[%c0_561, %c0_562, %c0_563], %1230 {strides = array<i32>} : memref<1x16x32xf32, #tpu.memory_space<vmem>>, vector<1x16x32xf32>,
    %c0_564 = arith.constant 0 : index
    %c0_565 = arith.constant 0 : index
    %c0_566 = arith.constant 0 : index
    %1231 = vector.load %arg28[%c0_564, %c0_565, %c0_566] : memref<1x8x32xf32, #tpu.memory_space<vmem>>, vector<1x8x32xf32>
    %1232 = vector.shape_cast %1231 : vector<1x8x32xf32> to vector<8x32xf32>
    %1233 = vector.shape_cast %1227 : vector<8x32xf32> to vector<1x8x32xf32>
    tpu.vector_store %arg28[%c0_564, %c0_565, %c0_566], %1233 {strides = array<i32>} : memref<1x8x32xf32, #tpu.memory_space<vmem>>, vector<1x8x32xf32>,
    return
  }
  func.func @transform_0(%arg0: i32) -> (i32, i32, i32) {
    %c0_i32 = arith.constant 0 : i32
    %c0_i32_0 = arith.constant 0 : i32
    %c0_i32_1 = arith.constant 0 : i32
    return %arg0, %c0_i32, %c0_i32_0 : i32, i32, i32
  }
  func.func @transform_1(%arg0: i32) -> (i32, i32, i32) {
    %c0_i32 = arith.constant 0 : i32
    %c0_i32_0 = arith.constant 0 : i32
    %c0_i32_1 = arith.constant 0 : i32
    return %arg0, %c0_i32, %c0_i32_0 : i32, i32, i32
  }
  func.func @transform_2(%arg0: i32) -> (i32, i32, i32) {
    %c0_i32 = arith.constant 0 : i32
    %c0_i32_0 = arith.constant 0 : i32
    %c0_i32_1 = arith.constant 0 : i32
    return %arg0, %c0_i32, %c0_i32_0 : i32, i32, i32
  }
  func.func @transform_3(%arg0: i32) -> (i32, i32, i32) {
    %c0_i32 = arith.constant 0 : i32
    %c0_i32_0 = arith.constant 0 : i32
    %c0_i32_1 = arith.constant 0 : i32
    return %arg0, %c0_i32, %c0_i32_0 : i32, i32, i32
  }
  func.func @transform_4(%arg0: i32) -> (i32, i32, i32) {
    %c0_i32 = arith.constant 0 : i32
    %c0_i32_0 = arith.constant 0 : i32
    %c0_i32_1 = arith.constant 0 : i32
    %c0_i32_2 = arith.constant 0 : i32
    return %c0_i32, %c0_i32_0, %c0_i32_1 : i32, i32, i32
  }
  func.func @transform_5(%arg0: i32) -> (i32, i32, i32) {
    %c0_i32 = arith.constant 0 : i32
    %c0_i32_0 = arith.constant 0 : i32
    %c0_i32_1 = arith.constant 0 : i32
    %c0_i32_2 = arith.constant 0 : i32
    return %c0_i32, %c0_i32_0, %c0_i32_1 : i32, i32, i32
  }
  func.func @transform_6(%arg0: i32) -> (i32, i32, i32) {
    %c0_i32 = arith.constant 0 : i32
    %c0_i32_0 = arith.constant 0 : i32
    %c0_i32_1 = arith.constant 0 : i32
    %c0_i32_2 = arith.constant 0 : i32
    return %c0_i32, %c0_i32_0, %c0_i32_1 : i32, i32, i32
  }
  func.func @transform_7(%arg0: i32) -> (i32, i32, i32) {
    %c0_i32 = arith.constant 0 : i32
    %c0_i32_0 = arith.constant 0 : i32
    %c0_i32_1 = arith.constant 0 : i32
    %c0_i32_2 = arith.constant 0 : i32
    return %c0_i32, %c0_i32_0, %c0_i32_1 : i32, i32, i32
  }
  func.func @transform_8(%arg0: i32) -> (i32, i32, i32) {
    %c0_i32 = arith.constant 0 : i32
    %c0_i32_0 = arith.constant 0 : i32
    %c0_i32_1 = arith.constant 0 : i32
    %c0_i32_2 = arith.constant 0 : i32
    return %c0_i32, %c0_i32_0, %c0_i32_1 : i32, i32, i32
  }
  func.func @transform_9(%arg0: i32) -> (i32, i32, i32) {
    %c0_i32 = arith.constant 0 : i32
    %c0_i32_0 = arith.constant 0 : i32
    %c0_i32_1 = arith.constant 0 : i32
    %c0_i32_2 = arith.constant 0 : i32
    return %c0_i32, %c0_i32_0, %c0_i32_1 : i32, i32, i32
  }
  func.func @transform_10(%arg0: i32) -> (i32, i32, i32) {
    %c0_i32 = arith.constant 0 : i32
    %c0_i32_0 = arith.constant 0 : i32
    %c0_i32_1 = arith.constant 0 : i32
    %c0_i32_2 = arith.constant 0 : i32
    return %c0_i32, %c0_i32_0, %c0_i32_1 : i32, i32, i32
  }
  func.func @transform_11(%arg0: i32) -> (i32, i32, i32) {
    %c0_i32 = arith.constant 0 : i32
    %c0_i32_0 = arith.constant 0 : i32
    %c0_i32_1 = arith.constant 0 : i32
    %c0_i32_2 = arith.constant 0 : i32
    return %c0_i32, %c0_i32_0, %c0_i32_1 : i32, i32, i32
  }
  func.func @transform_12(%arg0: i32) -> (i32, i32, i32) {
    %c0_i32 = arith.constant 0 : i32
    %c0_i32_0 = arith.constant 0 : i32
    %c0_i32_1 = arith.constant 0 : i32
    %c0_i32_2 = arith.constant 0 : i32
    return %c0_i32, %c0_i32_0, %c0_i32_1 : i32, i32, i32
  }
  func.func @transform_13(%arg0: i32) -> (i32, i32, i32) {
    %c0_i32 = arith.constant 0 : i32
    %c0_i32_0 = arith.constant 0 : i32
    %c0_i32_1 = arith.constant 0 : i32
    %c0_i32_2 = arith.constant 0 : i32
    return %c0_i32, %c0_i32_0, %c0_i32_1 : i32, i32, i32
  }
  func.func @transform_14(%arg0: i32) -> (i32, i32, i32) {
    %c0_i32 = arith.constant 0 : i32
    %c0_i32_0 = arith.constant 0 : i32
    %c0_i32_1 = arith.constant 0 : i32
    %c0_i32_2 = arith.constant 0 : i32
    return %c0_i32, %c0_i32_0, %c0_i32_1 : i32, i32, i32
  }
  func.func @transform_15(%arg0: i32) -> (i32, i32, i32) {
    %c0_i32 = arith.constant 0 : i32
    %c0_i32_0 = arith.constant 0 : i32
    %c0_i32_1 = arith.constant 0 : i32
    %c0_i32_2 = arith.constant 0 : i32
    return %c0_i32, %c0_i32_0, %c0_i32_1 : i32, i32, i32
  }
  func.func @transform_16(%arg0: i32) -> (i32, i32, i32) {
    %c0_i32 = arith.constant 0 : i32
    %c0_i32_0 = arith.constant 0 : i32
    %c0_i32_1 = arith.constant 0 : i32
    %c0_i32_2 = arith.constant 0 : i32
    return %c0_i32, %c0_i32_0, %c0_i32_1 : i32, i32, i32
  }
  func.func @transform_17(%arg0: i32) -> (i32, i32, i32) {
    %c0_i32 = arith.constant 0 : i32
    %c0_i32_0 = arith.constant 0 : i32
    %c0_i32_1 = arith.constant 0 : i32
    %c0_i32_2 = arith.constant 0 : i32
    return %c0_i32, %c0_i32_0, %c0_i32_1 : i32, i32, i32
  }
  func.func @transform_18(%arg0: i32) -> (i32, i32, i32) {
    %c0_i32 = arith.constant 0 : i32
    %c0_i32_0 = arith.constant 0 : i32
    %c0_i32_1 = arith.constant 0 : i32
    %c0_i32_2 = arith.constant 0 : i32
    return %c0_i32, %c0_i32_0, %c0_i32_1 : i32, i32, i32
  }
  func.func @transform_19(%arg0: i32) -> (i32, i32, i32) {
    %c0_i32 = arith.constant 0 : i32
    %c0_i32_0 = arith.constant 0 : i32
    %c0_i32_1 = arith.constant 0 : i32
    %c0_i32_2 = arith.constant 0 : i32
    return %c0_i32, %c0_i32_0, %c0_i32_1 : i32, i32, i32
  }
  func.func @transform_20(%arg0: i32) -> (i32, i32, i32) {
    %c0_i32 = arith.constant 0 : i32
    %c0_i32_0 = arith.constant 0 : i32
    %c0_i32_1 = arith.constant 0 : i32
    %c0_i32_2 = arith.constant 0 : i32
    return %c0_i32, %c0_i32_0, %c0_i32_1 : i32, i32, i32
  }
  func.func @transform_21(%arg0: i32) -> (i32, i32, i32) {
    %c0_i32 = arith.constant 0 : i32
    %c0_i32_0 = arith.constant 0 : i32
    %c0_i32_1 = arith.constant 0 : i32
    %c0_i32_2 = arith.constant 0 : i32
    return %c0_i32, %c0_i32_0, %c0_i32_1 : i32, i32, i32
  }
  func.func @transform_22(%arg0: i32) -> (i32, i32, i32) {
    %c0_i32 = arith.constant 0 : i32
    %c0_i32_0 = arith.constant 0 : i32
    %c0_i32_1 = arith.constant 0 : i32
    %c0_i32_2 = arith.constant 0 : i32
    return %c0_i32, %c0_i32_0, %c0_i32_1 : i32, i32, i32
  }
  func.func @transform_23(%arg0: i32) -> (i32, i32, i32) {
    %c0_i32 = arith.constant 0 : i32
    %c0_i32_0 = arith.constant 0 : i32
    %c0_i32_1 = arith.constant 0 : i32
    %c0_i32_2 = arith.constant 0 : i32
    return %c0_i32, %c0_i32_0, %c0_i32_1 : i32, i32, i32
  }
  func.func @transform_24(%arg0: i32) -> (i32, i32, i32) {
    %c0_i32 = arith.constant 0 : i32
    %c0_i32_0 = arith.constant 0 : i32
    %c0_i32_1 = arith.constant 0 : i32
    %c0_i32_2 = arith.constant 0 : i32
    return %c0_i32, %c0_i32_0, %c0_i32_1 : i32, i32, i32
  }
  func.func @transform_25(%arg0: i32) -> (i32, i32, i32) {
    %c0_i32 = arith.constant 0 : i32
    %c0_i32_0 = arith.constant 0 : i32
    %c0_i32_1 = arith.constant 0 : i32
    %c0_i32_2 = arith.constant 0 : i32
    return %c0_i32, %c0_i32_0, %c0_i32_1 : i32, i32, i32
  }
  func.func @transform_26(%arg0: i32) -> (i32, i32, i32) {
    %c0_i32 = arith.constant 0 : i32
    %c0_i32_0 = arith.constant 0 : i32
    %c0_i32_1 = arith.constant 0 : i32
    return %arg0, %c0_i32, %c0_i32_0 : i32, i32, i32
  }
  func.func @transform_27(%arg0: i32) -> (i32, i32, i32) {
    %c0_i32 = arith.constant 0 : i32
    %c0_i32_0 = arith.constant 0 : i32
    %c0_i32_1 = arith.constant 0 : i32
    return %arg0, %c0_i32, %c0_i32_0 : i32, i32, i32
  }
}

</mosaic_0001>

<bundles_post_ra>
// kernel: transformer_cross_encoder_forward.1
= control target key start
LH: loop header
LB: loop body
LE: loop exit
PB: predicated region body
PF: predicated region fallthrough
CT: control target
= control target key end

     0   :  { %s16688_s0 = inlined_call_operand.vmem [shape: f32[2,16,32], index: 0, kind: input, shape index: {}]   ;;  %s16689_s1 = inlined_call_operand.vmem [shape: f32[2,16,32], index: 1, kind: input, shape index: {}]   ;;  %s16690_s2 = inlined_call_operand.vmem [shape: f32[2,8,32], index: 2, kind: input, shape index: {}]   ;;  %s16691_s3 = inlined_call_operand.vmem [shape: f32[2,8,32], index: 3, kind: input, shape index: {}]   ;;  %s16692_s4 = inlined_call_operand.vmem [shape: f32[2,32,64], index: 4, kind: input, shape index: {}]   ;;  %s16693_s5 = inlined_call_operand.hbm [shape: f32[2,1,64], index: 5, kind: input, shape index: {}]   ;;  %s16694_s6 = inlined_call_operand.vmem [shape: f32[2,32,32], index: 6, kind: input, shape index: {}]   ;;  %s16695_s7 = inlined_call_operand.hbm [shape: f32[2,1,32], index: 7, kind: input, shape index: {}]   ;;  %s16696_s8 = inlined_call_operand.vmem [shape: f32[2,32,32], index: 8, kind: input, shape index: {}]   ;;  %s16697_s9 = inlined_call_operand.hbm [shape: f32[2,1,32], index: 9, kind: input, shape index: {}]   ;;  %s16698_s10 = inlined_call_operand.hbm [shape: f32[2,1,32], index: 10, kind: input, shape index: {}]   ;;  %s16699_s11 = inlined_call_operand.hbm [shape: f32[2,1,32], index: 11, kind: input, shape index: {}]   ;;  %s16700_s12 = inlined_call_operand.vmem [shape: f32[2,32,64], index: 12, kind: input, shape index: {}]   ;;  %s16701_s13 = inlined_call_operand.hbm [shape: f32[2,1,64], index: 13, kind: input, shape index: {}]   ;;  %s16702_s14 = inlined_call_operand.vmem [shape: f32[2,32,32], index: 14, kind: input, shape index: {}]   ;;  %s16703_s15 = inlined_call_operand.hbm [shape: f32[2,1,32], index: 15, kind: input, shape index: {}]   ;;  %s16704_s16 = inlined_call_operand.vmem [shape: f32[2,32,32], index: 16, kind: input, shape index: {}]   ;;  %s16705_s17 = inlined_call_operand.hbm [shape: f32[2,1,32], index: 17, kind: input, shape index: {}]   ;;  %s16706_s18 = inlined_call_operand.hbm [shape: f32[2,1,32], index: 18, kind: input, shape index: {}]   ;;  %s16707_s19 = inlined_call_operand.hbm [shape: f32[2,1,32], index: 19, kind: input, shape index: {}]   ;;  %s16708_s20 = inlined_call_operand.hbm [shape: f32[2,32,64], index: 20, kind: input, shape index: {}]   ;;  %s16709_s21 = inlined_call_operand.hbm [shape: f32[2,1,64], index: 21, kind: input, shape index: {}]   ;;  %s16710_s22 = inlined_call_operand.vmem [shape: f32[2,64,32], index: 22, kind: input, shape index: {}]   ;;  %s16711_s23 = inlined_call_operand.hbm [shape: f32[2,1,32], index: 23, kind: input, shape index: {}]   ;;  %s16712_s24 = inlined_call_operand.hbm [shape: f32[2,1,32], index: 24, kind: input, shape index: {}]   ;;  %s16713_s25 = inlined_call_operand.hbm [shape: f32[2,1,32], index: 25, kind: input, shape index: {}]   ;;  %s16714_s26 = inlined_call_operand.vmem [shape: f32[2,16,32], index: 26, kind: output, shape index: {0}]   ;;  %s16715_s27 = inlined_call_operand.vmem [shape: f32[2,8,32], index: 27, kind: output, shape index: {1}]  }
   0x1   :  { %16736 = sst [smem:[#allocation34_spill]] %s16688_s0 }
   0x2   :  { %16737 = sst [smem:[#allocation35_spill]] %s16689_s1 }
   0x3   :  { %16738 = sst [smem:[#allocation36_spill]] %s16690_s2 }
   0x4   :  { %16739 = sst [smem:[#allocation37_spill]] %s16691_s3 }
   0x5   :  { %16740 = sst [smem:[#allocation38_spill]] %s16692_s4 }
   0x6   :  { %16741 = sst [smem:[#allocation39_spill]] %s16693_s5 }
   0x7   :  { %16742 = sst [smem:[#allocation40_spill]] %s16694_s6 }
   0x8   :  { %16743 = sst [smem:[#allocation41_spill]] %s16695_s7 }
   0x9   :  { %16744 = sst [smem:[#allocation42_spill]] %s16696_s8 }
   0xa   :  { %16745 = sst [smem:[#allocation43_spill]] %s16697_s9 }
   0xb   :  { %16746 = sst [smem:[#allocation44_spill]] %s16698_s10 }
   0xc   :  { %16747 = sst [smem:[#allocation45_spill]] %s16699_s11 }
   0xd   :  { %16748 = sst [smem:[#allocation46_spill]] %s16701_s13 }
   0xe   :  { %16749 = sst [smem:[#allocation47_spill]] %s16703_s15 }
   0xf   :  { %16750 = sst [smem:[#allocation48_spill]] %s16705_s17 }
  0x10   :  { %16751 = sst [smem:[#allocation49_spill]] %s16706_s18 }
  0x11   :  { %16752 = sst [smem:[#allocation50_spill]] %s16707_s19 }
  0x12   :  { %33 = vsyncpa [#allocation3], 0 }
  0x13   :  { %34 = vsyncpa [#allocation5], 0 }
  0x14   :  { %35 = vsyncpa [#allocation8], 0 }
  0x15   :  { %36 = vsyncpa [#allocation11], 0 }
  0x16   :  { %37 = vsyncpa [#allocation14], 0 }
  0x17   :  { %38 = vsyncpa [#allocation17], 0 }
  0x18   :  { %39 = vsyncpa [#allocation20], 0 }
  0x19   :  { %40 = vsyncpa [#allocation23], 0  ;;  %s14755_s7 = smov 0  }
  0x1a LB: > { %16753 = sst [smem:[#allocation33_spill]] %s14585_s7  ;;  %s14761_s4 = sadd.s32 4294967295, %s14585_s7   ;;  %s14585_s7 = sphi %s14755_s7, %s46_s7  }
  0x1b   : > { %p12157_p0 = scmp.ge.s32.totalorder %s14585_s7, 1  ;;  %p669_p1 = scmp.lt.s32.totalorder %s14585_s7, 3 }
  0x1c   : > { %p13858_p2 = scmp.eq.s32.totalorder %s14761_s4, 0  ;;  %s14587_s30 = smov [#allocation4]  }
  0x1d   : > { %p14766_p3 = pnand %p12157_p0, %p669_p1  ;;  %s700_s9 = sshll.u32 %s14587_s30, 4  ;;  %s701_s9 = int_to_ptr.vmem [resolvable:$true] %s700_s9 }
  0x1e   : > { %s14588_s5 = smov [#allocation7]   ;;  %s14589_s10 = smov [#allocation10]  }
  0x1f   : > { %p13812_p4 = pneg %p14766_p3  ;;  %s729_s28 = sshll.u32 %s14588_s5, 4  ;;  %s14772_s28 = int_to_ptr.vmem [resolvable:$true] %s729_s28 }
  0x20   : > { %s758_s29 = sshll.u32 %s14589_s10, 4  ;;  %s14590_s1 = smov [#allocation13]   ;;  %s14780_s29 = int_to_ptr.vmem [resolvable:$true] %s758_s29 }
  0x21   : > { %p14776_p5 = pnand %p13858_p2, %p13812_p4  ;;  %s14782_s6 = sshll.u32 %s14590_s1, 4  ;;  %s791_s6 = int_to_ptr.vmem [resolvable:$true] %s14782_s6 }
  0x22   : > { %s14168_s2 = scalar_lea.vmem %s701_s9, 32  ;;  %p14176_p10 = scmp.lt.s32.totalorder %s701_s9, %s701_s9 }
  0x23   : > { %p14786_p6 = pneg %p14776_p5  ;;  %p14169_p7 = scmp.ne.s32.totalorder %s701_s9, %s14168_s2 }
  0x24   : > { %p14177_p11 = scmp.lt.s32.totalorder %s14168_s2, %s14168_s2 }
  0x25   : > { %p14171_p8 = pnand %p14169_p7, %p14786_p6 }
  0x26   : > { %p14178_p12 = por %p14177_p11, %p14176_p10 }
  0x27   : > { %p14172_p9 = pneg %p14171_p8 }
  0x29   : > { %p14179_p13 = pnand %p14178_p12, %p14172_p9 }
  0x2b   : > { %14182 = shalt.err (!%p14179_p13)
}
  0x2c   : > { %s16720_s3 = smov 16   ;;  %s14592_s30 = smov 1  }
  0x2d   : > { %s16757_s1 = sld [smem:[#allocation41_spill]]  ;;  %s14194_s7 = scalar_lea.vmem %s14772_s28, 32 }
  0x2e   : > { %p14195_p0 = scmp.ne.s32.totalorder %s14772_s28, %s14194_s7  ;;  %p14202_p7 = scmp.lt.s32.totalorder %s14772_s28, %s14772_s28 }
  0x2f   : > { %p14203_p8 = scmp.lt.s32.totalorder %s14194_s7, %s14194_s7 }
  0x30   : > { %p14197_p1 = pnand %p14195_p0, %p14786_p6 }
  0x31   : > { %p14204_p9 = por %p14203_p8, %p14202_p7 }
  0x32   : > { %p14198_p4 = pneg %p14197_p1 }
  0x33   : > { %13818 = dma.hbm_to_vmem [thread:$0]  (!%p14776_p5), %s16757_s1, 32, %s701_s9, [#allocation5], %s16720_s3, %s16720_s3, %s14592_s30  }
  0x34   : > { %p14205_p10 = pnand %p14204_p9, %p14198_p4 }
  0x36   : > { %14208 = shalt.err (!%p14205_p10)
}
  0x37   : > { %s16758_s9 = sld [smem:[#allocation44_spill]]  ;;  %s14220_s10 = scalar_lea.vmem %s14780_s29, 32 }
  0x38   : > { %p14221_p11 = scmp.ne.s32.totalorder %s14780_s29, %s14220_s10  ;;  %p14228_p0 = scmp.lt.s32.totalorder %s14780_s29, %s14780_s29 }
  0x39   : > { %p14229_p1 = scmp.lt.s32.totalorder %s14220_s10, %s14220_s10 }
  0x3a   : > { %p14223_p12 = pnand %p14221_p11, %p14786_p6 }
  0x3b   : > { %p14230_p4 = por %p14229_p1, %p14228_p0 }
  0x3c   : > { %p14224_p13 = pneg %p14223_p12 }
  0x3d   : > { %13824 = dma.hbm_to_vmem [thread:$0]  (!%p14776_p5), %s16758_s9, 32, %s14772_s28, [#allocation8], %s16720_s3, %s16720_s3, %s14592_s30  }
  0x3e   : > { %p14231_p7 = pnand %p14230_p4, %p14224_p13 }
  0x40   : > { %14234 = shalt.err (!%p14231_p7)
}
  0x41   : > { %s16759_s13 = sld [smem:[#allocation46_spill]]  ;;  %s14246_s28 = scalar_lea.vmem %s791_s6, 32 }
  0x42   : > { %p14247_p8 = scmp.ne.s32.totalorder %s791_s6, %s14246_s28  ;;  %p14254_p11 = scmp.lt.s32.totalorder %s791_s6, %s791_s6 }
  0x43   : > { %p14255_p12 = scmp.lt.s32.totalorder %s14246_s28, %s14246_s28 }
  0x44   : > { %p14249_p9 = pnand %p14247_p8, %p14786_p6 }
  0x45   : > { %p14256_p13 = por %p14255_p12, %p14254_p11 }
  0x46   : > { %p14250_p10 = pneg %p14249_p9 }
  0x47   : > { %13830 = dma.hbm_to_vmem [thread:$0]  (!%p14776_p5), %s16759_s13, 32, %s14780_s29, [#allocation11], %s16720_s3, %s16720_s3, %s14592_s30  }
  0x48   : > { %p14257_p0 = pnand %p14256_p13, %p14250_p10 }
  0x4a   : > { %14260 = shalt.err (!%p14257_p0)
}
  0x4b   : > { %s16760_s17 = sld [smem:[#allocation48_spill]]  ;;  %s14593_s29 = smov [#allocation16]  }
  0x4c   : > { %s816_s9 = sshll.u32 %s14593_s29, 4  ;;  %s14594_s10 = smov [#allocation19]   ;;  %s817_s9 = int_to_ptr.vmem [resolvable:$true] %s816_s9 }
  0x4d   : > { %s842_s7 = sshll.u32 %s14594_s10, 4  ;;  %s14272_s1 = scalar_lea.vmem %s817_s9, 32  ;;  %s843_s7 = int_to_ptr.vmem [resolvable:$true] %s842_s7 }
  0x4e   : > { %p14273_p1 = scmp.ne.s32.totalorder %s817_s9, %s14272_s1  ;;  %p14280_p8 = scmp.lt.s32.totalorder %s817_s9, %s817_s9 }
  0x4f   : > { %p14281_p9 = scmp.lt.s32.totalorder %s14272_s1, %s14272_s1 }
  0x50   : > { %p14275_p4 = pnand %p14273_p1, %p14786_p6 }
  0x51   : > { %13836 = dma.hbm_to_vmem [thread:$0]  (!%p14776_p5), %s16760_s17, 32, %s791_s6, [#allocation14], %s16720_s3, %s16720_s3, %s14592_s30  }
  0x52   : > { %p14276_p7 = pneg %p14275_p4  ;;  %p14282_p10 = por %p14281_p9, %p14280_p8 }
  0x54   : > { %p14283_p11 = pnand %p14282_p10, %p14276_p7 }
  0x56   : > { %14286 = shalt.err (!%p14283_p11)
}
  0x57   : > { %s16761_s19 = sld [smem:[#allocation50_spill]]  ;;  %s14298_s2 = scalar_lea.vmem %s843_s7, 32 }
  0x58   : > { %p14299_p12 = scmp.ne.s32.totalorder %s843_s7, %s14298_s2  ;;  %p14306_p1 = scmp.lt.s32.totalorder %s843_s7, %s843_s7 }
  0x59   : > { %p14307_p4 = scmp.lt.s32.totalorder %s14298_s2, %s14298_s2 }
  0x5a   : > { %p14301_p13 = pnand %p14299_p12, %p14786_p6 }
  0x5b   : > { %p14308_p7 = por %p14307_p4, %p14306_p1 }
  0x5c   : > { %p14302_p0 = pneg %p14301_p13 }
  0x5d   : > { %13842 = dma.hbm_to_vmem [thread:$0]  (!%p14776_p5), %s16761_s19, 32, %s817_s9, [#allocation17], %s16720_s3, %s16720_s3, %s14592_s30  }
  0x5e   : > { %p14309_p8 = pnand %p14308_p7, %p14302_p0 }
  0x60   : > { %14312 = shalt.err (!%p14309_p8)
}
  0x61   : > { %13848 = dma.hbm_to_vmem [thread:$0]  (!%p14776_p5), %s16709_s21, 32, %s843_s7, [#allocation20], %s16720_s3, %s16720_s3, %s14592_s30  }
  0x62   : > { %s14595_s9 = smov [#allocation22]   ;;  %s14596_s1 = smov [#allocation2]  }
  0x63   : > { %s871_s10 = sshll.u32 %s14595_s9, 4  ;;  %s684_s6 = sshll.u32 %s14596_s1, 4  ;;  %s872_s10 = int_to_ptr.vmem [resolvable:$true] %s871_s10  ;;  %s685_s6 = int_to_ptr.vmem [resolvable:$true] %s684_s6 }
  0x64   : > { %s14324_s28 = scalar_lea.vmem %s872_s10, 32  ;;  %p14332_p12 = scmp.lt.s32.totalorder %s872_s10, %s872_s10 }
  0x65   : > { %p14325_p9 = scmp.ne.s32.totalorder %s872_s10, %s14324_s28  ;;  %p14333_p13 = scmp.lt.s32.totalorder %s14324_s28, %s14324_s28 }
  0x67   : > { %p14327_p10 = pnand %p14325_p9, %p14786_p6  ;;  %p14334_p0 = por %p14333_p13, %p14332_p12 }
  0x69   : > { %p14328_p11 = pneg %p14327_p10 }
  0x6b   : > { %p14335_p1 = pnand %p14334_p0, %p14328_p11 }
  0x6d   : > { %14338 = shalt.err (!%p14335_p1)
}
  0x6e   : > { %13854 = dma.hbm_to_vmem [thread:$0]  (!%p14776_p5), %s16712_s24, 32, %s872_s10, [#allocation23], %s16720_s3, %s16720_s3, %s14592_s30  }
  0x6f   : > { %s14350_s5 = scalar_lea.vmem %s685_s6, 32  ;;  %p14358_p9 = scmp.lt.s32.totalorder %s685_s6, %s685_s6 }
  0x70   : > { %p14351_p4 = scmp.ne.s32.totalorder %s685_s6, %s14350_s5  ;;  %p14359_p10 = scmp.lt.s32.totalorder %s14350_s5, %s14350_s5 }
  0x72   : > { %p14353_p7 = pnand %p14351_p4, %p14786_p6  ;;  %p14360_p11 = por %p14359_p10, %p14358_p9 }
  0x74   : > { %p14354_p8 = pneg %p14353_p7 }
  0x76   : > { %p14361_p12 = pnand %p14360_p11, %p14354_p8 }
  0x78   : > { %14364 = shalt.err (!%p14361_p12)
}
  0x79   : > { %s16762_s1 = sld [smem:[#allocation39_spill]]  ;;  %s14597_s10 = smov [#allocation6]  }
  0x7a   : > { %s716_s28 = sshll.u32 %s14597_s10, 4  ;;  %s14598_s7 = smov [#allocation9]   ;;  %s717_s28 = int_to_ptr.vmem [resolvable:$true] %s716_s28 }
  0x7b   : > { %s742_s2 = sshll.u32 %s14598_s7, 4  ;;  %s14376_s13 = scalar_lea.vmem %s717_s28, 32  ;;  %s743_s2 = int_to_ptr.vmem [resolvable:$true] %s742_s2 }
  0x7c   : > { %p14377_p13 = scmp.ne.s32.totalorder %s717_s28, %s14376_s13  ;;  %p14384_p4 = scmp.lt.s32.totalorder %s717_s28, %s717_s28 }
  0x7d   : > { %p14385_p7 = scmp.lt.s32.totalorder %s14376_s13, %s14376_s13 }
  0x7e   : > { %p14379_p0 = pnand %p14377_p13, %p14786_p6 }
  0x7f   : > { %13815 = dma.hbm_to_vmem [thread:$0]  (!%p14776_p5), %s16762_s1, 32, %s685_s6, [#allocation3], %s16720_s3, %s16720_s3, %s14592_s30  }
  0x80   : > { %p14380_p1 = pneg %p14379_p0  ;;  %p14386_p8 = por %p14385_p7, %p14384_p4 }
  0x82   : > { %p14387_p9 = pnand %p14386_p8, %p14380_p1 }
  0x84   : > { %14390 = shalt.err (!%p14387_p9)
}
  0x85   : > { %s16763_s29 = sld [smem:[#allocation43_spill]]  ;;  %s14402_s9 = scalar_lea.vmem %s743_s2, 32 }
  0x86   : > { %p14403_p10 = scmp.ne.s32.totalorder %s743_s2, %s14402_s9  ;;  %p14410_p13 = scmp.lt.s32.totalorder %s743_s2, %s743_s2 }
  0x87   : > { %p14411_p0 = scmp.lt.s32.totalorder %s14402_s9, %s14402_s9 }
  0x88   : > { %p14405_p11 = pnand %p14403_p10, %p14786_p6 }
  0x89   : > { %p14412_p1 = por %p14411_p0, %p14410_p13 }
  0x8a   : > { %p14406_p12 = pneg %p14405_p11 }
  0x8b   : > { %13821 = dma.hbm_to_vmem [thread:$0]  (!%p14776_p5), %s16763_s29, 32, %s717_s28, [#allocation5], %s16720_s3, %s16720_s3, %s14592_s30  }
  0x8c   : > { %p14413_p4 = pnand %p14412_p1, %p14406_p12 }
  0x8e   : > { %14416 = shalt.err (!%p14413_p4)
}
  0x8f   : > { %s16764_s10 = sld [smem:[#allocation45_spill]]  ;;  %s14599_s28 = smov [#allocation12]  }
  0x90   : > { %s774_s7 = sshll.u32 %s14599_s28, 4  ;;  %s14600_s6 = smov [#allocation15]   ;;  %s775_s7 = int_to_ptr.vmem [resolvable:$true] %s774_s7 }
  0x91   : > { %s803_s5 = sshll.u32 %s14600_s6, 4  ;;  %s14428_s29 = scalar_lea.vmem %s775_s7, 32  ;;  %s804_s5 = int_to_ptr.vmem [resolvable:$true] %s803_s5 }
  0x92   : > { %p14429_p7 = scmp.ne.s32.totalorder %s775_s7, %s14428_s29  ;;  %p14436_p10 = scmp.lt.s32.totalorder %s775_s7, %s775_s7 }
  0x93   : > { %p14437_p11 = scmp.lt.s32.totalorder %s14428_s29, %s14428_s29 }
  0x94   : > { %p14431_p8 = pnand %p14429_p7, %p14786_p6 }
  0x95   : > { %13827 = dma.hbm_to_vmem [thread:$0]  (!%p14776_p5), %s16764_s10, 32, %s743_s2, [#allocation8], %s16720_s3, %s16720_s3, %s14592_s30  }
  0x96   : > { %p14432_p9 = pneg %p14431_p8  ;;  %p14438_p12 = por %p14437_p11, %p14436_p10 }
  0x98   : > { %p14439_p13 = pnand %p14438_p12, %p14432_p9 }
  0x9a   : > { %14442 = shalt.err (!%p14439_p13)
}
  0x9b   : > { %s16765_s15 = sld [smem:[#allocation47_spill]]  ;;  %s14454_s13 = scalar_lea.vmem %s804_s5, 32 }
  0x9c   : > { %p14455_p0 = scmp.ne.s32.totalorder %s804_s5, %s14454_s13  ;;  %p14462_p7 = scmp.lt.s32.totalorder %s804_s5, %s804_s5 }
  0x9d   : > { %p14463_p8 = scmp.lt.s32.totalorder %s14454_s13, %s14454_s13 }
  0x9e   : > { %p14457_p1 = pnand %p14455_p0, %p14786_p6 }
  0x9f   : > { %p14464_p9 = por %p14463_p8, %p14462_p7 }
  0xa0   : > { %p14458_p4 = pneg %p14457_p1 }
  0xa1   : > { %13833 = dma.hbm_to_vmem [thread:$0]  (!%p14776_p5), %s16765_s15, 32, %s775_s7, [#allocation11], %s16720_s3, %s16720_s3, %s14592_s30  }
  0xa2   : > { %p14465_p10 = pnand %p14464_p9, %p14458_p4 }
  0xa4   : > { %14468 = shalt.err (!%p14465_p10)
}
  0xa5   : > { %s16766_s18 = sld [smem:[#allocation49_spill]]  ;;  %s14601_s28 = smov [#allocation18]  }
  0xa6   : > { %s829_s7 = sshll.u32 %s14601_s28, 4  ;;  %s830_s7 = int_to_ptr.vmem [resolvable:$true] %s829_s7 }
  0xa7   : > { %s14480_s6 = scalar_lea.vmem %s830_s7, 1024  ;;  %p14488_p0 = scmp.lt.s32.totalorder %s830_s7, %s830_s7 }
  0xa8   : > { %p14481_p11 = scmp.ne.s32.totalorder %s830_s7, %s14480_s6  ;;  %p14489_p1 = scmp.lt.s32.totalorder %s14480_s6, %s14480_s6 }
  0xaa   : > { %p14483_p12 = pnand %p14481_p11, %p14786_p6  ;;  %p14490_p4 = por %p14489_p1, %p14488_p0 }
  0xab   : > { %13839 = dma.hbm_to_vmem [thread:$0]  (!%p14776_p5), %s16766_s18, 32, %s804_s5, [#allocation14], %s16720_s3, %s16720_s3, %s14592_s30  }
  0xac   : > { %p14484_p13 = pneg %p14483_p12 }
  0xae   : > { %p14491_p7 = pnand %p14490_p4, %p14484_p13 }
  0xb0   : > { %14494 = shalt.err (!%p14491_p7)
}
  0xb1   : > { %s14602_s29 = smov 128   ;;  %s14603_s2 = smov 8  }
  0xb2   : > { %13845 = dma.hbm_to_vmem [thread:$0]  (!%p14776_p5), %s16708_s20, 1024, %s830_s7, [#allocation17], %s14602_s29, %s14602_s29, %s14603_s2  }
  0xb3   : > { %s14604_s13 = smov [#allocation21]   ;;  %s14605_s10 = smov [#allocation24]  }
  0xb4   : > { %s858_s1 = sshll.u32 %s14604_s13, 4  ;;  %s884_s28 = sshll.u32 %s14605_s10, 4  ;;  %s859_s1 = int_to_ptr.vmem [resolvable:$true] %s858_s1  ;;  %s885_s28 = int_to_ptr.vmem [resolvable:$true] %s884_s28 }
  0xb5   : > { %s14506_s3 = scalar_lea.vmem %s859_s1, 32  ;;  %p14514_p11 = scmp.lt.s32.totalorder %s859_s1, %s859_s1 }
  0xb6   : > { %p14507_p8 = scmp.ne.s32.totalorder %s859_s1, %s14506_s3  ;;  %p14515_p12 = scmp.lt.s32.totalorder %s14506_s3, %s14506_s3 }
  0xb8   : > { %p14509_p9 = pnand %p14507_p8, %p14786_p6  ;;  %p14516_p13 = por %p14515_p12, %p14514_p11 }
  0xba   : > { %p14510_p10 = pneg %p14509_p9 }
  0xbc   : > { %p14517_p0 = pnand %p14516_p13, %p14510_p10 }
  0xbe   : > { %14520 = shalt.err (!%p14517_p0)
}
  0xbf   : > { %s16767_s7 = smov 16   ;;  %s14532_s2 = scalar_lea.vmem %s885_s28, 32 }
  0xc0   : > { %13851 = dma.hbm_to_vmem [thread:$0]  (!%p14776_p5), %s16711_s23, 32, %s859_s1, [#allocation20], %s16767_s7, %s16767_s7, %s14592_s30  }
  0xc1   : > { %p14533_p1 = scmp.ne.s32.totalorder %s885_s28, %s14532_s2  ;;  %p14540_p8 = scmp.lt.s32.totalorder %s885_s28, %s885_s28 }
  0xc2   : > { %p14541_p9 = scmp.lt.s32.totalorder %s14532_s2, %s14532_s2 }
  0xc3   : > { %p14535_p4 = pnand %p14533_p1, %p14786_p6 }
  0xc4   : > { %p14542_p11 = por %p14541_p9, %p14540_p8 }
  0xc5   : > { %p14536_p7 = pneg %p14535_p4 }
  0xc7   : > { %p14543_p10 = pnand %p14542_p11, %p14536_p7 }
  0xc9   : > { %14546 = shalt.err (!%p14543_p10)
}
  0xca   : > { %13857 = dma.hbm_to_vmem [thread:$0]  (!%p14776_p5), %s16713_s25, 32, %s885_s28, [#allocation23], %s16767_s7, %s16767_s7, %s14592_s30  }
  0xcb   : > { %930 = sbr.rel (%p14766_p3) target bundleno = 19855 (0x4d8f), region = 124 }
  0xd0   : > { %14552 = dma.done.wait (%p13858_p2), [#allocation3], 32  }
  0xd1   : > { %14554 = vsyncadd (%p13858_p2), [#allocation3], 4294967264 }
  0xd2   : > { %14556 = dma.done.wait (%p13858_p2), [#allocation5], 64  }
  0xd3   : > { %14558 = vsyncadd (%p13858_p2), [#allocation5], 4294967232 }
  0xd4   : > { %14560 = dma.done.wait (%p13858_p2), [#allocation8], 64  }
  0xd5   : > { %14562 = vsyncadd (%p13858_p2), [#allocation8], 4294967232 }
  0xd6   : > { %14564 = dma.done.wait (%p13858_p2), [#allocation11], 64  }
  0xd7   : > { %14566 = vsyncadd (%p13858_p2), [#allocation11], 4294967232 }
  0xd8   : > { %14568 = dma.done.wait (%p13858_p2), [#allocation14], 64  }
  0xd9   : > { %14570 = vsyncadd (%p13858_p2), [#allocation14], 4294967232 }
  0xda   : > { %14572 = dma.done.wait (%p13858_p2), [#allocation17], 1056  }
  0xdb   : > { %14574 = vsyncadd (%p13858_p2), [#allocation17], 4294966240 }
  0xdc   : > { %14576 = dma.done.wait (%p13858_p2), [#allocation20], 64  }
  0xdd   : > { %14578 = vsyncadd (%p13858_p2), [#allocation20], 4294967232 }
  0xde   : > { %14580 = dma.done.wait (%p13858_p2), [#allocation23], 64  }
  0xdf   : > { %14582 = vsyncadd (%p13858_p2), [#allocation23], 4294967232  ;;  %p1075_p3 = scmp.lt.s32.totalorder %s14761_s4, 1  ;;  %s16768_s30 = sld [smem:[#allocation34_spill]]  ;;  %vm1121_vm0 = vcmask 261120   ;;  %vm1310_vm1 = vcmask 64512  }
  0xe0   : > { %s16769_s10 = sld [smem:[#allocation35_spill]]  ;;  %v15042_v10 = vld [vmem:[#allocation2] ss:$0 sm:$0xff]  ;;  %vm1396_vm2 = vcmask 130048   ;;  %v15102_v38 = vld [vmem:[#allocation4] ss:$0 sm:$0xff] }
  0xe1   : > { %s16785_s4 = smov (!%p1075_p3, %s14761_s4), 1  ;;  %s16770_s29 = sld [smem:[#allocation38_spill]]  ;;  %vm14614_vm3 = vmmov 0   ;;  %vm6199_vm4 = vcmask 523264  }
  0xe2   : > { %s14987_s8 = sshll.u32 %s16785_s4, 4  ;;  %s16728_s11 = smov 88  }
  0xe3   : > { %s16772_s7 = sld [smem:[#allocation42_spill]]  ;;  %s16724_s2 = smov 80  }
  0xe4   : > { %s16732_s3 = smov 104   ;;  %s16734_s9 = smov 112  }
  0xe5   : > { %s1079_s5 = scalar_lea.vmem %s16768_s30, %s14987_s8  ;;  %s16726_s30 = smov 120  }
  0xe6   : > { %s14997_s28 = scalar_lea.vmem %s16769_s10, %s14987_s8  ;;  %v15015_v3 = vld [vmem:[%s1079_s5] sm:$0xff]  ;;  %v15018_v4 = vld [vmem:[%s1079_s5 + $0x8] sm:$0xff]  ;;  %s16730_s5 = smov 96  }
  0xe7   : > { %v15002_v0 = vld [vmem:[%s16770_s29 + $0x18] sm:$0xff]  ;;  %v15007_v1 = vld [vmem:[%s16770_s29 + $0x10] sm:$0xff]  ;;  %v15013_v2 = vld [vmem:[%s16770_s29 + $0x8] sm:$0xff]  ;;  %s16771_s10 = sld [smem:[#allocation40_spill]]  ;;  %s16722_s0 = smov 72  }
  0xe8   : > { %12912 = vmatprep.subr.mxu1 %v15002_v0  ;;  %v15021_v5 = vld [vmem:[%s14997_s28] sm:$0xff]  ;;  %v1106_v6 = vld [vmem:[%s14997_s28 + $0x8] sm:$0xff]  ;;  %s16782_s13 = smov 112  }
  0xe9   : > { %12913 = vmatpush3.msra.mxu1 %v15002_v0  ;;  %v1108_v7 = vadd.f32 %v15021_v5, %v15015_v3  ;;  %v15031_v8 = vld [vmem:[%s16770_s29] sm:$0xff]  ;;  %v1109_v9 = vadd.f32 %v1106_v6, %v15018_v4  ;;  %s16773_s6 = smov %s16772_s7 }
  0xea   : > { %12914 = vmatprep.subr.mxu1 %v15007_v1  ;;  %v15133_v52 = vld [vmem:[%s16772_s7] sm:$0xff]  ;;  %s15193_s7 = sshll.u32 %s16785_s4, 3  ;;  %s16780_s4 = smov 80  }
  0xeb   : > { %12915 = vmatpush3.msra.mxu1 %v15007_v1  ;;  %12920 = vmatprep.mubr.msk.f32.mxu1 %vm1121_vm0, %v1108_v7  ;;  %s1101_s1 = scalar_lea.vmem %s16715_s27, %s15193_s7 }
  0xec   : > { %12916 = vmatprep.subr.mxu1 %v15013_v2 }
  0xed   : > { %12917 = vmatpush3.msra.mxu1 %v15013_v2  ;;  %v15071_v19 = vld [vmem:[%s16771_s10 + $0x18] sm:$0xff]  ;;  %v15076_v20 = vld [vmem:[%s16771_s10 + $0x10] sm:$0xff]  ;;  %v15083_v21 = vld [vmem:[%s16771_s10 + $0x8] sm:$0xff] }
  0xee   : > { %12918 = vmatprep.subr.mxu1 %v15031_v8  ;;  %v15090_v22 = vld [vmem:[%s16771_s10] sm:$0xff] }
  0xef   : > { %12919 = vmatpush3.msra.mxu1 %v15031_v8 }
  0xf0   : > { %12921 = vmatmul.mubr.msk.f32.vlgmr.msra.gmra.mxu1 %vm1121_vm0, %v1109_v9  ;;  %12923 = vmatprep.subr.mxu1 %v15071_v19 }
  0xf1   : > { %12931 = vmatprep.mubr.msk.f32.mxu1 %vm1121_vm0, %v15015_v3  ;;  %12924 = vmatpush3.msra.mxu1 %v15071_v19 }
  0xf2   : > { %12925 = vmatprep.subr.mxu1 %v15076_v20 }
  0xf3   : > { %12926 = vmatpush3.msra.mxu1 %v15076_v20 }
  0xf4   : > { %12927 = vmatprep.subr.mxu1 %v15083_v21 }
  0xf5   : > { %12928 = vmatpush3.msra.mxu1 %v15083_v21 }
  0xf6   : > { %12929 = vmatprep.subr.mxu1 %v15090_v22 }
  0xf7   : > { %12930 = vmatpush3.msra.mxu1 %v15090_v22 }
  0xf8   : > { %12932 = vmatmul.mubr.msk.f32.vlgmr.msra.gmra.mxu1 %vm1121_vm0, %v15018_v4 }
 0x1b0   : > { %v12922_v11 = vpop.f32.mrf.mxu1 }
 0x1b1   : > { %v15045_v12 = vadd.f32 %v12922_v11, %v15042_v10 }
 0x1b2   : > { %v1194_v13 = vpop.f32.mrf.mxu1 }
 0x1b3   : > { %v15048_v14 = vadd.f32 %v15042_v10, %v1194_v13  ;;  %1308 = vrot.lane.b32.xlu0 %v15045_v12, %s16730_s5  ;;  %v15064_v18 = vmul.f32 0.35355338, %v15045_v12 }
 0x1b5   : > { %v15053_v15 = vmul.f32 0.35355338, %v15048_v14 }
 0x1b7   : > { %1306 = vrot.lane.b32.xlu0 %v15048_v14, %s16730_s5  ;;  %12938 = vmatprep.mubr.msk.f32.mxu0 %vm1310_vm1, %v15053_v15  ;;  %s16775_s5 = sld [smem:[#allocation37_spill]] }
 0x1b8   : > { %v12933_v37 = vpop.f32.mrf.mxu1 }
 0x1b9   : > { %v15105_v39 = vadd.f32 %v12933_v37, %v15102_v38 }
 0x1ba   : > { %v1286_v40 = vpop.f32.mrf.mxu1 }
 0x1bb   : > { %v15108_v41 = vadd.f32 %v15102_v38, %v1286_v40  ;;  %12941 = vmatprep.subr.mxu1 %v15105_v39 }
 0x1bc   : > { %12942 = vmatpush3.msra.mxu1 %v15105_v39 }
 0x1bd   : > { %12943 = vmatprep.subr.mxu1 %v15108_v41 }
 0x1be   : > { %12944 = vmatpush3.msra.mxu1 %v15108_v41 }
 0x225   : > { %v1309_v16 = vpop.permute.xlu0 %1308 }
 0x226   : > { %12934 = vmatprep.subr.msk.mxu0 %vm1310_vm1, %v1309_v16 }
 0x227   : > { %12935 = vmatpush3.xpose.msk.msra.mxu0 %vm1310_vm1, %v1309_v16 }
 0x229   : > { %v1307_v17 = vpop.permute.xlu0 %1306 }
 0x22a   : > { %12936 = vmatprep.subr.msk.mxu0 %vm1310_vm1, %v1307_v17 }
 0x22b   : > { %12937 = vmatpush3.xpose.msk.msra.mxu0 %vm1310_vm1, %v1307_v17 }
 0x22e   : > { %12939 = vmatmul.mubr.msk.f32.vlgmr.msra.gmra.mxu0 %vm1310_vm1, %v15064_v18 }
 0x2ee   : > { %v12940_v23 = vpop.f32.mrf.mxu0 }
 0x2ef   : > { %v1400_v26 = vsel %vm1396_vm2, %v12940_v23, -inf }
 0x2f0   : > { %v1387_v24 = vpop.f32.mrf.mxu0 }
 0x2f1   : > { %v1397_v25 = vsel %vm1396_vm2, %v1387_v24, -inf }
 0x2f2   : > { %1398 = vmax.xlane.f32.xlu1 %v1397_v25 }
 0x2f6   : > { %1401 = vmax.xlane.f32.xlu1 %v1400_v26 }
 0x37b   : > { %v1399_v27 = vpop.xlane.xlu1 %1398 }
 0x37c   : > { %v1403_v28 = vsub.f32 %v1387_v24, %v1399_v27 }
 0x37e   : > { %v1405_v29 = vmul.f32 1.442695, %v1403_v28 }
 0x37f   : > { %v1402_v30 = vpop.xlane.xlu1 %1401 }
 0x380   : > { %13924 = vpow2.f32 %v1405_v29  ;;  %v1404_v31 = vsub.f32 %v12940_v23, %v1402_v30 }
 0x382   : > { %v1407_v32 = vmul.f32 1.442695, %v1404_v31 }
 0x384   : > { %13926 = vpow2.f32 %v1407_v32 }
 0x38d   : > { %v13925_v33 = vpop.eup %13924 }
 0x38e   : > { %v1409_v34 = vsel %vm1396_vm2, %v13925_v33, 0.0 }
 0x38f   : > { %1410 = vadd.xlane.f32.xlu0 %v1409_v34 }
 0x391   : > { %v13927_v35 = vpop.eup %13926 }
 0x392   : > { %v1412_v36 = vsel %vm1396_vm2, %v13927_v35, 0.0 }
 0x393   : > { %1413 = vadd.xlane.f32.xlu1 %v1412_v36 }
 0x3a4   : > { %1506 = vrot.lane.b32.xlu1 %v15045_v12, %s16728_s11 }
 0x3a8   : > { %1504 = vrot.lane.b32.xlu1 %v15048_v14, %s16728_s11  ;;  %s16776_s11 = smov 104  }
 0x3ac   : > { %1500 = vrot.lane.b32.xlu1 %v15053_v15, %s16726_s30 }
 0x3b0   : > { %1502 = vrot.lane.b32.xlu1 %v15064_v18, %s16726_s30 }
 0x418   : > { %v1411_v42 = vpop.xlane.xlu0 %1410 }
 0x419   : > { %13928 = vrcp.f32 %v1411_v42 }
 0x41c   : > { %v1414_v43 = vpop.xlane.xlu1 %1413 }
 0x41d   : > { %13930 = vrcp.f32 %v1414_v43 }
 0x420   : > { %v1507_v44 = vpop.permute.xlu1 %1506 }
 0x421   : > { %12948 = vmatprep.subr.msk.mxu1 %vm1310_vm1, %v1507_v44 }
 0x424   : > { %v1505_v46 = vpop.permute.xlu1 %1504 }
 0x426   : > { %v13929_v45 = vpop.eup %13928 }
 0x427   : > { %v1417_v47 = vmul.f32 %v13929_v45, %v13925_v33  ;;  %v14613_v45 = vmov 0.0  }
 0x428   : > { %v1501_v50 = vpop.permute.xlu1 %1500 }
 0x429   : > { %12945 = vmatprep.mubr.msk.f32.mxu1 %vm1396_vm2, %v1417_v47 }
 0x42a   : > { %v13931_v48 = vpop.eup %13930 }
 0x42b   : > { %v1418_v49 = vmul.f32 %v13931_v48, %v13927_v35 }
 0x42c   : > { %v1503_v51 = vpop.permute.xlu1 %1502 }
 0x42d   : > { %12946 = vmatmul.mubr.msk.f32.vlgmr.msra.gmra.mxu1 %vm1396_vm2, %v1418_v49 }
 0x42e   : > { %12949 = vmatpush3.xpose.msk.msra.mxu1 %vm1310_vm1, %v1507_v44  ;;  %12952 = vmatprep.mubr.msk.f32.mxu1 %vm1310_vm1, %v1501_v50 }
 0x42f   : > { %12950 = vmatprep.subr.msk.mxu1 %vm1310_vm1, %v1505_v46 }
 0x432   : > { %12951 = vmatpush3.xpose.msk.msra.mxu1 %vm1310_vm1, %v1505_v46 }
 0x433   : > { %12967 = vmatprep.subr.mxu1 %v15133_v52 }
 0x435   : > { %12953 = vmatmul.mubr.msk.f32.vlgmr.msra.gmra.mxu1 %vm1310_vm1, %v1503_v51 }
 0x436   : > { %12968 = vmatpush3.msra.mxu1 %v15133_v52 }
 0x4ed   : > { %v12947_v53 = vpop.f32.mrf.mxu1 }
 0x4ef   : > { %v1491_v54 = vpop.f32.mrf.mxu1 }
 0x4f0   : > { %12969 = vmatprep.mubr.msk.f32.mxu1 %vm1310_vm1, %v1491_v54 }
 0x4f1   : > { %12970 = vmatmul.mubr.msk.f32.vlgmr.msra.gmra.mxu1 %vm1310_vm1, %v12947_v53 }
 0x4f5   : > { %v12954_v55 = vpop.f32.mrf.mxu1 }
 0x4f6   : > { %v1594_v56 = vsel %vm1396_vm2, %v12954_v55, -inf }
 0x4f7   : > { %1595 = vmax.xlane.f32.xlu1 %v1594_v56  ;;  %v1582_v57 = vpop.f32.mrf.mxu1 }
 0x4f8   : > { %v1591_v58 = vsel %vm1396_vm2, %v1582_v57, -inf }
 0x4f9   : > { %1592 = vmax.xlane.f32.xlu0 %v1591_v58 }
 0x508   : > { %1868 = vrot.lane.b32.xlu1 %v15048_v14, %s16724_s2 }
 0x50c   : > { %2147 = vrot.lane.b32.xlu1 %v15053_v15, %s16732_s3 }
 0x50f   : > { %1617 = vrot.lane.b32.xlu0 %v15105_v39, %s16726_s30 }
 0x580   : > { %v1596_v59 = vpop.xlane.xlu1 %1595 }
 0x581   : > { %v1598_v60 = vsub.f32 %v12954_v55, %v1596_v59 }
 0x582   : > { %v1593_v61 = vpop.xlane.xlu0 %1592 }
 0x583   : > { %v1601_v62 = vmul.f32 1.442695, %v1598_v60  ;;  %v1597_v63 = vsub.f32 %v1582_v57, %v1593_v61 }
 0x584   : > { %v1869_v31 = vpop.permute.xlu1 %1868 }
 0x585   : > { %13932 = vpow2.f32 %v1601_v62  ;;  %v1599_v6 = vmul.f32 1.442695, %v1597_v63 }
 0x586   : > { %v1618_v7 = vpop.permute.xlu0 %1617 }
 0x587   : > { %13934 = vpow2.f32 %v1599_v6  ;;  %12955 = vmatprep.subr.mxu0 %v1618_v7 }
 0x588   : > { %12956 = vmatpush3.msra.mxu0 %v1618_v7  ;;  %v2148_v33 = vpop.permute.xlu1 %2147 }
 0x592   : > { %v13933_v9 = vpop.eup %13932 }
 0x593   : > { %v1606_v11 = vsel %vm1396_vm2, %v13933_v9, 0.0 }
 0x594   : > { %v13935_v13 = vpop.eup %13934  ;;  %1607 = vadd.xlane.f32.xlu0 %v1606_v11 }
 0x595   : > { %v1603_v16 = vsel %vm1396_vm2, %v13935_v13, 0.0 }
 0x598   : > { %1604 = vadd.xlane.f32.xlu0 %v1603_v16 }
 0x5ae   : > { %1615 = vrot.lane.b32.xlu0 %v15108_v41, %s16726_s30  ;;  %s16777_s30 = smov 96  }
 0x5b2   : > { %1870 = vrot.lane.b32.xlu0 %v15045_v12, %s16724_s2 }
 0x5b6   : > { %1864 = vrot.lane.b32.xlu0 %v15053_v15, %s16734_s9  ;;  %v15166_v15 = vld [vmem:[%s16773_s6 + $0x8] sm:$0xff] }
 0x5ba   : > { %1866 = vrot.lane.b32.xlu0 %v15064_v18, %s16734_s9 }
 0x5be   : > { %2153 = vrot.lane.b32.xlu0 %v15045_v12, %s16722_s0 }
 0x5c2   : > { %2151 = vrot.lane.b32.xlu0 %v15048_v14, %s16722_s0  ;;  %s16774_s0 = sld [smem:[#allocation36_spill]] }
 0x5c6   : > { %2149 = vrot.lane.b32.xlu0 %v15064_v18, %s16732_s3  ;;  %s15203_s3 = scalar_lea.vmem %s16775_s5, %s15193_s7  ;;  %s16781_s5 = smov 72  }
 0x5c7   : > { %v15209_v46 = vld [vmem:[%s15203_s3] sm:$0xff] }
 0x5c8   : > { %s1088_s2 = scalar_lea.vmem %s16774_s0, %s15193_s7  ;;  %s16779_s0 = smov 120  }
 0x5c9   : > { %v15212_v47 = vld [vmem:[%s1088_s2] sm:$0xff]  ;;  %s16778_s2 = smov 88  }
 0x5ca   : > { %v2483_v48 = vadd.f32 %v15209_v46, %v15212_v47 }
 0x61d   : > { %v1608_v17 = vpop.xlane.xlu0 %1607 }
 0x61e   : > { %13936 = vrcp.f32 %v1608_v17 }
 0x621   : > { %v1605_v23 = vpop.xlane.xlu0 %1604 }
 0x622   : > { %13938 = vrcp.f32 %v1605_v23 }
 0x625   : > { %v1616_v24 = vpop.permute.xlu0 %1615 }
 0x626   : > { %12957 = vmatprep.subr.mxu0 %v1616_v24 }
 0x627   : > { %12958 = vmatpush3.msra.mxu0 %v1616_v24 }
 0x628   : > { %12962 = vmatprep.subr.mxu0 %v15166_v15 }
 0x629   : > { %v1871_v18 = vpop.permute.xlu0 %1870 }
 0x62b   : > { %v13937_v12 = vpop.eup %13936 }
 0x62c   : > { %v1612_v26 = vmul.f32 %v13937_v12, %v13933_v9 }
 0x62d   : > { %v1865_v27 = vpop.permute.xlu0 %1864 }
 0x62f   : > { %v13939_v25 = vpop.eup %13938 }
 0x630   : > { %v1611_v14 = vmul.f32 %v13939_v25, %v13935_v13 }
 0x631   : > { %v1867_v29 = vpop.permute.xlu0 %1866 }
 0x632   : > { %12959 = vmatprep.mubr.msk.f32.mxu0 %vm1396_vm2, %v1611_v14 }
 0x633   : > { %12960 = vmatmul.mubr.msk.f32.vlgmr.msra.gmra.mxu0 %vm1396_vm2, %v1612_v26 }
 0x634   : > { %12963 = vmatpush3.msra.mxu0 %v15166_v15 }
 0x635   : > { %12972 = vmatprep.subr.msk.mxu0 %vm1310_vm1, %v1871_v18  ;;  %v2154_v32 = vpop.permute.xlu0 %2153 }
 0x639   : > { %v2152_v34 = vpop.permute.xlu0 %2151 }
 0x63d   : > { %v2150_v35 = vpop.permute.xlu0 %2149 }
 0x6f3   : > { %v12961_v28 = vpop.f32.mrf.mxu0 }
 0x6f5   : > { %v1693_v30 = vpop.f32.mrf.mxu0 }
 0x6f6   : > { %12964 = vmatprep.mubr.msk.f32.mxu0 %vm1310_vm1, %v1693_v30 }
 0x6f7   : > { %12965 = vmatmul.mubr.msk.f32.vlgmr.msra.gmra.mxu0 %vm1310_vm1, %v12961_v28 }
 0x6f8   : > { %12973 = vmatpush3.xpose.msk.msra.mxu0 %vm1310_vm1, %v1871_v18  ;;  %12976 = vmatprep.mubr.msk.f32.mxu0 %vm1310_vm1, %v1865_v27 }
 0x6f9   : > { %12974 = vmatprep.subr.msk.mxu0 %vm1310_vm1, %v1869_v31 }
 0x6fc   : > { %12975 = vmatpush3.xpose.msk.msra.mxu0 %vm1310_vm1, %v1869_v31 }
 0x6fd   : > { %12991 = vmatprep.subr.msk.mxu0 %vm1310_vm1, %v2154_v32 }
 0x6ff   : > { %12977 = vmatmul.mubr.msk.f32.vlgmr.msra.gmra.mxu0 %vm1310_vm1, %v1867_v29  ;;  %v15241_v29 = vld [vmem:[%s16773_s6 + $0x10] sm:$0xff] }
 0x700   : > { %12992 = vmatpush3.xpose.msk.msra.mxu0 %vm1310_vm1, %v2154_v32  ;;  %12995 = vmatprep.mubr.msk.f32.mxu0 %vm1310_vm1, %v2148_v33  ;;  %v12971_v32 = vpop.f32.mrf.mxu1 }
 0x701   : > { %12993 = vmatprep.subr.msk.mxu0 %vm1310_vm1, %v2152_v34 }
 0x704   : > { %12994 = vmatpush3.xpose.msk.msra.mxu0 %vm1310_vm1, %v2152_v34 }
 0x705   : > { %13010 = vmatprep.subr.mxu0 %v14613_v45 }
 0x707   : > { %12996 = vmatmul.mubr.msk.f32.vlgmr.msra.gmra.mxu0 %vm1310_vm1, %v2150_v35 }
 0x708   : > { %13018 = vmatprep.mubr.msk.f32.mxu0 %vm14614_vm3, %v14613_v45  ;;  %13011 = vmatpush3.msra.mxu0 %v15002_v0 }
 0x709   : > { %13012 = vmatprep.subr.mxu0 %v14613_v45 }
 0x70a   : > { %13013 = vmatpush3.msra.mxu0 %v15007_v1 }
 0x70b   : > { %13014 = vmatprep.subr.mxu0 %v14613_v45 }
 0x70c   : > { %13015 = vmatpush3.msra.mxu0 %v15013_v2 }
 0x70d   : > { %13016 = vmatprep.subr.mxu0 %v14613_v45 }
 0x70e   : > { %13017 = vmatpush3.msra.mxu0 %v15031_v8 }
 0x70f   : > { %13019 = vmatmul.mubr.msk.f32.vlgmr.msra.gmra.mxu0 %vm1121_vm0, %v2483_v48  ;;  %13032 = vmatprep.subr.mxu0 %v14613_v45 }
 0x710   : > { %13034 = vmatprep.mubr.msk.f32.mxu0 %vm14614_vm3, %v14613_v45 }
 0x7b7   : > { %v15186_v36 = vpop.f32.mrf.mxu0 }
 0x7b9   : > { %v15188_v37 = vpop.f32.mrf.mxu0 }
 0x7bf   : > { %v12978_v40 = vpop.f32.mrf.mxu0 }
 0x7c0   : > { %v1958_v42 = vsel %vm1396_vm2, %v12978_v40, -inf }
 0x7c1   : > { %1959 = vmax.xlane.f32.xlu0 %v1958_v42  ;;  %v1946_v43 = vpop.f32.mrf.mxu0 }
 0x7c2   : > { %v1955_v44 = vsel %vm1396_vm2, %v1946_v43, -inf }
 0x7c3   : > { %1956 = vmax.xlane.f32.xlu1 %v1955_v44 }
 0x7c7   : > { %v12997_v56 = vpop.f32.mrf.mxu0 }
 0x7c8   : > { %v2241_v59 = vsel %vm1396_vm2, %v12997_v56, -inf }
 0x7c9   : > { %v2229_v57 = vpop.f32.mrf.mxu0 }
 0x7ca   : > { %v2238_v58 = vsel %vm1396_vm2, %v2229_v57, -inf }
 0x7cf   : > { %v2553_v60 = vpop.f32.mrf.mxu0 }
 0x7d0   : > { %v15248_v30 = vadd.f32 %v15042_v10, %v2553_v60 }
 0x7d1   : > { %v13020_v61 = vpop.f32.mrf.mxu0 }
 0x7d2   : > { %v15255_v31 = vmul.f32 0.35355338, %v15248_v30 }
 0x84a   : > { %v1960_v0 = vpop.xlane.xlu0 %1959 }
 0x84b   : > { %v1962_v1 = vsub.f32 %v12978_v40, %v1960_v0 }
 0x84c   : > { %v1957_v49 = vpop.xlane.xlu1 %1956 }
 0x84d   : > { %v1965_v50 = vmul.f32 1.442695, %v1962_v1  ;;  %v1961_v51 = vsub.f32 %v1946_v43, %v1957_v49 }
 0x84f   : > { %13940 = vpow2.f32 %v1965_v50  ;;  %v1963_v53 = vmul.f32 1.442695, %v1961_v51  ;;  %v15283_v50 = vld [vmem:[%s16773_s6 + $0x18] sm:$0xff]  ;;  %v1861_v51 = vadd.f32 %v12971_v32, %v15186_v36 }
 0x851   : > { %13942 = vpow2.f32 %v1963_v53 }
 0x85c   : > { %v13941_v2 = vpop.eup %13940 }
 0x85d   : > { %v1970_v54 = vsel %vm1396_vm2, %v13941_v2, 0.0 }
 0x85e   : > { %v13943_v55 = vpop.eup %13942  ;;  %1971 = vadd.xlane.f32.xlu1 %v1970_v54 }
 0x85f   : > { %v1967_v8 = vsel %vm1396_vm2, %v13943_v55, 0.0 }
 0x860   : > { %1968 = vadd.xlane.f32.xlu0 %v1967_v8 }
 0x86f   : > { %1977 = vrot.lane.b32.xlu1 %v15108_v41, %s16734_s9 }
 0x876   : > { %1979 = vrot.lane.b32.xlu0 %v15105_v39, %s16734_s9 }
 0x893   : > { %2239 = vmax.xlane.f32.xlu1 %v2238_v58 }
 0x895   : > { %2242 = vmax.xlane.f32.xlu0 %v2241_v59 }
 0x8e7   : > { %v1972_v62 = vpop.xlane.xlu1 %1971 }
 0x8e8   : > { %13944 = vrcp.f32 %v1972_v62 }
 0x8e9   : > { %v1969_v63 = vpop.xlane.xlu0 %1968 }
 0x8ea   : > { %13946 = vrcp.f32 %v1969_v63 }
 0x8eb   : > { %v1978_v7 = vpop.permute.xlu1 %1977 }
 0x8ed   : > { %v1980_v6 = vpop.permute.xlu0 %1979 }
 0x8ee   : > { %12979 = vmatprep.subr.mxu1 %v1980_v6 }
 0x8ef   : > { %12980 = vmatpush3.msra.mxu1 %v1980_v6 }
 0x8f0   : > { %12981 = vmatprep.subr.mxu1 %v1978_v7 }
 0x8f1   : > { %12982 = vmatpush3.msra.mxu1 %v1978_v7 }
 0x8f2   : > { %12986 = vmatprep.subr.mxu1 %v15241_v29 }
 0x8f5   : > { %v13945_v9 = vpop.eup %13944 }
 0x8f6   : > { %v1976_v16 = vmul.f32 %v13945_v9, %v13941_v2 }
 0x8f7   : > { %v13947_v11 = vpop.eup %13946 }
 0x8f8   : > { %v1975_v13 = vmul.f32 %v13947_v11, %v13943_v55 }
 0x8fa   : > { %12983 = vmatprep.mubr.msk.f32.mxu1 %vm1396_vm2, %v1975_v13 }
 0x8fb   : > { %12984 = vmatmul.mubr.msk.f32.vlgmr.msra.gmra.mxu1 %vm1396_vm2, %v1976_v16 }
 0x8fc   : > { %12987 = vmatpush3.msra.mxu1 %v15241_v29 }
 0x91c   : > { %v2240_v17 = vpop.xlane.xlu1 %2239 }
 0x91d   : > { %v2244_v23 = vsub.f32 %v2229_v57, %v2240_v17 }
 0x91e   : > { %v2243_v24 = vpop.xlane.xlu0 %2242 }
 0x91f   : > { %v2246_v12 = vmul.f32 1.442695, %v2244_v23  ;;  %v2245_v25 = vsub.f32 %v12997_v56, %v2243_v24 }
 0x921   : > { %13948 = vpow2.f32 %v2246_v12  ;;  %v2248_v14 = vmul.f32 1.442695, %v2245_v25 }
 0x923   : > { %13950 = vpow2.f32 %v2248_v14 }
 0x92e   : > { %v13949_v26 = vpop.eup %13948 }
 0x92f   : > { %v2250_v18 = vsel %vm1396_vm2, %v13949_v26, 0.0 }
 0x930   : > { %v13951_v27 = vpop.eup %13950  ;;  %2251 = vadd.xlane.f32.xlu0 %v2250_v18 }
 0x931   : > { %v2253_v28 = vsel %vm1396_vm2, %v13951_v27, 0.0 }
 0x932   : > { %2254 = vadd.xlane.f32.xlu1 %v2253_v28 }
 0x943   : > { %2260 = vrot.lane.b32.xlu1 %v15108_v41, %s16776_s11  ;;  %v15261_v41 = vpop.f32.mrf.mxu1 }
 0x944   : > { %v1856_v9 = vadd.f32 %v15261_v41, %v15188_v37 }
 0x946   : > { %2262 = vrot.lane.b32.xlu0 %v15105_v39, %s16776_s11 }
 0x947   : > { %2632 = vrot.lane.b32.xlu1 %v15248_v30, %s16777_s30 }
 0x94a   : > { %2795 = vrot.lane.b32.xlu0 %v15248_v30, %s16778_s2 }
 0x94b   : > { %2793 = vrot.lane.b32.xlu1 %v15255_v31, %s16779_s0 }
 0x9b9   : > { %v2252_v10 = vpop.xlane.xlu0 %2251 }
 0x9ba   : > { %13952 = vrcp.f32 %v2252_v10 }
 0x9bb   : > { %v12985_v33 = vpop.f32.mrf.mxu1  ;;  %v2255_v34 = vpop.xlane.xlu1 %2254 }
 0x9bc   : > { %13954 = vrcp.f32 %v2255_v34 }
 0x9bd   : > { %v2055_v39 = vpop.f32.mrf.mxu1  ;;  %v2263_v35 = vpop.permute.xlu0 %2262 }
 0x9be   : > { %12988 = vmatprep.mubr.msk.f32.mxu1 %vm1310_vm1, %v2055_v39  ;;  %12998 = vmatprep.subr.mxu1 %v2263_v35 }
 0x9bf   : > { %12989 = vmatmul.mubr.msk.f32.vlgmr.msra.gmra.mxu1 %vm1310_vm1, %v12985_v33  ;;  %v2261_v40 = vpop.permute.xlu1 %2260 }
 0x9c0   : > { %12999 = vmatpush3.msra.mxu1 %v2263_v35 }
 0x9c1   : > { %13000 = vmatprep.subr.mxu1 %v2261_v40  ;;  %v2796_v43 = vpop.permute.xlu0 %2795 }
 0x9c2   : > { %13001 = vmatpush3.msra.mxu1 %v2261_v40 }
 0x9c3   : > { %v2633_v42 = vpop.permute.xlu1 %2632  ;;  %13005 = vmatprep.subr.mxu1 %v15283_v50 }
 0x9c4   : > { %13033 = vmatpush3.xpose.msk.msra.mxu0 %vm1310_vm1, %v2633_v42 }
 0x9c5   : > { %13042 = vmatprep.subr.mxu0 %v14613_v45 }
 0x9c7   : > { %v13953_v44 = vpop.eup %13952  ;;  %13035 = vmatmul.mubr.msk.f32.vlgmr.msra.gmra.mxu0 %vm1310_vm1, %v15255_v31  ;;  %v2794_v48 = vpop.permute.xlu1 %2793 }
 0x9c8   : > { %13043 = vmatpush3.xpose.msk.msra.mxu0 %vm1310_vm1, %v2796_v43  ;;  %13044 = vmatprep.mubr.msk.f32.mxu0 %vm14614_vm3, %v14613_v45  ;;  %v2258_v0 = vmul.f32 %v13953_v44, %v13949_v26 }
 0x9c9   : > { %v13955_v1 = vpop.eup %13954  ;;  %13052 = vmatprep.subr.mxu0 %v14613_v45 }
 0x9ca   : > { %13002 = vmatprep.mubr.msk.f32.mxu1 %vm1396_vm2, %v2258_v0  ;;  %v2259_v49 = vmul.f32 %v13955_v1, %v13951_v27 }
 0x9cb   : > { %13045 = vmatmul.mubr.msk.f32.vlgmr.msra.gmra.mxu0 %vm1310_vm1, %v2794_v48 }
 0x9cc   : > { %13003 = vmatmul.mubr.msk.f32.vlgmr.msra.gmra.mxu1 %vm1396_vm2, %v2259_v49  ;;  %13053 = vmatpush3.msra.mxu0 %v15166_v15 }
 0x9cd   : > { %13054 = vmatprep.mubr.msk.f32.mxu0 %vm14614_vm3, %v14613_v45  ;;  %13062 = vmatprep.subr.mxu0 %v14613_v45 }
 0x9ce   : > { %13006 = vmatpush3.msra.mxu1 %v15283_v50 }
 0x9cf   : > { %13021 = vmatprep.subr.mxu1 %v14613_v45 }
 0xa7f   : > { %v12990_v53 = vpop.f32.mrf.mxu1 }
 0xa80   : > { %v2146_v15 = vadd.f32 %v12990_v53, %v1861_v51 }
 0xa81   : > { %v2136_v8 = vpop.f32.mrf.mxu1 }
 0xa82   : > { %v2145_v13 = vadd.f32 %v2136_v8, %v1856_v9 }
 0xa87   : > { %v2705_v2 = vpop.f32.mrf.mxu0 }
 0xa88   : > { %v2709_v54 = vsel %vm1310_vm1, %v2705_v2, -inf }
 0xa89   : > { %2710 = vmax.xlane.f32.xlu0 %v2709_v54  ;;  %v13036_v55 = vpop.f32.mrf.mxu0 }
 0xa8b   : > { %v2867_v56 = vpop.f32.mrf.mxu0 }
 0xa8c   : > { %v13004_v57 = vpop.f32.mrf.mxu1  ;;  %v2871_v58 = vsel %vm1310_vm1, %v2867_v56, -inf }
 0xa8d   : > { %2872 = vmax.xlane.f32.xlu1 %v2871_v58  ;;  %v13046_v59 = vpop.f32.mrf.mxu0 }
 0xa8e   : > { %v2338_v60 = vpop.f32.mrf.mxu1 }
 0xa8f   : > { %13007 = vmatprep.mubr.msk.f32.mxu1 %vm1310_vm1, %v2338_v60 }
 0xa90   : > { %13008 = vmatmul.mubr.msk.f32.vlgmr.msra.gmra.mxu1 %vm1310_vm1, %v13004_v57 }
 0xa91   : > { %13022 = vmatpush3.msra.mxu1 %v15071_v19  ;;  %13029 = vmatprep.mubr.msk.f32.mxu1 %vm14614_vm3, %v14613_v45 }
 0xa92   : > { %13023 = vmatprep.subr.mxu1 %v14613_v45 }
 0xa93   : > { %13024 = vmatpush3.msra.mxu1 %v15076_v20 }
 0xa94   : > { %13025 = vmatprep.subr.mxu1 %v14613_v45 }
 0xa95   : > { %13026 = vmatpush3.msra.mxu1 %v15083_v21 }
 0xa96   : > { %13027 = vmatprep.subr.mxu1 %v14613_v45 }
 0xa97   : > { %13028 = vmatpush3.msra.mxu1 %v15090_v22 }
 0xa98   : > { %13030 = vmatmul.mubr.msk.f32.vlgmr.msra.gmra.mxu1 %vm1121_vm0, %v15212_v47  ;;  %13037 = vmatprep.subr.mxu1 %v14613_v45 }
 0xa99   : > { %13039 = vmatprep.mubr.msk.f32.mxu1 %vm14614_vm3, %v14613_v45 }
 0xb12   : > { %v2711_v19 = vpop.xlane.xlu0 %2710 }
 0xb13   : > { %v2712_v36 = vsub.f32 %v2705_v2, %v2711_v19 }
 0xb15   : > { %v2713_v61 = vmul.f32 1.442695, %v2712_v36 }
 0xb16   : > { %v2873_v20 = vpop.xlane.xlu1 %2872 }
 0xb17   : > { %13956 = vpow2.f32 %v2713_v61  ;;  %v2874_v62 = vsub.f32 %v2867_v56, %v2873_v20 }
 0xb19   : > { %v2875_v63 = vmul.f32 1.442695, %v2874_v62  ;;  %v12237_v62 = vld [vmem:[#allocation6] ss:$0 sm:$0xff] }
 0xb1b   : > { %13958 = vpow2.f32 %v2875_v63 }
 0xb24   : > { %v13957_v21 = vpop.eup %13956 }
 0xb25   : > { %v2715_v6 = vsel %vm1310_vm1, %v13957_v21, 0.0 }
 0xb26   : > { %2716 = vadd.xlane.f32.xlu0 %v2715_v6 }
 0xb28   : > { %v13959_v22 = vpop.eup %13958 }
 0xb29   : > { %v2877_v7 = vsel %vm1310_vm1, %v13959_v22, 0.0 }
 0xb2a   : > { %2878 = vadd.xlane.f32.xlu0 %v2877_v7 }
 0xb40   : > { %3107 = vrot.lane.b32.xlu0 %v15248_v30, %s16780_s4 }
 0xb50   : > { %v13009_v11 = vpop.f32.mrf.mxu1 }
 0xb51   : > { %v15313_v16 = vadd.f32 %v13009_v11, %v2146_v15 }
 0xb52   : > { %v2419_v17 = vpop.f32.mrf.mxu1 }
 0xb53   : > { %v15315_v23 = vadd.f32 %v2419_v17, %v2145_v13 }
 0xb55   : > { %v2430_v61 = vadd.f32 %v15315_v23, %v15015_v3 }
 0xb58   : > { %v2626_v24 = vpop.f32.mrf.mxu1 }
 0xb59   : > { %v15318_v12 = vadd.f32 %v15102_v38, %v2626_v24 }
 0xb5a   : > { %v13031_v25 = vpop.f32.mrf.mxu1 }
 0xb5b   : > { %13038 = vmatpush3.msra.mxu1 %v15318_v12  ;;  %2883 = vrot.lane.b32.xlu1 %v15318_v12, %s16779_s0 }
 0xb5c   : > { %13047 = vmatprep.subr.mxu1 %v14613_v45 }
 0xb5f   : > { %3105 = vrot.lane.b32.xlu1 %v15255_v31, %s16734_s9 }
 0xbaf   : > { %v2717_v37 = vpop.xlane.xlu0 %2716 }
 0xbb0   : > { %13960 = vrcp.f32 %v2717_v37 }
 0xbb3   : > { %v2879_v14 = vpop.xlane.xlu0 %2878 }
 0xbb4   : > { %13962 = vrcp.f32 %v2879_v14 }
 0xbb7   : > { %v3108_v33 = vpop.permute.xlu0 %3107 }
 0xbbd   : > { %v13961_v26 = vpop.eup %13960 }
 0xbbe   : > { %v2719_v18 = vmul.f32 %v13961_v26, %v13957_v21  ;;  %v2438_v21 = vadd.f32 %v12237_v62, %v2430_v61 }
 0xbc0   : > { %13040 = vmatmul.mubr.msk.f32.vlgmr.msra.gmra.mxu1 %vm1310_vm1, %v2719_v18  ;;  %v2440_v6 = vsel %vm1121_vm0, %v2438_v21, 0.0 }
 0xbc1   : > { %13049 = vmatprep.mubr.msk.f32.mxu1 %vm14614_vm3, %v14613_v45  ;;  %v13963_v38 = vpop.eup %13962 }
 0xbc2   : > { %v2881_v28 = vmul.f32 %v13963_v38, %v13959_v22  ;;  %v15379_v38 = vld [vmem:[#allocation7] ss:$0 sm:$0xff] }
 0xbcd   : > { %v2884_v27 = vpop.permute.xlu1 %2883 }
 0xbce   : > { %13048 = vmatpush3.msra.mxu1 %v2884_v27 }
 0xbcf   : > { %13050 = vmatmul.mubr.msk.f32.vlgmr.msra.gmra.mxu1 %vm1310_vm1, %v2881_v28  ;;  %13057 = vmatprep.subr.mxu1 %v14613_v45  ;;  %v15381_v28 = vld [vmem:[#allocation9] ss:$0 sm:$0xff] }
 0xbd0   : > { %13058 = vmatpush3.msra.mxu1 %v15133_v52  ;;  %13059 = vmatprep.mubr.msk.f32.mxu1 %vm14614_vm3, %v14613_v45 }
 0xbd1   : > { %13067 = vmatprep.subr.mxu1 %v14613_v45  ;;  %v3106_v52 = vpop.permute.xlu1 %3105 }
 0xc80   : > { %v2789_v32 = vpop.f32.mrf.mxu1 }
 0xc81   : > { %13060 = vmatmul.mubr.msk.f32.vlgmr.msra.gmra.mxu1 %vm1310_vm1, %v2789_v32 }
 0xc82   : > { %v13041_v41 = vpop.f32.mrf.mxu1  ;;  %13069 = vmatprep.mubr.msk.f32.mxu1 %vm14614_vm3, %v14613_v45 }
 0xc8f   : > { %v2955_v10 = vpop.f32.mrf.mxu1 }
 0xc90   : > { %13055 = vmatmul.mubr.msk.f32.vlgmr.msra.gmra.mxu0 %vm1310_vm1, %v2955_v10 }
 0xc91   : > { %13063 = vmatpush3.xpose.msk.msra.mxu0 %vm1310_vm1, %v3108_v33  ;;  %v13051_v34 = vpop.f32.mrf.mxu1  ;;  %13064 = vmatprep.mubr.msk.f32.mxu0 %vm14614_vm3, %v14613_v45 }
 0xc92   : > { %13072 = vmatprep.subr.mxu0 %v14613_v45 }
 0xc94   : > { %13065 = vmatmul.mubr.msk.f32.vlgmr.msra.gmra.mxu0 %vm1310_vm1, %v3106_v52 }
 0xc95   : > { %13073 = vmatpush3.msra.mxu0 %v15241_v29  ;;  %13074 = vmatprep.mubr.msk.f32.mxu0 %vm14614_vm3, %v14613_v45 }
 0xc96   : > { %13082 = vmatprep.subr.mxu0 %v14613_v45 }
 0xd41   : > { %v3101_v39 = vpop.f32.mrf.mxu1 }
 0xd43   : > { %v13061_v35 = vpop.f32.mrf.mxu1 }
 0xd50   : > { %v3028_v40 = vpop.f32.mrf.mxu0 }
 0xd51   : > { %v3102_v42 = vadd.f32 %v3101_v39, %v3028_v40  ;;  %v2431_v40 = vadd.f32 %v15313_v16, %v15018_v4  ;;  %v3605_v16 = vld [vmem:[%s16700_s12 + $0x18] sm:$0xff] }
 0xd52   : > { %v13056_v43 = vpop.f32.mrf.mxu0 }
 0xd54   : > { %v3179_v44 = vpop.f32.mrf.mxu0 }
 0xd55   : > { %v3183_v48 = vsel %vm1310_vm1, %v3179_v44, -inf }
 0xd56   : > { %3184 = vmax.xlane.f32.xlu1 %v3183_v48  ;;  %v13066_v0 = vpop.f32.mrf.mxu0 }
 0xd67   : > { %3346 = vrot.lane.b32.xlu1 %v15248_v30, %s16781_s5 }
 0xd6b   : > { %3344 = vrot.lane.b32.xlu1 %v15255_v31, %s16776_s11 }
 0xddf   : > { %v3185_v29 = vpop.xlane.xlu1 %3184 }
 0xde0   : > { %v3186_v1 = vsub.f32 %v3179_v44, %v3185_v29  ;;  %v2439_v44 = vadd.f32 %v12237_v62, %v2431_v40 }
 0xde2   : > { %v3187_v49 = vmul.f32 1.442695, %v3186_v1  ;;  %v2443_v48 = vsel %vm1121_vm0, %v2439_v44, 0.0 }
 0xde3   : > { %v3347_v54 = vpop.permute.xlu1 %3346 }
 0xde4   : > { %13964 = vpow2.f32 %v3187_v49 }
 0xde7   : > { %v3345_v55 = vpop.permute.xlu1 %3344 }
 0xdf1   : > { %v13965_v51 = vpop.eup %13964 }
 0xdf2   : > { %v3189_v53 = vsel %vm1310_vm1, %v13965_v51, 0.0 }
 0xdf3   : > { %3190 = vadd.xlane.f32.xlu0 %v3189_v53 }
 0xe09   : > { %3194 = vrot.lane.b32.xlu0 %v15318_v12, %s16734_s9 }
 0xe7c   : > { %v3191_v15 = vpop.xlane.xlu0 %3190 }
 0xe7d   : > { %13966 = vrcp.f32 %v3191_v15 }
 0xe80   : > { %v3195_v2 = vpop.permute.xlu0 %3194 }
 0xe81   : > { %13068 = vmatpush3.msra.mxu1 %v3195_v2 }
 0xe82   : > { %13077 = vmatprep.subr.mxu1 %v14613_v45 }
 0xe8a   : > { %v13967_v30 = vpop.eup %13966 }
 0xe8b   : > { %v3193_v31 = vmul.f32 %v13967_v30, %v13965_v51  ;;  %v3604_v30 = vld [vmem:[%s16700_s12 + $0x10] sm:$0xff] }
 0xe8d   : > { %13070 = vmatmul.mubr.msk.f32.vlgmr.msra.gmra.mxu1 %vm1310_vm1, %v3193_v31  ;;  %v3602_v31 = vld [vmem:[%s16700_s12] sm:$0xff] }
 0xe8e   : > { %13078 = vmatpush3.xpose.msk.msra.mxu1 %vm1310_vm1, %v3347_v54  ;;  %13079 = vmatprep.mubr.msk.f32.mxu1 %vm14614_vm3, %v14613_v45  ;;  %v3603_v54 = vld [vmem:[%s16700_s12 + $0x8] sm:$0xff] }
 0xe8f   : > { %13087 = vmatprep.subr.mxu1 %v14613_v45 }
 0xe91   : > { %13080 = vmatmul.mubr.msk.f32.vlgmr.msra.gmra.mxu1 %vm1310_vm1, %v3345_v55  ;;  %v3771_v55 = vld [vmem:[%s16702_s14 + $0x18] sm:$0xff] }
 0xe92   : > { %13088 = vmatpush3.msra.mxu1 %v15283_v50  ;;  %13089 = vmatprep.mubr.msk.f32.mxu1 %vm14614_vm3, %v14613_v45 }
 0xe93   : > { %13103 = vmatprep.subr.mxu1 %v14613_v45 }
 0xf4d   : > { %v3266_v8 = vpop.f32.mrf.mxu1 }
 0xf4e   : > { %13075 = vmatmul.mubr.msk.f32.vlgmr.msra.gmra.mxu0 %vm1310_vm1, %v3266_v8 }
 0xf4f   : > { %v13071_v56 = vpop.f32.mrf.mxu1  ;;  %13084 = vmatprep.mubr.msk.f32.mxu0 %vm14614_vm3, %v14613_v45 }
 0xf51   : > { %v3418_v57 = vpop.f32.mrf.mxu1 }
 0xf52   : > { %v3422_v58 = vsel %vm1310_vm1, %v3418_v57, -inf }
 0xf53   : > { %3423 = vmax.xlane.f32.xlu0 %v3422_v58  ;;  %v13081_v59 = vpop.f32.mrf.mxu1 }
 0xf69   : > { %3433 = vrot.lane.b32.xlu0 %v15318_v12, %s16776_s11 }
 0xfdc   : > { %v3424_v50 = vpop.xlane.xlu0 %3423 }
 0xfdd   : > { %v3425_v60 = vsub.f32 %v3418_v57, %v3424_v50 }
 0xfdf   : > { %v3426_v19 = vmul.f32 1.442695, %v3425_v60 }
 0xfe0   : > { %v3434_v36 = vpop.permute.xlu0 %3433 }
 0xfe1   : > { %13968 = vpow2.f32 %v3426_v19  ;;  %13083 = vmatpush3.msra.mxu0 %v3434_v36 }
 0xfe2   : > { %13092 = vmatprep.subr.mxu0 %v3605_v16 }
 0xfee   : > { %v13969_v20 = vpop.eup %13968 }
 0xfef   : > { %v3428_v63 = vsel %vm1310_vm1, %v13969_v20, 0.0 }
 0xff0   : > { %3429 = vadd.xlane.f32.xlu1 %v3428_v63 }
 0xff4   : > { %2441 = vadd.xlane.f32.xlu1 %v2440_v6  ;;  %v3770_v6 = vld [vmem:[%s16702_s14 + $0x10] sm:$0xff] }
0x100e   : > { %v3339_v22 = vpop.f32.mrf.mxu0 }
0x100f   : > { %v3343_v7 = vadd.f32 %v3339_v22, %v3102_v42 }
0x1010   : > { %v13076_v9 = vpop.f32.mrf.mxu0 }
0x1011   : > { %v3769_v9 = vld [vmem:[%s16702_s14 + $0x8] sm:$0xff] }
0x1079   : > { %v3430_v11 = vpop.xlane.xlu1 %3429 }
0x107a   : > { %13970 = vrcp.f32 %v3430_v11  ;;  %v3768_v11 = vld [vmem:[%s16702_s14] sm:$0xff] }
0x107d   : > { %v2442_v13 = vpop.xlane.xlu1 %2441 }
0x107e   : > { %v2447_v17 = vmul.f32 0.03125, %v2442_v13 }
0x1080   : > { %v2449_v24 = vsub.f32 %v2438_v21, %v2447_v17 }
0x1082   : > { %v2451_v12 = vmul.f32 %v2449_v24, %v2449_v24 }
0x1084   : > { %v2453_v3 = vsel %vm1121_vm0, %v2451_v12, 0.0  ;;  %v12258_v12 = vld [vmem:[#allocation10] ss:$0 sm:$0xff] }
0x1085   : > { %2454 = vadd.xlane.f32.xlu0 %v2453_v3 }
0x1087   : > { %v13971_v23 = vpop.eup %13970 }
0x1088   : > { %v3432_v25 = vmul.f32 %v13971_v23, %v13969_v20 }
0x108a   : > { %13085 = vmatmul.mubr.msk.f32.vlgmr.msra.gmra.mxu0 %vm1310_vm1, %v3432_v25  ;;  %v15455_v25 = vld [vmem:[#allocation12] ss:$0 sm:$0xff] }
0x108b   : > { %13093 = vmatpush3.msra.mxu0 %v3605_v16 }
0x108c   : > { %13094 = vmatprep.subr.mxu0 %v3604_v30 }
0x108d   : > { %13095 = vmatpush3.msra.mxu0 %v3604_v30 }
0x108e   : > { %13096 = vmatprep.subr.mxu0 %v3603_v54 }
0x108f   : > { %13097 = vmatpush3.msra.mxu0 %v3603_v54 }
0x1090   : > { %13098 = vmatprep.subr.mxu0 %v3602_v31 }
0x1091   : > { %13099 = vmatpush3.msra.mxu0 %v3602_v31 }
0x1092   : > { %13114 = vmatprep.subr.mxu0 %v3771_v55 }
0x110e   : > { %v2455_v37 = vpop.xlane.xlu0 %2454 }
0x110f   : > { %v2459_v14 = vmul.f32 0.03125, %v2455_v37 }
0x1111   : > { %v2461_v26 = vadd.f32 1e-05, %v2459_v14 }
0x1113   : > { %13972 = vrsqrt.f32 %v2461_v26 }
0x1120   : > { %v13973_v18 = vpop.eup %13972 }
0x1121   : > { %v2465_v27 = vmul.f32 %v13973_v18, %v2449_v24 }
0x1123   : > { %v2473_v32 = vmul.f32 %v15379_v38, %v2465_v27 }
0x1125   : > { %v15385_v41 = vadd.f32 %v15381_v28, %v2473_v32 }
0x1127   : > { %v3600_v10 = vadd.f32 %v15385_v41, %v15021_v5 }
0x1129   : > { %13100 = vmatprep.mubr.msk.f32.mxu0 %vm1121_vm0, %v3600_v10 }
0x114a   : > { %v3505_v33 = vpop.f32.mrf.mxu0 }
0x114b   : > { %13090 = vmatmul.mubr.msk.f32.vlgmr.msra.gmra.mxu1 %vm1310_vm1, %v3505_v33 }
0x114c   : > { %v13086_v34 = vpop.f32.mrf.mxu0  ;;  %13111 = vmatprep.mubr.msk.f32.mxu1 %vm14614_vm3, %v14613_v45  ;;  %13104 = vmatpush3.msra.mxu1 %v3605_v16 }
0x114d   : > { %13105 = vmatprep.subr.mxu1 %v14613_v45 }
0x114e   : > { %13106 = vmatpush3.msra.mxu1 %v3604_v30 }
0x114f   : > { %13107 = vmatprep.subr.mxu1 %v14613_v45 }
0x1150   : > { %13108 = vmatpush3.msra.mxu1 %v3603_v54 }
0x1151   : > { %13109 = vmatprep.subr.mxu1 %v14613_v45 }
0x1152   : > { %13110 = vmatpush3.msra.mxu1 %v3602_v31 }
0x1153   : > { %13125 = vmatprep.subr.mxu1 %v14613_v45 }
0x120b   : > { %v3578_v52 = vpop.f32.mrf.mxu1 }
0x120c   : > { %v3582_v39 = vadd.f32 %v3578_v52, %v3343_v7  ;;  %v14152_v7 = vld [vmem:[%s14997_s28 + $0x8] sm:$0xff] }
0x120d   : > { %v13091_v35 = vpop.f32.mrf.mxu1 }
0x120e   : > { %v3583_v42 = vadd.f32 %v3582_v39, %v15212_v47 }
0x1210   : > { %v3584_v43 = vadd.f32 %v12237_v62, %v3583_v42 }
0x1212   : > { %v3585_v5 = vsel %vm1121_vm0, %v3584_v43, 0.0 }
0x1213   : > { %3586 = vadd.xlane.f32.xlu1 %v3585_v5 }
0x1217   : > { %2444 = vadd.xlane.f32.xlu1 %v2443_v48 }
0x129c   : > { %v3587_v0 = vpop.xlane.xlu1 %3586 }
0x129d   : > { %v3588_v29 = vmul.f32 0.03125, %v3587_v0 }
0x129f   : > { %v3589_v1 = vsub.f32 %v3584_v43, %v3588_v29 }
0x12a0   : > { %v2445_v49 = vpop.xlane.xlu1 %2444 }
0x12a1   : > { %v2448_v51 = vmul.f32 0.03125, %v2445_v49  ;;  %v3590_v53 = vmul.f32 %v3589_v1, %v3589_v1 }
0x12a3   : > { %v2450_v15 = vsub.f32 %v2439_v44, %v2448_v51  ;;  %v3591_v2 = vsel %vm1121_vm0, %v3590_v53, 0.0 }
0x12a4   : > { %3592 = vadd.xlane.f32.xlu1 %v3591_v2 }
0x12a5   : > { %v2452_v4 = vmul.f32 %v2450_v15, %v2450_v15 }
0x12a7   : > { %v2456_v47 = vsel %vm1121_vm0, %v2452_v4, 0.0 }
0x12a8   : > { %2457 = vadd.xlane.f32.xlu1 %v2456_v47 }
0x132d   : > { %v3593_v8 = vpop.xlane.xlu1 %3592 }
0x132e   : > { %v3594_v56 = vmul.f32 0.03125, %v3593_v8 }
0x1330   : > { %v3595_v57 = vadd.f32 1e-05, %v3594_v56 }
0x1331   : > { %v2458_v58 = vpop.xlane.xlu1 %2457 }
0x1332   : > { %13974 = vrsqrt.f32 %v3595_v57  ;;  %v2460_v59 = vmul.f32 0.03125, %v2458_v58 }
0x1334   : > { %v2462_v50 = vadd.f32 1e-05, %v2460_v59 }
0x1336   : > { %13976 = vrsqrt.f32 %v2462_v50 }
0x133f   : > { %v13975_v60 = vpop.eup %13974 }
0x1340   : > { %v3597_v19 = vmul.f32 %v13975_v60, %v3589_v1  ;;  %v15502_v1 = vld [vmem:[%s16704_s16 + $0x8] sm:$0xff] }
0x1342   : > { %v3598_v36 = vmul.f32 %v15379_v38, %v3597_v19 }
0x1343   : > { %v13977_v61 = vpop.eup %13976 }
0x1344   : > { %v2466_v20 = vmul.f32 %v13977_v61, %v2450_v15  ;;  %v15421_v62 = vadd.f32 %v15381_v28, %v3598_v36 }
0x1346   : > { %v3694_v63 = vadd.f32 %v15421_v62, %v15209_v46  ;;  %v2474_v21 = vmul.f32 %v15379_v38, %v2466_v20 }
0x1348   : > { %13112 = vmatmul.mubr.msk.f32.vlgmr.msra.gmra.mxu1 %vm1121_vm0, %v3694_v63  ;;  %v15431_v22 = vadd.f32 %v15381_v28, %v2474_v21 }
0x1349   : > { %13126 = vmatpush3.msra.mxu1 %v3771_v55  ;;  %13133 = vmatprep.mubr.msk.f32.mxu1 %vm14614_vm3, %v14613_v45 }
0x134a   : > { %13127 = vmatprep.subr.mxu1 %v14613_v45  ;;  %v3601_v46 = vadd.f32 %v14152_v7, %v15431_v22 }
0x134b   : > { %13128 = vmatpush3.msra.mxu1 %v3770_v6 }
0x134c   : > { %13129 = vmatprep.subr.mxu1 %v14613_v45  ;;  %13101 = vmatmul.mubr.msk.f32.vlgmr.msra.gmra.mxu0 %vm1121_vm0, %v3601_v46 }
0x134d   : > { %13115 = vmatpush3.msra.mxu0 %v3771_v55  ;;  %13130 = vmatpush3.msra.mxu1 %v3769_v9 }
0x134e   : > { %13116 = vmatprep.subr.mxu0 %v3770_v6  ;;  %13122 = vmatprep.mubr.msk.f32.mxu0 %vm1121_vm0, %v15385_v41 }
0x134f   : > { %13131 = vmatprep.subr.mxu1 %v14613_v45  ;;  %13117 = vmatpush3.msra.mxu0 %v3770_v6 }
0x1350   : > { %13132 = vmatpush3.msra.mxu1 %v3768_v11  ;;  %13118 = vmatprep.subr.mxu0 %v3769_v9 }
0x1351   : > { %13134 = vmatmul.mubr.msk.f32.vlgmr.msra.gmra.mxu1 %vm1121_vm0, %v15421_v62  ;;  %13119 = vmatpush3.msra.mxu0 %v3769_v9 }
0x1352   : > { %13120 = vmatprep.subr.mxu0 %v3768_v11 }
0x1353   : > { %13121 = vmatpush3.msra.mxu0 %v3768_v11 }
0x1354   : > { %13123 = vmatmul.mubr.msk.f32.vlgmr.msra.gmra.mxu0 %vm1121_vm0, %v15431_v22 }
0x1408   : > { %v3764_v13 = vpop.f32.mrf.mxu1 }
0x1409   : > { %v15468_v27 = vadd.f32 %v12258_v12, %v3764_v13 }
0x140a   : > { %v13113_v17 = vpop.f32.mrf.mxu1 }
0x140c   : > { %v13102_v24 = vpop.f32.mrf.mxu0 }
0x140d   : > { %v15476_v32 = vadd.f32 %v13102_v24, %v12258_v12 }
0x140e   : > { %v3685_v3 = vpop.f32.mrf.mxu0 }
0x140f   : > { %v15453_v23 = vadd.f32 %v12258_v12, %v3685_v3  ;;  %v15481_v10 = vmul.f32 0.35355338, %v15476_v32  ;;  %v15529_v3 = vld [vmem:[%s16704_s16] sm:$0xff] }
0x1411   : > { %v3929_v37 = vpop.f32.mrf.mxu1  ;;  %v15458_v14 = vmul.f32 0.35355338, %v15453_v23 }
0x1412   : > { %v15461_v26 = vadd.f32 %v15455_v25, %v3929_v37 }
0x1413   : > { %v13135_v18 = vpop.f32.mrf.mxu1  ;;  %4131 = vrot.lane.b32.xlu1 %v15458_v14, %s16779_s0  ;;  %13138 = vmatprep.mubr.msk.f32.mxu0 %vm1310_vm1, %v15458_v14 }
0x1414   : > { %13141 = vmatprep.subr.mxu1 %v15461_v26  ;;  %v13124_v38 = vpop.f32.mrf.mxu0 }
0x1415   : > { %v15471_v28 = vadd.f32 %v13124_v38, %v15455_v25  ;;  %13142 = vmatpush3.msra.mxu1 %v15461_v26 }
0x1416   : > { %v15493_v35 = vpop.f32.mrf.mxu0 }
0x1417   : > { %3943 = vrot.lane.b32.xlu1 %v15468_v27, %s16777_s30 }
0x141b   : > { %4135 = vrot.lane.b32.xlu1 %v15468_v27, %s16778_s2 }
0x141f   : > { %4133 = vrot.lane.b32.xlu1 %v15481_v10, %s16779_s0 }
0x1485   : > { %v4132_v33 = vpop.permute.xlu1 %4131 }
0x1489   : > { %v3944_v34 = vpop.permute.xlu1 %3943 }
0x148a   : > { %13136 = vmatprep.subr.msk.mxu0 %vm1310_vm1, %v3944_v34 }
0x148b   : > { %13137 = vmatpush3.xpose.msk.msra.mxu0 %vm1310_vm1, %v3944_v34 }
0x148d   : > { %v4136_v52 = vpop.permute.xlu1 %4135 }
0x148e   : > { %13139 = vmatmul.mubr.msk.f32.vlgmr.msra.gmra.mxu0 %vm1310_vm1, %v15481_v10  ;;  %13146 = vmatprep.subr.msk.mxu0 %vm1310_vm1, %v4136_v52 }
0x148f   : > { %13147 = vmatpush3.xpose.msk.msra.mxu0 %vm1310_vm1, %v4136_v52  ;;  %13148 = vmatprep.mubr.msk.f32.mxu0 %vm1310_vm1, %v4132_v33 }
0x1490   : > { %13156 = vmatprep.subr.mxu0 %v15502_v1 }
0x1491   : > { %v4134_v39 = vpop.permute.xlu1 %4133 }
0x1492   : > { %13149 = vmatmul.mubr.msk.f32.vlgmr.msra.gmra.mxu0 %vm1310_vm1, %v4134_v39 }
0x1493   : > { %13157 = vmatpush3.msra.mxu0 %v15502_v1 }
0x154e   : > { %v13140_v40 = vpop.f32.mrf.mxu0 }
0x154f   : > { %v4031_v42 = vsel %vm1310_vm1, %v13140_v40, -inf }
0x1550   : > { %4032 = vmax.xlane.f32.xlu1 %v4031_v42  ;;  %v4019_v43 = vpop.f32.mrf.mxu0 }
0x1551   : > { %v4028_v5 = vsel %vm1310_vm1, %v4019_v43, -inf }
0x1552   : > { %v13150_v44 = vpop.f32.mrf.mxu0  ;;  %4029 = vmax.xlane.f32.xlu0 %v4028_v5 }
0x1553   : > { %v4221_v29 = vsel %vm1310_vm1, %v13150_v44, -inf }
0x1554   : > { %v4209_v48 = vpop.f32.mrf.mxu0 }
0x1555   : > { %v4218_v0 = vsel %vm1310_vm1, %v4209_v48, -inf }
0x1556   : > { %4219 = vmax.xlane.f32.xlu0 %v4218_v0 }
0x155a   : > { %4222 = vmax.xlane.f32.xlu0 %v4221_v29 }
0x1561   : > { %4491 = vrot.lane.b32.xlu1 %v15468_v27, %s16780_s4 }
0x15d9   : > { %v4033_v49 = vpop.xlane.xlu1 %4032 }
0x15da   : > { %v4035_v51 = vsub.f32 %v13140_v40, %v4033_v49 }
0x15db   : > { %v4030_v53 = vpop.xlane.xlu0 %4029 }
0x15dc   : > { %v4038_v15 = vmul.f32 1.442695, %v4035_v51  ;;  %v4034_v2 = vsub.f32 %v4019_v43, %v4030_v53 }
0x15dd   : > { %v15508_v4 = vpop.permute.xlu1 %4491 }
0x15de   : > { %13978 = vpow2.f32 %v4038_v15  ;;  %v4036_v47 = vmul.f32 1.442695, %v4034_v2  ;;  %13166 = vmatprep.subr.msk.mxu0 %vm1310_vm1, %v15508_v4 }
0x15df   : > { %v4220_v16 = vpop.xlane.xlu0 %4219 }
0x15e0   : > { %13980 = vpow2.f32 %v4036_v47  ;;  %v4224_v30 = vsub.f32 %v4209_v48, %v4220_v16 }
0x15e2   : > { %v4226_v55 = vmul.f32 1.442695, %v4224_v30 }
0x15e3   : > { %v4223_v54 = vpop.xlane.xlu0 %4222 }
0x15e4   : > { %v4225_v31 = vsub.f32 %v13150_v44, %v4223_v54 }
0x15e6   : > { %v4228_v8 = vmul.f32 1.442695, %v4225_v31 }
0x15e8   : > { %13982 = vpow2.f32 %v4228_v8 }
0x15e9   : > { %13984 = vpow2.f32 %v4226_v55 }
0x15eb   : > { %v13979_v56 = vpop.eup %13978 }
0x15ec   : > { %v4043_v57 = vsel %vm1310_vm1, %v13979_v56, 0.0 }
0x15ed   : > { %v13981_v58 = vpop.eup %13980  ;;  %4044 = vadd.xlane.f32.xlu0 %v4043_v57 }
0x15ee   : > { %v4040_v59 = vsel %vm1310_vm1, %v13981_v58, 0.0 }
0x15f1   : > { %4041 = vadd.xlane.f32.xlu0 %v4040_v59 }
0x15f5   : > { %v13983_v50 = vpop.eup %13982 }
0x15f6   : > { %v4233_v60 = vsel %vm1310_vm1, %v13983_v50, 0.0  ;;  %v13985_v19 = vpop.eup %13984 }
0x15f7   : > { %4234 = vadd.xlane.f32.xlu0 %v4233_v60  ;;  %v4230_v36 = vsel %vm1310_vm1, %v13985_v19, 0.0 }
0x15fb   : > { %4231 = vadd.xlane.f32.xlu0 %v4230_v36 }
0x1611   : > { %4241 = vrot.lane.b32.xlu0 %v15461_v26, %s16779_s0 }
0x1615   : > { %4487 = vrot.lane.b32.xlu0 %v15458_v14, %s16782_s13 }
0x1619   : > { %4489 = vrot.lane.b32.xlu0 %v15481_v10, %s16782_s13 }
0x1676   : > { %v4045_v61 = vpop.xlane.xlu0 %4044 }
0x1677   : > { %13986 = vrcp.f32 %v4045_v61 }
0x167a   : > { %v4042_v20 = vpop.xlane.xlu0 %4041 }
0x167b   : > { %13988 = vrcp.f32 %v4042_v20 }
0x1680   : > { %v4235_v63 = vpop.xlane.xlu0 %4234 }
0x1681   : > { %13990 = vrcp.f32 %v4235_v63 }
0x1684   : > { %v4232_v21 = vpop.xlane.xlu0 %4231  ;;  %v13987_v6 = vpop.eup %13986 }
0x1685   : > { %13992 = vrcp.f32 %v4232_v21  ;;  %v4049_v11 = vmul.f32 %v13987_v6, %v13979_v56 }
0x1688   : > { %v13989_v7 = vpop.eup %13988  ;;  %v4242_v46 = vpop.permute.xlu0 %4241 }
0x1689   : > { %13151 = vmatprep.subr.mxu1 %v4242_v46  ;;  %v4048_v9 = vmul.f32 %v13989_v7, %v13981_v58 }
0x168b   : > { %13143 = vmatprep.mubr.msk.f32.mxu1 %vm1310_vm1, %v4048_v9 }
0x168c   : > { %13144 = vmatmul.mubr.msk.f32.vlgmr.msra.gmra.mxu1 %vm1310_vm1, %v4049_v11  ;;  %v4488_v33 = vpop.permute.xlu0 %4487 }
0x168d   : > { %13152 = vmatpush3.msra.mxu1 %v4242_v46 }
0x168e   : > { %v13991_v13 = vpop.eup %13990  ;;  %13161 = vmatprep.subr.mxu1 %v15529_v3 }
0x168f   : > { %v4239_v12 = vmul.f32 %v13991_v13, %v13983_v50  ;;  %v15566_v50 = vld [vmem:[%s16704_s16 + $0x10] sm:$0xff] }
0x1690   : > { %v4490_v52 = vpop.permute.xlu0 %4489 }
0x1692   : > { %v13993_v17 = vpop.eup %13992 }
0x1693   : > { %v4238_v24 = vmul.f32 %v13993_v17, %v13985_v19 }
0x1695   : > { %13153 = vmatprep.mubr.msk.f32.mxu1 %vm1310_vm1, %v4238_v24 }
0x1696   : > { %13154 = vmatmul.mubr.msk.f32.vlgmr.msra.gmra.mxu1 %vm1310_vm1, %v4239_v12 }
0x1697   : > { %13162 = vmatpush3.msra.mxu1 %v15529_v3 }
0x174c   : > { %v13145_v37 = vpop.f32.mrf.mxu1 }
0x174e   : > { %v4122_v18 = vpop.f32.mrf.mxu1 }
0x174f   : > { %13163 = vmatprep.mubr.msk.f32.mxu1 %vm1310_vm1, %v4122_v18 }
0x1750   : > { %13164 = vmatmul.mubr.msk.f32.vlgmr.msra.gmra.mxu1 %vm1310_vm1, %v13145_v37 }
0x1756   : > { %v13155_v38 = vpop.f32.mrf.mxu1 }
0x1758   : > { %v4316_v34 = vpop.f32.mrf.mxu1 }
0x1759   : > { %13158 = vmatprep.mubr.msk.f32.mxu0 %vm1310_vm1, %v4316_v34 }
0x175a   : > { %13159 = vmatmul.mubr.msk.f32.vlgmr.msra.gmra.mxu0 %vm1310_vm1, %v13155_v38 }
0x175b   : > { %13167 = vmatpush3.xpose.msk.msra.mxu0 %vm1310_vm1, %v15508_v4  ;;  %13168 = vmatprep.mubr.msk.f32.mxu0 %vm1310_vm1, %v4488_v33 }
0x175c   : > { %13176 = vmatprep.subr.mxu0 %v15566_v50 }
0x175e   : > { %13169 = vmatmul.mubr.msk.f32.vlgmr.msra.gmra.mxu0 %vm1310_vm1, %v4490_v52 }
0x175f   : > { %13177 = vmatpush3.msra.mxu0 %v15566_v50 }
0x1810   : > { %v13165_v39 = vpop.f32.mrf.mxu1 }
0x1812   : > { %v15570_v60 = vpop.f32.mrf.mxu1 }
0x181a   : > { %v13160_v40 = vpop.f32.mrf.mxu0 }
0x181b   : > { %v15541_v42 = vadd.f32 %v13165_v39, %v13160_v40 }
0x181c   : > { %v15543_v43 = vpop.f32.mrf.mxu0 }
0x181e   : > { %v13170_v5 = vpop.f32.mrf.mxu0 }
0x181f   : > { %v4577_v44 = vsel %vm1310_vm1, %v13170_v5, -inf }
0x1820   : > { %4578 = vmax.xlane.f32.xlu0 %v4577_v44  ;;  %v4565_v48 = vpop.f32.mrf.mxu0 }
0x1821   : > { %v4574_v0 = vsel %vm1310_vm1, %v4565_v48, -inf }
0x1822   : > { %4575 = vmax.xlane.f32.xlu1 %v4574_v0  ;;  %v15604_v0 = vld [vmem:[%s16704_s16 + $0x18] sm:$0xff] }
0x18a9   : > { %v4579_v29 = vpop.xlane.xlu0 %4578 }
0x18aa   : > { %v4581_v49 = vsub.f32 %v13170_v5, %v4579_v29 }
0x18ab   : > { %v4576_v51 = vpop.xlane.xlu1 %4575 }
0x18ac   : > { %v4584_v53 = vmul.f32 1.442695, %v4581_v49  ;;  %v4580_v15 = vsub.f32 %v4565_v48, %v4576_v51  ;;  %v15615_v51 = vadd.f32 %v15455_v25, %v15493_v35 }
0x18ae   : > { %13994 = vpow2.f32 %v4584_v53  ;;  %v4582_v2 = vmul.f32 1.442695, %v4580_v15 }
0x18b0   : > { %13996 = vpow2.f32 %v4582_v2 }
0x18bb   : > { %v13995_v4 = vpop.eup %13994 }
0x18bc   : > { %v4589_v47 = vsel %vm1310_vm1, %v13995_v4, 0.0 }
0x18bd   : > { %v13997_v16 = vpop.eup %13996  ;;  %4590 = vadd.xlane.f32.xlu1 %v4589_v47 }
0x18be   : > { %v4586_v30 = vsel %vm1310_vm1, %v13997_v16, 0.0 }
0x18bf   : > { %4587 = vadd.xlane.f32.xlu0 %v4586_v30 }
0x18ce   : > { %4767 = vrot.lane.b32.xlu1 %v15468_v27, %s16781_s5 }
0x18d2   : > { %4763 = vrot.lane.b32.xlu1 %v15458_v14, %s16776_s11 }
0x18d5   : > { %4596 = vrot.lane.b32.xlu0 %v15461_v26, %s16782_s13 }
0x18d9   : > { %4765 = vrot.lane.b32.xlu0 %v15481_v10, %s16776_s11 }
0x1946   : > { %v4591_v54 = vpop.xlane.xlu1 %4590 }
0x1947   : > { %13998 = vrcp.f32 %v4591_v54 }
0x1948   : > { %v4588_v31 = vpop.xlane.xlu0 %4587 }
0x1949   : > { %14000 = vrcp.f32 %v4588_v31 }
0x194a   : > { %v4768_v8 = vpop.permute.xlu1 %4767 }
0x194c   : > { %v4597_v55 = vpop.permute.xlu0 %4596 }
0x194d   : > { %13171 = vmatprep.subr.mxu1 %v4597_v55 }
0x194e   : > { %13172 = vmatpush3.msra.mxu1 %v4597_v55  ;;  %v4764_v59 = vpop.permute.xlu1 %4763 }
0x194f   : > { %13181 = vmatprep.subr.msk.mxu1 %vm1310_vm1, %v4768_v8 }
0x1950   : > { %v4766_v10 = vpop.permute.xlu0 %4765 }
0x1954   : > { %v13999_v56 = vpop.eup %13998 }
0x1955   : > { %v4595_v14 = vmul.f32 %v13999_v56, %v13995_v4 }
0x1956   : > { %v14001_v57 = vpop.eup %14000 }
0x1957   : > { %v4594_v58 = vmul.f32 %v14001_v57, %v13997_v16 }
0x1959   : > { %13173 = vmatprep.mubr.msk.f32.mxu1 %vm1310_vm1, %v4594_v58 }
0x195a   : > { %13174 = vmatmul.mubr.msk.f32.vlgmr.msra.gmra.mxu1 %vm1310_vm1, %v4595_v14 }
0x195b   : > { %13182 = vmatpush3.xpose.msk.msra.mxu1 %vm1310_vm1, %v4768_v8  ;;  %13183 = vmatprep.mubr.msk.f32.mxu1 %vm1310_vm1, %v4764_v59 }
0x195c   : > { %13191 = vmatprep.subr.mxu1 %v15604_v0 }
0x195e   : > { %13184 = vmatmul.mubr.msk.f32.vlgmr.msra.gmra.mxu1 %vm1310_vm1, %v4766_v10 }
0x195f   : > { %13192 = vmatpush3.msra.mxu1 %v15604_v0 }
0x1960   : > { %13203 = vmatprep.subr.mxu1 %v14613_v45 }
0x1a1a   : > { %v13175_v19 = vpop.f32.mrf.mxu1 }
0x1a1c   : > { %v4671_v36 = vpop.f32.mrf.mxu1 }
0x1a1d   : > { %13178 = vmatprep.mubr.msk.f32.mxu0 %vm1310_vm1, %v4671_v36 }
0x1a1e   : > { %13179 = vmatmul.mubr.msk.f32.vlgmr.msra.gmra.mxu0 %vm1310_vm1, %v13175_v19  ;;  %v13185_v61 = vpop.f32.mrf.mxu1 }
0x1a1f   : > { %v4853_v20 = vsel %vm1310_vm1, %v13185_v61, -inf }
0x1a20   : > { %4854 = vmax.xlane.f32.xlu0 %v4853_v20  ;;  %v4841_v63 = vpop.f32.mrf.mxu1 }
0x1a21   : > { %v4850_v21 = vsel %vm1310_vm1, %v4841_v63, -inf }
0x1a22   : > { %4851 = vmax.xlane.f32.xlu1 %v4850_v21 }
0x1aa9   : > { %v4855_v6 = vpop.xlane.xlu0 %4854 }
0x1aaa   : > { %v4857_v7 = vsub.f32 %v13185_v61, %v4855_v6 }
0x1aab   : > { %v4852_v46 = vpop.xlane.xlu1 %4851 }
0x1aac   : > { %v4860_v9 = vmul.f32 1.442695, %v4857_v7  ;;  %v4856_v11 = vsub.f32 %v4841_v63, %v4852_v46 }
0x1aae   : > { %14002 = vpow2.f32 %v4860_v9  ;;  %v4858_v13 = vmul.f32 1.442695, %v4856_v11 }
0x1ab0   : > { %14004 = vpow2.f32 %v4858_v13 }
0x1abb   : > { %v14003_v17 = vpop.eup %14002 }
0x1abc   : > { %v4865_v24 = vsel %vm1310_vm1, %v14003_v17, 0.0 }
0x1abd   : > { %v14005_v12 = vpop.eup %14004  ;;  %4866 = vadd.xlane.f32.xlu1 %v4865_v24 }
0x1abe   : > { %v4862_v37 = vsel %vm1310_vm1, %v14005_v12, 0.0 }
0x1abf   : > { %4863 = vadd.xlane.f32.xlu0 %v4862_v37 }
0x1ace   : > { %5096 = vrot.lane.b32.xlu1 %v15476_v32, %s16777_s30 }
0x1ad2   : > { %5094 = vrot.lane.b32.xlu1 %v15453_v23, %s16777_s30 }
0x1ad5   : > { %4872 = vrot.lane.b32.xlu0 %v15461_v26, %s16776_s11 }
0x1ade   : > { %v13180_v18 = vpop.f32.mrf.mxu0 }
0x1adf   : > { %v4762_v38 = vadd.f32 %v13180_v18, %v15541_v42  ;;  %v15594_v42 = vmul.f32 0.35355338, %v15468_v27 }
0x1ae0   : > { %v15609_v27 = vpop.f32.mrf.mxu0 }
0x1b46   : > { %v4867_v33 = vpop.xlane.xlu1 %4866 }
0x1b47   : > { %14006 = vrcp.f32 %v4867_v33 }
0x1b48   : > { %v4864_v34 = vpop.xlane.xlu0 %4863 }
0x1b49   : > { %14008 = vrcp.f32 %v4864_v34 }
0x1b4a   : > { %v5097_v44 = vpop.permute.xlu1 %5096 }
0x1b4c   : > { %v4873_v52 = vpop.permute.xlu0 %4872 }
0x1b4d   : > { %13186 = vmatprep.subr.mxu0 %v4873_v52 }
0x1b4e   : > { %13187 = vmatpush3.msra.mxu0 %v4873_v52  ;;  %v5095_v26 = vpop.permute.xlu1 %5094 }
0x1b4f   : > { %13196 = vmatprep.subr.mxu0 %v14613_v45 }
0x1b54   : > { %v14007_v39 = vpop.eup %14006 }
0x1b55   : > { %v4871_v48 = vmul.f32 %v14007_v39, %v14003_v17 }
0x1b56   : > { %v14009_v40 = vpop.eup %14008 }
0x1b57   : > { %v4870_v5 = vmul.f32 %v14009_v40, %v14005_v12 }
0x1b59   : > { %13188 = vmatprep.mubr.msk.f32.mxu0 %vm1310_vm1, %v4870_v5 }
0x1b5a   : > { %13189 = vmatmul.mubr.msk.f32.vlgmr.msra.gmra.mxu0 %vm1310_vm1, %v4871_v48 }
0x1b5b   : > { %13197 = vmatpush3.xpose.msk.msra.mxu0 %vm1310_vm1, %v5097_v44  ;;  %13200 = vmatprep.mubr.msk.f32.mxu0 %vm14614_vm3, %v14613_v45 }
0x1b5c   : > { %13198 = vmatprep.subr.mxu0 %v14613_v45 }
0x1b5f   : > { %13199 = vmatpush3.xpose.msk.msra.mxu0 %vm1310_vm1, %v5095_v26 }
0x1b60   : > { %13217 = vmatprep.subr.mxu0 %v14613_v45 }
0x1b62   : > { %13201 = vmatmul.mubr.msk.f32.vlgmr.msra.gmra.mxu0 %vm1310_vm1, %v15594_v42 }
0x1b63   : > { %13221 = vmatprep.mubr.msk.f32.mxu0 %vm14614_vm3, %v14613_v45 }
0x1c1a   : > { %v13190_v29 = vpop.f32.mrf.mxu0 }
0x1c1c   : > { %v4947_v49 = vpop.f32.mrf.mxu0 }
0x1c1d   : > { %13193 = vmatprep.mubr.msk.f32.mxu1 %vm1310_vm1, %v4947_v49 }
0x1c1e   : > { %13194 = vmatmul.mubr.msk.f32.vlgmr.msra.gmra.mxu1 %vm1310_vm1, %v13190_v29 }
0x1c1f   : > { %13204 = vmatpush3.msra.mxu1 %v15471_v28  ;;  %13207 = vmatprep.mubr.msk.f32.mxu1 %vm14614_vm3, %v14613_v45 }
0x1c20   : > { %13205 = vmatprep.subr.mxu1 %v14613_v45 }
0x1c21   : > { %13206 = vmatpush3.msra.mxu1 %v15615_v51 }
0x1c22   : > { %v5171_v53 = vpop.f32.mrf.mxu0  ;;  %13210 = vmatprep.subr.mxu1 %v14613_v45 }
0x1c23   : > { %v5175_v15 = vsel %vm1396_vm2, %v5171_v53, -inf }
0x1c24   : > { %5176 = vmax.xlane.f32.xlu0 %v5175_v15  ;;  %v13202_v2 = vpop.f32.mrf.mxu0 }
0x1c25   : > { %v4479_v2 = vadd.f32 %v15570_v60, %v15543_v43 }
0x1c3a   : > { %5263 = vrot.lane.b32.xlu0 %v15476_v32, %s16778_s2 }
0x1c3e   : > { %5259 = vrot.lane.b32.xlu0 %v15594_v42, %s16779_s0 }
0x1cad   : > { %v5177_v25 = vpop.xlane.xlu0 %5176 }
0x1cae   : > { %v5178_v35 = vsub.f32 %v5171_v53, %v5177_v25  ;;  %v4761_v25 = vadd.f32 %v15609_v27, %v4479_v2 }
0x1cb0   : > { %v5179_v4 = vmul.f32 1.442695, %v5178_v35 }
0x1cb1   : > { %v5264_v56 = vpop.permute.xlu0 %5263 }
0x1cb2   : > { %14010 = vpow2.f32 %v5179_v4 }
0x1cb5   : > { %v5260_v58 = vpop.permute.xlu0 %5259 }
0x1cbf   : > { %v14011_v47 = vpop.eup %14010 }
0x1cc0   : > { %v5181_v16 = vsel %vm1396_vm2, %v14011_v47, 0.0 }
0x1cc1   : > { %5182 = vadd.xlane.f32.xlu1 %v5181_v16 }
0x1cd2   : > { %5261 = vrot.lane.b32.xlu1 %v15453_v23, %s16778_s2 }
0x1cde   : > { %v13195_v30 = vpop.f32.mrf.mxu1 }
0x1cdf   : > { %v15631_v54 = vadd.f32 %v13195_v30, %v4762_v38 }
0x1ce0   : > { %v15645_v14 = vpop.f32.mrf.mxu1 }
0x1ce1   : > { %v5037_v35 = vadd.f32 %v15645_v14, %v4761_v25  ;;  %v5040_v16 = vadd.f32 %v15631_v54, %v15431_v22 }
0x1ce3   : > { %v5039_v4 = vadd.f32 %v5037_v35, %v15385_v41 }
0x1d4a   : > { %v5183_v31 = vpop.xlane.xlu1 %5182 }
0x1d4b   : > { %14012 = vrcp.f32 %v5183_v31 }
0x1d4e   : > { %v5262_v57 = vpop.permute.xlu1 %5261 }
0x1d58   : > { %v14013_v55 = vpop.eup %14012 }
0x1d59   : > { %v5185_v8 = vmul.f32 %v14013_v55, %v14011_v47  ;;  %v15705_v47 = vld [vmem:[#allocation13] ss:$0 sm:$0xff] }
0x1d5a   : > { %v5047_v30 = vadd.f32 %v15705_v47, %v5039_v4  ;;  %v5048_v55 = vadd.f32 %v15705_v47, %v5040_v16  ;;  %v15767_v4 = vld [vmem:[%s16710_s22 + $0x30] sm:$0xff] }
0x1d5b   : > { %13208 = vmatmul.mubr.msk.f32.vlgmr.msra.gmra.mxu1 %vm1396_vm2, %v5185_v8 }
0x1d5c   : > { %13211 = vmatpush3.xpose.msk.msra.mxu1 %vm1310_vm1, %v5264_v56  ;;  %13214 = vmatprep.mubr.msk.f32.mxu1 %vm14614_vm3, %v14613_v45  ;;  %v5049_v31 = vsel %vm1121_vm0, %v5047_v30, 0.0  ;;  %v5052_v43 = vsel %vm1121_vm0, %v5048_v55, 0.0 }
0x1d5d   : > { %13212 = vmatprep.subr.mxu1 %v14613_v45 }
0x1d60   : > { %13213 = vmatpush3.xpose.msk.msra.mxu1 %vm1310_vm1, %v5262_v57 }
0x1d61   : > { %13229 = vmatprep.subr.mxu1 %v14613_v45 }
0x1d63   : > { %13215 = vmatmul.mubr.msk.f32.vlgmr.msra.gmra.mxu1 %vm1310_vm1, %v5260_v58 }
0x1d64   : > { %13230 = vmatpush3.msra.mxu1 %v15529_v3  ;;  %13231 = vmatprep.mubr.msk.f32.mxu1 %vm14614_vm3, %v14613_v45 }
0x1d65   : > { %13241 = vmatprep.subr.mxu1 %v14613_v45 }
0x1e1b   : > { %v5255_v59 = vpop.f32.mrf.mxu1 }
0x1e1c   : > { %13232 = vmatmul.mubr.msk.f32.vlgmr.msra.gmra.mxu1 %vm1310_vm1, %v5255_v59 }
0x1e1d   : > { %v13209_v10 = vpop.f32.mrf.mxu1  ;;  %13245 = vmatprep.mubr.msk.f32.mxu1 %vm14614_vm3, %v14613_v45 }
0x1e23   : > { %v5337_v19 = vpop.f32.mrf.mxu1 }
0x1e24   : > { %v5341_v36 = vsel %vm1396_vm2, %v5337_v19, -inf }
0x1e25   : > { %5342 = vmax.xlane.f32.xlu1 %v5341_v36  ;;  %v13216_v61 = vpop.f32.mrf.mxu1 }
0x1e36   : > { %5354 = vrot.lane.b32.xlu1 %v15615_v51, %s16779_s0 }
0x1e3a   : > { %5583 = vrot.lane.b32.xlu1 %v15476_v32, %s16780_s4 }
0x1e3e   : > { %5579 = vrot.lane.b32.xlu1 %v15594_v42, %s16782_s13 }
0x1e42   : > { %5827 = vrot.lane.b32.xlu1 %v15453_v23, %s16781_s5 }
0x1eae   : > { %v5343_v3 = vpop.xlane.xlu1 %5342 }
0x1eaf   : > { %v5344_v20 = vsub.f32 %v5337_v19, %v5343_v3 }
0x1eb1   : > { %v5345_v63 = vmul.f32 1.442695, %v5344_v20 }
0x1eb2   : > { %v5355_v13 = vpop.permute.xlu1 %5354 }
0x1eb3   : > { %14014 = vpow2.f32 %v5345_v63 }
0x1eb6   : > { %v5584_v24 = vpop.permute.xlu1 %5583 }
0x1ec0   : > { %v14015_v21 = vpop.eup %14014 }
0x1ec1   : > { %v5347_v6 = vsel %vm1396_vm2, %v14015_v21, 0.0 }
0x1ec2   : > { %5348 = vadd.xlane.f32.xlu0 %v5347_v6  ;;  %v6091_v6 = vld [vmem:[#allocation18 + $0x18] sm:$0xff] }
0x1ed8   : > { %5356 = vrot.lane.b32.xlu0 %v15471_v28, %s16779_s0 }
0x1edc   : > { %5581 = vrot.lane.b32.xlu0 %v15453_v23, %s16780_s4  ;;  %v15664_v7 = vpop.f32.mrf.mxu1 }
0x1ede   : > { %v13233_v46 = vpop.f32.mrf.mxu1 }
0x1edf   : > { %v6090_v46 = vld [vmem:[#allocation18 + $0x10] sm:$0xff] }
0x1ee0   : > { %5829 = vrot.lane.b32.xlu0 %v15476_v32, %s16781_s5 }
0x1ee4   : > { %5825 = vrot.lane.b32.xlu0 %v15594_v42, %s16776_s11 }
0x1f4b   : > { %v5349_v9 = vpop.xlane.xlu0 %5348 }
0x1f4c   : > { %14016 = vrcp.f32 %v5349_v9  ;;  %v6089_v9 = vld [vmem:[#allocation18 + $0x8] sm:$0xff] }
0x1f4f   : > { %v5357_v11 = vpop.permute.xlu0 %5356 }
0x1f50   : > { %13218 = vmatpush3.msra.mxu0 %v5357_v11  ;;  %v6088_v11 = vld [vmem:[#allocation18] sm:$0xff] }
0x1f51   : > { %13219 = vmatprep.subr.mxu0 %v14613_v45 }
0x1f52   : > { %13220 = vmatpush3.msra.mxu0 %v5355_v13 }
0x1f53   : > { %13224 = vmatprep.subr.mxu0 %v14613_v45  ;;  %v5582_v37 = vpop.permute.xlu0 %5581 }
0x1f57   : > { %v5830_v18 = vpop.permute.xlu0 %5829 }
0x1f59   : > { %v14017_v23 = vpop.eup %14016 }
0x1f5a   : > { %v5351_v17 = vmul.f32 %v14017_v23, %v14015_v21 }
0x1f5b   : > { %v5826_v33 = vpop.permute.xlu0 %5825 }
0x1f5c   : > { %13222 = vmatmul.mubr.msk.f32.vlgmr.msra.gmra.mxu0 %vm1396_vm2, %v5351_v17 }
0x1f5d   : > { %13225 = vmatpush3.msra.mxu0 %v15502_v1  ;;  %13226 = vmatprep.mubr.msk.f32.mxu0 %vm14614_vm3, %v14613_v45  ;;  %v5580_v1 = vpop.permute.xlu1 %5579 }
0x1f5e   : > { %13234 = vmatprep.subr.mxu0 %v14613_v45 }
0x1f61   : > { %v5828_v38 = vpop.permute.xlu1 %5827 }
0x201c   : > { %v5429_v32 = vpop.f32.mrf.mxu0 }
0x201d   : > { %13227 = vmatmul.mubr.msk.f32.vlgmr.msra.gmra.mxu0 %vm1310_vm1, %v5429_v32 }
0x201e   : > { %13235 = vmatpush3.xpose.msk.msra.mxu0 %vm1310_vm1, %v5584_v24  ;;  %v13223_v12 = vpop.f32.mrf.mxu0  ;;  %13238 = vmatprep.mubr.msk.f32.mxu0 %vm14614_vm3, %v14613_v45 }
0x201f   : > { %13236 = vmatprep.subr.mxu0 %v14613_v45 }
0x2022   : > { %13237 = vmatpush3.xpose.msk.msra.mxu0 %vm1310_vm1, %v5582_v37 }
0x2023   : > { %13253 = vmatprep.subr.mxu0 %v14613_v45 }
0x2025   : > { %13239 = vmatmul.mubr.msk.f32.vlgmr.msra.gmra.mxu0 %vm1310_vm1, %v5580_v1 }
0x2026   : > { %13254 = vmatpush3.xpose.msk.msra.mxu0 %vm1310_vm1, %v5830_v18  ;;  %13257 = vmatprep.mubr.msk.f32.mxu0 %vm14614_vm3, %v14613_v45 }
0x2027   : > { %13255 = vmatprep.subr.mxu0 %v14613_v45 }
0x202a   : > { %13256 = vmatpush3.xpose.msk.msra.mxu0 %vm1310_vm1, %v5828_v38 }
0x202b   : > { %13272 = vmatprep.subr.mxu0 %v6091_v6 }
0x202d   : > { %13258 = vmatmul.mubr.msk.f32.vlgmr.msra.gmra.mxu0 %vm1310_vm1, %v5826_v33  ;;  %v15733_v33 = vld [vmem:[#allocation15] ss:$0 sm:$0xff] }
0x202e   : > { %13273 = vmatpush3.msra.mxu0 %v6091_v6 }
0x202f   : > { %13274 = vmatprep.subr.mxu0 %v6090_v46 }
0x2030   : > { %13275 = vmatpush3.msra.mxu0 %v6090_v46 }
0x2031   : > { %13276 = vmatprep.subr.mxu0 %v6089_v9 }
0x2032   : > { %13277 = vmatpush3.msra.mxu0 %v6089_v9 }
0x2033   : > { %13278 = vmatprep.subr.mxu0 %v6088_v11 }
0x2034   : > { %13279 = vmatpush3.msra.mxu0 %v6088_v11 }
0x2035   : > { %13302 = vmatprep.subr.mxu0 %v14613_v45 }
0x20dd   : > { %v15691_v34 = vpop.f32.mrf.mxu0 }
0x20df   : > { %v13228_v52 = vpop.f32.mrf.mxu0 }
0x20e5   : > { %v5657_v39 = vpop.f32.mrf.mxu0 }
0x20e6   : > { %v5661_v40 = vsel %vm1396_vm2, %v5657_v39, -inf }
0x20e7   : > { %5662 = vmax.xlane.f32.xlu1 %v5661_v40  ;;  %v13240_v5 = vpop.f32.mrf.mxu0 }
0x20e8   : > { %v15735_v5 = vld [vmem:[#allocation16] ss:$0 sm:$0xff] }
0x20ed   : > { %v5903_v44 = vpop.f32.mrf.mxu0 }
0x20ee   : > { %v5907_v26 = vsel %vm1396_vm2, %v5903_v44, -inf }
0x20ef   : > { %v13259_v48 = vpop.f32.mrf.mxu0 }
0x20f8   : > { %5672 = vrot.lane.b32.xlu1 %v15615_v51, %s16782_s13 }
0x211c   : > { %5908 = vmax.xlane.f32.xlu1 %v5907_v26 }
0x2170   : > { %v5663_v42 = vpop.xlane.xlu1 %5662 }
0x2171   : > { %v5664_v29 = vsub.f32 %v5657_v39, %v5663_v42 }
0x2173   : > { %v5665_v49 = vmul.f32 1.442695, %v5664_v29 }
0x2174   : > { %v5673_v41 = vpop.permute.xlu1 %5672 }
0x2175   : > { %14018 = vpow2.f32 %v5665_v49 }
0x2182   : > { %v14019_v53 = vpop.eup %14018 }
0x2183   : > { %v5667_v15 = vsel %vm1396_vm2, %v14019_v53, 0.0 }
0x2184   : > { %5668 = vadd.xlane.f32.xlu0 %v5667_v15 }
0x219a   : > { %5674 = vrot.lane.b32.xlu0 %v15471_v28, %s16782_s13 }
0x21a5   : > { %v5909_v8 = vpop.xlane.xlu1 %5908 }
0x21a6   : > { %v5910_v56 = vsub.f32 %v5903_v44, %v5909_v8  ;;  %v15813_v8 = vld [vmem:[%s16710_s22] sm:$0xff] }
0x21a8   : > { %v5911_v57 = vmul.f32 1.442695, %v5910_v56 }
0x21b9   : > { %5050 = vadd.xlane.f32.xlu0 %v5049_v31 }
0x21bd   : > { %5053 = vadd.xlane.f32.xlu0 %v5052_v43  ;;  %v15797_v43 = vld [vmem:[%s16710_s22 + $0x10] sm:$0xff] }
0x220d   : > { %v5669_v60 = vpop.xlane.xlu0 %5668 }
0x220e   : > { %14020 = vrcp.f32 %v5669_v60 }
0x220f   : > { %14022 = vpow2.f32 %v5911_v57 }
0x2211   : > { %v5675_v27 = vpop.permute.xlu0 %5674 }
0x2212   : > { %13242 = vmatpush3.msra.mxu1 %v5675_v27 }
0x2213   : > { %13243 = vmatprep.subr.mxu1 %v14613_v45 }
0x2214   : > { %13244 = vmatpush3.msra.mxu1 %v5673_v41  ;;  %v15805_v41 = vld [vmem:[%s16710_s22 + $0x8] sm:$0xff] }
0x2215   : > { %13248 = vmatprep.subr.mxu1 %v14613_v45 }
0x221b   : > { %v14021_v22 = vpop.eup %14020 }
0x221c   : > { %v5671_v54 = vmul.f32 %v14021_v22, %v14019_v53  ;;  %v14023_v20 = vpop.eup %14022  ;;  %v5576_v53 = vadd.f32 %v15664_v7, %v15691_v34  ;;  %v15781_v7 = vld [vmem:[%s16710_s22 + $0x20] sm:$0xff]  ;;  %v15788_v34 = vld [vmem:[%s16710_s22 + $0x18] sm:$0xff] }
0x221d   : > { %v5913_v21 = vsel %vm1396_vm2, %v14023_v20, 0.0 }
0x221e   : > { %13246 = vmatmul.mubr.msk.f32.vlgmr.msra.gmra.mxu1 %vm1396_vm2, %v5671_v54 }
0x221f   : > { %13249 = vmatpush3.msra.mxu1 %v15566_v50  ;;  %13250 = vmatprep.mubr.msk.f32.mxu1 %vm14614_vm3, %v14613_v45 }
0x2220   : > { %13260 = vmatprep.subr.mxu1 %v14613_v45 }
0x2242   : > { %v5051_v58 = vpop.xlane.xlu0 %5050 }
0x2243   : > { %v5055_v14 = vmul.f32 0.03125, %v5051_v58 }
0x2245   : > { %v5057_v59 = vsub.f32 %v5047_v30, %v5055_v14  ;;  %v15774_v30 = vld [vmem:[%s16710_s22 + $0x28] sm:$0xff] }
0x2246   : > { %v5054_v10 = vpop.xlane.xlu0 %5053 }
0x2247   : > { %v5056_v19 = vmul.f32 0.03125, %v5054_v10  ;;  %v5059_v36 = vmul.f32 %v5057_v59, %v5057_v59 }
0x2249   : > { %v5058_v61 = vsub.f32 %v5048_v55, %v5056_v19  ;;  %v5061_v3 = vsel %vm1121_vm0, %v5059_v36, 0.0  ;;  %v15792_v55 = vld [vmem:[#allocation19] ss:$0 sm:$0xff] }
0x224a   : > { %5062 = vadd.xlane.f32.xlu1 %v5061_v3 }
0x224b   : > { %v5060_v50 = vmul.f32 %v5058_v61, %v5058_v61 }
0x224d   : > { %v5064_v63 = vsel %vm1121_vm0, %v5060_v50, 0.0 }
0x224e   : > { %5065 = vadd.xlane.f32.xlu0 %v5064_v63  ;;  %5914 = vadd.xlane.f32.xlu1 %v5913_v21 }
0x225f   : > { %5918 = vrot.lane.b32.xlu1 %v15615_v51, %s16776_s11 }
0x2264   : > { %5920 = vrot.lane.b32.xlu0 %v15471_v28, %s16776_s11 }
0x22d3   : > { %v5063_v13 = vpop.xlane.xlu1 %5062 }
0x22d4   : > { %v5067_v23 = vmul.f32 0.03125, %v5063_v13 }
0x22d6   : > { %v5069_v51 = vadd.f32 1e-05, %v5067_v23 }
0x22d7   : > { %v5066_v17 = vpop.xlane.xlu0 %5065  ;;  %v5915_v32 = vpop.xlane.xlu1 %5914 }
0x22d8   : > { %14024 = vrsqrt.f32 %v5069_v51  ;;  %v5068_v28 = vmul.f32 0.03125, %v5066_v17 }
0x22d9   : > { %14026 = vrcp.f32 %v5915_v32 }
0x22da   : > { %v5070_v24 = vadd.f32 1e-05, %v5068_v28 }
0x22db   : > { %v5921_v37 = vpop.permute.xlu0 %5920  ;;  %v5919_v18 = vpop.permute.xlu1 %5918 }
0x22dc   : > { %14028 = vrsqrt.f32 %v5070_v24 }
0x22de   : > { %v5747_v12 = vpop.f32.mrf.mxu1 }
0x22df   : > { %13251 = vmatmul.mubr.msk.f32.vlgmr.msra.gmra.mxu1 %vm1310_vm1, %v5747_v12 }
0x22e0   : > { %13261 = vmatpush3.msra.mxu1 %v5921_v37  ;;  %v13247_v1 = vpop.f32.mrf.mxu1  ;;  %13264 = vmatprep.mubr.msk.f32.mxu1 %vm14614_vm3, %v14613_v45 }
0x22e1   : > { %13262 = vmatprep.subr.mxu1 %v14613_v45 }
0x22e2   : > { %13263 = vmatpush3.msra.mxu1 %v5919_v18 }
0x22e3   : > { %13267 = vmatprep.subr.mxu1 %v14613_v45 }
0x22e5   : > { %v14025_v38 = vpop.eup %14024 }
0x22e6   : > { %v14027_v52 = vpop.eup %14026  ;;  %v5073_v39 = vmul.f32 %v14025_v38, %v5057_v59  ;;  %v15821_v59 = vld [vmem:[#allocation21] ss:$0 sm:$0xff]  ;;  %v15837_v38 = vld [vmem:[%s16770_s29 + $0x38] sm:$0xff] }
0x22e7   : > { %v5917_v40 = vmul.f32 %v14027_v52, %v14023_v20  ;;  %v15842_v52 = vld [vmem:[%s16770_s29 + $0x30] sm:$0xff] }
0x22e8   : > { %v5081_v44 = vmul.f32 %v15733_v33, %v5073_v39  ;;  %v15849_v39 = vld [vmem:[%s16770_s29 + $0x28] sm:$0xff] }
0x22e9   : > { %v14029_v48 = vpop.eup %14028  ;;  %13265 = vmatmul.mubr.msk.f32.vlgmr.msra.gmra.mxu1 %vm1396_vm2, %v5917_v40  ;;  %v15856_v40 = vld [vmem:[%s16770_s29 + $0x20] sm:$0xff] }
0x22ea   : > { %v15740_v26 = vadd.f32 %v15735_v5, %v5081_v44  ;;  %v5074_v42 = vmul.f32 %v14029_v48, %v5058_v61  ;;  %13268 = vmatpush3.msra.mxu1 %v15604_v0  ;;  %13269 = vmatprep.mubr.msk.f32.mxu1 %vm14614_vm3, %v14613_v45  ;;  %v15759_v0 = vld [vmem:[%s16710_s22 + $0x38] sm:$0xff] }
0x22eb   : > { %13283 = vmatprep.subr.mxu1 %v15759_v0  ;;  %v15865_v44 = vld [vmem:[%s16771_s10 + $0x38] sm:$0xff] }
0x22ec   : > { %13280 = vmatprep.mubr.msk.f32.mxu0 %vm1121_vm0, %v15740_v26  ;;  %v5082_v29 = vmul.f32 %v15733_v33, %v5074_v42 }
0x22ee   : > { %v5090_v49 = vadd.f32 %v15735_v5, %v5082_v29 }
0x22f0   : > { %13281 = vmatmul.mubr.msk.f32.vlgmr.msra.gmra.mxu0 %vm1121_vm0, %v5090_v49 }
0x22f1   : > { %13303 = vmatpush3.msra.mxu0 %v6091_v6  ;;  %13310 = vmatprep.mubr.msk.f32.mxu0 %vm14614_vm3, %v14613_v45 }
0x22f2   : > { %13304 = vmatprep.subr.mxu0 %v14613_v45 }
0x22f3   : > { %13305 = vmatpush3.msra.mxu0 %v6090_v46 }
0x22f4   : > { %13306 = vmatprep.subr.mxu0 %v14613_v45 }
0x22f5   : > { %13307 = vmatpush3.msra.mxu0 %v6089_v9 }
0x22f6   : > { %13308 = vmatprep.subr.mxu0 %v14613_v45 }
0x22f7   : > { %13309 = vmatpush3.msra.mxu0 %v6088_v11 }
0x22f8   : > { %13313 = vmatprep.subr.mxu0 %v14613_v45 }
0x239f   : > { %v5820_v15 = vpop.f32.mrf.mxu1 }
0x23a0   : > { %v5824_v2 = vadd.f32 %v5820_v15, %v5576_v53 }
0x23a1   : > { %v13252_v25 = vpop.f32.mrf.mxu1 }
0x23a9   : > { %v5993_v35 = vpop.f32.mrf.mxu1 }
0x23aa   : > { %13270 = vmatmul.mubr.msk.f32.vlgmr.msra.gmra.mxu1 %vm1310_vm1, %v5993_v35 }
0x23ab   : > { %13284 = vmatpush3.msra.mxu1 %v15759_v0  ;;  %v13266_v16 = vpop.f32.mrf.mxu1 }
0x23ac   : > { %13285 = vmatprep.subr.mxu1 %v15767_v4  ;;  %v15868_v16 = vld [vmem:[#allocation22] ss:$0 sm:$0xff] }
0x23ad   : > { %13286 = vmatpush3.msra.mxu1 %v15767_v4 }
0x23ae   : > { %13287 = vmatprep.subr.mxu1 %v15774_v30 }
0x23af   : > { %13288 = vmatpush3.msra.mxu1 %v15774_v30 }
0x23b0   : > { %13289 = vmatprep.subr.mxu1 %v15781_v7  ;;  %v13282_v31 = vpop.f32.mrf.mxu0 }
0x23b1   : > { %13290 = vmatpush3.msra.mxu1 %v15781_v7  ;;  %v6188_v22 = vadd.f32 %v13282_v31, %v15792_v55 }
0x23b2   : > { %13291 = vmatprep.subr.mxu1 %v15788_v34  ;;  %v6182_v60 = vpop.f32.mrf.mxu0 }
0x23b3   : > { %13292 = vmatpush3.msra.mxu1 %v15788_v34  ;;  %v6183_v27 = vadd.f32 %v15792_v55, %v6182_v60  ;;  %v6192_v56 = vmax.f32 %v6188_v22, 0.0 }
0x23b4   : > { %13293 = vmatprep.subr.mxu1 %v15797_v43 }
0x23b5   : > { %v6191_v54 = vmax.f32 %v6183_v27, 0.0  ;;  %13294 = vmatpush3.msra.mxu1 %v15797_v43  ;;  %v15870_v27 = vld [vmem:[#allocation24] ss:$0 sm:$0xff] }
0x23b6   : > { %13295 = vmatprep.subr.mxu1 %v15805_v41 }
0x23b7   : > { %13296 = vmatpush3.msra.mxu1 %v15805_v41  ;;  %13299 = vmatprep.mubr.msk.f32.mxu1 %vm6199_vm4, %v6191_v54 }
0x23b8   : > { %13297 = vmatprep.subr.mxu1 %v15813_v8 }
0x23b9   : > { %13298 = vmatpush3.msra.mxu1 %v15813_v8 }
0x23ba   : > { %13300 = vmatmul.mubr.msk.f32.vlgmr.msra.gmra.mxu1 %vm6199_vm4, %v6192_v56  ;;  %13332 = vmatprep.subr.mxu1 %v15837_v38 }
0x23bb   : > { %13333 = vmatpush3.msra.mxu1 %v15837_v38 }
0x23bc   : > { %13334 = vmatprep.subr.mxu1 %v15842_v52 }
0x23bd   : > { %13335 = vmatpush3.msra.mxu1 %v15842_v52 }
0x23be   : > { %13336 = vmatprep.subr.mxu1 %v15849_v39 }
0x23bf   : > { %13337 = vmatpush3.msra.mxu1 %v15849_v39 }
0x23c0   : > { %13338 = vmatprep.subr.mxu1 %v15856_v40 }
0x23c1   : > { %13339 = vmatpush3.msra.mxu1 %v15856_v40 }
0x23c2   : > { %13343 = vmatprep.subr.mxu1 %v15865_v44 }
0x246a   : > { %v6066_v57 = vpop.f32.mrf.mxu1 }
0x246b   : > { %v6070_v14 = vadd.f32 %v6066_v57, %v5824_v2 }
0x246c   : > { %v13271_v58 = vpop.f32.mrf.mxu1 }
0x246d   : > { %v6071_v19 = vadd.f32 %v6070_v14, %v15421_v62 }
0x246f   : > { %v6072_v21 = vadd.f32 %v15705_v47, %v6071_v19  ;;  %v15881_v19 = vld [vmem:[%s14997_s28] sm:$0xff] }
0x2471   : > { %v6073_v46 = vsel %vm1121_vm0, %v6072_v21, 0.0 }
0x247a   : > { %v13301_v10 = vpop.f32.mrf.mxu1 }
0x247b   : > { %v6278_v36 = vadd.f32 %v13301_v10, %v15821_v59 }
0x247c   : > { %v6272_v61 = vpop.f32.mrf.mxu1 }
0x247d   : > { %v6282_v3 = vadd.f32 %v6278_v36, %v5090_v49  ;;  %v6273_v20 = vadd.f32 %v15821_v59, %v6272_v61 }
0x247f   : > { %v6281_v50 = vadd.f32 %v6273_v20, %v15740_v26  ;;  %v6286_v63 = vsel %vm1121_vm0, %v6282_v3, 0.0 }
0x2480   : > { %6287 = vadd.xlane.f32.xlu0 %v6286_v63  ;;  %v15895_v63 = vld [vmem:[%s16771_s10 + $0x30] sm:$0xff] }
0x2481   : > { %v6283_v6 = vsel %vm1121_vm0, %v6281_v50, 0.0 }
0x2482   : > { %6284 = vadd.xlane.f32.xlu1 %v6283_v6 }
0x2484   : > { %6074 = vadd.xlane.f32.xlu0 %v6073_v46  ;;  %v15955_v46 = vld [vmem:[#allocation4 + $0x1] ss:$0 sm:$0xff] }
0x2509   : > { %v6288_v62 = vpop.xlane.xlu0 %6287 }
0x250a   : > { %v6290_v9 = vmul.f32 0.03125, %v6288_v62 }
0x250b   : > { %v6285_v11 = vpop.xlane.xlu1 %6284 }
0x250c   : > { %v6292_v13 = vsub.f32 %v6282_v3, %v6290_v9  ;;  %v6289_v23 = vmul.f32 0.03125, %v6285_v11  ;;  %v14154_v3 = vld [vmem:[%s14997_s28 + $0x8] sm:$0xff] }
0x250d   : > { %v6075_v51 = vpop.xlane.xlu0 %6074 }
0x250e   : > { %v6291_v17 = vsub.f32 %v6281_v50, %v6289_v23  ;;  %v6076_v32 = vmul.f32 0.03125, %v6075_v51  ;;  %v6294_v28 = vmul.f32 %v6292_v13, %v6292_v13 }
0x2510   : > { %v6077_v24 = vsub.f32 %v6072_v21, %v6076_v32  ;;  %v6298_v12 = vsel %vm1121_vm0, %v6294_v28, 0.0  ;;  %v6293_v47 = vmul.f32 %v6291_v17, %v6291_v17 }
0x2511   : > { %6299 = vadd.xlane.f32.xlu0 %v6298_v12 }
0x2512   : > { %v6295_v37 = vsel %vm1121_vm0, %v6293_v47, 0.0  ;;  %v6078_v1 = vmul.f32 %v6077_v24, %v6077_v24 }
0x2513   : > { %6296 = vadd.xlane.f32.xlu1 %v6295_v37 }
0x2514   : > { %v6079_v18 = vsel %vm1121_vm0, %v6078_v1, 0.0 }
0x2517   : > { %6080 = vadd.xlane.f32.xlu1 %v6079_v18 }
0x259a   : > { %v6300_v48 = vpop.xlane.xlu0 %6299 }
0x259b   : > { %v6302_v26 = vmul.f32 0.03125, %v6300_v48 }
0x259c   : > { %v6297_v42 = vpop.xlane.xlu1 %6296 }
0x259d   : > { %v6304_v29 = vadd.f32 1e-05, %v6302_v26  ;;  %v6301_v49 = vmul.f32 0.03125, %v6297_v42 }
0x259f   : > { %14030 = vrsqrt.f32 %v6304_v29  ;;  %v6303_v53 = vadd.f32 1e-05, %v6301_v49 }
0x25a0   : > { %v6081_v15 = vpop.xlane.xlu1 %6080 }
0x25a1   : > { %14032 = vrsqrt.f32 %v6303_v53  ;;  %v6082_v2 = vmul.f32 0.03125, %v6081_v15 }
0x25a3   : > { %v6083_v25 = vadd.f32 1e-05, %v6082_v2 }
0x25a5   : > { %14034 = vrsqrt.f32 %v6083_v25 }
0x25ac   : > { %v14031_v35 = vpop.eup %14030 }
0x25ad   : > { %v6308_v31 = vmul.f32 %v14031_v35, %v6292_v13 }
0x25ae   : > { %v14033_v60 = vpop.eup %14032 }
0x25af   : > { %v6307_v22 = vmul.f32 %v14033_v60, %v6291_v17  ;;  %v6316_v54 = vmul.f32 %v15868_v16, %v6308_v31 }
0x25b1   : > { %v6315_v56 = vmul.f32 %v15868_v16, %v6307_v22  ;;  %v15875_v58 = vadd.f32 %v15870_v27, %v6316_v54 }
0x25b2   : > { %v14035_v57 = vpop.eup %14034 }
0x25b3   : > { %v15878_v14 = vadd.f32 %v15870_v27, %v6315_v56  ;;  %v6085_v10 = vmul.f32 %v14035_v57, %v6077_v24  ;;  %v6489_v20 = vadd.f32 %v14154_v3, %v15875_v58 }
0x25b5   : > { %v6488_v36 = vadd.f32 %v15881_v19, %v15878_v14  ;;  %v6086_v61 = vmul.f32 %v15733_v33, %v6085_v10  ;;  %v15904_v33 = vld [vmem:[%s16771_s10 + $0x28] sm:$0xff] }
0x25b7   : > { %13340 = vmatprep.mubr.msk.f32.mxu1 %vm1121_vm0, %v6488_v36  ;;  %v15890_v50 = vadd.f32 %v15735_v5, %v6086_v61  ;;  %v15913_v5 = vld [vmem:[%s16771_s10 + $0x20] sm:$0xff] }
0x25b8   : > { %13341 = vmatmul.mubr.msk.f32.vlgmr.msra.gmra.mxu1 %vm1121_vm0, %v6489_v20  ;;  %v16003_v36 = vld [vmem:[%s16773_s6 + $0x20] sm:$0xff] }
0x25b9   : > { %13344 = vmatpush3.msra.mxu1 %v15865_v44  ;;  %13311 = vmatmul.mubr.msk.f32.vlgmr.msra.gmra.mxu0 %vm1121_vm0, %v15890_v50 }
0x25ba   : > { %13345 = vmatprep.subr.mxu1 %v15895_v63  ;;  %13351 = vmatprep.mubr.msk.f32.mxu1 %vm1121_vm0, %v15878_v14 }
0x25bb   : > { %13346 = vmatpush3.msra.mxu1 %v15895_v63  ;;  %13314 = vmatpush3.msra.mxu0 %v15759_v0  ;;  %v15938_v0 = vld [vmem:[#allocation2 + $0x1] ss:$0 sm:$0xff] }
0x25bc   : > { %13347 = vmatprep.subr.mxu1 %v15904_v33  ;;  %13315 = vmatprep.subr.mxu0 %v14613_v45 }
0x25bd   : > { %13348 = vmatpush3.msra.mxu1 %v15904_v33  ;;  %13316 = vmatpush3.msra.mxu0 %v15767_v4 }
0x25be   : > { %13349 = vmatprep.subr.mxu1 %v15913_v5  ;;  %13317 = vmatprep.subr.mxu0 %v14613_v45 }
0x25bf   : > { %13350 = vmatpush3.msra.mxu1 %v15913_v5  ;;  %13318 = vmatpush3.msra.mxu0 %v15774_v30 }
0x25c0   : > { %13352 = vmatmul.mubr.msk.f32.vlgmr.msra.gmra.mxu1 %vm1121_vm0, %v15875_v58  ;;  %13319 = vmatprep.subr.mxu0 %v14613_v45 }
0x25c1   : > { %13320 = vmatpush3.msra.mxu0 %v15781_v7  ;;  %13329 = vmatprep.mubr.msk.f32.mxu0 %vm14614_vm3, %v14613_v45 }
0x25c2   : > { %13321 = vmatprep.subr.mxu0 %v14613_v45 }
0x25c3   : > { %13322 = vmatpush3.msra.mxu0 %v15788_v34 }
0x25c4   : > { %13323 = vmatprep.subr.mxu0 %v14613_v45 }
0x25c5   : > { %13324 = vmatpush3.msra.mxu0 %v15797_v43 }
0x25c6   : > { %13325 = vmatprep.subr.mxu0 %v14613_v45 }
0x25c7   : > { %13326 = vmatpush3.msra.mxu0 %v15805_v41 }
0x25c8   : > { %13327 = vmatprep.subr.mxu0 %v14613_v45 }
0x25c9   : > { %13328 = vmatpush3.msra.mxu0 %v15813_v8 }
0x2678   : > { %v13342_v4 = vpop.f32.mrf.mxu1 }
0x2679   : > { %v15941_v30 = vadd.f32 %v13342_v4, %v15938_v0  ;;  %v6394_v7 = vpop.f32.mrf.mxu0 }
0x267a   : > { %v6395_v34 = vadd.f32 %v15792_v55, %v6394_v7  ;;  %v6575_v21 = vpop.f32.mrf.mxu1 }
0x267b   : > { %v15945_v43 = vadd.f32 %v15938_v0, %v6575_v21  ;;  %6695 = vrot.lane.b32.xlu0 %v15941_v30, %s16777_s30  ;;  %v13312_v41 = vpop.f32.mrf.mxu0  ;;  %v15974_v51 = vmul.f32 0.35355338, %v15941_v30 }
0x267c   : > { %v6398_v6 = vmax.f32 %v6395_v34, 0.0 }
0x267d   : > { %6693 = vrot.lane.b32.xlu1 %v15945_v43, %s16777_s30  ;;  %v15952_v8 = vmul.f32 0.35355338, %v15945_v43 }
0x267e   : > { %13330 = vmatmul.mubr.msk.f32.vlgmr.msra.gmra.mxu0 %vm6199_vm4, %v6398_v6 }
0x267f   : > { %13358 = vmatprep.mubr.msk.f32.mxu0 %vm1310_vm1, %v15952_v8 }
0x2680   : > { %v13353_v55 = vpop.f32.mrf.mxu1 }
0x2681   : > { %v15960_v62 = vadd.f32 %v13353_v55, %v15955_v46 }
0x2682   : > { %v6669_v9 = vpop.f32.mrf.mxu1 }
0x2683   : > { %v15963_v11 = vadd.f32 %v15955_v46, %v6669_v9  ;;  %13361 = vmatprep.subr.mxu1 %v15960_v62 }
0x2684   : > { %13362 = vmatpush3.msra.mxu1 %v15960_v62 }
0x2685   : > { %13363 = vmatprep.subr.mxu1 %v15963_v11 }
0x2686   : > { %13364 = vmatpush3.msra.mxu1 %v15963_v11 }
0x26ed   : > { %v6696_v13 = vpop.permute.xlu0 %6695 }
0x26ee   : > { %13354 = vmatprep.subr.msk.mxu0 %vm1310_vm1, %v6696_v13 }
0x26ef   : > { %13355 = vmatpush3.xpose.msk.msra.mxu0 %vm1310_vm1, %v6696_v13  ;;  %v6694_v23 = vpop.permute.xlu1 %6693 }
0x26f0   : > { %13356 = vmatprep.subr.msk.mxu0 %vm1310_vm1, %v6694_v23 }
0x26f3   : > { %13357 = vmatpush3.xpose.msk.msra.mxu0 %vm1310_vm1, %v6694_v23 }
0x26f6   : > { %13359 = vmatmul.mubr.msk.f32.vlgmr.msra.gmra.mxu0 %vm1310_vm1, %v15974_v51 }
0x273e   : > { %v15978_v17 = vpop.f32.mrf.mxu0 }
0x2740   : > { %v13331_v32 = vpop.f32.mrf.mxu0 }
0x27b6   : > { %v13360_v28 = vpop.f32.mrf.mxu0 }
0x27b7   : > { %v6785_v24 = vsel %vm1396_vm2, %v13360_v28, -inf }
0x27b8   : > { %6786 = vmax.xlane.f32.xlu0 %v6785_v24  ;;  %v6773_v12 = vpop.f32.mrf.mxu0 }
0x27b9   : > { %v6782_v47 = vsel %vm1396_vm2, %v6773_v12, -inf }
0x27ba   : > { %6783 = vmax.xlane.f32.xlu1 %v6782_v47 }
0x2841   : > { %v6787_v37 = vpop.xlane.xlu0 %6786 }
0x2842   : > { %v6789_v1 = vsub.f32 %v13360_v28, %v6787_v37 }
0x2843   : > { %v6784_v18 = vpop.xlane.xlu1 %6783 }
0x2844   : > { %v6792_v48 = vmul.f32 1.442695, %v6789_v1  ;;  %v6788_v26 = vsub.f32 %v6773_v12, %v6784_v18 }
0x2846   : > { %14036 = vpow2.f32 %v6792_v48  ;;  %v6790_v42 = vmul.f32 1.442695, %v6788_v26 }
0x2848   : > { %14038 = vpow2.f32 %v6790_v42 }
0x2853   : > { %v14037_v29 = vpop.eup %14036 }
0x2854   : > { %v6797_v49 = vsel %vm1396_vm2, %v14037_v29, 0.0 }
0x2855   : > { %v14039_v53 = vpop.eup %14038  ;;  %6798 = vadd.xlane.f32.xlu1 %v6797_v49 }
0x2856   : > { %v6794_v15 = vsel %vm1396_vm2, %v14039_v53, 0.0 }
0x2857   : > { %6795 = vadd.xlane.f32.xlu0 %v6794_v15 }
0x2866   : > { %6889 = vrot.lane.b32.xlu1 %v15945_v43, %s16778_s2 }
0x286a   : > { %6885 = vrot.lane.b32.xlu1 %v15952_v8, %s16779_s0 }
0x286d   : > { %6891 = vrot.lane.b32.xlu0 %v15941_v30, %s16778_s2 }
0x2871   : > { %6887 = vrot.lane.b32.xlu0 %v15974_v51, %s16779_s0 }
0x28de   : > { %v6799_v2 = vpop.xlane.xlu1 %6798 }
0x28df   : > { %14040 = vrcp.f32 %v6799_v2 }
0x28e0   : > { %v6796_v25 = vpop.xlane.xlu0 %6795 }
0x28e1   : > { %14042 = vrcp.f32 %v6796_v25 }
0x28e2   : > { %v6890_v31 = vpop.permute.xlu1 %6889 }
0x28e4   : > { %v6892_v35 = vpop.permute.xlu0 %6891 }
0x28e5   : > { %13368 = vmatprep.subr.msk.mxu1 %vm1310_vm1, %v6892_v35 }
0x28e6   : > { %v6886_v57 = vpop.permute.xlu1 %6885 }
0x28e8   : > { %v6888_v10 = vpop.permute.xlu0 %6887 }
0x28ec   : > { %v14041_v60 = vpop.eup %14040 }
0x28ed   : > { %v6803_v56 = vmul.f32 %v14041_v60, %v14037_v29 }
0x28ee   : > { %v14043_v22 = vpop.eup %14042 }
0x28ef   : > { %v6802_v54 = vmul.f32 %v14043_v22, %v14039_v53 }
0x28f1   : > { %13365 = vmatprep.mubr.msk.f32.mxu1 %vm1396_vm2, %v6802_v54 }
0x28f2   : > { %13366 = vmatmul.mubr.msk.f32.vlgmr.msra.gmra.mxu1 %vm1396_vm2, %v6803_v56 }
0x28f3   : > { %13369 = vmatpush3.xpose.msk.msra.mxu1 %vm1310_vm1, %v6892_v35  ;;  %13372 = vmatprep.mubr.msk.f32.mxu1 %vm1310_vm1, %v6886_v57 }
0x28f4   : > { %13370 = vmatprep.subr.msk.mxu1 %vm1310_vm1, %v6890_v31 }
0x28f7   : > { %13371 = vmatpush3.xpose.msk.msra.mxu1 %vm1310_vm1, %v6890_v31 }
0x28f8   : > { %13387 = vmatprep.subr.mxu1 %v16003_v36 }
0x28fa   : > { %13373 = vmatmul.mubr.msk.f32.vlgmr.msra.gmra.mxu1 %vm1310_vm1, %v6888_v10 }
0x28fb   : > { %13388 = vmatpush3.msra.mxu1 %v16003_v36 }
0x29b2   : > { %v13367_v61 = vpop.f32.mrf.mxu1 }
0x29b4   : > { %v6876_v3 = vpop.f32.mrf.mxu1 }
0x29b5   : > { %13389 = vmatprep.mubr.msk.f32.mxu1 %vm1310_vm1, %v6876_v3 }
0x29b6   : > { %13390 = vmatmul.mubr.msk.f32.vlgmr.msra.gmra.mxu1 %vm1310_vm1, %v13367_v61 }
0x29ba   : > { %v13374_v20 = vpop.f32.mrf.mxu1 }
0x29bb   : > { %v6979_v4 = vsel %vm1396_vm2, %v13374_v20, -inf }
0x29bc   : > { %6980 = vmax.xlane.f32.xlu0 %v6979_v4  ;;  %v6967_v7 = vpop.f32.mrf.mxu1 }
0x29bd   : > { %v6976_v34 = vsel %vm1396_vm2, %v6967_v7, -inf }
0x29be   : > { %6977 = vmax.xlane.f32.xlu1 %v6976_v34 }
0x2a45   : > { %v6981_v21 = vpop.xlane.xlu0 %6980 }
0x2a46   : > { %v6983_v41 = vsub.f32 %v13374_v20, %v6981_v21 }
0x2a47   : > { %v6978_v6 = vpop.xlane.xlu1 %6977 }
0x2a48   : > { %v6986_v55 = vmul.f32 1.442695, %v6983_v41  ;;  %v6982_v9 = vsub.f32 %v6967_v7, %v6978_v6 }
0x2a4a   : > { %14044 = vpow2.f32 %v6986_v55  ;;  %v6984_v13 = vmul.f32 1.442695, %v6982_v9 }
0x2a4c   : > { %14046 = vpow2.f32 %v6984_v13 }
0x2a57   : > { %v14045_v23 = vpop.eup %14044 }
0x2a58   : > { %v6991_v32 = vsel %vm1396_vm2, %v14045_v23, 0.0 }
0x2a59   : > { %v14047_v28 = vpop.eup %14046  ;;  %6992 = vadd.xlane.f32.xlu1 %v6991_v32 }
0x2a5a   : > { %v6988_v24 = vsel %vm1396_vm2, %v14047_v28, 0.0 }
0x2a5b   : > { %6989 = vadd.xlane.f32.xlu0 %v6988_v24 }
0x2a6a   : > { %7000 = vrot.lane.b32.xlu1 %v15963_v11, %s16779_s0 }
0x2a6e   : > { %7255 = vrot.lane.b32.xlu1 %v15941_v30, %s16780_s4 }
0x2a71   : > { %7002 = vrot.lane.b32.xlu0 %v15960_v62, %s16779_s0 }
0x2a72   : > { %7249 = vrot.lane.b32.xlu1 %v15952_v8, %s16782_s13 }
0x2a75   : > { %7253 = vrot.lane.b32.xlu0 %v15945_v43, %s16780_s4 }
0x2a76   : > { %7538 = vrot.lane.b32.xlu1 %v15941_v30, %s16781_s5  ;;  %v16036_v30 = vld [vmem:[%s16773_s6 + $0x28] sm:$0xff] }
0x2a79   : > { %7251 = vrot.lane.b32.xlu0 %v15974_v51, %s16782_s13 }
0x2a7a   : > { %7532 = vrot.lane.b32.xlu1 %v15952_v8, %s16776_s11 }
0x2a7d   : > { %7536 = vrot.lane.b32.xlu0 %v15945_v43, %s16781_s5 }
0x2a81   : > { %7534 = vrot.lane.b32.xlu0 %v15974_v51, %s16776_s11 }
0x2ae2   : > { %v6993_v12 = vpop.xlane.xlu1 %6992 }
0x2ae3   : > { %14048 = vrcp.f32 %v6993_v12 }
0x2ae4   : > { %v6990_v47 = vpop.xlane.xlu0 %6989 }
0x2ae5   : > { %14050 = vrcp.f32 %v6990_v47 }
0x2ae6   : > { %v7001_v1 = vpop.permute.xlu1 %7000 }
0x2ae8   : > { %v7003_v37 = vpop.permute.xlu0 %7002 }
0x2ae9   : > { %13375 = vmatprep.subr.mxu0 %v7003_v37 }
0x2aea   : > { %13376 = vmatpush3.msra.mxu0 %v7003_v37  ;;  %v7256_v48 = vpop.permute.xlu1 %7255 }
0x2aeb   : > { %13377 = vmatprep.subr.mxu0 %v7001_v1 }
0x2aec   : > { %13378 = vmatpush3.msra.mxu0 %v7001_v1  ;;  %v7254_v29 = vpop.permute.xlu0 %7253 }
0x2aed   : > { %13382 = vmatprep.subr.mxu0 %v16036_v30 }
0x2aee   : > { %v7250_v26 = vpop.permute.xlu1 %7249 }
0x2af0   : > { %v14049_v43 = vpop.eup %14048  ;;  %v7252_v15 = vpop.permute.xlu0 %7251 }
0x2af1   : > { %v6997_v18 = vmul.f32 %v14049_v43, %v14045_v23 }
0x2af2   : > { %v14051_v8 = vpop.eup %14050  ;;  %v7539_v53 = vpop.permute.xlu1 %7538 }
0x2af3   : > { %v6996_v51 = vmul.f32 %v14051_v8, %v14047_v28 }
0x2af4   : > { %v7537_v25 = vpop.permute.xlu0 %7536 }
0x2af5   : > { %13379 = vmatprep.mubr.msk.f32.mxu0 %vm1396_vm2, %v6996_v51 }
0x2af6   : > { %13380 = vmatmul.mubr.msk.f32.vlgmr.msra.gmra.mxu0 %vm1396_vm2, %v6997_v18  ;;  %v7533_v2 = vpop.permute.xlu1 %7532 }
0x2af7   : > { %13383 = vmatpush3.msra.mxu0 %v16036_v30 }
0x2af8   : > { %13392 = vmatprep.subr.msk.mxu0 %vm1310_vm1, %v7256_v48  ;;  %v7535_v35 = vpop.permute.xlu0 %7534 }
0x2bb6   : > { %v13381_v42 = vpop.f32.mrf.mxu0 }
0x2bb8   : > { %v7078_v49 = vpop.f32.mrf.mxu0 }
0x2bb9   : > { %13384 = vmatprep.mubr.msk.f32.mxu0 %vm1310_vm1, %v7078_v49  ;;  %v16091_v49 = vld [vmem:[%s15203_s3] sm:$0xff] }
0x2bba   : > { %13385 = vmatmul.mubr.msk.f32.vlgmr.msra.gmra.mxu0 %vm1310_vm1, %v13381_v42 }
0x2bbb   : > { %13393 = vmatpush3.xpose.msk.msra.mxu0 %vm1310_vm1, %v7256_v48  ;;  %13396 = vmatprep.mubr.msk.f32.mxu0 %vm1310_vm1, %v7250_v26 }
0x2bbc   : > { %13394 = vmatprep.subr.msk.mxu0 %vm1310_vm1, %v7254_v29 }
0x2bbf   : > { %13395 = vmatpush3.xpose.msk.msra.mxu0 %vm1310_vm1, %v7254_v29 }
0x2bc0   : > { %13411 = vmatprep.subr.msk.mxu0 %vm1310_vm1, %v7539_v53 }
0x2bc2   : > { %13397 = vmatmul.mubr.msk.f32.vlgmr.msra.gmra.mxu0 %vm1310_vm1, %v7252_v15 }
0x2bc3   : > { %13412 = vmatpush3.xpose.msk.msra.mxu0 %vm1310_vm1, %v7539_v53  ;;  %13415 = vmatprep.mubr.msk.f32.mxu0 %vm1310_vm1, %v7533_v2 }
0x2bc4   : > { %13413 = vmatprep.subr.msk.mxu0 %vm1310_vm1, %v7537_v25 }
0x2bc7   : > { %13414 = vmatpush3.xpose.msk.msra.mxu0 %vm1310_vm1, %v7537_v25 }
0x2bc8   : > { %13430 = vmatprep.subr.mxu0 %v14613_v45 }
0x2bca   : > { %13416 = vmatmul.mubr.msk.f32.vlgmr.msra.gmra.mxu0 %vm1310_vm1, %v7535_v35 }
0x2bcb   : > { %13431 = vmatpush3.msra.mxu0 %v15837_v38  ;;  %13438 = vmatprep.mubr.msk.f32.mxu0 %vm14614_vm3, %v14613_v45  ;;  %v6469_v38 = vadd.f32 %v15821_v59, %v15978_v17 }
0x2bcc   : > { %13432 = vmatprep.subr.mxu0 %v14613_v45 }
0x2bcd   : > { %13433 = vmatpush3.msra.mxu0 %v15842_v52  ;;  %v6472_v52 = vadd.f32 %v6469_v38, %v15890_v50 }
0x2bce   : > { %13434 = vmatprep.subr.mxu0 %v14613_v45 }
0x2bcf   : > { %13435 = vmatpush3.msra.mxu0 %v15849_v39 }
0x2bd0   : > { %13436 = vmatprep.subr.mxu0 %v14613_v45 }
0x2bd1   : > { %13437 = vmatpush3.msra.mxu0 %v15856_v40  ;;  %v6473_v40 = vsel %vm1121_vm0, %v6472_v52, 0.0 }
0x2bd2   : > { %13452 = vmatprep.subr.mxu0 %v14613_v45 }
0x2c7a   : > { %v16067_v31 = vpop.f32.mrf.mxu0 }
0x2c7c   : > { %v16071_v60 = vpop.f32.mrf.mxu0 }
0x2c82   : > { %v13398_v22 = vpop.f32.mrf.mxu0 }
0x2c83   : > { %v7343_v54 = vsel %vm1396_vm2, %v13398_v22, -inf }
0x2c84   : > { %7344 = vmax.xlane.f32.xlu0 %v7343_v54  ;;  %v7331_v39 = vpop.f32.mrf.mxu0 }
0x2c85   : > { %v7340_v56 = vsel %vm1396_vm2, %v7331_v39, -inf }
0x2c86   : > { %7341 = vmax.xlane.f32.xlu1 %v7340_v56  ;;  %v16105_v56 = vld [vmem:[%s16773_s6 + $0x30] sm:$0xff] }
0x2c88   : > { %6474 = vadd.xlane.f32.xlu0 %v6473_v40  ;;  %v13391_v40 = vpop.f32.mrf.mxu1 }
0x2c8a   : > { %v13417_v9 = vpop.f32.mrf.mxu0 }
0x2c8b   : > { %v7626_v23 = vsel %vm1396_vm2, %v13417_v9, -inf }
0x2c8c   : > { %v7614_v13 = vpop.f32.mrf.mxu0 }
0x2c8d   : > { %v7623_v32 = vsel %vm1396_vm2, %v7614_v13, -inf }
0x2d0d   : > { %v7345_v57 = vpop.xlane.xlu0 %7344 }
0x2d0e   : > { %v7347_v10 = vsub.f32 %v13398_v22, %v7345_v57  ;;  %v7240_v57 = vpop.f32.mrf.mxu1 }
0x2d0f   : > { %v7342_v61 = vpop.xlane.xlu1 %7341 }
0x2d10   : > { %v7350_v3 = vmul.f32 1.442695, %v7347_v10  ;;  %v7346_v59 = vsub.f32 %v7331_v39, %v7342_v61 }
0x2d11   : > { %v6475_v17 = vpop.xlane.xlu0 %6474 }
0x2d12   : > { %14052 = vpow2.f32 %v7350_v3  ;;  %v7348_v20 = vmul.f32 1.442695, %v7346_v59  ;;  %v6476_v4 = vmul.f32 0.03125, %v6475_v17 }
0x2d14   : > { %14054 = vpow2.f32 %v7348_v20  ;;  %v6477_v50 = vsub.f32 %v6472_v52, %v6476_v4 }
0x2d16   : > { %v6478_v7 = vmul.f32 %v6477_v50, %v6477_v50 }
0x2d18   : > { %v6479_v34 = vsel %vm1121_vm0, %v6478_v7, 0.0 }
0x2d19   : > { %6480 = vadd.xlane.f32.xlu1 %v6479_v34 }
0x2d1f   : > { %v14053_v21 = vpop.eup %14052 }
0x2d20   : > { %v7355_v41 = vsel %vm1396_vm2, %v14053_v21, 0.0 }
0x2d21   : > { %v14055_v6 = vpop.eup %14054  ;;  %7356 = vadd.xlane.f32.xlu0 %v7355_v41  ;;  %v16132_v41 = vld [vmem:[%s16773_s6 + $0x38] sm:$0xff] }
0x2d22   : > { %v7352_v55 = vsel %vm1396_vm2, %v14055_v6, 0.0 }
0x2d23   : > { %7353 = vadd.xlane.f32.xlu1 %v7352_v55 }
0x2d34   : > { %7362 = vrot.lane.b32.xlu1 %v15963_v11, %s16782_s13 }
0x2d37   : > { %7364 = vrot.lane.b32.xlu0 %v15960_v62, %s16782_s13 }
0x2d56   : > { %7627 = vmax.xlane.f32.xlu0 %v7626_v23 }
0x2d58   : > { %7624 = vmax.xlane.f32.xlu1 %v7623_v32  ;;  %v7241_v32 = vadd.f32 %v7240_v57, %v16071_v60 }
0x2da2   : > { %v6481_v28 = vpop.xlane.xlu1 %6480 }
0x2da3   : > { %v6482_v24 = vmul.f32 0.03125, %v6481_v28 }
0x2da5   : > { %v6483_v12 = vadd.f32 1e-05, %v6482_v24 }
0x2da7   : > { %14056 = vrsqrt.f32 %v6483_v12 }
0x2daa   : > { %v7357_v47 = vpop.xlane.xlu0 %7356 }
0x2dab   : > { %14058 = vrcp.f32 %v7357_v47 }
0x2dac   : > { %v7354_v37 = vpop.xlane.xlu1 %7353 }
0x2dad   : > { %14060 = vrcp.f32 %v7354_v37 }
0x2dae   : > { %v7365_v1 = vpop.permute.xlu0 %7364 }
0x2daf   : > { %13399 = vmatprep.subr.mxu1 %v7365_v1 }
0x2db0   : > { %13400 = vmatpush3.msra.mxu1 %v7365_v1  ;;  %v7363_v43 = vpop.permute.xlu1 %7362 }
0x2db1   : > { %13401 = vmatprep.subr.mxu1 %v7363_v43 }
0x2db2   : > { %13402 = vmatpush3.msra.mxu1 %v7363_v43 }
0x2db3   : > { %13406 = vmatprep.subr.mxu1 %v16105_v56 }
0x2db4   : > { %v14057_v8 = vpop.eup %14056 }
0x2db5   : > { %v6485_v51 = vmul.f32 %v14057_v8, %v6477_v50 }
0x2db7   : > { %v6486_v18 = vmul.f32 %v15868_v16, %v6485_v51 }
0x2db8   : > { %v14059_v48 = vpop.eup %14058 }
0x2db9   : > { %v16088_v26 = vadd.f32 %v15870_v27, %v6486_v18  ;;  %v7361_v15 = vmul.f32 %v14059_v48, %v14053_v21 }
0x2dba   : > { %v14061_v42 = vpop.eup %14060 }
0x2dbb   : > { %v7360_v29 = vmul.f32 %v14061_v42, %v14055_v6  ;;  %v7867_v53 = vadd.f32 %v16091_v49, %v16088_v26 }
0x2dbd   : > { %13403 = vmatprep.mubr.msk.f32.mxu1 %vm1396_vm2, %v7360_v29  ;;  %13439 = vmatmul.mubr.msk.f32.vlgmr.msra.gmra.mxu0 %vm1121_vm0, %v7867_v53 }
0x2dbe   : > { %13404 = vmatmul.mubr.msk.f32.vlgmr.msra.gmra.mxu1 %vm1396_vm2, %v7361_v15  ;;  %13454 = vmatprep.mubr.msk.f32.mxu0 %vm14614_vm3, %v14613_v45 }
0x2dbf   : > { %13407 = vmatpush3.msra.mxu1 %v16105_v56 }
0x2ddf   : > { %v7628_v16 = vpop.xlane.xlu0 %7627 }
0x2de0   : > { %v7630_v27 = vsub.f32 %v13417_v9, %v7628_v16 }
0x2de1   : > { %v7625_v2 = vpop.xlane.xlu1 %7624 }
0x2de2   : > { %v7633_v25 = vmul.f32 1.442695, %v7630_v27  ;;  %v7629_v35 = vsub.f32 %v7614_v13, %v7625_v2  ;;  %v7246_v13 = vadd.f32 %v13391_v40, %v16067_v31 }
0x2de4   : > { %14062 = vpow2.f32 %v7633_v25  ;;  %v7631_v38 = vmul.f32 1.442695, %v7629_v35 }
0x2de6   : > { %14064 = vpow2.f32 %v7631_v38 }
0x2df1   : > { %v14063_v22 = vpop.eup %14062 }
0x2df2   : > { %v7638_v52 = vsel %vm1396_vm2, %v14063_v22, 0.0 }
0x2df3   : > { %v14065_v54 = vpop.eup %14064  ;;  %7639 = vadd.xlane.f32.xlu1 %v7638_v52 }
0x2df4   : > { %v7635_v39 = vsel %vm1396_vm2, %v14065_v54, 0.0 }
0x2df5   : > { %7636 = vadd.xlane.f32.xlu0 %v7635_v39 }
0x2e04   : > { %7645 = vrot.lane.b32.xlu1 %v15963_v11, %s16776_s11 }
0x2e0b   : > { %7647 = vrot.lane.b32.xlu0 %v15960_v62, %s16776_s11 }
0x2e7c   : > { %v7640_v10 = vpop.xlane.xlu1 %7639 }
0x2e7d   : > { %v7937_v61 = vpop.f32.mrf.mxu0  ;;  %14066 = vrcp.f32 %v7640_v10 }
0x2e7e   : > { %v16114_v3 = vadd.f32 %v15938_v0, %v7937_v61  ;;  %v13405_v59 = vpop.f32.mrf.mxu1  ;;  %v7637_v17 = vpop.xlane.xlu0 %7636 }
0x2e7f   : > { %14068 = vrcp.f32 %v7637_v17  ;;  %v13440_v20 = vpop.f32.mrf.mxu0 }
0x2e80   : > { %8016 = vrot.lane.b32.xlu1 %v16114_v3, %s16777_s30  ;;  %v7440_v4 = vpop.f32.mrf.mxu1  ;;  %8179 = vrot.lane.b32.xlu0 %v16114_v3, %s16778_s2  ;;  %v16123_v11 = vmul.f32 0.35355338, %v16114_v3  ;;  %v7646_v0 = vpop.permute.xlu1 %7645 }
0x2e81   : > { %13408 = vmatprep.mubr.msk.f32.mxu1 %vm1310_vm1, %v7440_v4 }
0x2e82   : > { %13409 = vmatmul.mubr.msk.f32.vlgmr.msra.gmra.mxu1 %vm1310_vm1, %v13405_v59  ;;  %v7648_v62 = vpop.permute.xlu0 %7647 }
0x2e83   : > { %13418 = vmatprep.subr.mxu1 %v7648_v62 }
0x2e84   : > { %8177 = vrot.lane.b32.xlu1 %v16123_v11, %s16779_s0  ;;  %13419 = vmatpush3.msra.mxu1 %v7648_v62 }
0x2e85   : > { %13420 = vmatprep.subr.mxu1 %v7646_v0 }
0x2e86   : > { %13421 = vmatpush3.msra.mxu1 %v7646_v0 }
0x2e87   : > { %13425 = vmatprep.subr.mxu1 %v16132_v41 }
0x2e8a   : > { %v14067_v50 = vpop.eup %14066 }
0x2e8b   : > { %v7644_v21 = vmul.f32 %v14067_v50, %v14063_v22 }
0x2e8c   : > { %v14069_v7 = vpop.eup %14068 }
0x2e8d   : > { %v7643_v34 = vmul.f32 %v14069_v7, %v14065_v54 }
0x2e8f   : > { %13422 = vmatprep.mubr.msk.f32.mxu1 %vm1396_vm2, %v7643_v34 }
0x2e90   : > { %13423 = vmatmul.mubr.msk.f32.vlgmr.msra.gmra.mxu1 %vm1396_vm2, %v7644_v21 }
0x2e91   : > { %13426 = vmatpush3.msra.mxu1 %v16132_v41 }
0x2e92   : > { %13441 = vmatprep.subr.mxu1 %v14613_v45 }
0x2ef2   : > { %v8017_v6 = vpop.permute.xlu1 %8016  ;;  %v8180_v55 = vpop.permute.xlu0 %8179 }
0x2ef3   : > { %13453 = vmatpush3.xpose.msk.msra.mxu0 %vm1310_vm1, %v8017_v6 }
0x2ef4   : > { %13462 = vmatprep.subr.mxu0 %v14613_v45 }
0x2ef6   : > { %13455 = vmatmul.mubr.msk.f32.vlgmr.msra.gmra.mxu0 %vm1310_vm1, %v16123_v11  ;;  %v8178_v9 = vpop.permute.xlu1 %8177 }
0x2ef7   : > { %13463 = vmatpush3.xpose.msk.msra.mxu0 %vm1310_vm1, %v8180_v55  ;;  %13464 = vmatprep.mubr.msk.f32.mxu0 %vm14614_vm3, %v14613_v45 }
0x2ef8   : > { %13472 = vmatprep.subr.mxu0 %v14613_v45 }
0x2efa   : > { %13465 = vmatmul.mubr.msk.f32.vlgmr.msra.gmra.mxu0 %vm1310_vm1, %v8178_v9 }
0x2efb   : > { %13473 = vmatpush3.msra.mxu0 %v16036_v30  ;;  %13474 = vmatprep.mubr.msk.f32.mxu0 %vm14614_vm3, %v14613_v45 }
0x2efc   : > { %13482 = vmatprep.subr.mxu0 %v14613_v45 }
0x2f42   : > { %v13410_v23 = vpop.f32.mrf.mxu1 }
0x2f43   : > { %v7531_v28 = vadd.f32 %v13410_v23, %v7246_v13 }
0x2f44   : > { %v7521_v24 = vpop.f32.mrf.mxu1 }
0x2f45   : > { %v7530_v12 = vadd.f32 %v7521_v24, %v7241_v32 }
0x2f50   : > { %v13424_v47 = vpop.f32.mrf.mxu1 }
0x2f52   : > { %v7723_v37 = vpop.f32.mrf.mxu1 }
0x2f53   : > { %13427 = vmatprep.mubr.msk.f32.mxu1 %vm1310_vm1, %v7723_v37 }
0x2f54   : > { %13428 = vmatmul.mubr.msk.f32.vlgmr.msra.gmra.mxu1 %vm1310_vm1, %v13424_v47 }
0x2f55   : > { %13442 = vmatpush3.msra.mxu1 %v15865_v44  ;;  %13449 = vmatprep.mubr.msk.f32.mxu1 %vm14614_vm3, %v14613_v45 }
0x2f56   : > { %13443 = vmatprep.subr.mxu1 %v14613_v45 }
0x2f57   : > { %13444 = vmatpush3.msra.mxu1 %v15895_v63 }
0x2f58   : > { %13445 = vmatprep.subr.mxu1 %v14613_v45 }
0x2f59   : > { %13446 = vmatpush3.msra.mxu1 %v15904_v33 }
0x2f5a   : > { %13447 = vmatprep.subr.mxu1 %v14613_v45 }
0x2f5b   : > { %13448 = vmatpush3.msra.mxu1 %v15913_v5 }
0x2f5c   : > { %13450 = vmatmul.mubr.msk.f32.vlgmr.msra.gmra.mxu1 %vm1121_vm0, %v16088_v26  ;;  %13457 = vmatprep.subr.mxu1 %v14613_v45 }
0x2f5d   : > { %13459 = vmatprep.mubr.msk.f32.mxu1 %vm14614_vm3, %v14613_v45 }
0x2fb6   : > { %v8089_v44 = vpop.f32.mrf.mxu0 }
0x2fb7   : > { %v8093_v30 = vsel %vm1310_vm1, %v8089_v44, -inf }
0x2fb8   : > { %8094 = vmax.xlane.f32.xlu0 %v8093_v30  ;;  %v13456_v63 = vpop.f32.mrf.mxu0 }
0x2fba   : > { %v8251_v31 = vpop.f32.mrf.mxu0 }
0x2fbb   : > { %v8255_v33 = vsel %vm1310_vm1, %v8251_v31, -inf }
0x2fbc   : > { %8256 = vmax.xlane.f32.xlu1 %v8255_v33  ;;  %v13466_v60 = vpop.f32.mrf.mxu0 }
0x3014   : > { %v13429_v1 = vpop.f32.mrf.mxu1 }
0x3015   : > { %v16170_v5 = vadd.f32 %v13429_v1, %v7531_v28 }
0x3016   : > { %v7804_v43 = vpop.f32.mrf.mxu1 }
0x3017   : > { %v16172_v8 = vadd.f32 %v7804_v43, %v7530_v12 }
0x3019   : > { %v7815_v1 = vadd.f32 %v16172_v8, %v15878_v14 }
0x301c   : > { %v8010_v51 = vpop.f32.mrf.mxu1 }
0x301d   : > { %v16175_v18 = vadd.f32 %v15955_v46, %v8010_v51  ;;  %v12377_v51 = vld [vmem:[#allocation6 + $0x1] ss:$0 sm:$0xff] }
0x301e   : > { %v13451_v48 = vpop.f32.mrf.mxu1 }
0x301f   : > { %13458 = vmatpush3.msra.mxu1 %v16175_v18  ;;  %8267 = vrot.lane.b32.xlu1 %v16175_v18, %s16779_s0 }
0x3020   : > { %13467 = vmatprep.subr.mxu1 %v14613_v45 }
0x3023   : > { %8489 = vrot.lane.b32.xlu1 %v16123_v11, %s16782_s13 }
0x3041   : > { %v8095_v42 = vpop.xlane.xlu0 %8094 }
0x3042   : > { %v8096_v29 = vsub.f32 %v8089_v44, %v8095_v42  ;;  %v7823_v42 = vadd.f32 %v12377_v51, %v7815_v1 }
0x3044   : > { %v8097_v53 = vmul.f32 1.442695, %v8096_v29  ;;  %v7825_v29 = vsel %vm1121_vm0, %v7823_v42, 0.0 }
0x3045   : > { %v8257_v15 = vpop.xlane.xlu1 %8256 }
0x3046   : > { %14070 = vpow2.f32 %v8097_v53  ;;  %v8258_v16 = vsub.f32 %v8251_v31, %v8257_v15 }
0x3048   : > { %v8259_v27 = vmul.f32 1.442695, %v8258_v16 }
0x304a   : > { %14072 = vpow2.f32 %v8259_v27 }
0x3053   : > { %v14071_v46 = vpop.eup %14070 }
0x3054   : > { %v8099_v2 = vsel %vm1310_vm1, %v14071_v46, 0.0 }
0x3055   : > { %8100 = vadd.xlane.f32.xlu0 %v8099_v2 }
0x3057   : > { %v14073_v25 = vpop.eup %14072 }
0x3058   : > { %v8261_v35 = vsel %vm1310_vm1, %v14073_v25, 0.0 }
0x3059   : > { %8262 = vadd.xlane.f32.xlu0 %v8261_v35 }
0x306f   : > { %8491 = vrot.lane.b32.xlu0 %v16114_v3, %s16780_s4 }
0x3091   : > { %v8268_v39 = vpop.permute.xlu1 %8267 }
0x30de   : > { %v8101_v38 = vpop.xlane.xlu0 %8100 }
0x30df   : > { %14074 = vrcp.f32 %v8101_v38 }
0x30e2   : > { %v8263_v22 = vpop.xlane.xlu0 %8262 }
0x30e3   : > { %14076 = vrcp.f32 %v8263_v22 }
0x30e6   : > { %v8492_v17 = vpop.permute.xlu0 %8491 }
0x30ec   : > { %v14075_v52 = vpop.eup %14074 }
0x30ed   : > { %v8103_v54 = vmul.f32 %v14075_v52, %v14071_v46 }
0x30ef   : > { %13460 = vmatmul.mubr.msk.f32.vlgmr.msra.gmra.mxu1 %vm1310_vm1, %v8103_v54 }
0x30f0   : > { %v14077_v40 = vpop.eup %14076  ;;  %13468 = vmatpush3.msra.mxu1 %v8268_v39  ;;  %13469 = vmatprep.mubr.msk.f32.mxu1 %vm14614_vm3, %v14613_v45  ;;  %v16240_v39 = vld [vmem:[#allocation7 + $0x1] ss:$0 sm:$0xff] }
0x30f1   : > { %v8265_v57 = vmul.f32 %v14077_v40, %v14073_v25  ;;  %13477 = vmatprep.subr.mxu1 %v14613_v45 }
0x30f3   : > { %13470 = vmatmul.mubr.msk.f32.vlgmr.msra.gmra.mxu1 %vm1310_vm1, %v8265_v57  ;;  %v16242_v57 = vld [vmem:[#allocation9 + $0x1] ss:$0 sm:$0xff] }
0x30f4   : > { %13478 = vmatpush3.msra.mxu1 %v16003_v36  ;;  %13479 = vmatprep.mubr.msk.f32.mxu1 %vm14614_vm3, %v14613_v45  ;;  %v8490_v36 = vpop.permute.xlu1 %8489 }
0x30f5   : > { %13487 = vmatprep.subr.mxu1 %v14613_v45 }
0x31af   : > { %v8173_v10 = vpop.f32.mrf.mxu1 }
0x31b0   : > { %13480 = vmatmul.mubr.msk.f32.vlgmr.msra.gmra.mxu1 %vm1310_vm1, %v8173_v10 }
0x31b1   : > { %v13461_v61 = vpop.f32.mrf.mxu1  ;;  %13489 = vmatprep.mubr.msk.f32.mxu1 %vm14614_vm3, %v14613_v45 }
0x31b3   : > { %v8339_v59 = vpop.f32.mrf.mxu1 }
0x31b4   : > { %13475 = vmatmul.mubr.msk.f32.vlgmr.msra.gmra.mxu0 %vm1310_vm1, %v8339_v59 }
0x31b5   : > { %13483 = vmatpush3.xpose.msk.msra.mxu0 %vm1310_vm1, %v8492_v17  ;;  %v13471_v20 = vpop.f32.mrf.mxu1  ;;  %13484 = vmatprep.mubr.msk.f32.mxu0 %vm14614_vm3, %v14613_v45 }
0x31b6   : > { %13492 = vmatprep.subr.mxu0 %v14613_v45 }
0x31b8   : > { %13485 = vmatmul.mubr.msk.f32.vlgmr.msra.gmra.mxu0 %vm1310_vm1, %v8490_v36 }
0x31b9   : > { %13493 = vmatpush3.msra.mxu0 %v16105_v56  ;;  %13494 = vmatprep.mubr.msk.f32.mxu0 %vm14614_vm3, %v14613_v45 }
0x31ba   : > { %13502 = vmatprep.subr.mxu0 %v14613_v45 }
0x3270   : > { %v8485_v4 = vpop.f32.mrf.mxu1 }
0x3272   : > { %v13481_v62 = vpop.f32.mrf.mxu1 }
0x3274   : > { %v8412_v0 = vpop.f32.mrf.mxu0 }
0x3275   : > { %v8486_v50 = vadd.f32 %v8485_v4, %v8412_v0  ;;  %v7816_v0 = vadd.f32 %v16170_v5, %v15875_v58  ;;  %v12401_v5 = vld [vmem:[%s16700_s12 + $0x38] sm:$0xff] }
0x3276   : > { %v13476_v7 = vpop.f32.mrf.mxu0 }
0x3278   : > { %v8563_v34 = vpop.f32.mrf.mxu0 }
0x3279   : > { %v8567_v21 = vsel %vm1310_vm1, %v8563_v34, -inf }
0x327a   : > { %8568 = vmax.xlane.f32.xlu1 %v8567_v21  ;;  %v13486_v6 = vpop.f32.mrf.mxu0 }
0x328b   : > { %8730 = vrot.lane.b32.xlu1 %v16114_v3, %s16781_s5 }
0x328f   : > { %8728 = vrot.lane.b32.xlu1 %v16123_v11, %s16776_s11 }
0x3303   : > { %v8569_v56 = vpop.xlane.xlu1 %8568 }
0x3304   : > { %v8570_v55 = vsub.f32 %v8563_v34, %v8569_v56  ;;  %v7824_v34 = vadd.f32 %v12377_v51, %v7816_v0 }
0x3306   : > { %v8571_v9 = vmul.f32 1.442695, %v8570_v55  ;;  %v7828_v21 = vsel %vm1121_vm0, %v7824_v34, 0.0 }
0x3307   : > { %v8731_v24 = vpop.permute.xlu1 %8730 }
0x3308   : > { %14078 = vpow2.f32 %v8571_v9 }
0x330b   : > { %v8729_v12 = vpop.permute.xlu1 %8728 }
0x3315   : > { %v14079_v13 = vpop.eup %14078 }
0x3316   : > { %v8573_v23 = vsel %vm1310_vm1, %v14079_v13, 0.0 }
0x3317   : > { %8574 = vadd.xlane.f32.xlu0 %v8573_v23 }
0x332d   : > { %8578 = vrot.lane.b32.xlu0 %v16175_v18, %s16782_s13 }
0x33a0   : > { %v8575_v32 = vpop.xlane.xlu0 %8574 }
0x33a1   : > { %14080 = vrcp.f32 %v8575_v32 }
0x33a4   : > { %v8579_v28 = vpop.permute.xlu0 %8578 }
0x33a5   : > { %13488 = vmatpush3.msra.mxu1 %v8579_v28 }
0x33a6   : > { %13497 = vmatprep.subr.mxu1 %v14613_v45 }
0x33ae   : > { %v14081_v3 = vpop.eup %14080 }
0x33af   : > { %v8577_v11 = vmul.f32 %v14081_v3, %v14079_v13  ;;  %v12400_v3 = vld [vmem:[%s16700_s12 + $0x30] sm:$0xff] }
0x33b1   : > { %13490 = vmatmul.mubr.msk.f32.vlgmr.msra.gmra.mxu1 %vm1310_vm1, %v8577_v11  ;;  %v12398_v11 = vld [vmem:[%s16700_s12 + $0x20] sm:$0xff] }
0x33b2   : > { %13498 = vmatpush3.xpose.msk.msra.mxu1 %vm1310_vm1, %v8731_v24  ;;  %13499 = vmatprep.mubr.msk.f32.mxu1 %vm14614_vm3, %v14613_v45  ;;  %v12399_v24 = vld [vmem:[%s16700_s12 + $0x28] sm:$0xff] }
0x33b3   : > { %13507 = vmatprep.subr.mxu1 %v14613_v45 }
0x33b5   : > { %13500 = vmatmul.mubr.msk.f32.vlgmr.msra.gmra.mxu1 %vm1310_vm1, %v8729_v12  ;;  %v12409_v12 = vld [vmem:[%s16702_s14 + $0x38] sm:$0xff] }
0x33b6   : > { %13508 = vmatpush3.msra.mxu1 %v16132_v41  ;;  %13509 = vmatprep.mubr.msk.f32.mxu1 %vm14614_vm3, %v14613_v45 }
0x33b7   : > { %13523 = vmatprep.subr.mxu1 %v14613_v45 }
0x3471   : > { %v8650_v47 = vpop.f32.mrf.mxu1 }
0x3472   : > { %13495 = vmatmul.mubr.msk.f32.vlgmr.msra.gmra.mxu0 %vm1310_vm1, %v8650_v47 }
0x3473   : > { %v13491_v37 = vpop.f32.mrf.mxu1  ;;  %13504 = vmatprep.mubr.msk.f32.mxu0 %vm14614_vm3, %v14613_v45 }
0x3475   : > { %v8802_v44 = vpop.f32.mrf.mxu1 }
0x3476   : > { %v8806_v30 = vsel %vm1310_vm1, %v8802_v44, -inf }
0x3477   : > { %8807 = vmax.xlane.f32.xlu0 %v8806_v30  ;;  %v13501_v63 = vpop.f32.mrf.mxu1 }
0x348d   : > { %8817 = vrot.lane.b32.xlu0 %v16175_v18, %s16776_s11 }
0x3500   : > { %v8808_v41 = vpop.xlane.xlu0 %8807 }
0x3501   : > { %v8809_v31 = vsub.f32 %v8802_v44, %v8808_v41 }
0x3503   : > { %v8810_v33 = vmul.f32 1.442695, %v8809_v31 }
0x3504   : > { %v8818_v60 = vpop.permute.xlu0 %8817 }
0x3505   : > { %14082 = vpow2.f32 %v8810_v33  ;;  %13503 = vmatpush3.msra.mxu0 %v8818_v60 }
0x3506   : > { %13512 = vmatprep.subr.mxu0 %v12401_v5 }
0x3512   : > { %v14083_v43 = vpop.eup %14082 }
0x3513   : > { %v8812_v48 = vsel %vm1310_vm1, %v14083_v43, 0.0 }
0x3514   : > { %8813 = vadd.xlane.f32.xlu1 %v8812_v48 }
0x3518   : > { %7826 = vadd.xlane.f32.xlu1 %v7825_v29  ;;  %v12408_v29 = vld [vmem:[%s16702_s14 + $0x30] sm:$0xff] }
0x3532   : > { %v8723_v53 = vpop.f32.mrf.mxu0 }
0x3533   : > { %v8727_v18 = vadd.f32 %v8723_v53, %v8486_v50 }
0x3534   : > { %v13496_v15 = vpop.f32.mrf.mxu0 }
0x359d   : > { %v8814_v16 = vpop.xlane.xlu1 %8813 }
0x359e   : > { %14084 = vrcp.f32 %v8814_v16  ;;  %v12406_v16 = vld [vmem:[%s16702_s14 + $0x20] sm:$0xff] }
0x35a1   : > { %v7827_v27 = vpop.xlane.xlu1 %7826 }
0x35a2   : > { %v7831_v46 = vmul.f32 0.03125, %v7827_v27 }
0x35a4   : > { %v7833_v2 = vsub.f32 %v7823_v42, %v7831_v46 }
0x35a6   : > { %v7835_v25 = vmul.f32 %v7833_v2, %v7833_v2 }
0x35a8   : > { %v7837_v14 = vsel %vm1121_vm0, %v7835_v25, 0.0  ;;  %v12402_v25 = vld [vmem:[#allocation10 + $0x1] ss:$0 sm:$0xff] }
0x35a9   : > { %7838 = vadd.xlane.f32.xlu0 %v7837_v14 }
0x35ab   : > { %v14085_v8 = vpop.eup %14084 }
0x35ac   : > { %v8816_v35 = vmul.f32 %v14085_v8, %v14083_v43 }
0x35ae   : > { %13505 = vmatmul.mubr.msk.f32.vlgmr.msra.gmra.mxu0 %vm1310_vm1, %v8816_v35  ;;  %v16316_v35 = vld [vmem:[#allocation12 + $0x1] ss:$0 sm:$0xff] }
0x35af   : > { %13513 = vmatpush3.msra.mxu0 %v12401_v5 }
0x35b0   : > { %13514 = vmatprep.subr.mxu0 %v12400_v3 }
0x35b1   : > { %13515 = vmatpush3.msra.mxu0 %v12400_v3 }
0x35b2   : > { %13516 = vmatprep.subr.mxu0 %v12399_v24 }
0x35b3   : > { %13517 = vmatpush3.msra.mxu0 %v12399_v24 }
0x35b4   : > { %13518 = vmatprep.subr.mxu0 %v12398_v11 }
0x35b5   : > { %13519 = vmatpush3.msra.mxu0 %v12398_v11 }
0x35b6   : > { %13534 = vmatprep.subr.mxu0 %v12409_v12 }
0x3632   : > { %v7839_v38 = vpop.xlane.xlu0 %7838 }
0x3633   : > { %v7843_v22 = vmul.f32 0.03125, %v7839_v38 }
0x3635   : > { %v7845_v52 = vadd.f32 1e-05, %v7843_v22 }
0x3637   : > { %14086 = vrsqrt.f32 %v7845_v52 }
0x3644   : > { %v14087_v54 = vpop.eup %14086 }
0x3645   : > { %v7849_v40 = vmul.f32 %v14087_v54, %v7833_v2 }
0x3647   : > { %v7857_v10 = vmul.f32 %v16240_v39, %v7849_v40 }
0x3649   : > { %v16246_v61 = vadd.f32 %v16242_v57, %v7857_v10 }
0x364b   : > { %v8984_v59 = vadd.f32 %v15881_v19, %v16246_v61 }
0x364d   : > { %13520 = vmatprep.mubr.msk.f32.mxu0 %vm1121_vm0, %v8984_v59 }
0x366e   : > { %v8889_v17 = vpop.f32.mrf.mxu0 }
0x366f   : > { %13510 = vmatmul.mubr.msk.f32.vlgmr.msra.gmra.mxu1 %vm1310_vm1, %v8889_v17 }
0x3670   : > { %v13506_v20 = vpop.f32.mrf.mxu0  ;;  %13531 = vmatprep.mubr.msk.f32.mxu1 %vm14614_vm3, %v14613_v45  ;;  %13524 = vmatpush3.msra.mxu1 %v12401_v5 }
0x3671   : > { %13525 = vmatprep.subr.mxu1 %v14613_v45 }
0x3672   : > { %13526 = vmatpush3.msra.mxu1 %v12400_v3 }
0x3673   : > { %13527 = vmatprep.subr.mxu1 %v14613_v45 }
0x3674   : > { %13528 = vmatpush3.msra.mxu1 %v12399_v24 }
0x3675   : > { %13529 = vmatprep.subr.mxu1 %v14613_v45 }
0x3676   : > { %13530 = vmatpush3.msra.mxu1 %v12398_v11 }
0x3677   : > { %13545 = vmatprep.subr.mxu1 %v14613_v45 }
0x372f   : > { %v8962_v36 = vpop.f32.mrf.mxu1 }
0x3730   : > { %v8966_v4 = vadd.f32 %v8962_v36, %v8727_v18  ;;  %v14156_v18 = vld [vmem:[%s14997_s28 + $0x8] sm:$0xff] }
0x3731   : > { %v13511_v62 = vpop.f32.mrf.mxu1 }
0x3732   : > { %v8967_v50 = vadd.f32 %v8966_v4, %v16088_v26 }
0x3734   : > { %v8968_v7 = vadd.f32 %v12377_v51, %v8967_v50 }
0x3736   : > { %v8969_v19 = vsel %vm1121_vm0, %v8968_v7, 0.0 }
0x3737   : > { %8970 = vadd.xlane.f32.xlu1 %v8969_v19 }
0x373b   : > { %7829 = vadd.xlane.f32.xlu1 %v7828_v21 }
0x37c0   : > { %v8971_v6 = vpop.xlane.xlu1 %8970 }
0x37c1   : > { %v8972_v56 = vmul.f32 0.03125, %v8971_v6 }
0x37c3   : > { %v8973_v55 = vsub.f32 %v8968_v7, %v8972_v56 }
0x37c4   : > { %v7830_v9 = vpop.xlane.xlu1 %7829 }
0x37c5   : > { %v7832_v13 = vmul.f32 0.03125, %v7830_v9  ;;  %v8974_v23 = vmul.f32 %v8973_v55, %v8973_v55 }
0x37c7   : > { %v7834_v32 = vsub.f32 %v7824_v34, %v7832_v13  ;;  %v8975_v28 = vsel %vm1121_vm0, %v8974_v23, 0.0 }
0x37c8   : > { %8976 = vadd.xlane.f32.xlu1 %v8975_v28 }
0x37c9   : > { %v7836_v58 = vmul.f32 %v7834_v32, %v7834_v32 }
0x37cb   : > { %v7840_v26 = vsel %vm1121_vm0, %v7836_v58, 0.0 }
0x37cc   : > { %7841 = vadd.xlane.f32.xlu1 %v7840_v26 }
0x3851   : > { %v8977_v47 = vpop.xlane.xlu1 %8976 }
0x3852   : > { %v8978_v37 = vmul.f32 0.03125, %v8977_v47 }
0x3854   : > { %v8979_v44 = vadd.f32 1e-05, %v8978_v37 }
0x3855   : > { %v7842_v30 = vpop.xlane.xlu1 %7841 }
0x3856   : > { %14088 = vrsqrt.f32 %v8979_v44  ;;  %v7844_v63 = vmul.f32 0.03125, %v7842_v30 }
0x3858   : > { %v7846_v41 = vadd.f32 1e-05, %v7844_v63 }
0x385a   : > { %14090 = vrsqrt.f32 %v7846_v41 }
0x3863   : > { %v14089_v31 = vpop.eup %14088 }
0x3864   : > { %v8981_v33 = vmul.f32 %v14089_v31, %v8973_v55  ;;  %v16363_v55 = vld [vmem:[%s16704_s16 + $0x28] sm:$0xff] }
0x3866   : > { %v8982_v60 = vmul.f32 %v16240_v39, %v8981_v33 }
0x3867   : > { %v14091_v1 = vpop.eup %14090 }
0x3868   : > { %v7850_v43 = vmul.f32 %v14091_v1, %v7834_v32  ;;  %v16282_v51 = vadd.f32 %v16242_v57, %v8982_v60 }
0x386a   : > { %v7858_v48 = vmul.f32 %v16240_v39, %v7850_v43  ;;  %v9080_v42 = vadd.f32 %v16091_v49, %v16282_v51  ;;  %v12407_v49 = vld [vmem:[%s16702_s14 + $0x28] sm:$0xff] }
0x386c   : > { %13532 = vmatmul.mubr.msk.f32.vlgmr.msra.gmra.mxu1 %vm1121_vm0, %v9080_v42  ;;  %v16292_v53 = vadd.f32 %v16242_v57, %v7858_v48 }
0x386d   : > { %13546 = vmatpush3.msra.mxu1 %v12409_v12  ;;  %13553 = vmatprep.mubr.msk.f32.mxu1 %vm14614_vm3, %v14613_v45 }
0x386e   : > { %13547 = vmatprep.subr.mxu1 %v14613_v45  ;;  %v8985_v15 = vadd.f32 %v14156_v18, %v16292_v53 }
0x386f   : > { %13548 = vmatpush3.msra.mxu1 %v12408_v29 }
0x3870   : > { %13549 = vmatprep.subr.mxu1 %v14613_v45  ;;  %13521 = vmatmul.mubr.msk.f32.vlgmr.msra.gmra.mxu0 %vm1121_vm0, %v8985_v15 }
0x3871   : > { %13535 = vmatpush3.msra.mxu0 %v12409_v12  ;;  %13550 = vmatpush3.msra.mxu1 %v12407_v49 }
0x3872   : > { %13536 = vmatprep.subr.mxu0 %v12408_v29  ;;  %13542 = vmatprep.mubr.msk.f32.mxu0 %vm1121_vm0, %v16246_v61 }
0x3873   : > { %13551 = vmatprep.subr.mxu1 %v14613_v45  ;;  %13537 = vmatpush3.msra.mxu0 %v12408_v29 }
0x3874   : > { %13552 = vmatpush3.msra.mxu1 %v12406_v16  ;;  %13538 = vmatprep.subr.mxu0 %v12407_v49 }
0x3875   : > { %13554 = vmatmul.mubr.msk.f32.vlgmr.msra.gmra.mxu1 %vm1121_vm0, %v16282_v51  ;;  %13539 = vmatpush3.msra.mxu0 %v12407_v49 }
0x3876   : > { %13540 = vmatprep.subr.mxu0 %v12406_v16 }
0x3877   : > { %13541 = vmatpush3.msra.mxu0 %v12406_v16 }
0x3878   : > { %13543 = vmatmul.mubr.msk.f32.vlgmr.msra.gmra.mxu0 %vm1121_vm0, %v16292_v53 }
0x392c   : > { %v9150_v27 = vpop.f32.mrf.mxu1 }
0x392d   : > { %v16329_v40 = vadd.f32 %v12402_v25, %v9150_v27 }
0x392e   : > { %v13533_v46 = vpop.f32.mrf.mxu1 }
0x3930   : > { %v13522_v2 = vpop.f32.mrf.mxu0 }
0x3931   : > { %v16337_v10 = vadd.f32 %v13522_v2, %v12402_v25 }
0x3932   : > { %v9071_v14 = vpop.f32.mrf.mxu0 }
0x3933   : > { %v16314_v8 = vadd.f32 %v12402_v25, %v9071_v14  ;;  %v16342_v59 = vmul.f32 0.35355338, %v16337_v10  ;;  %v16390_v14 = vld [vmem:[%s16704_s16 + $0x20] sm:$0xff] }
0x3935   : > { %v9317_v38 = vpop.f32.mrf.mxu1  ;;  %v16319_v22 = vmul.f32 0.35355338, %v16314_v8 }
0x3936   : > { %v16322_v52 = vadd.f32 %v16316_v35, %v9317_v38 }
0x3937   : > { %v13555_v54 = vpop.f32.mrf.mxu1  ;;  %9523 = vrot.lane.b32.xlu1 %v16319_v22, %s16779_s0  ;;  %13558 = vmatprep.mubr.msk.f32.mxu0 %vm1310_vm1, %v16319_v22 }
0x3938   : > { %13561 = vmatprep.subr.mxu1 %v16322_v52  ;;  %v13544_v39 = vpop.f32.mrf.mxu0 }
0x3939   : > { %v16332_v57 = vadd.f32 %v13544_v39, %v16316_v35  ;;  %13562 = vmatpush3.msra.mxu1 %v16322_v52 }
0x393a   : > { %v16354_v62 = vpop.f32.mrf.mxu0 }
0x393b   : > { %9335 = vrot.lane.b32.xlu1 %v16329_v40, %s16777_s30 }
0x393f   : > { %9527 = vrot.lane.b32.xlu1 %v16329_v40, %s16778_s2 }
0x3943   : > { %9525 = vrot.lane.b32.xlu1 %v16342_v59, %s16779_s0 }
0x39a9   : > { %v9524_v17 = vpop.permute.xlu1 %9523 }
0x39ad   : > { %v9336_v20 = vpop.permute.xlu1 %9335 }
0x39ae   : > { %13556 = vmatprep.subr.msk.mxu0 %vm1310_vm1, %v9336_v20 }
0x39af   : > { %13557 = vmatpush3.xpose.msk.msra.mxu0 %vm1310_vm1, %v9336_v20 }
0x39b1   : > { %v9528_v36 = vpop.permute.xlu1 %9527 }
0x39b2   : > { %13559 = vmatmul.mubr.msk.f32.vlgmr.msra.gmra.mxu0 %vm1310_vm1, %v16342_v59  ;;  %13566 = vmatprep.subr.msk.mxu0 %vm1310_vm1, %v9528_v36 }
0x39b3   : > { %13567 = vmatpush3.xpose.msk.msra.mxu0 %vm1310_vm1, %v9528_v36  ;;  %13568 = vmatprep.mubr.msk.f32.mxu0 %vm1310_vm1, %v9524_v17 }
0x39b4   : > { %13576 = vmatprep.subr.mxu0 %v16363_v55 }
0x39b5   : > { %v9526_v4 = vpop.permute.xlu1 %9525 }
0x39b6   : > { %13569 = vmatmul.mubr.msk.f32.vlgmr.msra.gmra.mxu0 %vm1310_vm1, %v9526_v4 }
0x39b7   : > { %13577 = vmatpush3.msra.mxu0 %v16363_v55 }
0x3a72   : > { %v13560_v0 = vpop.f32.mrf.mxu0 }
0x3a73   : > { %v9423_v50 = vsel %vm1310_vm1, %v13560_v0, -inf }
0x3a74   : > { %9424 = vmax.xlane.f32.xlu1 %v9423_v50  ;;  %v9411_v7 = vpop.f32.mrf.mxu0 }
0x3a75   : > { %v9420_v19 = vsel %vm1310_vm1, %v9411_v7, -inf }
0x3a76   : > { %v13570_v34 = vpop.f32.mrf.mxu0  ;;  %9421 = vmax.xlane.f32.xlu0 %v9420_v19 }
0x3a77   : > { %v9613_v56 = vsel %vm1310_vm1, %v13570_v34, -inf }
0x3a78   : > { %v9601_v21 = vpop.f32.mrf.mxu0 }
0x3a79   : > { %v9610_v6 = vsel %vm1310_vm1, %v9601_v21, -inf }
0x3a7a   : > { %9611 = vmax.xlane.f32.xlu0 %v9610_v6 }
0x3a7e   : > { %9614 = vmax.xlane.f32.xlu0 %v9613_v56 }
0x3a85   : > { %9883 = vrot.lane.b32.xlu1 %v16329_v40, %s16780_s4 }
0x3afd   : > { %v9425_v9 = vpop.xlane.xlu1 %9424 }
0x3afe   : > { %v9427_v13 = vsub.f32 %v13560_v0, %v9425_v9 }
0x3aff   : > { %v9422_v23 = vpop.xlane.xlu0 %9421 }
0x3b00   : > { %v9430_v32 = vmul.f32 1.442695, %v9427_v13  ;;  %v9426_v28 = vsub.f32 %v9411_v7, %v9422_v23 }
0x3b01   : > { %v16369_v58 = vpop.permute.xlu1 %9883 }
0x3b02   : > { %14092 = vpow2.f32 %v9430_v32  ;;  %v9428_v26 = vmul.f32 1.442695, %v9426_v28  ;;  %13586 = vmatprep.subr.msk.mxu0 %vm1310_vm1, %v16369_v58 }
0x3b03   : > { %v9612_v5 = vpop.xlane.xlu0 %9611 }
0x3b04   : > { %14094 = vpow2.f32 %v9428_v26  ;;  %v9616_v3 = vsub.f32 %v9601_v21, %v9612_v5 }
0x3b06   : > { %v9618_v12 = vmul.f32 1.442695, %v9616_v3 }
0x3b07   : > { %v9615_v24 = vpop.xlane.xlu0 %9614 }
0x3b08   : > { %v9617_v11 = vsub.f32 %v13570_v34, %v9615_v24 }
0x3b0a   : > { %v9620_v47 = vmul.f32 1.442695, %v9617_v11 }
0x3b0c   : > { %14096 = vpow2.f32 %v9620_v47 }
0x3b0d   : > { %14098 = vpow2.f32 %v9618_v12 }
0x3b0f   : > { %v14093_v37 = vpop.eup %14092 }
0x3b10   : > { %v9435_v44 = vsel %vm1310_vm1, %v14093_v37, 0.0 }
0x3b11   : > { %v14095_v30 = vpop.eup %14094  ;;  %9436 = vadd.xlane.f32.xlu0 %v9435_v44 }
0x3b12   : > { %v9432_v63 = vsel %vm1310_vm1, %v14095_v30, 0.0 }
0x3b15   : > { %9433 = vadd.xlane.f32.xlu0 %v9432_v63 }
0x3b19   : > { %v14097_v41 = vpop.eup %14096 }
0x3b1a   : > { %v9625_v31 = vsel %vm1310_vm1, %v14097_v41, 0.0  ;;  %v14099_v33 = vpop.eup %14098 }
0x3b1b   : > { %9626 = vadd.xlane.f32.xlu0 %v9625_v31  ;;  %v9622_v60 = vsel %vm1310_vm1, %v14099_v33, 0.0 }
0x3b1f   : > { %9623 = vadd.xlane.f32.xlu0 %v9622_v60 }
0x3b35   : > { %9633 = vrot.lane.b32.xlu0 %v16322_v52, %s16779_s0 }
0x3b39   : > { %9879 = vrot.lane.b32.xlu0 %v16319_v22, %s16782_s13 }
0x3b3d   : > { %9881 = vrot.lane.b32.xlu0 %v16342_v59, %s16782_s13 }
0x3b9a   : > { %v9437_v1 = vpop.xlane.xlu0 %9436 }
0x3b9b   : > { %14100 = vrcp.f32 %v9437_v1 }
0x3b9e   : > { %v9434_v43 = vpop.xlane.xlu0 %9433 }
0x3b9f   : > { %14102 = vrcp.f32 %v9434_v43 }
0x3ba4   : > { %v9627_v48 = vpop.xlane.xlu0 %9626 }
0x3ba5   : > { %14104 = vrcp.f32 %v9627_v48 }
0x3ba8   : > { %v9624_v42 = vpop.xlane.xlu0 %9623  ;;  %v14101_v29 = vpop.eup %14100 }
0x3ba9   : > { %14106 = vrcp.f32 %v9624_v42  ;;  %v9441_v16 = vmul.f32 %v14101_v29, %v14093_v37 }
0x3bac   : > { %v14103_v18 = vpop.eup %14102  ;;  %v9634_v15 = vpop.permute.xlu0 %9633 }
0x3bad   : > { %13571 = vmatprep.subr.mxu1 %v9634_v15  ;;  %v9440_v49 = vmul.f32 %v14103_v18, %v14095_v30 }
0x3baf   : > { %13563 = vmatprep.mubr.msk.f32.mxu1 %vm1310_vm1, %v9440_v49 }
0x3bb0   : > { %13564 = vmatmul.mubr.msk.f32.vlgmr.msra.gmra.mxu1 %vm1310_vm1, %v9441_v16  ;;  %v9880_v17 = vpop.permute.xlu0 %9879 }
0x3bb1   : > { %13572 = vmatpush3.msra.mxu1 %v9634_v15 }
0x3bb2   : > { %v14105_v27 = vpop.eup %14104  ;;  %13581 = vmatprep.subr.mxu1 %v16390_v14 }
0x3bb3   : > { %v9631_v25 = vmul.f32 %v14105_v27, %v14097_v41  ;;  %v16427_v41 = vld [vmem:[%s16704_s16 + $0x30] sm:$0xff] }
0x3bb4   : > { %v9882_v36 = vpop.permute.xlu0 %9881 }
0x3bb6   : > { %v14107_v46 = vpop.eup %14106 }
0x3bb7   : > { %v9630_v2 = vmul.f32 %v14107_v46, %v14099_v33 }
0x3bb9   : > { %13573 = vmatprep.mubr.msk.f32.mxu1 %vm1310_vm1, %v9630_v2 }
0x3bba   : > { %13574 = vmatmul.mubr.msk.f32.vlgmr.msra.gmra.mxu1 %vm1310_vm1, %v9631_v25 }
0x3bbb   : > { %13582 = vmatpush3.msra.mxu1 %v16390_v14 }
0x3c70   : > { %v13565_v38 = vpop.f32.mrf.mxu1 }
0x3c72   : > { %v9514_v54 = vpop.f32.mrf.mxu1 }
0x3c73   : > { %13583 = vmatprep.mubr.msk.f32.mxu1 %vm1310_vm1, %v9514_v54 }
0x3c74   : > { %13584 = vmatmul.mubr.msk.f32.vlgmr.msra.gmra.mxu1 %vm1310_vm1, %v13565_v38 }
0x3c7a   : > { %v13575_v39 = vpop.f32.mrf.mxu1 }
0x3c7c   : > { %v9708_v20 = vpop.f32.mrf.mxu1 }
0x3c7d   : > { %13578 = vmatprep.mubr.msk.f32.mxu0 %vm1310_vm1, %v9708_v20 }
0x3c7e   : > { %13579 = vmatmul.mubr.msk.f32.vlgmr.msra.gmra.mxu0 %vm1310_vm1, %v13575_v39 }
0x3c7f   : > { %13587 = vmatpush3.xpose.msk.msra.mxu0 %vm1310_vm1, %v16369_v58  ;;  %13588 = vmatprep.mubr.msk.f32.mxu0 %vm1310_vm1, %v9880_v17 }
0x3c80   : > { %13596 = vmatprep.subr.mxu0 %v16427_v41 }
0x3c82   : > { %13589 = vmatmul.mubr.msk.f32.vlgmr.msra.gmra.mxu0 %vm1310_vm1, %v9882_v36 }
0x3c83   : > { %13597 = vmatpush3.msra.mxu0 %v16427_v41 }
0x3d34   : > { %v13585_v4 = vpop.f32.mrf.mxu1 }
0x3d36   : > { %v16431_v31 = vpop.f32.mrf.mxu1 }
0x3d3e   : > { %v13580_v0 = vpop.f32.mrf.mxu0 }
0x3d3f   : > { %v16402_v50 = vadd.f32 %v13585_v4, %v13580_v0 }
0x3d40   : > { %v16404_v7 = vpop.f32.mrf.mxu0 }
0x3d42   : > { %v13590_v19 = vpop.f32.mrf.mxu0 }
0x3d43   : > { %v9969_v34 = vsel %vm1310_vm1, %v13590_v19, -inf }
0x3d44   : > { %9970 = vmax.xlane.f32.xlu0 %v9969_v34  ;;  %v9957_v21 = vpop.f32.mrf.mxu0 }
0x3d45   : > { %v9966_v6 = vsel %vm1310_vm1, %v9957_v21, -inf }
0x3d46   : > { %9967 = vmax.xlane.f32.xlu1 %v9966_v6  ;;  %v16465_v6 = vld [vmem:[%s16704_s16 + $0x38] sm:$0xff] }
0x3dcd   : > { %v9971_v56 = vpop.xlane.xlu0 %9970 }
0x3dce   : > { %v9973_v9 = vsub.f32 %v13590_v19, %v9971_v56 }
0x3dcf   : > { %v9968_v13 = vpop.xlane.xlu1 %9967 }
0x3dd0   : > { %v9976_v23 = vmul.f32 1.442695, %v9973_v9  ;;  %v9972_v32 = vsub.f32 %v9957_v21, %v9968_v13  ;;  %v16476_v13 = vadd.f32 %v16316_v35, %v16354_v62 }
0x3dd2   : > { %14108 = vpow2.f32 %v9976_v23  ;;  %v9974_v28 = vmul.f32 1.442695, %v9972_v32 }
0x3dd4   : > { %14110 = vpow2.f32 %v9974_v28 }
0x3ddf   : > { %v14109_v58 = vpop.eup %14108 }
0x3de0   : > { %v9981_v26 = vsel %vm1310_vm1, %v14109_v58, 0.0 }
0x3de1   : > { %v14111_v5 = vpop.eup %14110  ;;  %9982 = vadd.xlane.f32.xlu1 %v9981_v26 }
0x3de2   : > { %v9978_v3 = vsel %vm1310_vm1, %v14111_v5, 0.0 }
0x3de3   : > { %9979 = vadd.xlane.f32.xlu0 %v9978_v3 }
0x3df2   : > { %10159 = vrot.lane.b32.xlu1 %v16329_v40, %s16781_s5 }
0x3df6   : > { %10155 = vrot.lane.b32.xlu1 %v16319_v22, %s16776_s11 }
0x3df9   : > { %9988 = vrot.lane.b32.xlu0 %v16322_v52, %s16782_s13 }
0x3dfd   : > { %10157 = vrot.lane.b32.xlu0 %v16342_v59, %s16776_s11 }
0x3e6a   : > { %v9983_v24 = vpop.xlane.xlu1 %9982 }
0x3e6b   : > { %14112 = vrcp.f32 %v9983_v24 }
0x3e6c   : > { %v9980_v11 = vpop.xlane.xlu0 %9979 }
0x3e6d   : > { %14114 = vrcp.f32 %v9980_v11 }
0x3e6e   : > { %v10160_v47 = vpop.permute.xlu1 %10159 }
0x3e70   : > { %v9989_v12 = vpop.permute.xlu0 %9988 }
0x3e71   : > { %13591 = vmatprep.subr.mxu1 %v9989_v12 }
0x3e72   : > { %13592 = vmatpush3.msra.mxu1 %v9989_v12  ;;  %v10156_v63 = vpop.permute.xlu1 %10155 }
0x3e73   : > { %13601 = vmatprep.subr.msk.mxu1 %vm1310_vm1, %v10160_v47 }
0x3e74   : > { %v10158_v59 = vpop.permute.xlu0 %10157 }
0x3e78   : > { %v14113_v37 = vpop.eup %14112 }
0x3e79   : > { %v9987_v22 = vmul.f32 %v14113_v37, %v14109_v58 }
0x3e7a   : > { %v14115_v44 = vpop.eup %14114 }
0x3e7b   : > { %v9986_v30 = vmul.f32 %v14115_v44, %v14111_v5 }
0x3e7d   : > { %13593 = vmatprep.mubr.msk.f32.mxu1 %vm1310_vm1, %v9986_v30 }
0x3e7e   : > { %13594 = vmatmul.mubr.msk.f32.vlgmr.msra.gmra.mxu1 %vm1310_vm1, %v9987_v22 }
0x3e7f   : > { %13602 = vmatpush3.xpose.msk.msra.mxu1 %vm1310_vm1, %v10160_v47  ;;  %13603 = vmatprep.mubr.msk.f32.mxu1 %vm1310_vm1, %v10156_v63 }
0x3e80   : > { %13611 = vmatprep.subr.mxu1 %v16465_v6 }
0x3e82   : > { %13604 = vmatmul.mubr.msk.f32.vlgmr.msra.gmra.mxu1 %vm1310_vm1, %v10158_v59 }
0x3e83   : > { %13612 = vmatpush3.msra.mxu1 %v16465_v6 }
0x3e84   : > { %13623 = vmatprep.subr.mxu1 %v14613_v45 }
0x3f3e   : > { %v13595_v33 = vpop.f32.mrf.mxu1 }
0x3f40   : > { %v10063_v60 = vpop.f32.mrf.mxu1 }
0x3f41   : > { %13598 = vmatprep.mubr.msk.f32.mxu0 %vm1310_vm1, %v10063_v60 }
0x3f42   : > { %13599 = vmatmul.mubr.msk.f32.vlgmr.msra.gmra.mxu0 %vm1310_vm1, %v13595_v33  ;;  %v13605_v1 = vpop.f32.mrf.mxu1 }
0x3f43   : > { %v10245_v43 = vsel %vm1310_vm1, %v13605_v1, -inf }
0x3f44   : > { %10246 = vmax.xlane.f32.xlu0 %v10245_v43  ;;  %v10233_v48 = vpop.f32.mrf.mxu1 }
0x3f45   : > { %v10242_v42 = vsel %vm1310_vm1, %v10233_v48, -inf }
0x3f46   : > { %10243 = vmax.xlane.f32.xlu1 %v10242_v42 }
0x3fcd   : > { %v10247_v29 = vpop.xlane.xlu0 %10246 }
0x3fce   : > { %v10249_v18 = vsub.f32 %v13605_v1, %v10247_v29 }
0x3fcf   : > { %v10244_v15 = vpop.xlane.xlu1 %10243 }
0x3fd0   : > { %v10252_v49 = vmul.f32 1.442695, %v10249_v18  ;;  %v10248_v16 = vsub.f32 %v10233_v48, %v10244_v15 }
0x3fd2   : > { %14116 = vpow2.f32 %v10252_v49  ;;  %v10250_v27 = vmul.f32 1.442695, %v10248_v16 }
0x3fd4   : > { %14118 = vpow2.f32 %v10250_v27 }
0x3fdf   : > { %v14117_v46 = vpop.eup %14116 }
0x3fe0   : > { %v10257_v2 = vsel %vm1310_vm1, %v14117_v46, 0.0 }
0x3fe1   : > { %v14119_v25 = vpop.eup %14118  ;;  %10258 = vadd.xlane.f32.xlu1 %v10257_v2 }
0x3fe2   : > { %v10254_v38 = vsel %vm1310_vm1, %v14119_v25, 0.0 }
0x3fe3   : > { %10255 = vadd.xlane.f32.xlu0 %v10254_v38 }
0x3ff2   : > { %10488 = vrot.lane.b32.xlu1 %v16337_v10, %s16777_s30 }
0x3ff6   : > { %10486 = vrot.lane.b32.xlu1 %v16314_v8, %s16777_s30 }
0x3ff9   : > { %10264 = vrot.lane.b32.xlu0 %v16322_v52, %s16776_s11 }
0x4002   : > { %v13600_v54 = vpop.f32.mrf.mxu0 }
0x4003   : > { %v10154_v39 = vadd.f32 %v13600_v54, %v16402_v50  ;;  %v16455_v50 = vmul.f32 0.35355338, %v16329_v40 }
0x4004   : > { %v16470_v40 = vpop.f32.mrf.mxu0 }
0x406a   : > { %v10259_v17 = vpop.xlane.xlu1 %10258 }
0x406b   : > { %14120 = vrcp.f32 %v10259_v17 }
0x406c   : > { %v10256_v20 = vpop.xlane.xlu0 %10255 }
0x406d   : > { %14122 = vrcp.f32 %v10256_v20 }
0x406e   : > { %v10489_v34 = vpop.permute.xlu1 %10488 }
0x4070   : > { %v10265_v36 = vpop.permute.xlu0 %10264 }
0x4071   : > { %13606 = vmatprep.subr.mxu0 %v10265_v36 }
0x4072   : > { %13607 = vmatpush3.msra.mxu0 %v10265_v36  ;;  %v10487_v52 = vpop.permute.xlu1 %10486 }
0x4073   : > { %13616 = vmatprep.subr.mxu0 %v14613_v45 }
0x4078   : > { %v14121_v4 = vpop.eup %14120 }
0x4079   : > { %v10263_v21 = vmul.f32 %v14121_v4, %v14117_v46 }
0x407a   : > { %v14123_v0 = vpop.eup %14122 }
0x407b   : > { %v10262_v19 = vmul.f32 %v14123_v0, %v14119_v25 }
0x407d   : > { %13608 = vmatprep.mubr.msk.f32.mxu0 %vm1310_vm1, %v10262_v19 }
0x407e   : > { %13609 = vmatmul.mubr.msk.f32.vlgmr.msra.gmra.mxu0 %vm1310_vm1, %v10263_v21 }
0x407f   : > { %13617 = vmatpush3.xpose.msk.msra.mxu0 %vm1310_vm1, %v10489_v34  ;;  %13620 = vmatprep.mubr.msk.f32.mxu0 %vm14614_vm3, %v14613_v45 }
0x4080   : > { %13618 = vmatprep.subr.mxu0 %v14613_v45 }
0x4083   : > { %13619 = vmatpush3.xpose.msk.msra.mxu0 %vm1310_vm1, %v10487_v52 }
0x4084   : > { %13637 = vmatprep.subr.mxu0 %v14613_v45 }
0x4086   : > { %13621 = vmatmul.mubr.msk.f32.vlgmr.msra.gmra.mxu0 %vm1310_vm1, %v16455_v50 }
0x4087   : > { %13641 = vmatprep.mubr.msk.f32.mxu0 %vm14614_vm3, %v14613_v45 }
0x413e   : > { %v13610_v56 = vpop.f32.mrf.mxu0 }
0x4140   : > { %v10339_v9 = vpop.f32.mrf.mxu0 }
0x4141   : > { %13613 = vmatprep.mubr.msk.f32.mxu1 %vm1310_vm1, %v10339_v9 }
0x4142   : > { %13614 = vmatmul.mubr.msk.f32.vlgmr.msra.gmra.mxu1 %vm1310_vm1, %v13610_v56 }
0x4143   : > { %13624 = vmatpush3.msra.mxu1 %v16332_v57  ;;  %13627 = vmatprep.mubr.msk.f32.mxu1 %vm14614_vm3, %v14613_v45 }
0x4144   : > { %13625 = vmatprep.subr.mxu1 %v14613_v45 }
0x4145   : > { %13626 = vmatpush3.msra.mxu1 %v16476_v13 }
0x4146   : > { %v10563_v23 = vpop.f32.mrf.mxu0  ;;  %13630 = vmatprep.subr.mxu1 %v14613_v45 }
0x4147   : > { %v10567_v32 = vsel %vm1396_vm2, %v10563_v23, -inf }
0x4148   : > { %10568 = vmax.xlane.f32.xlu0 %v10567_v32  ;;  %v13622_v28 = vpop.f32.mrf.mxu0  ;;  %v16565_v32 = vld [vmem:[#allocation13 + $0x1] ss:$0 sm:$0xff] }
0x415e   : > { %10655 = vrot.lane.b32.xlu0 %v16337_v10, %s16778_s2 }
0x4162   : > { %10651 = vrot.lane.b32.xlu0 %v16455_v50, %s16779_s0 }
0x41d1   : > { %v10569_v35 = vpop.xlane.xlu0 %10568 }
0x41d2   : > { %v10570_v62 = vsub.f32 %v10563_v23, %v10569_v35 }
0x41d4   : > { %v10571_v58 = vmul.f32 1.442695, %v10570_v62 }
0x41d5   : > { %v10656_v37 = vpop.permute.xlu0 %10655 }
0x41d6   : > { %14124 = vpow2.f32 %v10571_v58 }
0x41d9   : > { %v10652_v30 = vpop.permute.xlu0 %10651 }
0x41e3   : > { %v14125_v26 = vpop.eup %14124 }
0x41e4   : > { %v10573_v5 = vsel %vm1396_vm2, %v14125_v26, 0.0 }
0x41e5   : > { %10574 = vadd.xlane.f32.xlu1 %v10573_v5 }
0x41f6   : > { %10653 = vrot.lane.b32.xlu1 %v16314_v8, %s16778_s2 }
0x4202   : > { %v13615_v3 = vpop.f32.mrf.mxu1 }
0x4203   : > { %v16492_v24 = vadd.f32 %v13615_v3, %v10154_v39 }
0x4204   : > { %v16506_v22 = vpop.f32.mrf.mxu1 }
0x426e   : > { %v10575_v11 = vpop.xlane.xlu1 %10574 }
0x426f   : > { %14126 = vrcp.f32 %v10575_v11 }
0x4272   : > { %v10654_v44 = vpop.permute.xlu1 %10653 }
0x427c   : > { %v14127_v12 = vpop.eup %14126 }
0x427d   : > { %v10577_v47 = vmul.f32 %v14127_v12, %v14125_v26 }
0x427f   : > { %13628 = vmatmul.mubr.msk.f32.vlgmr.msra.gmra.mxu1 %vm1396_vm2, %v10577_v47 }
0x4280   : > { %13631 = vmatpush3.xpose.msk.msra.mxu1 %vm1310_vm1, %v10656_v37  ;;  %13634 = vmatprep.mubr.msk.f32.mxu1 %vm14614_vm3, %v14613_v45 }
0x4281   : > { %13632 = vmatprep.subr.mxu1 %v14613_v45 }
0x4284   : > { %13633 = vmatpush3.xpose.msk.msra.mxu1 %vm1310_vm1, %v10654_v44 }
0x4285   : > { %13649 = vmatprep.subr.mxu1 %v14613_v45 }
0x4287   : > { %13635 = vmatmul.mubr.msk.f32.vlgmr.msra.gmra.mxu1 %vm1310_vm1, %v10652_v30 }
0x4288   : > { %13650 = vmatpush3.msra.mxu1 %v16390_v14  ;;  %13651 = vmatprep.mubr.msk.f32.mxu1 %vm14614_vm3, %v14613_v45 }
0x4289   : > { %13661 = vmatprep.subr.mxu1 %v14613_v45 }
0x433f   : > { %v10647_v63 = vpop.f32.mrf.mxu1 }
0x4340   : > { %13652 = vmatmul.mubr.msk.f32.vlgmr.msra.gmra.mxu1 %vm1310_vm1, %v10647_v63  ;;  %v10432_v63 = vadd.f32 %v16492_v24, %v16292_v53 }
0x4341   : > { %v13629_v59 = vpop.f32.mrf.mxu1  ;;  %13665 = vmatprep.mubr.msk.f32.mxu1 %vm14614_vm3, %v14613_v45 }
0x4342   : > { %v10440_v59 = vadd.f32 %v16565_v32, %v10432_v63 }
0x4347   : > { %v10729_v33 = vpop.f32.mrf.mxu1 }
0x4348   : > { %v10733_v60 = vsel %vm1396_vm2, %v10729_v33, -inf }
0x4349   : > { %10734 = vmax.xlane.f32.xlu1 %v10733_v60  ;;  %v13636_v1 = vpop.f32.mrf.mxu1 }
0x435a   : > { %10746 = vrot.lane.b32.xlu1 %v16476_v13, %s16779_s0 }
0x435e   : > { %10975 = vrot.lane.b32.xlu1 %v16337_v10, %s16780_s4 }
0x4362   : > { %10971 = vrot.lane.b32.xlu1 %v16455_v50, %s16782_s13 }
0x4366   : > { %11219 = vrot.lane.b32.xlu1 %v16314_v8, %s16781_s5 }
0x43d2   : > { %v10735_v14 = vpop.xlane.xlu1 %10734 }
0x43d3   : > { %v10736_v43 = vsub.f32 %v10729_v33, %v10735_v14  ;;  %v10444_v33 = vsel %vm1121_vm0, %v10440_v59, 0.0 }
0x43d5   : > { %v10737_v48 = vmul.f32 1.442695, %v10736_v43 }
0x43d6   : > { %v10747_v27 = vpop.permute.xlu1 %10746 }
0x43d7   : > { %14128 = vpow2.f32 %v10737_v48 }
0x43da   : > { %v10976_v2 = vpop.permute.xlu1 %10975 }
0x43e4   : > { %v14129_v42 = vpop.eup %14128 }
0x43e5   : > { %v10739_v29 = vsel %vm1396_vm2, %v14129_v42, 0.0 }
0x43e6   : > { %10740 = vadd.xlane.f32.xlu0 %v10739_v29 }
0x43fc   : > { %10748 = vrot.lane.b32.xlu0 %v16332_v57, %s16779_s0 }
0x4400   : > { %10973 = vrot.lane.b32.xlu0 %v16314_v8, %s16780_s4  ;;  %v16525_v18 = vpop.f32.mrf.mxu1  ;;  %s1097_s4 = scalar_lea.vmem %s16714_s26, %s14987_s8 }
0x4402   : > { %v13653_v15 = vpop.f32.mrf.mxu1 }
0x4403   : > { %v16589_v15 = vld [vmem:[#allocation16 + $0x1] ss:$0 sm:$0xff] }
0x4404   : > { %11221 = vrot.lane.b32.xlu0 %v16337_v10, %s16781_s5 }
0x4408   : > { %11217 = vrot.lane.b32.xlu0 %v16455_v50, %s16776_s11  ;;  %v9871_v50 = vadd.f32 %v16431_v31, %v16404_v7 }
0x440a   : > { %v10153_v56 = vadd.f32 %v16470_v40, %v9871_v50 }
0x440c   : > { %v10429_v9 = vadd.f32 %v16506_v22, %v10153_v56  ;;  %v11484_v56 = vld [vmem:[#allocation18 + $0x38] sm:$0xff] }
0x440e   : > { %v10431_v23 = vadd.f32 %v10429_v9, %v16246_v61  ;;  %v11483_v9 = vld [vmem:[#allocation18 + $0x30] sm:$0xff] }
0x4410   : > { %v10439_v28 = vadd.f32 %v16565_v32, %v10431_v23  ;;  %v11482_v23 = vld [vmem:[#allocation18 + $0x28] sm:$0xff] }
0x4412   : > { %v10441_v35 = vsel %vm1121_vm0, %v10439_v28, 0.0 }
0x446f   : > { %v10741_v49 = vpop.xlane.xlu0 %10740 }
0x4470   : > { %14130 = vrcp.f32 %v10741_v49 }
0x4473   : > { %v10749_v16 = vpop.permute.xlu0 %10748 }
0x4474   : > { %13638 = vmatpush3.msra.mxu0 %v10749_v16 }
0x4475   : > { %13639 = vmatprep.subr.mxu0 %v14613_v45 }
0x4476   : > { %13640 = vmatpush3.msra.mxu0 %v10747_v27 }
0x4477   : > { %13644 = vmatprep.subr.mxu0 %v14613_v45  ;;  %v10974_v38 = vpop.permute.xlu0 %10973 }
0x447b   : > { %v11222_v54 = vpop.permute.xlu0 %11221 }
0x447d   : > { %v14131_v8 = vpop.eup %14130 }
0x447e   : > { %v10743_v46 = vmul.f32 %v14131_v8, %v14129_v42  ;;  %v16587_v42 = vld [vmem:[#allocation15 + $0x1] ss:$0 sm:$0xff] }
0x447f   : > { %v11218_v17 = vpop.permute.xlu0 %11217 }
0x4480   : > { %13642 = vmatmul.mubr.msk.f32.vlgmr.msra.gmra.mxu0 %vm1396_vm2, %v10743_v46 }
0x4481   : > { %13645 = vmatpush3.msra.mxu0 %v16363_v55  ;;  %13646 = vmatprep.mubr.msk.f32.mxu0 %vm14614_vm3, %v14613_v45  ;;  %v10972_v55 = vpop.permute.xlu1 %10971 }
0x4482   : > { %13654 = vmatprep.subr.mxu0 %v14613_v45 }
0x4485   : > { %v11220_v39 = vpop.permute.xlu1 %11219 }
0x4540   : > { %v10821_v10 = vpop.f32.mrf.mxu0 }
0x4541   : > { %13647 = vmatmul.mubr.msk.f32.vlgmr.msra.gmra.mxu0 %vm1310_vm1, %v10821_v10 }
0x4542   : > { %13655 = vmatpush3.xpose.msk.msra.mxu0 %vm1310_vm1, %v10976_v2  ;;  %v13643_v25 = vpop.f32.mrf.mxu0  ;;  %13658 = vmatprep.mubr.msk.f32.mxu0 %vm14614_vm3, %v14613_v45 }
0x4543   : > { %13656 = vmatprep.subr.mxu0 %v14613_v45 }
0x4546   : > { %13657 = vmatpush3.xpose.msk.msra.mxu0 %vm1310_vm1, %v10974_v38 }
0x4547   : > { %13673 = vmatprep.subr.mxu0 %v14613_v45 }
0x4549   : > { %13659 = vmatmul.mubr.msk.f32.vlgmr.msra.gmra.mxu0 %vm1310_vm1, %v10972_v55 }
0x454a   : > { %13674 = vmatpush3.xpose.msk.msra.mxu0 %vm1310_vm1, %v11222_v54  ;;  %13677 = vmatprep.mubr.msk.f32.mxu0 %vm14614_vm3, %v14613_v45 }
0x454b   : > { %13675 = vmatprep.subr.mxu0 %v14613_v45 }
0x454e   : > { %13676 = vmatpush3.xpose.msk.msra.mxu0 %vm1310_vm1, %v11220_v39 }
0x454f   : > { %13692 = vmatprep.subr.mxu0 %v11484_v56 }
0x4551   : > { %13678 = vmatmul.mubr.msk.f32.vlgmr.msra.gmra.mxu0 %vm1310_vm1, %v11218_v17 }
0x4552   : > { %13693 = vmatpush3.msra.mxu0 %v11484_v56 }
0x4553   : > { %13694 = vmatprep.subr.mxu0 %v11483_v9 }
0x4554   : > { %13695 = vmatpush3.msra.mxu0 %v11483_v9 }
0x4555   : > { %13696 = vmatprep.subr.mxu0 %v11482_v23 }
0x4556   : > { %13697 = vmatpush3.msra.mxu0 %v11482_v23 }
0x4601   : > { %v16552_v20 = vpop.f32.mrf.mxu0 }
0x4602   : > { %v10968_v25 = vadd.f32 %v16525_v18, %v16552_v20 }
0x4603   : > { %v13648_v36 = vpop.f32.mrf.mxu0 }
0x4609   : > { %v11049_v4 = vpop.f32.mrf.mxu0 }
0x460a   : > { %v11053_v0 = vsel %vm1396_vm2, %v11049_v4, -inf }
0x460b   : > { %11054 = vmax.xlane.f32.xlu1 %v11053_v0  ;;  %v13660_v19 = vpop.f32.mrf.mxu0 }
0x4611   : > { %v11295_v34 = vpop.f32.mrf.mxu0 }
0x4612   : > { %v11299_v52 = vsel %vm1396_vm2, %v11295_v34, -inf }
0x4613   : > { %v13679_v21 = vpop.f32.mrf.mxu0 }
0x461c   : > { %11064 = vrot.lane.b32.xlu1 %v16476_v13, %s16782_s13 }
0x4640   : > { %11300 = vmax.xlane.f32.xlu1 %v11299_v52 }
0x4651   : > { %11310 = vrot.lane.b32.xlu1 %v16476_v13, %s16776_s11 }
0x4675   : > { %10442 = vadd.xlane.f32.xlu1 %v10441_v35 }
0x4694   : > { %v11055_v62 = vpop.xlane.xlu1 %11054 }
0x4695   : > { %v11056_v58 = vsub.f32 %v11049_v4, %v11055_v62 }
0x4697   : > { %v11057_v26 = vmul.f32 1.442695, %v11056_v58 }
0x4698   : > { %v11065_v31 = vpop.permute.xlu1 %11064 }
0x4699   : > { %14132 = vpow2.f32 %v11057_v26 }
0x46a6   : > { %v14133_v13 = vpop.eup %14132 }
0x46a7   : > { %v11059_v7 = vsel %vm1396_vm2, %v14133_v13, 0.0 }
0x46a8   : > { %11060 = vadd.xlane.f32.xlu0 %v11059_v7 }
0x46be   : > { %11066 = vrot.lane.b32.xlu0 %v16332_v57, %s16782_s13 }
0x46c9   : > { %v11301_v61 = vpop.xlane.xlu1 %11300 }
0x46ca   : > { %v11302_v40 = vsub.f32 %v11295_v34, %v11301_v61 }
0x46cc   : > { %v11303_v5 = vmul.f32 1.442695, %v11302_v40 }
0x46cd   : > { %v11311_v12 = vpop.permute.xlu1 %11310 }
0x46ce   : > { %14134 = vpow2.f32 %v11303_v5 }
0x46db   : > { %v14135_v3 = vpop.eup %14134 }
0x46dc   : > { %v11305_v11 = vsel %vm1396_vm2, %v14135_v3, 0.0 }
0x46dd   : > { %11306 = vadd.xlane.f32.xlu0 %v11305_v11  ;;  %v12475_v11 = vld [vmem:[%s16710_s22 + $0x70] sm:$0xff] }
0x46f3   : > { %11312 = vrot.lane.b32.xlu0 %v16332_v57, %s16776_s11 }
0x46fe   : > { %v10443_v47 = vpop.xlane.xlu1 %10442 }
0x46ff   : > { %v10447_v37 = vmul.f32 0.03125, %v10443_v47  ;;  %v12473_v47 = vld [vmem:[%s16710_s22 + $0x60] sm:$0xff] }
0x4701   : > { %v10449_v44 = vsub.f32 %v10439_v28, %v10447_v37  ;;  %v11481_v28 = vld [vmem:[#allocation18 + $0x20] sm:$0xff] }
0x4702   : > { %13698 = vmatprep.subr.mxu0 %v11481_v28  ;;  %v12472_v37 = vld [vmem:[%s16710_s22 + $0x58] sm:$0xff] }
0x4703   : > { %v10451_v30 = vmul.f32 %v10449_v44, %v10449_v44  ;;  %13699 = vmatpush3.msra.mxu0 %v11481_v28 }
0x4704   : > { %13722 = vmatprep.subr.mxu0 %v14613_v45 }
0x4705   : > { %v10453_v22 = vsel %vm1121_vm0, %v10451_v30, 0.0  ;;  %v12470_v30 = vld [vmem:[%s16710_s22 + $0x48] sm:$0xff] }
0x4706   : > { %10454 = vadd.xlane.f32.xlu1 %v10453_v22  ;;  %v12469_v22 = vld [vmem:[%s16710_s22 + $0x40] sm:$0xff] }
0x4712   : > { %10445 = vadd.xlane.f32.xlu0 %v10444_v33 }
0x4731   : > { %v11061_v60 = vpop.xlane.xlu0 %11060 }
0x4732   : > { %14136 = vrcp.f32 %v11061_v60 }
0x4735   : > { %v11067_v1 = vpop.permute.xlu0 %11066 }
0x4736   : > { %13662 = vmatpush3.msra.mxu1 %v11067_v1 }
0x4737   : > { %13663 = vmatprep.subr.mxu1 %v14613_v45 }
0x4738   : > { %13664 = vmatpush3.msra.mxu1 %v11065_v31 }
0x4739   : > { %13668 = vmatprep.subr.mxu1 %v14613_v45 }
0x473f   : > { %v14137_v57 = vpop.eup %14136 }
0x4740   : > { %v11063_v14 = vmul.f32 %v14137_v57, %v14133_v13 }
0x4742   : > { %13666 = vmatmul.mubr.msk.f32.vlgmr.msra.gmra.mxu1 %vm1396_vm2, %v11063_v14 }
0x4743   : > { %13669 = vmatpush3.msra.mxu1 %v16427_v41  ;;  %13670 = vmatprep.mubr.msk.f32.mxu1 %vm14614_vm3, %v14613_v45 }
0x4744   : > { %13680 = vmatprep.subr.mxu1 %v14613_v45 }
0x4766   : > { %v11307_v41 = vpop.xlane.xlu0 %11306 }
0x476a   : > { %v11313_v46 = vpop.permute.xlu0 %11312 }
0x478f   : > { %v10455_v53 = vpop.xlane.xlu1 %10454 }
0x4790   : > { %v10459_v24 = vmul.f32 0.03125, %v10455_v53  ;;  %v12477_v53 = vld [vmem:[#allocation19 + $0x1] ss:$0 sm:$0xff] }
0x4792   : > { %v10461_v43 = vadd.f32 1e-05, %v10459_v24 }
0x4794   : > { %14138 = vrsqrt.f32 %v10461_v43 }
0x4795   : > { %14140 = vrcp.f32 %v11307_v41 }
0x479b   : > { %v10446_v36 = vpop.xlane.xlu0 %10445 }
0x479c   : > { %v10448_v4 = vmul.f32 0.03125, %v10446_v36 }
0x479e   : > { %v10450_v21 = vsub.f32 %v10440_v59, %v10448_v4 }
0x47a0   : > { %v10452_v18 = vmul.f32 %v10450_v21, %v10450_v21 }
0x47a1   : > { %v14139_v48 = vpop.eup %14138 }
0x47a2   : > { %v10465_v29 = vmul.f32 %v14139_v48, %v10449_v44  ;;  %v14141_v27 = vpop.eup %14140  ;;  %v10456_v20 = vsel %vm1121_vm0, %v10452_v18, 0.0  ;;  %v12471_v44 = vld [vmem:[%s16710_s22 + $0x50] sm:$0xff] }
0x47a3   : > { %v11309_v2 = vmul.f32 %v14141_v27, %v14135_v3  ;;  %v12476_v3 = vld [vmem:[%s16710_s22 + $0x78] sm:$0xff] }
0x47a4   : > { %v10473_v49 = vmul.f32 %v16587_v42, %v10465_v29 }
0x47a6   : > { %v16593_v16 = vadd.f32 %v16589_v15, %v10473_v49 }
0x47a8   : > { %13700 = vmatprep.mubr.msk.f32.mxu0 %vm1121_vm0, %v16593_v16 }
0x4802   : > { %v11139_v8 = vpop.f32.mrf.mxu1 }
0x4803   : > { %13671 = vmatmul.mubr.msk.f32.vlgmr.msra.gmra.mxu1 %vm1310_vm1, %v11139_v8 }
0x4804   : > { %13681 = vmatpush3.msra.mxu1 %v11313_v46  ;;  %v13667_v10 = vpop.f32.mrf.mxu1  ;;  %13684 = vmatprep.mubr.msk.f32.mxu1 %vm14614_vm3, %v14613_v45  ;;  %v12480_v46 = vld [vmem:[#allocation21 + $0x1] ss:$0 sm:$0xff] }
0x4805   : > { %13682 = vmatprep.subr.mxu1 %v14613_v45 }
0x4806   : > { %13683 = vmatpush3.msra.mxu1 %v11311_v12  ;;  %v12474_v12 = vld [vmem:[%s16710_s22 + $0x68] sm:$0xff] }
0x4807   : > { %13685 = vmatmul.mubr.msk.f32.vlgmr.msra.gmra.mxu1 %vm1396_vm2, %v11309_v2  ;;  %13687 = vmatprep.subr.mxu1 %v14613_v45 }
0x4808   : > { %13688 = vmatpush3.msra.mxu1 %v16465_v6  ;;  %13689 = vmatprep.mubr.msk.f32.mxu1 %vm14614_vm3, %v14613_v45 }
0x4809   : > { %13703 = vmatprep.subr.mxu1 %v12476_v3 }
0x48c3   : > { %v11212_v38 = vpop.f32.mrf.mxu1 }
0x48c4   : > { %v11216_v55 = vadd.f32 %v11212_v38, %v10968_v25 }
0x48c5   : > { %v13672_v54 = vpop.f32.mrf.mxu1 }
0x48c7   : > { %v11385_v39 = vpop.f32.mrf.mxu1 }
0x48c8   : > { %13690 = vmatmul.mubr.msk.f32.vlgmr.msra.gmra.mxu1 %vm1310_vm1, %v11385_v39 }
0x48c9   : > { %v13686_v17 = vpop.f32.mrf.mxu1  ;;  %13704 = vmatpush3.msra.mxu1 %v12476_v3 }
0x48ca   : > { %13705 = vmatprep.subr.mxu1 %v12475_v11 }
0x48cb   : > { %13706 = vmatpush3.msra.mxu1 %v12475_v11 }
0x48cc   : > { %13707 = vmatprep.subr.mxu1 %v12474_v12 }
0x48cd   : > { %13708 = vmatpush3.msra.mxu1 %v12474_v12 }
0x48ce   : > { %13709 = vmatprep.subr.mxu1 %v12473_v47 }
0x48cf   : > { %13710 = vmatpush3.msra.mxu1 %v12473_v47 }
0x48d0   : > { %13711 = vmatprep.subr.mxu1 %v12472_v37 }
0x48d1   : > { %13712 = vmatpush3.msra.mxu1 %v12472_v37 }
0x48d2   : > { %13713 = vmatprep.subr.mxu1 %v12471_v44 }
0x48d3   : > { %13714 = vmatpush3.msra.mxu1 %v12471_v44 }
0x48d4   : > { %13715 = vmatprep.subr.mxu1 %v12470_v30 }
0x48d5   : > { %13716 = vmatpush3.msra.mxu1 %v12470_v30 }
0x48d6   : > { %13717 = vmatprep.subr.mxu1 %v12469_v22 }
0x48d7   : > { %13718 = vmatpush3.msra.mxu1 %v12469_v22 }
0x4988   : > { %v11458_v0 = vpop.f32.mrf.mxu1 }
0x4989   : > { %v11462_v19 = vadd.f32 %v11458_v0, %v11216_v55 }
0x498a   : > { %v13691_v34 = vpop.f32.mrf.mxu1 }
0x498b   : > { %v11463_v6 = vadd.f32 %v11462_v19, %v16282_v51 }
0x498d   : > { %v11464_v52 = vadd.f32 %v16565_v32, %v11463_v6 }
0x498f   : > { %v11465_v50 = vsel %vm1121_vm0, %v11464_v52, 0.0 }
0x4990   : > { %11466 = vadd.xlane.f32.xlu0 %v11465_v50 }
0x4994   : > { %10457 = vadd.xlane.f32.xlu0 %v10456_v20 }
0x4a19   : > { %v11467_v51 = vpop.xlane.xlu0 %11466 }
0x4a1a   : > { %v11468_v32 = vmul.f32 0.03125, %v11467_v51 }
0x4a1c   : > { %v11469_v35 = vsub.f32 %v11464_v52, %v11468_v32 }
0x4a1d   : > { %v10458_v62 = vpop.xlane.xlu0 %10457 }
0x4a1e   : > { %v10460_v58 = vmul.f32 0.03125, %v10458_v62  ;;  %v11470_v26 = vmul.f32 %v11469_v35, %v11469_v35 }
0x4a20   : > { %v10462_v13 = vadd.f32 1e-05, %v10460_v58  ;;  %v11471_v7 = vsel %vm1121_vm0, %v11470_v26, 0.0 }
0x4a21   : > { %11472 = vadd.xlane.f32.xlu1 %v11471_v7 }
0x4a22   : > { %14142 = vrsqrt.f32 %v10462_v13 }
0x4a2f   : > { %v14143_v31 = vpop.eup %14142 }
0x4a30   : > { %v10466_v61 = vmul.f32 %v14143_v31, %v10450_v21 }
0x4a32   : > { %v10474_v40 = vmul.f32 %v16587_v42, %v10466_v61 }
0x4a34   : > { %v16617_v5 = vadd.f32 %v16589_v15, %v10474_v40  ;;  %v12483_v40 = vld [vmem:[#allocation22 + $0x1] ss:$0 sm:$0xff] }
0x4a36   : > { %13701 = vmatmul.mubr.msk.f32.vlgmr.msra.gmra.mxu0 %vm1121_vm0, %v16617_v5 }
0x4a37   : > { %13723 = vmatpush3.msra.mxu0 %v11484_v56  ;;  %13730 = vmatprep.mubr.msk.f32.mxu0 %vm14614_vm3, %v14613_v45 }
0x4a38   : > { %13724 = vmatprep.subr.mxu0 %v14613_v45 }
0x4a39   : > { %13725 = vmatpush3.msra.mxu0 %v11483_v9 }
0x4a3a   : > { %13726 = vmatprep.subr.mxu0 %v14613_v45 }
0x4a3b   : > { %13727 = vmatpush3.msra.mxu0 %v11482_v23 }
0x4a3c   : > { %13728 = vmatprep.subr.mxu0 %v14613_v45 }
0x4a3d   : > { %13729 = vmatpush3.msra.mxu0 %v11481_v28 }
0x4a3e   : > { %13733 = vmatprep.subr.mxu0 %v14613_v45 }
0x4aaa   : > { %v11473_v63 = vpop.xlane.xlu1 %11472 }
0x4aab   : > { %v11474_v59 = vmul.f32 0.03125, %v11473_v63 }
0x4aad   : > { %v11475_v33 = vadd.f32 1e-05, %v11474_v59 }
0x4aaf   : > { %14144 = vrsqrt.f32 %v11475_v33 }
0x4abc   : > { %v14145_v60 = vpop.eup %14144 }
0x4abd   : > { %v11477_v1 = vmul.f32 %v14145_v60, %v11469_v35 }
0x4abf   : > { %v11478_v57 = vmul.f32 %v16587_v42, %v11477_v1 }
0x4ac1   : > { %v11479_v14 = vadd.f32 %v16589_v15, %v11478_v57 }
0x4ac3   : > { %13731 = vmatmul.mubr.msk.f32.vlgmr.msra.gmra.mxu0 %vm1121_vm0, %v11479_v14 }
0x4ac4   : > { %13734 = vmatpush3.msra.mxu0 %v12476_v3  ;;  %13749 = vmatprep.mubr.msk.f32.mxu0 %vm14614_vm3, %v14613_v45 }
0x4ac5   : > { %13735 = vmatprep.subr.mxu0 %v14613_v45 }
0x4ac6   : > { %13736 = vmatpush3.msra.mxu0 %v12475_v11  ;;  %v12484_v11 = vld [vmem:[#allocation24 + $0x1] ss:$0 sm:$0xff] }
0x4ac7   : > { %13737 = vmatprep.subr.mxu0 %v14613_v45 }
0x4ac8   : > { %13738 = vmatpush3.msra.mxu0 %v12474_v12 }
0x4ac9   : > { %13739 = vmatprep.subr.mxu0 %v14613_v45 }
0x4aca   : > { %13740 = vmatpush3.msra.mxu0 %v12473_v47 }
0x4acb   : > { %13741 = vmatprep.subr.mxu0 %v14613_v45 }
0x4acc   : > { %13742 = vmatpush3.msra.mxu0 %v12472_v37 }
0x4acd   : > { %13743 = vmatprep.subr.mxu0 %v14613_v45 }
0x4ace   : > { %13744 = vmatpush3.msra.mxu0 %v12471_v44 }
0x4acf   : > { %13745 = vmatprep.subr.mxu0 %v14613_v45 }
0x4ad0   : > { %13746 = vmatpush3.msra.mxu0 %v12470_v30 }
0x4ad1   : > { %13747 = vmatprep.subr.mxu0 %v14613_v45 }
0x4ad2   : > { %13748 = vmatpush3.msra.mxu0 %v12469_v22 }
0x4af6   : > { %v13702_v24 = vpop.f32.mrf.mxu0 }
0x4af7   : > { %v11586_v43 = vadd.f32 %v13702_v24, %v12477_v53 }
0x4af8   : > { %v11580_v48 = vpop.f32.mrf.mxu0 }
0x4af9   : > { %v11581_v42 = vadd.f32 %v12477_v53, %v11580_v48  ;;  %v11590_v15 = vmax.f32 %v11586_v43, 0.0 }
0x4afb   : > { %v11589_v29 = vmax.f32 %v11581_v42, 0.0 }
0x4afd   : > { %13719 = vmatprep.mubr.msk.f32.mxu1 %vm6199_vm4, %v11589_v29 }
0x4afe   : > { %13720 = vmatmul.mubr.msk.f32.vlgmr.msra.gmra.mxu1 %vm6199_vm4, %v11590_v15 }
0x4b83   : > { %v11791_v49 = vpop.f32.mrf.mxu0 }
0x4b84   : > { %v11792_v41 = vadd.f32 %v12477_v53, %v11791_v49 }
0x4b85   : > { %v13732_v27 = vpop.f32.mrf.mxu0 }
0x4b86   : > { %v11795_v8 = vmax.f32 %v11792_v41, 0.0 }
0x4b88   : > { %13750 = vmatmul.mubr.msk.f32.vlgmr.msra.gmra.mxu0 %vm6199_vm4, %v11795_v8 }
0x4bbe   : > { %v13721_v45 = vpop.f32.mrf.mxu1 }
0x4bbf   : > { %v11675_v10 = vadd.f32 %v13721_v45, %v12480_v46 }
0x4bc0   : > { %v11669_v2 = vpop.f32.mrf.mxu1 }
0x4bc1   : > { %v11679_v25 = vadd.f32 %v11675_v10, %v16617_v5  ;;  %v11670_v38 = vadd.f32 %v12480_v46, %v11669_v2 }
0x4bc3   : > { %v11678_v55 = vadd.f32 %v11670_v38, %v16593_v16  ;;  %v11683_v54 = vsel %vm1121_vm0, %v11679_v25, 0.0 }
0x4bc4   : > { %11684 = vadd.xlane.f32.xlu1 %v11683_v54 }
0x4bc5   : > { %v11680_v39 = vsel %vm1121_vm0, %v11678_v55, 0.0 }
0x4bc6   : > { %11681 = vadd.xlane.f32.xlu0 %v11680_v39 }
0x4c48   : > { %v11865_v17 = vpop.f32.mrf.mxu0 }
0x4c49   : > { %v11866_v6 = vadd.f32 %v12480_v46, %v11865_v17 }
0x4c4a   : > { %v13751_v36 = vpop.f32.mrf.mxu0 }
0x4c4b   : > { %v11869_v16 = vadd.f32 %v11866_v6, %v11479_v14 }
0x4c4d   : > { %v11685_v4 = vpop.xlane.xlu1 %11684  ;;  %v11870_v9 = vsel %vm1121_vm0, %v11869_v16, 0.0 }
0x4c4e   : > { %v11687_v0 = vmul.f32 0.03125, %v11685_v4 }
0x4c4f   : > { %v11682_v19 = vpop.xlane.xlu0 %11681 }
0x4c50   : > { %v11689_v34 = vsub.f32 %v11679_v25, %v11687_v0  ;;  %v11686_v21 = vmul.f32 0.03125, %v11682_v19 }
0x4c52   : > { %v11688_v52 = vsub.f32 %v11678_v55, %v11686_v21  ;;  %v11691_v50 = vmul.f32 %v11689_v34, %v11689_v34 }
0x4c54   : > { %v11695_v18 = vsel %vm1121_vm0, %v11691_v50, 0.0  ;;  %v11690_v20 = vmul.f32 %v11688_v52, %v11688_v52 }
0x4c55   : > { %11696 = vadd.xlane.f32.xlu1 %v11695_v18 }
0x4c56   : > { %v11692_v56 = vsel %vm1121_vm0, %v11690_v20, 0.0 }
0x4c57   : > { %11693 = vadd.xlane.f32.xlu0 %v11692_v56 }
0x4c5b   : > { %11871 = vadd.xlane.f32.xlu0 %v11870_v9 }
0x4cde   : > { %v11697_v23 = vpop.xlane.xlu1 %11696 }
0x4cdf   : > { %v11699_v28 = vmul.f32 0.03125, %v11697_v23 }
0x4ce0   : > { %v11694_v51 = vpop.xlane.xlu0 %11693 }
0x4ce1   : > { %v11701_v32 = vadd.f32 1e-05, %v11699_v28  ;;  %v11698_v35 = vmul.f32 0.03125, %v11694_v51 }
0x4ce3   : > { %14146 = vrsqrt.f32 %v11701_v32  ;;  %v11700_v62 = vadd.f32 1e-05, %v11698_v35 }
0x4ce4   : > { %v11872_v58 = vpop.xlane.xlu0 %11871 }
0x4ce5   : > { %14148 = vrsqrt.f32 %v11700_v62  ;;  %v11873_v26 = vmul.f32 0.03125, %v11872_v58 }
0x4ce7   : > { %v11874_v13 = vsub.f32 %v11869_v16, %v11873_v26 }
0x4ce9   : > { %v11875_v7 = vmul.f32 %v11874_v13, %v11874_v13 }
0x4ceb   : > { %v11876_v31 = vsel %vm1121_vm0, %v11875_v7, 0.0 }
0x4cec   : > { %11877 = vadd.xlane.f32.xlu1 %v11876_v31 }
0x4cf0   : > { %v14147_v61 = vpop.eup %14146 }
0x4cf1   : > { %v11705_v5 = vmul.f32 %v14147_v61, %v11689_v34 }
0x4cf2   : > { %v14149_v3 = vpop.eup %14148 }
0x4cf3   : > { %v11713_v12 = vmul.f32 %v12483_v40, %v11705_v5  ;;  %v11704_v47 = vmul.f32 %v14149_v3, %v11688_v52 }
0x4cf5   : > { %v11721_v37 = vadd.f32 %v12484_v11, %v11713_v12  ;;  %v11712_v44 = vmul.f32 %v12483_v40, %v11704_v47 }
0x4cf7   : > { %11886 = vst.msk [vmem:[%s1097_s4 + $0x8] sm:$0xff] %vm1121_vm0, %v11721_v37  ;;  %v11720_v30 = vadd.f32 %v12484_v11, %v11712_v44 }
0x4cf9   : > { %11885 = vst.msk [vmem:[%s1097_s4] sm:$0xff] %vm1121_vm0, %v11720_v30 }
0x4d75   : > { %v11878_v22 = vpop.xlane.xlu1 %11877 }
0x4d76   : > { %v11879_v63 = vmul.f32 0.03125, %v11878_v22 }
0x4d78   : > { %v11880_v59 = vadd.f32 1e-05, %v11879_v63 }
0x4d7a   : > { %14150 = vrsqrt.f32 %v11880_v59 }
0x4d87   : > { %v14151_v33 = vpop.eup %14150 }
0x4d88   : > { %v11882_v60 = vmul.f32 %v14151_v33, %v11874_v13 }
0x4d8a   : > { %v11883_v1 = vmul.f32 %v12483_v40, %v11882_v60 }
0x4d8c   : > { %v11884_v57 = vadd.f32 %v12484_v11, %v11883_v1 }
0x4d8e   : > { %11887 = vst.msk [vmem:[%s1101_s1] sm:$0xff] %vm1121_vm0, %v11884_v57 }
0x4d8f PF: > { %s16783_s8 = sld [smem:[#allocation33_spill]] }
0x4d95   : > { %s46_s7 = sadd.s32 1, %s16783_s8  }
0x4d96   : > { %p43_p2 = scmp.ge.s32.totalorder %s46_s7, 4  }
0x4d98   :  { %45 = sbr.rel (!%p43_p2) target bundleno = 26 (0x1a), region = 258 }
0x4d9d   :  { %11923 = vsyncpa [#allocation3], 1 }
0x4d9e   :  { %11925 = vsyncpa [#allocation3 + $0x1], 1 }
0x4d9f   :  { %11926 = vsyncpa [#allocation5], 1 }
0x4da0   :  { %11927 = vsyncpa [#allocation8], 1 }
0x4da1   :  { %11928 = vsyncpa [#allocation11], 1 }
0x4da2   :  { %11929 = vsyncpa [#allocation14], 1 }
0x4da3   :  { %11930 = vsyncpa [#allocation17], 1 }
0x4da4   :  { %11931 = vsyncpa [#allocation20], 1 }
0x4da5   :  { %11932 = vsyncpa [#allocation23], 1 }

</bundles_post_ra>
